<compile_context>
chip_gen: v6e
topology: v6e:2x2x1
jax: 0.10.0
libtpu: 0.0.40
codegen_flags: <defaults>
</compile_context>

<pallas_src>
import functools

import jax
import jax.numpy as jnp
from jax.experimental import pallas as pl
from jax.experimental.pallas import tpu as pltpu

EPS = 1e-5
# Raise the scoped-VMEM limit (v5e default is only 16 MiB); 32 MiB is safe on
# every generation incl. v7x's 64 MiB physical VMEM.
VMEM_LIMIT = 32 * 1024 * 1024


def _round_up(x, m):
    return (x + m - 1) // m * m


# ----------------------------------------------------------------------------
# Kernels
# ----------------------------------------------------------------------------
def _upconv_kernel(x_ref, w_ref, b_ref, out_ref, sum_ref, ssq_ref):
    # x_ref:   (1, Cin, S1) f32   flattened (d,h,w) for one batch element
    # w_ref:   (4*Cout, Cin) bf16 rows packed as (kh*2 + kw)*Cout + co
    # b_ref:   (4*Cout, 1) f32
    # out_ref: (1, 4*Cout, S1) bf16  lane-dense tap-major output (pre-BN)
    # sum/ssq: (1, 4*Cout, 1) f32    per-batch-element BN partial stats
    r = jnp.dot(w_ref[...], x_ref[0].astype(jnp.bfloat16),
                preferred_element_type=jnp.float32) + b_ref[...]
    out_ref[0] = r.astype(out_ref.dtype)
    sum_ref[0] = jnp.sum(r, axis=1, keepdims=True)
    ssq_ref[0] = jnp.sum(r * r, axis=1, keepdims=True)


def _stack_taps(a, stack_ref, hp, wp):
    # a: (C, L) f32, masked activation on the zero-padded flattened volume.
    # Writes the 27 shifted tap copies into stack_ref (27*C, L); tap order
    # (kd, kh, kw, c) matches the (Cout, 27*C) weight packing in init_params.
    # TODO(synk): for production volumes, tile D into the grid with a 1-voxel
    # halo and replace these full-volume rolls with halo'd slice loads.
    c, L = a.shape
    t = 0
    for kd in (-1, 0, 1):
        for kh in (-1, 0, 1):
            bd = kd * hp * wp + kh * wp
            base = a if bd == 0 else pltpu.roll(a, shift=(-bd) % L, axis=1)
            for kw in (-1, 0, 1):
                xs = base if kw == 0 else pltpu.roll(base, shift=(-kw) % L,
                                                     axis=1)
                stack_ref[pl.ds(t * c, c), :] = xs
                t += 1


def _conv_tail(w_ref, b_ref, m, stack_ref, out_ref, sum_ref, ssq_ref):
    # Single stacked MXU matmul (contraction = 27*Cin) in bf16, f32 accumulate.
    # TODO(synk): write the BN partial stats to an (8,128)-padded lane-dense
    # slab instead of lane-width-1 outputs (minor).
    o = jnp.dot(w_ref[...], stack_ref[...].astype(jnp.bfloat16),
                preferred_element_type=jnp.float32)
    o = (o + b_ref[...]) * m                # re-zero the padded border / tail
    out_ref[0] = o.astype(out_ref.dtype)
    sum_ref[0] = jnp.sum(o, axis=1, keepdims=True)
    ssq_ref[0] = jnp.sum(o * o, axis=1, keepdims=True)


def _conv1_kernel(up_ref, y_ref, w_ref, b_ref, scale_ref, shift_ref, mask_ref,
                  out_ref, sum_ref, ssq_ref, a_ref, stack_ref, *, hp, wp):
    # up_ref: (1, Cu, L) bf16 raw (pre-BN) upsampled activation, padded layout
    # y_ref:  (1, Cy, L) bf16 zero-padded skip activation (no BN)
    # w_ref:  (Cout, 27*(Cu+Cy)) bf16 ; b_ref: (Cout, 1) f32
    # scale/shift_ref: (Cu, 1) f32 fused bnup apply ; mask_ref: (1, L) f32
    # out_ref: (1, Cout, L) bf16 raw conv output (border zeroed), lane-dense
    # a_ref: VMEM (Cu+Cy, L) f32 ; stack_ref: VMEM (27*(Cu+Cy), L) f32
    m = mask_ref[...]
    cu = up_ref.shape[1]
    cy = y_ref.shape[1]
    up = up_ref[0].astype(jnp.float32) * scale_ref[...] + shift_ref[...]
    a_ref[pl.ds(0, cu), :] = jnp.maximum(up, 0.0) * m
    a_ref[pl.ds(cu, cy), :] = y_ref[0].astype(jnp.float32)
    _stack_taps(a_ref[...], stack_ref, hp, wp)
    _conv_tail(w_ref, b_ref, m, stack_ref, out_ref, sum_ref, ssq_ref)


def _conv2_kernel(x_ref, w_ref, b_ref, scale_ref, shift_ref, mask_ref,
                  out_ref, sum_ref, ssq_ref, stack_ref, *, hp, wp):
    # Same as conv1 but a single input with fused bn1+ReLU on its load path.
    m = mask_ref[...]
    z = x_ref[0].astype(jnp.float32) * scale_ref[...] + shift_ref[...]
    a = jnp.maximum(z, 0.0) * m
    _stack_taps(a, stack_ref, hp, wp)
    _conv_tail(w_ref, b_ref, m, stack_ref, out_ref, sum_ref, ssq_ref)


# ----------------------------------------------------------------------------
# pallas_call wrappers
# ----------------------------------------------------------------------------
def upconv_pallas(x_flat, w_pack, b_pack):
    n, cin, s1 = x_flat.shape
    r4 = w_pack.shape[0]
    out_shape = (
        jax.ShapeDtypeStruct((n, r4, s1), jnp.bfloat16),
        jax.ShapeDtypeStruct((n, r4, 1), jnp.float32),
        jax.ShapeDtypeStruct((n, r4, 1), jnp.float32),
    )
    return pl.pallas_call(
        _upconv_kernel,
        out_shape=out_shape,
        grid_spec=pltpu.PrefetchScalarGridSpec(
            num_scalar_prefetch=0,
            grid=(n,),
            in_specs=[
                pl.BlockSpec((1, cin, s1), lambda i: (i, 0, 0)),
                pl.BlockSpec((r4, cin), lambda i: (0, 0)),
                pl.BlockSpec((r4, 1), lambda i: (0, 0)),
            ],
            out_specs=[
                pl.BlockSpec((1, r4, s1), lambda i: (i, 0, 0)),
                pl.BlockSpec((1, r4, 1), lambda i: (i, 0, 0)),
                pl.BlockSpec((1, r4, 1), lambda i: (i, 0, 0)),
            ],
        ),
        compiler_params=pltpu.CompilerParams(
            dimension_semantics=("parallel",),
            vmem_limit_bytes=VMEM_LIMIT),
    )(x_flat, w_pack, b_pack)


def conv1_pallas(up_pad, y_pad, w_pack, b, scale_up, shift_up, mask, hp, wp):
    # TODO(synk): for production volumes tile D (and H) into the grid with a
    # 1-voxel halo and mark those axes "parallel" so v7x's 2nd TC is fed at n=1.
    n, cu, spad = up_pad.shape
    cy = y_pad.shape[1]
    cin = cu + cy
    cout = w_pack.shape[0]
    kern = functools.partial(_conv1_kernel, hp=hp, wp=wp)
    out_shape = (
        jax.ShapeDtypeStruct((n, cout, spad), jnp.bfloat16),
        jax.ShapeDtypeStruct((n, cout, 1), jnp.float32),
        jax.ShapeDtypeStruct((n, cout, 1), jnp.float32),
    )
    return pl.pallas_call(
        kern,
        out_shape=out_shape,
        grid_spec=pltpu.PrefetchScalarGridSpec(
            num_scalar_prefetch=0,
            grid=(n,),
            in_specs=[
                pl.BlockSpec((1, cu, spad), lambda i: (i, 0, 0)),
                pl.BlockSpec((1, cy, spad), lambda i: (i, 0, 0)),
                pl.BlockSpec((cout, 27 * cin), lambda i: (0, 0)),
                pl.BlockSpec((cout, 1), lambda i: (0, 0)),
                pl.BlockSpec((cu, 1), lambda i: (0, 0)),
                pl.BlockSpec((cu, 1), lambda i: (0, 0)),
                pl.BlockSpec((1, spad), lambda i: (0, 0)),
            ],
            out_specs=[
                pl.BlockSpec((1, cout, spad), lambda i: (i, 0, 0)),
                pl.BlockSpec((1, cout, 1), lambda i: (i, 0, 0)),
                pl.BlockSpec((1, cout, 1), lambda i: (i, 0, 0)),
            ],
            scratch_shapes=[
                pltpu.VMEM((cin, spad), jnp.float32),
                pltpu.VMEM((27 * cin, spad), jnp.float32),
            ],
        ),
        compiler_params=pltpu.CompilerParams(
            dimension_semantics=("parallel",),
            vmem_limit_bytes=VMEM_LIMIT),
    )(up_pad, y_pad, w_pack, b, scale_up, shift_up, mask)


def conv2_pallas(x, w_pack, b, scale, shift, mask, hp, wp):
    n, c, spad = x.shape
    cout = w_pack.shape[0]
    kern = functools.partial(_conv2_kernel, hp=hp, wp=wp)
    out_shape = (
        jax.ShapeDtypeStruct((n, cout, spad), jnp.bfloat16),
        jax.ShapeDtypeStruct((n, cout, 1), jnp.float32),
        jax.ShapeDtypeStruct((n, cout, 1), jnp.float32),
    )
    return pl.pallas_call(
        kern,
        out_shape=out_shape,
        grid_spec=pltpu.PrefetchScalarGridSpec(
            num_scalar_prefetch=0,
            grid=(n,),
            in_specs=[
                pl.BlockSpec((1, c, spad), lambda i: (i, 0, 0)),
                pl.BlockSpec((cout, 27 * c), lambda i: (0, 0)),
                pl.BlockSpec((cout, 1), lambda i: (0, 0)),
                pl.BlockSpec((c, 1), lambda i: (0, 0)),
                pl.BlockSpec((c, 1), lambda i: (0, 0)),
                pl.BlockSpec((1, spad), lambda i: (0, 0)),
            ],
            out_specs=[
                pl.BlockSpec((1, cout, spad), lambda i: (i, 0, 0)),
                pl.BlockSpec((1, cout, 1), lambda i: (i, 0, 0)),
                pl.BlockSpec((1, cout, 1), lambda i: (i, 0, 0)),
            ],
            scratch_shapes=[pltpu.VMEM((27 * c, spad), jnp.float32)],
        ),
        compiler_params=pltpu.CompilerParams(
            dimension_semantics=("parallel",),
            vmem_limit_bytes=VMEM_LIMIT),
    )(x, w_pack, b, scale, shift, mask)


# ----------------------------------------------------------------------------
# Tiny JAX glue: BN stat finalize, interior mask, tap interleave
# ----------------------------------------------------------------------------
def _bn_scale_shift(total, total_sq, count, gamma, beta):
    # TODO(synk): E[x^2]-mean^2 in f32 can cancel for huge activations; use a
    # shifted/Welford accumulation in production (training-mode biased var, as
    # PyTorch uses for the forward pass).
    mean = total / count
    var = total_sq / count - mean * mean
    scale = gamma / jnp.sqrt(var + EPS)
    shift = beta - mean * scale
    return scale, shift


def _interior_mask(dp, hp, wp, spad):
    m = jnp.zeros((dp, hp, wp), jnp.float32).at[1:-1, 1:-1, 1:-1].set(1.0)
    m = m.reshape(dp * hp * wp)
    return jnp.pad(m, (0, spad - dp * hp * wp)).reshape(1, spad)


def upsample_unet3d_forward(x, y, params):
    n, cin, d, h, w = x.shape
    cout = params["b1"].shape[0]
    cy = y.shape[1]
    h2, w2 = 2 * h, 2 * w
    dp, hp, wp = d + 2, h2 + 2, w2 + 2
    sp = dp * hp * wp
    spad = _round_up(sp, 128)
    s1 = d * h * w
    cnt = n * d * h2 * w2

    # --- upconv: one packed (4*Cout, Cin) @ (Cin, S1) bf16 matmul + BN sums ---
    taps, s_up, q_up = upconv_pallas(x.reshape(n, cin, s1),
                                     params["w_up"], params["b_up"])
    s_up_c = s_up[..., 0].reshape(n, 4, cout).sum(axis=(0, 1))
    q_up_c = q_up[..., 0].reshape(n, 4, cout).sum(axis=(0, 1))
    scale_up, shift_up = _bn_scale_shift(s_up_c, q_up_c, cnt,
                                         params["g_up"], params["be_up"])

    # --- XLA (bf16): interleave taps -> (D,2H,2W) and zero-pad; pad the skip.
    # No concatenated activation is materialized (conv1 reads up & skip
    # separately and fuses bnup+ReLU into its load path).
    # TODO(synk): fold this interleave/pad into the upconv store path
    # (index_map into the padded layout) to save one more HBM pass.
    t6 = taps.reshape(n, 2, 2, cout, d, h, w)
    u = t6.transpose(0, 3, 4, 5, 1, 6, 2).reshape(n, cout, d, h2, w2)
    up_pad = jnp.pad(u, ((0, 0), (0, 0), (1, 1), (1, 1), (1, 1)))
    up_pad = jnp.pad(up_pad.reshape(n, cout, sp),
                     ((0, 0), (0, 0), (0, spad - sp)))
    y_pad = jnp.pad(y.astype(jnp.bfloat16),
                    ((0, 0), (0, 0), (1, 1), (1, 1), (1, 1)))
    y_pad = jnp.pad(y_pad.reshape(n, cy, sp), ((0, 0), (0, 0), (0, spad - sp)))
    mask = _interior_mask(dp, hp, wp, spad)

    # --- conv1: fused bnup+ReLU on up rows, pass-through skip rows -----------
    o1, s1_, q1_ = conv1_pallas(up_pad, y_pad, params["w1"], params["b1"],
                                scale_up.reshape(cout, 1),
                                shift_up.reshape(cout, 1), mask, hp, wp)
    scale1, shift1 = _bn_scale_shift(s1_[..., 0].sum(0), q1_[..., 0].sum(0),
                                     cnt, params["g1"], params["be1"])

    # --- conv2 with fused bn1+ReLU on its input -------------------------------
    # TODO(synk): bn2 in the PyTorch module is nn.BatchNorm2d applied to a 5-D
    # tensor (raises at runtime in torch); implemented with BatchNorm3d
    # batch-statistic semantics here.
    o2, s2_, q2_ = conv2_pallas(o1, params["w2"], params["b2"],
                                scale1.reshape(cout, 1),
                                shift1.reshape(cout, 1), mask, hp, wp)
    scale2, shift2 = _bn_scale_shift(s2_[..., 0].sum(0), q2_[..., 0].sum(0),
                                     cnt, params["g2"], params["be2"])

    # --- final bn2-apply + ReLU fused with the 1-voxel crop in ONE XLA pass ---
    # (a Pallas version of the crop would need lane-sparse W2-wide stores).
    o2v = o2[:, :, :sp].reshape(n, cout, dp, hp, wp)[:, :, 1:-1, 1:-1, 1:-1]
    out = jnp.maximum(
        o2v.astype(jnp.float32) * scale2[None, :, None, None, None]
        + shift2[None, :, None, None, None], 0.0)
    return out


# ----------------------------------------------------------------------------
# Deterministic synthetic parameters (PyTorch layouts kept for the reference)
# ----------------------------------------------------------------------------
def init_params(key, cin, cout):
    ks = jax.random.split(key, 12)
    w_up_pt = 0.1 * jax.random.normal(ks[0], (cin, cout, 1, 2, 2), jnp.float32)
    b_up = 0.1 * jax.random.normal(ks[1], (cout,), jnp.float32)
    w1_pt = 0.1 * jax.random.normal(ks[2], (cout, cin, 3, 3, 3), jnp.float32)
    b1 = 0.1 * jax.random.normal(ks[3], (cout,), jnp.float32)
    w2_pt = 0.1 * jax.random.normal(ks[4], (cout, cout, 3, 3, 3), jnp.float32)
    b2 = 0.1 * jax.random.normal(ks[5], (cout,), jnp.float32)
    g_up = 1.0 + 0.1 * jax.random.normal(ks[6], (cout,), jnp.float32)
    be_up = 0.1 * jax.random.normal(ks[7], (cout,), jnp.float32)
    g1 = 1.0 + 0.1 * jax.random.normal(ks[8], (cout,), jnp.float32)
    be1 = 0.1 * jax.random.normal(ks[9], (cout,), jnp.float32)
    g2 = 1.0 + 0.1 * jax.random.normal(ks[10], (cout,), jnp.float32)
    be2 = 0.1 * jax.random.normal(ks[11], (cout,), jnp.float32)

    pt = dict(w_up=w_up_pt, b_up=b_up, w1=w1_pt, b1=b1, w2=w2_pt, b2=b2,
              g_up=g_up, be_up=be_up, g1=g1, be1=be1, g2=g2, be2=be2)
    params = dict(
        # ConvTranspose3d weight (cin,cout,1,2,2) -> (4*cout, cin) bf16,
        # row = (kh*2 + kw)*cout + co
        w_up=jnp.transpose(w_up_pt[:, :, 0], (2, 3, 1, 0))
            .reshape(4 * cout, cin).astype(jnp.bfloat16),
        b_up=jnp.tile(b_up, 4).reshape(4 * cout, 1),
        # Conv3d weight (cout,cin,3,3,3) -> (cout, 27*cin) bf16,
        # column = ((kd*3+kh)*3+kw)*cin + ci  (matches the in-kernel tap stack)
        w1=jnp.transpose(w1_pt, (0, 2, 3, 4, 1))
            .reshape(cout, 27 * cin).astype(jnp.bfloat16),
        b1=b1.reshape(cout, 1),
        w2=jnp.transpose(w2_pt, (0, 2, 3, 4, 1))
            .reshape(cout, 27 * cout).astype(jnp.bfloat16),
        b2=b2.reshape(cout, 1),
        g_up=g_up, be_up=be_up, g1=g1, be1=be1, g2=g2, be2=be2,
    )
    return pt, params


# ----------------------------------------------------------------------------
# Pure-JAX reference (PyTorch NCDHW semantics, f32) for validation
# ----------------------------------------------------------------------------
def reference_forward(x, y, pt):
    def bn_relu(v, gamma, beta):
        mean = jnp.mean(v, axis=(0, 2, 3, 4), keepdims=True)
        var = jnp.mean(v * v, axis=(0, 2, 3, 4), keepdims=True) - mean * mean
        g = gamma[None, :, None, None, None]
        b = beta[None, :, None, None, None]
        return jnp.maximum((v - mean) / jnp.sqrt(var + EPS) * g + b, 0.0)

    # ConvTranspose3d with kernel = stride = (1,2,2) (non-overlapping)
    wt = pt["w_up"]
    t = jnp.einsum('ncdhw,cokl->nodhwkl', x, wt[:, :, 0],
                   precision=jax.lax.Precision.HIGHEST)
    n, co, d, h, w, _, _ = t.shape
    t = t.transpose(0, 1, 2, 3, 5, 4, 6).reshape(n, co, d, 2 * h, 2 * w)
    t = t + pt["b_up"][None, :, None, None, None]
    xu = bn_relu(t, pt["g_up"], pt["be_up"])

    cat = jnp.concatenate([xu, y], axis=1)

    def conv3(v, wgt, bias):
        out = jax.lax.conv_general_dilated(
            v, wgt, window_strides=(1, 1, 1), padding=((1, 1),) * 3,
            dimension_numbers=('NCDHW', 'OIDHW', 'NCDHW'),
            precision=jax.lax.Precision.HIGHEST)
        return out + bias[None, :, None, None, None]

    o1 = bn_relu(conv3(cat, pt["w1"], pt["b1"]), pt["g1"], pt["be1"])
    o2 = bn_relu(conv3(o1, pt["w2"], pt["b2"]), pt["g2"], pt["be2"])
    return o2


if __name__ == "__main__":
    key = jax.random.PRNGKey(0)
    in_channels, out_channels = 8, 4
    N, D, H, W = 2, 4, 8, 8

    k_param, kx, ky = jax.random.split(key, 3)
    pt, params = init_params(k_param, in_channels, out_channels)

    x = jax.random.normal(kx, (N, in_channels, D, H, W), jnp.float32)
    y = jax.random.normal(ky, (N, in_channels - out_channels, D, 2 * H, 2 * W),
                          jnp.float32)

    out = jax.jit(upsample_unet3d_forward)(x, y, params)
    out = jax.block_until_ready(out)

    assert out.shape == (N, out_channels, D, 2 * H, 2 * W), out.shape

    ref = reference_forward(x, y, pt)
    max_err = float(jnp.max(jnp.abs(out - ref)))
    rel_rms = float(jnp.sqrt(jnp.mean((out - ref) ** 2)
                             / (jnp.mean(ref ** 2) + 1e-12)))
    # bf16 MXU inputs + bf16 intermediate HBM activations => tolerance loosened
    # vs the f32 reference (accumulation and BN stats stay in f32).
    if max_err > 1e-1 or rel_rms > 3e-2:
        raise AssertionError(
            f"Pallas vs reference mismatch: max_abs={max_err}, rel_rms={rel_rms}")

    print("KERNEL_OK")
</pallas_src>

<mosaic_0001>
module attributes {stable_mosaic.version = 11 : i64} {
  func.func @_upconv_kernel(%arg0: i32, %arg1: memref<1x8x256xf32, #tpu.memory_space<vmem>>, %arg2: memref<16x8xbf16, #tpu.memory_space<vmem>>, %arg3: memref<16x1xf32, #tpu.memory_space<vmem>>, %arg4: memref<1x16x256xbf16, #tpu.memory_space<vmem>>, %arg5: memref<1x16x1xf32, #tpu.memory_space<vmem>>, %arg6: memref<1x16x1xf32, #tpu.memory_space<vmem>>) attributes {dimension_semantics = [#tpu.dimension_semantics<parallel>], iteration_bounds = array<i64: 2>, scalar_prefetch = 0 : i64, scratch_operands = 0 : i64, tpu.core_type = #tpu.core_type<tc>, window_params = [{transform_indices = @transform_0, window_bounds = array<i64: 1, 8, 256>}, {pipeline_mode = #tpu.pipeline_mode<synchronous>, transform_indices = @transform_1, window_bounds = array<i64: 16, 8>}, {pipeline_mode = #tpu.pipeline_mode<synchronous>, transform_indices = @transform_2, window_bounds = array<i64: 16, 1>}, {transform_indices = @transform_3, window_bounds = array<i64: 1, 16, 256>}, {transform_indices = @transform_4, window_bounds = array<i64: 1, 16, 1>}, {transform_indices = @transform_5, window_bounds = array<i64: 1, 16, 1>}]} {
    %c0 = arith.constant 0 : index
    %c0_0 = arith.constant 0 : index
    %0 = vector.load %arg2[%c0, %c0_0] : memref<16x8xbf16, #tpu.memory_space<vmem>>, vector<16x8xbf16>
    %c0_1 = arith.constant 0 : index
    %c0_2 = arith.constant 0 : index
    %c0_3 = arith.constant 0 : index
    %1 = vector.load %arg1[%c0_1, %c0_2, %c0_3] : memref<1x8x256xf32, #tpu.memory_space<vmem>>, vector<1x8x256xf32>
    %2 = vector.shape_cast %1 : vector<1x8x256xf32> to vector<8x256xf32>
    %3 = arith.truncf %2 : vector<8x256xf32> to vector<8x256xbf16>
    %cst = arith.constant dense<0.000000e+00> : vector<16x256xf32>
    %4 = tpu.matmul %0, %3, %cst {dimension_numbers = #tpu.dot_dimension_numbers<[1], [0], [0], [1], [0, 0, 1, 1], [], []>} : vector<16x8xbf16>, vector<8x256xbf16>, vector<16x256xf32> -> vector<16x256xf32>
    %c0_4 = arith.constant 0 : index
    %c0_5 = arith.constant 0 : index
    %5 = vector.load %arg3[%c0_4, %c0_5] : memref<16x1xf32, #tpu.memory_space<vmem>>, vector<16x1xf32>
    %6 = vector.broadcast %5 : vector<16x1xf32> to vector<16x256xf32>
    %7 = arith.addf %4, %6 : vector<16x256xf32>
    %8 = arith.truncf %7 : vector<16x256xf32> to vector<16x256xbf16>
    %c0_6 = arith.constant 0 : index
    %c0_7 = arith.constant 0 : index
    %c0_8 = arith.constant 0 : index
    %9 = vector.load %arg4[%c0_6, %c0_7, %c0_8] : memref<1x16x256xbf16, #tpu.memory_space<vmem>>, vector<1x16x256xbf16>
    %10 = vector.shape_cast %9 : vector<1x16x256xbf16> to vector<16x256xbf16>
    %11 = vector.shape_cast %8 : vector<16x256xbf16> to vector<1x16x256xbf16>
    tpu.vector_store %arg4[%c0_6, %c0_7, %c0_8], %11 {strides = array<i32>} : memref<1x16x256xbf16, #tpu.memory_space<vmem>>, vector<1x16x256xbf16>,
    %cst_9 = arith.constant dense<0.000000e+00> : vector<16xf32>
    %12 = vector.multi_reduction <add>, %7, %cst_9 [1] : vector<16x256xf32> to vector<16xf32>
    %13 = vector.shape_cast %12 : vector<16xf32> to vector<16x1xf32>
    %c0_10 = arith.constant 0 : index
    %c0_11 = arith.constant 0 : index
    %c0_12 = arith.constant 0 : index
    %14 = vector.load %arg5[%c0_10, %c0_11, %c0_12] : memref<1x16x1xf32, #tpu.memory_space<vmem>>, vector<1x16x1xf32>
    %15 = vector.shape_cast %14 : vector<1x16x1xf32> to vector<16x1xf32>
    %16 = vector.shape_cast %13 : vector<16x1xf32> to vector<1x16x1xf32>
    tpu.vector_store %arg5[%c0_10, %c0_11, %c0_12], %16 {strides = array<i32>} : memref<1x16x1xf32, #tpu.memory_space<vmem>>, vector<1x16x1xf32>,
    %17 = arith.mulf %7, %7 : vector<16x256xf32>
    %cst_13 = arith.constant dense<0.000000e+00> : vector<16xf32>
    %18 = vector.multi_reduction <add>, %17, %cst_13 [1] : vector<16x256xf32> to vector<16xf32>
    %19 = vector.shape_cast %18 : vector<16xf32> to vector<16x1xf32>
    %c0_14 = arith.constant 0 : index
    %c0_15 = arith.constant 0 : index
    %c0_16 = arith.constant 0 : index
    %20 = vector.load %arg6[%c0_14, %c0_15, %c0_16] : memref<1x16x1xf32, #tpu.memory_space<vmem>>, vector<1x16x1xf32>
    %21 = vector.shape_cast %20 : vector<1x16x1xf32> to vector<16x1xf32>
    %22 = vector.shape_cast %19 : vector<16x1xf32> to vector<1x16x1xf32>
    tpu.vector_store %arg6[%c0_14, %c0_15, %c0_16], %22 {strides = array<i32>} : memref<1x16x1xf32, #tpu.memory_space<vmem>>, vector<1x16x1xf32>,
    return
  }
  func.func @transform_0(%arg0: i32) -> (i32, i32, i32) {
    %c0_i32 = arith.constant 0 : i32
    %c0_i32_0 = arith.constant 0 : i32
    %c0_i32_1 = arith.constant 0 : i32
    return %arg0, %c0_i32, %c0_i32_0 : i32, i32, i32
  }
  func.func @transform_1(%arg0: i32) -> (i32, i32) {
    %c0_i32 = arith.constant 0 : i32
    %c0_i32_0 = arith.constant 0 : i32
    %c0_i32_1 = arith.constant 0 : i32
    return %c0_i32, %c0_i32_0 : i32, i32
  }
  func.func @transform_2(%arg0: i32) -> (i32, i32) {
    %c0_i32 = arith.constant 0 : i32
    %c0_i32_0 = arith.constant 0 : i32
    %c0_i32_1 = arith.constant 0 : i32
    return %c0_i32, %c0_i32_0 : i32, i32
  }
  func.func @transform_3(%arg0: i32) -> (i32, i32, i32) {
    %c0_i32 = arith.constant 0 : i32
    %c0_i32_0 = arith.constant 0 : i32
    %c0_i32_1 = arith.constant 0 : i32
    return %arg0, %c0_i32, %c0_i32_0 : i32, i32, i32
  }
  func.func @transform_4(%arg0: i32) -> (i32, i32, i32) {
    %c0_i32 = arith.constant 0 : i32
    %c0_i32_0 = arith.constant 0 : i32
    %c0_i32_1 = arith.constant 0 : i32
    return %arg0, %c0_i32, %c0_i32_0 : i32, i32, i32
  }
  func.func @transform_5(%arg0: i32) -> (i32, i32, i32) {
    %c0_i32 = arith.constant 0 : i32
    %c0_i32_0 = arith.constant 0 : i32
    %c0_i32_1 = arith.constant 0 : i32
    return %arg0, %c0_i32, %c0_i32_0 : i32, i32, i32
  }
}

module attributes {stable_mosaic.version = 11 : i64} {
  func.func @_conv1_kernel(%arg0: i32, %arg1: memref<1x4x2048xbf16, #tpu.memory_space<vmem>>, %arg2: memref<1x4x2048xbf16, #tpu.memory_space<vmem>>, %arg3: memref<4x216xbf16, #tpu.memory_space<vmem>>, %arg4: memref<4x1xf32, #tpu.memory_space<vmem>>, %arg5: memref<4x1xf32, #tpu.memory_space<vmem>>, %arg6: memref<4x1xf32, #tpu.memory_space<vmem>>, %arg7: memref<1x2048xf32, #tpu.memory_space<vmem>>, %arg8: memref<1x4x2048xbf16, #tpu.memory_space<vmem>>, %arg9: memref<1x4x1xf32, #tpu.memory_space<vmem>>, %arg10: memref<1x4x1xf32, #tpu.memory_space<vmem>>, %arg11: memref<8x2048xf32, #tpu.memory_space<vmem>>, %arg12: memref<216x2048xf32, #tpu.memory_space<vmem>>) attributes {dimension_semantics = [#tpu.dimension_semantics<parallel>], iteration_bounds = array<i64: 2>, scalar_prefetch = 0 : i64, scratch_operands = 2 : i64, tpu.core_type = #tpu.core_type<tc>, window_params = [{transform_indices = @transform_0, window_bounds = array<i64: 1, 4, 2048>}, {transform_indices = @transform_1, window_bounds = array<i64: 1, 4, 2048>}, {pipeline_mode = #tpu.pipeline_mode<synchronous>, transform_indices = @transform_2, window_bounds = array<i64: 4, 216>}, {pipeline_mode = #tpu.pipeline_mode<synchronous>, transform_indices = @transform_3, window_bounds = array<i64: 4, 1>}, {pipeline_mode = #tpu.pipeline_mode<synchronous>, transform_indices = @transform_4, window_bounds = array<i64: 4, 1>}, {pipeline_mode = #tpu.pipeline_mode<synchronous>, transform_indices = @transform_5, window_bounds = array<i64: 4, 1>}, {pipeline_mode = #tpu.pipeline_mode<synchronous>, transform_indices = @transform_6, window_bounds = array<i64: 1, 2048>}, {transform_indices = @transform_7, window_bounds = array<i64: 1, 4, 2048>}, {transform_indices = @transform_8, window_bounds = array<i64: 1, 4, 1>}, {transform_indices = @transform_9, window_bounds = array<i64: 1, 4, 1>}]} {
    %c0 = arith.constant 0 : index
    %c0_0 = arith.constant 0 : index
    %0 = vector.load %arg7[%c0, %c0_0] : memref<1x2048xf32, #tpu.memory_space<vmem>>, vector<1x2048xf32>
    %c0_1 = arith.constant 0 : index
    %c0_2 = arith.constant 0 : index
    %c0_3 = arith.constant 0 : index
    %1 = vector.load %arg1[%c0_1, %c0_2, %c0_3] : memref<1x4x2048xbf16, #tpu.memory_space<vmem>>, vector<1x4x2048xbf16>
    %2 = vector.shape_cast %1 : vector<1x4x2048xbf16> to vector<4x2048xbf16>
    %3 = arith.extf %2 : vector<4x2048xbf16> to vector<4x2048xf32>
    %c0_4 = arith.constant 0 : index
    %c0_5 = arith.constant 0 : index
    %4 = vector.load %arg5[%c0_4, %c0_5] : memref<4x1xf32, #tpu.memory_space<vmem>>, vector<4x1xf32>
    %5 = vector.broadcast %4 : vector<4x1xf32> to vector<4x2048xf32>
    %6 = arith.mulf %3, %5 : vector<4x2048xf32>
    %c0_6 = arith.constant 0 : index
    %c0_7 = arith.constant 0 : index
    %7 = vector.load %arg6[%c0_6, %c0_7] : memref<4x1xf32, #tpu.memory_space<vmem>>, vector<4x1xf32>
    %8 = vector.broadcast %7 : vector<4x1xf32> to vector<4x2048xf32>
    %9 = arith.addf %6, %8 : vector<4x2048xf32>
    %cst = arith.constant 0.000000e+00 : f32
    %10 = vector.broadcast %cst : f32 to vector<4x2048xf32>
    %11 = arith.maximumf %9, %10 : vector<4x2048xf32>
    %12 = vector.broadcast %0 : vector<1x2048xf32> to vector<4x2048xf32>
    %13 = arith.mulf %11, %12 : vector<4x2048xf32>
    %c0_8 = arith.constant 0 : index
    %c0_9 = arith.constant 0 : index
    %14 = vector.load %arg11[%c0_8, %c0_9] : memref<8x2048xf32, #tpu.memory_space<vmem>>, vector<4x2048xf32>
    tpu.vector_store %arg11[%c0_8, %c0_9], %13 {strides = array<i32>} : memref<8x2048xf32, #tpu.memory_space<vmem>>, vector<4x2048xf32>,
    %c0_10 = arith.constant 0 : index
    %c0_11 = arith.constant 0 : index
    %c0_12 = arith.constant 0 : index
    %15 = vector.load %arg2[%c0_10, %c0_11, %c0_12] : memref<1x4x2048xbf16, #tpu.memory_space<vmem>>, vector<1x4x2048xbf16>
    %16 = vector.shape_cast %15 : vector<1x4x2048xbf16> to vector<4x2048xbf16>
    %17 = arith.extf %16 : vector<4x2048xbf16> to vector<4x2048xf32>
    %c4 = arith.constant 4 : index
    %c0_13 = arith.constant 0 : index
    %18 = vector.load %arg11[%c4, %c0_13] : memref<8x2048xf32, #tpu.memory_space<vmem>>, vector<4x2048xf32>
    tpu.vector_store %arg11[%c4, %c0_13], %17 {strides = array<i32>} : memref<8x2048xf32, #tpu.memory_space<vmem>>, vector<4x2048xf32>,
    %c0_14 = arith.constant 0 : index
    %c0_15 = arith.constant 0 : index
    %19 = vector.load %arg11[%c0_14, %c0_15] : memref<8x2048xf32, #tpu.memory_space<vmem>>, vector<8x2048xf32>
    %c342_i32 = arith.constant 342 : i32
    %20 = tpu.dynamic_rotate %19 by %c342_i32 dim 1 : vector<8x2048xf32>, i32 -> vector<8x2048xf32>
    %c1_i32 = arith.constant 1 : i32
    %21 = tpu.dynamic_rotate %20 by %c1_i32 dim 1 : vector<8x2048xf32>, i32 -> vector<8x2048xf32>
    %c0_16 = arith.constant 0 : index
    %c0_17 = arith.constant 0 : index
    %22 = vector.load %arg12[%c0_16, %c0_17] : memref<216x2048xf32, #tpu.memory_space<vmem>>, vector<8x2048xf32>
    tpu.vector_store %arg12[%c0_16, %c0_17], %21 {strides = array<i32>} : memref<216x2048xf32, #tpu.memory_space<vmem>>, vector<8x2048xf32>,
    %c8 = arith.constant 8 : index
    %c0_18 = arith.constant 0 : index
    %23 = vector.load %arg12[%c8, %c0_18] : memref<216x2048xf32, #tpu.memory_space<vmem>>, vector<8x2048xf32>
    tpu.vector_store %arg12[%c8, %c0_18], %20 {strides = array<i32>} : memref<216x2048xf32, #tpu.memory_space<vmem>>, vector<8x2048xf32>,
    %c2047_i32 = arith.constant 2047 : i32
    %24 = tpu.dynamic_rotate %20 by %c2047_i32 dim 1 : vector<8x2048xf32>, i32 -> vector<8x2048xf32>
    %c16 = arith.constant 16 : index
    %c0_19 = arith.constant 0 : index
    %25 = vector.load %arg12[%c16, %c0_19] : memref<216x2048xf32, #tpu.memory_space<vmem>>, vector<8x2048xf32>
    tpu.vector_store %arg12[%c16, %c0_19], %24 {strides = array<i32>} : memref<216x2048xf32, #tpu.memory_space<vmem>>, vector<8x2048xf32>,
    %c324_i32 = arith.constant 324 : i32
    %26 = tpu.dynamic_rotate %19 by %c324_i32 dim 1 : vector<8x2048xf32>, i32 -> vector<8x2048xf32>
    %c1_i32_20 = arith.constant 1 : i32
    %27 = tpu.dynamic_rotate %26 by %c1_i32_20 dim 1 : vector<8x2048xf32>, i32 -> vector<8x2048xf32>
    %c24 = arith.constant 24 : index
    %c0_21 = arith.constant 0 : index
    %28 = vector.load %arg12[%c24, %c0_21] : memref<216x2048xf32, #tpu.memory_space<vmem>>, vector<8x2048xf32>
    tpu.vector_store %arg12[%c24, %c0_21], %27 {strides = array<i32>} : memref<216x2048xf32, #tpu.memory_space<vmem>>, vector<8x2048xf32>,
    %c32 = arith.constant 32 : index
    %c0_22 = arith.constant 0 : index
    %29 = vector.load %arg12[%c32, %c0_22] : memref<216x2048xf32, #tpu.memory_space<vmem>>, vector<8x2048xf32>
    tpu.vector_store %arg12[%c32, %c0_22], %26 {strides = array<i32>} : memref<216x2048xf32, #tpu.memory_space<vmem>>, vector<8x2048xf32>,
    %c2047_i32_23 = arith.constant 2047 : i32
    %30 = tpu.dynamic_rotate %26 by %c2047_i32_23 dim 1 : vector<8x2048xf32>, i32 -> vector<8x2048xf32>
    %c40 = arith.constant 40 : index
    %c0_24 = arith.constant 0 : index
    %31 = vector.load %arg12[%c40, %c0_24] : memref<216x2048xf32, #tpu.memory_space<vmem>>, vector<8x2048xf32>
    tpu.vector_store %arg12[%c40, %c0_24], %30 {strides = array<i32>} : memref<216x2048xf32, #tpu.memory_space<vmem>>, vector<8x2048xf32>,
    %c306_i32 = arith.constant 306 : i32
    %32 = tpu.dynamic_rotate %19 by %c306_i32 dim 1 : vector<8x2048xf32>, i32 -> vector<8x2048xf32>
    %c1_i32_25 = arith.constant 1 : i32
    %33 = tpu.dynamic_rotate %32 by %c1_i32_25 dim 1 : vector<8x2048xf32>, i32 -> vector<8x2048xf32>
    %c48 = arith.constant 48 : index
    %c0_26 = arith.constant 0 : index
    %34 = vector.load %arg12[%c48, %c0_26] : memref<216x2048xf32, #tpu.memory_space<vmem>>, vector<8x2048xf32>
    tpu.vector_store %arg12[%c48, %c0_26], %33 {strides = array<i32>} : memref<216x2048xf32, #tpu.memory_space<vmem>>, vector<8x2048xf32>,
    %c56 = arith.constant 56 : index
    %c0_27 = arith.constant 0 : index
    %35 = vector.load %arg12[%c56, %c0_27] : memref<216x2048xf32, #tpu.memory_space<vmem>>, vector<8x2048xf32>
    tpu.vector_store %arg12[%c56, %c0_27], %32 {strides = array<i32>} : memref<216x2048xf32, #tpu.memory_space<vmem>>, vector<8x2048xf32>,
    %c2047_i32_28 = arith.constant 2047 : i32
    %36 = tpu.dynamic_rotate %32 by %c2047_i32_28 dim 1 : vector<8x2048xf32>, i32 -> vector<8x2048xf32>
    %c64 = arith.constant 64 : index
    %c0_29 = arith.constant 0 : index
    %37 = vector.load %arg12[%c64, %c0_29] : memref<216x2048xf32, #tpu.memory_space<vmem>>, vector<8x2048xf32>
    tpu.vector_store %arg12[%c64, %c0_29], %36 {strides = array<i32>} : memref<216x2048xf32, #tpu.memory_space<vmem>>, vector<8x2048xf32>,
    %c18_i32 = arith.constant 18 : i32
    %38 = tpu.dynamic_rotate %19 by %c18_i32 dim 1 : vector<8x2048xf32>, i32 -> vector<8x2048xf32>
    %c1_i32_30 = arith.constant 1 : i32
    %39 = tpu.dynamic_rotate %38 by %c1_i32_30 dim 1 : vector<8x2048xf32>, i32 -> vector<8x2048xf32>
    %c72 = arith.constant 72 : index
    %c0_31 = arith.constant 0 : index
    %40 = vector.load %arg12[%c72, %c0_31] : memref<216x2048xf32, #tpu.memory_space<vmem>>, vector<8x2048xf32>
    tpu.vector_store %arg12[%c72, %c0_31], %39 {strides = array<i32>} : memref<216x2048xf32, #tpu.memory_space<vmem>>, vector<8x2048xf32>,
    %c80 = arith.constant 80 : index
    %c0_32 = arith.constant 0 : index
    %41 = vector.load %arg12[%c80, %c0_32] : memref<216x2048xf32, #tpu.memory_space<vmem>>, vector<8x2048xf32>
    tpu.vector_store %arg12[%c80, %c0_32], %38 {strides = array<i32>} : memref<216x2048xf32, #tpu.memory_space<vmem>>, vector<8x2048xf32>,
    %c2047_i32_33 = arith.constant 2047 : i32
    %42 = tpu.dynamic_rotate %38 by %c2047_i32_33 dim 1 : vector<8x2048xf32>, i32 -> vector<8x2048xf32>
    %c88 = arith.constant 88 : index
    %c0_34 = arith.constant 0 : index
    %43 = vector.load %arg12[%c88, %c0_34] : memref<216x2048xf32, #tpu.memory_space<vmem>>, vector<8x2048xf32>
    tpu.vector_store %arg12[%c88, %c0_34], %42 {strides = array<i32>} : memref<216x2048xf32, #tpu.memory_space<vmem>>, vector<8x2048xf32>,
    %c1_i32_35 = arith.constant 1 : i32
    %44 = tpu.dynamic_rotate %19 by %c1_i32_35 dim 1 : vector<8x2048xf32>, i32 -> vector<8x2048xf32>
    %c96 = arith.constant 96 : index
    %c0_36 = arith.constant 0 : index
    %45 = vector.load %arg12[%c96, %c0_36] : memref<216x2048xf32, #tpu.memory_space<vmem>>, vector<8x2048xf32>
    tpu.vector_store %arg12[%c96, %c0_36], %44 {strides = array<i32>} : memref<216x2048xf32, #tpu.memory_space<vmem>>, vector<8x2048xf32>,
    %c104 = arith.constant 104 : index
    %c0_37 = arith.constant 0 : index
    %46 = vector.load %arg12[%c104, %c0_37] : memref<216x2048xf32, #tpu.memory_space<vmem>>, vector<8x2048xf32>
    tpu.vector_store %arg12[%c104, %c0_37], %19 {strides = array<i32>} : memref<216x2048xf32, #tpu.memory_space<vmem>>, vector<8x2048xf32>,
    %c2047_i32_38 = arith.constant 2047 : i32
    %47 = tpu.dynamic_rotate %19 by %c2047_i32_38 dim 1 : vector<8x2048xf32>, i32 -> vector<8x2048xf32>
    %c112 = arith.constant 112 : index
    %c0_39 = arith.constant 0 : index
    %48 = vector.load %arg12[%c112, %c0_39] : memref<216x2048xf32, #tpu.memory_space<vmem>>, vector<8x2048xf32>
    tpu.vector_store %arg12[%c112, %c0_39], %47 {strides = array<i32>} : memref<216x2048xf32, #tpu.memory_space<vmem>>, vector<8x2048xf32>,
    %c2030_i32 = arith.constant 2030 : i32
    %49 = tpu.dynamic_rotate %19 by %c2030_i32 dim 1 : vector<8x2048xf32>, i32 -> vector<8x2048xf32>
    %c1_i32_40 = arith.constant 1 : i32
    %50 = tpu.dynamic_rotate %49 by %c1_i32_40 dim 1 : vector<8x2048xf32>, i32 -> vector<8x2048xf32>
    %c120 = arith.constant 120 : index
    %c0_41 = arith.constant 0 : index
    %51 = vector.load %arg12[%c120, %c0_41] : memref<216x2048xf32, #tpu.memory_space<vmem>>, vector<8x2048xf32>
    tpu.vector_store %arg12[%c120, %c0_41], %50 {strides = array<i32>} : memref<216x2048xf32, #tpu.memory_space<vmem>>, vector<8x2048xf32>,
    %c128 = arith.constant 128 : index
    %c0_42 = arith.constant 0 : index
    %52 = vector.load %arg12[%c128, %c0_42] : memref<216x2048xf32, #tpu.memory_space<vmem>>, vector<8x2048xf32>
    tpu.vector_store %arg12[%c128, %c0_42], %49 {strides = array<i32>} : memref<216x2048xf32, #tpu.memory_space<vmem>>, vector<8x2048xf32>,
    %c2047_i32_43 = arith.constant 2047 : i32
    %53 = tpu.dynamic_rotate %49 by %c2047_i32_43 dim 1 : vector<8x2048xf32>, i32 -> vector<8x2048xf32>
    %c136 = arith.constant 136 : index
    %c0_44 = arith.constant 0 : index
    %54 = vector.load %arg12[%c136, %c0_44] : memref<216x2048xf32, #tpu.memory_space<vmem>>, vector<8x2048xf32>
    tpu.vector_store %arg12[%c136, %c0_44], %53 {strides = array<i32>} : memref<216x2048xf32, #tpu.memory_space<vmem>>, vector<8x2048xf32>,
    %c1742_i32 = arith.constant 1742 : i32
    %55 = tpu.dynamic_rotate %19 by %c1742_i32 dim 1 : vector<8x2048xf32>, i32 -> vector<8x2048xf32>
    %c1_i32_45 = arith.constant 1 : i32
    %56 = tpu.dynamic_rotate %55 by %c1_i32_45 dim 1 : vector<8x2048xf32>, i32 -> vector<8x2048xf32>
    %c144 = arith.constant 144 : index
    %c0_46 = arith.constant 0 : index
    %57 = vector.load %arg12[%c144, %c0_46] : memref<216x2048xf32, #tpu.memory_space<vmem>>, vector<8x2048xf32>
    tpu.vector_store %arg12[%c144, %c0_46], %56 {strides = array<i32>} : memref<216x2048xf32, #tpu.memory_space<vmem>>, vector<8x2048xf32>,
    %c152 = arith.constant 152 : index
    %c0_47 = arith.constant 0 : index
    %58 = vector.load %arg12[%c152, %c0_47] : memref<216x2048xf32, #tpu.memory_space<vmem>>, vector<8x2048xf32>
    tpu.vector_store %arg12[%c152, %c0_47], %55 {strides = array<i32>} : memref<216x2048xf32, #tpu.memory_space<vmem>>, vector<8x2048xf32>,
    %c2047_i32_48 = arith.constant 2047 : i32
    %59 = tpu.dynamic_rotate %55 by %c2047_i32_48 dim 1 : vector<8x2048xf32>, i32 -> vector<8x2048xf32>
    %c160 = arith.constant 160 : index
    %c0_49 = arith.constant 0 : index
    %60 = vector.load %arg12[%c160, %c0_49] : memref<216x2048xf32, #tpu.memory_space<vmem>>, vector<8x2048xf32>
    tpu.vector_store %arg12[%c160, %c0_49], %59 {strides = array<i32>} : memref<216x2048xf32, #tpu.memory_space<vmem>>, vector<8x2048xf32>,
    %c1724_i32 = arith.constant 1724 : i32
    %61 = tpu.dynamic_rotate %19 by %c1724_i32 dim 1 : vector<8x2048xf32>, i32 -> vector<8x2048xf32>
    %c1_i32_50 = arith.constant 1 : i32
    %62 = tpu.dynamic_rotate %61 by %c1_i32_50 dim 1 : vector<8x2048xf32>, i32 -> vector<8x2048xf32>
    %c168 = arith.constant 168 : index
    %c0_51 = arith.constant 0 : index
    %63 = vector.load %arg12[%c168, %c0_51] : memref<216x2048xf32, #tpu.memory_space<vmem>>, vector<8x2048xf32>
    tpu.vector_store %arg12[%c168, %c0_51], %62 {strides = array<i32>} : memref<216x2048xf32, #tpu.memory_space<vmem>>, vector<8x2048xf32>,
    %c176 = arith.constant 176 : index
    %c0_52 = arith.constant 0 : index
    %64 = vector.load %arg12[%c176, %c0_52] : memref<216x2048xf32, #tpu.memory_space<vmem>>, vector<8x2048xf32>
    tpu.vector_store %arg12[%c176, %c0_52], %61 {strides = array<i32>} : memref<216x2048xf32, #tpu.memory_space<vmem>>, vector<8x2048xf32>,
    %c2047_i32_53 = arith.constant 2047 : i32
    %65 = tpu.dynamic_rotate %61 by %c2047_i32_53 dim 1 : vector<8x2048xf32>, i32 -> vector<8x2048xf32>
    %c184 = arith.constant 184 : index
    %c0_54 = arith.constant 0 : index
    %66 = vector.load %arg12[%c184, %c0_54] : memref<216x2048xf32, #tpu.memory_space<vmem>>, vector<8x2048xf32>
    tpu.vector_store %arg12[%c184, %c0_54], %65 {strides = array<i32>} : memref<216x2048xf32, #tpu.memory_space<vmem>>, vector<8x2048xf32>,
    %c1706_i32 = arith.constant 1706 : i32
    %67 = tpu.dynamic_rotate %19 by %c1706_i32 dim 1 : vector<8x2048xf32>, i32 -> vector<8x2048xf32>
    %c1_i32_55 = arith.constant 1 : i32
    %68 = tpu.dynamic_rotate %67 by %c1_i32_55 dim 1 : vector<8x2048xf32>, i32 -> vector<8x2048xf32>
    %c192 = arith.constant 192 : index
    %c0_56 = arith.constant 0 : index
    %69 = vector.load %arg12[%c192, %c0_56] : memref<216x2048xf32, #tpu.memory_space<vmem>>, vector<8x2048xf32>
    tpu.vector_store %arg12[%c192, %c0_56], %68 {strides = array<i32>} : memref<216x2048xf32, #tpu.memory_space<vmem>>, vector<8x2048xf32>,
    %c200 = arith.constant 200 : index
    %c0_57 = arith.constant 0 : index
    %70 = vector.load %arg12[%c200, %c0_57] : memref<216x2048xf32, #tpu.memory_space<vmem>>, vector<8x2048xf32>
    tpu.vector_store %arg12[%c200, %c0_57], %67 {strides = array<i32>} : memref<216x2048xf32, #tpu.memory_space<vmem>>, vector<8x2048xf32>,
    %c2047_i32_58 = arith.constant 2047 : i32
    %71 = tpu.dynamic_rotate %67 by %c2047_i32_58 dim 1 : vector<8x2048xf32>, i32 -> vector<8x2048xf32>
    %c208 = arith.constant 208 : index
    %c0_59 = arith.constant 0 : index
    %72 = vector.load %arg12[%c208, %c0_59] : memref<216x2048xf32, #tpu.memory_space<vmem>>, vector<8x2048xf32>
    tpu.vector_store %arg12[%c208, %c0_59], %71 {strides = array<i32>} : memref<216x2048xf32, #tpu.memory_space<vmem>>, vector<8x2048xf32>,
    %c0_60 = arith.constant 0 : index
    %c0_61 = arith.constant 0 : index
    %73 = vector.load %arg3[%c0_60, %c0_61] : memref<4x216xbf16, #tpu.memory_space<vmem>>, vector<4x216xbf16>
    %c0_62 = arith.constant 0 : index
    %c0_63 = arith.constant 0 : index
    %74 = vector.load %arg12[%c0_62, %c0_63] : memref<216x2048xf32, #tpu.memory_space<vmem>>, vector<216x2048xf32>
    %75 = arith.truncf %74 : vector<216x2048xf32> to vector<216x2048xbf16>
    %cst_64 = arith.constant dense<0.000000e+00> : vector<4x2048xf32>
    %76 = tpu.matmul %73, %75, %cst_64 {dimension_numbers = #tpu.dot_dimension_numbers<[1], [0], [0], [1], [0, 0, 1, 1], [], []>} : vector<4x216xbf16>, vector<216x2048xbf16>, vector<4x2048xf32> -> vector<4x2048xf32>
    %c0_65 = arith.constant 0 : index
    %c0_66 = arith.constant 0 : index
    %77 = vector.load %arg4[%c0_65, %c0_66] : memref<4x1xf32, #tpu.memory_space<vmem>>, vector<4x1xf32>
    %78 = vector.broadcast %77 : vector<4x1xf32> to vector<4x2048xf32>
    %79 = arith.addf %76, %78 : vector<4x2048xf32>
    %80 = vector.broadcast %0 : vector<1x2048xf32> to vector<4x2048xf32>
    %81 = arith.mulf %79, %80 : vector<4x2048xf32>
    %82 = arith.truncf %81 : vector<4x2048xf32> to vector<4x2048xbf16>
    %c0_67 = arith.constant 0 : index
    %c0_68 = arith.constant 0 : index
    %c0_69 = arith.constant 0 : index
    %83 = vector.load %arg8[%c0_67, %c0_68, %c0_69] : memref<1x4x2048xbf16, #tpu.memory_space<vmem>>, vector<1x4x2048xbf16>
    %84 = vector.shape_cast %83 : vector<1x4x2048xbf16> to vector<4x2048xbf16>
    %85 = vector.shape_cast %82 : vector<4x2048xbf16> to vector<1x4x2048xbf16>
    tpu.vector_store %arg8[%c0_67, %c0_68, %c0_69], %85 {strides = array<i32>} : memref<1x4x2048xbf16, #tpu.memory_space<vmem>>, vector<1x4x2048xbf16>,
    %cst_70 = arith.constant dense<0.000000e+00> : vector<4xf32>
    %86 = vector.multi_reduction <add>, %81, %cst_70 [1] : vector<4x2048xf32> to vector<4xf32>
    %87 = vector.shape_cast %86 : vector<4xf32> to vector<4x1xf32>
    %c0_71 = arith.constant 0 : index
    %c0_72 = arith.constant 0 : index
    %c0_73 = arith.constant 0 : index
    %88 = vector.load %arg9[%c0_71, %c0_72, %c0_73] : memref<1x4x1xf32, #tpu.memory_space<vmem>>, vector<1x4x1xf32>
    %89 = vector.shape_cast %88 : vector<1x4x1xf32> to vector<4x1xf32>
    %90 = vector.shape_cast %87 : vector<4x1xf32> to vector<1x4x1xf32>
    tpu.vector_store %arg9[%c0_71, %c0_72, %c0_73], %90 {strides = array<i32>} : memref<1x4x1xf32, #tpu.memory_space<vmem>>, vector<1x4x1xf32>,
    %91 = arith.mulf %81, %81 : vector<4x2048xf32>
    %cst_74 = arith.constant dense<0.000000e+00> : vector<4xf32>
    %92 = vector.multi_reduction <add>, %91, %cst_74 [1] : vector<4x2048xf32> to vector<4xf32>
    %93 = vector.shape_cast %92 : vector<4xf32> to vector<4x1xf32>
    %c0_75 = arith.constant 0 : index
    %c0_76 = arith.constant 0 : index
    %c0_77 = arith.constant 0 : index
    %94 = vector.load %arg10[%c0_75, %c0_76, %c0_77] : memref<1x4x1xf32, #tpu.memory_space<vmem>>, vector<1x4x1xf32>
    %95 = vector.shape_cast %94 : vector<1x4x1xf32> to vector<4x1xf32>
    %96 = vector.shape_cast %93 : vector<4x1xf32> to vector<1x4x1xf32>
    tpu.vector_store %arg10[%c0_75, %c0_76, %c0_77], %96 {strides = array<i32>} : memref<1x4x1xf32, #tpu.memory_space<vmem>>, vector<1x4x1xf32>,
    return
  }
  func.func @transform_0(%arg0: i32) -> (i32, i32, i32) {
    %c0_i32 = arith.constant 0 : i32
    %c0_i32_0 = arith.constant 0 : i32
    %c0_i32_1 = arith.constant 0 : i32
    return %arg0, %c0_i32, %c0_i32_0 : i32, i32, i32
  }
  func.func @transform_1(%arg0: i32) -> (i32, i32, i32) {
    %c0_i32 = arith.constant 0 : i32
    %c0_i32_0 = arith.constant 0 : i32
    %c0_i32_1 = arith.constant 0 : i32
    return %arg0, %c0_i32, %c0_i32_0 : i32, i32, i32
  }
  func.func @transform_2(%arg0: i32) -> (i32, i32) {
    %c0_i32 = arith.constant 0 : i32
    %c0_i32_0 = arith.constant 0 : i32
    %c0_i32_1 = arith.constant 0 : i32
    return %c0_i32, %c0_i32_0 : i32, i32
  }
  func.func @transform_3(%arg0: i32) -> (i32, i32) {
    %c0_i32 = arith.constant 0 : i32
    %c0_i32_0 = arith.constant 0 : i32
    %c0_i32_1 = arith.constant 0 : i32
    return %c0_i32, %c0_i32_0 : i32, i32
  }
  func.func @transform_4(%arg0: i32) -> (i32, i32) {
    %c0_i32 = arith.constant 0 : i32
    %c0_i32_0 = arith.constant 0 : i32
    %c0_i32_1 = arith.constant 0 : i32
    return %c0_i32, %c0_i32_0 : i32, i32
  }
  func.func @transform_5(%arg0: i32) -> (i32, i32) {
    %c0_i32 = arith.constant 0 : i32
    %c0_i32_0 = arith.constant 0 : i32
    %c0_i32_1 = arith.constant 0 : i32
    return %c0_i32, %c0_i32_0 : i32, i32
  }
  func.func @transform_6(%arg0: i32) -> (i32, i32) {
    %c0_i32 = arith.constant 0 : i32
    %c0_i32_0 = arith.constant 0 : i32
    %c0_i32_1 = arith.constant 0 : i32
    return %c0_i32, %c0_i32_0 : i32, i32
  }
  func.func @transform_7(%arg0: i32) -> (i32, i32, i32) {
    %c0_i32 = arith.constant 0 : i32
    %c0_i32_0 = arith.constant 0 : i32
    %c0_i32_1 = arith.constant 0 : i32
    return %arg0, %c0_i32, %c0_i32_0 : i32, i32, i32
  }
  func.func @transform_8(%arg0: i32) -> (i32, i32, i32) {
    %c0_i32 = arith.constant 0 : i32
    %c0_i32_0 = arith.constant 0 : i32
    %c0_i32_1 = arith.constant 0 : i32
    return %arg0, %c0_i32, %c0_i32_0 : i32, i32, i32
  }
  func.func @transform_9(%arg0: i32) -> (i32, i32, i32) {
    %c0_i32 = arith.constant 0 : i32
    %c0_i32_0 = arith.constant 0 : i32
    %c0_i32_1 = arith.constant 0 : i32
    return %arg0, %c0_i32, %c0_i32_0 : i32, i32, i32
  }
}

module attributes {stable_mosaic.version = 11 : i64} {
  func.func @_conv2_kernel(%arg0: i32, %arg1: memref<1x4x2048xbf16, #tpu.memory_space<vmem>>, %arg2: memref<4x108xbf16, #tpu.memory_space<vmem>>, %arg3: memref<4x1xf32, #tpu.memory_space<vmem>>, %arg4: memref<4x1xf32, #tpu.memory_space<vmem>>, %arg5: memref<4x1xf32, #tpu.memory_space<vmem>>, %arg6: memref<1x2048xf32, #tpu.memory_space<vmem>>, %arg7: memref<1x4x2048xbf16, #tpu.memory_space<vmem>>, %arg8: memref<1x4x1xf32, #tpu.memory_space<vmem>>, %arg9: memref<1x4x1xf32, #tpu.memory_space<vmem>>, %arg10: memref<108x2048xf32, #tpu.memory_space<vmem>>) attributes {dimension_semantics = [#tpu.dimension_semantics<parallel>], iteration_bounds = array<i64: 2>, scalar_prefetch = 0 : i64, scratch_operands = 1 : i64, tpu.core_type = #tpu.core_type<tc>, window_params = [{transform_indices = @transform_0, window_bounds = array<i64: 1, 4, 2048>}, {pipeline_mode = #tpu.pipeline_mode<synchronous>, transform_indices = @transform_1, window_bounds = array<i64: 4, 108>}, {pipeline_mode = #tpu.pipeline_mode<synchronous>, transform_indices = @transform_2, window_bounds = array<i64: 4, 1>}, {pipeline_mode = #tpu.pipeline_mode<synchronous>, transform_indices = @transform_3, window_bounds = array<i64: 4, 1>}, {pipeline_mode = #tpu.pipeline_mode<synchronous>, transform_indices = @transform_4, window_bounds = array<i64: 4, 1>}, {pipeline_mode = #tpu.pipeline_mode<synchronous>, transform_indices = @transform_5, window_bounds = array<i64: 1, 2048>}, {transform_indices = @transform_6, window_bounds = array<i64: 1, 4, 2048>}, {transform_indices = @transform_7, window_bounds = array<i64: 1, 4, 1>}, {transform_indices = @transform_8, window_bounds = array<i64: 1, 4, 1>}]} {
    %c0 = arith.constant 0 : index
    %c0_0 = arith.constant 0 : index
    %0 = vector.load %arg6[%c0, %c0_0] : memref<1x2048xf32, #tpu.memory_space<vmem>>, vector<1x2048xf32>
    %c0_1 = arith.constant 0 : index
    %c0_2 = arith.constant 0 : index
    %c0_3 = arith.constant 0 : index
    %1 = vector.load %arg1[%c0_1, %c0_2, %c0_3] : memref<1x4x2048xbf16, #tpu.memory_space<vmem>>, vector<1x4x2048xbf16>
    %2 = vector.shape_cast %1 : vector<1x4x2048xbf16> to vector<4x2048xbf16>
    %3 = arith.extf %2 : vector<4x2048xbf16> to vector<4x2048xf32>
    %c0_4 = arith.constant 0 : index
    %c0_5 = arith.constant 0 : index
    %4 = vector.load %arg4[%c0_4, %c0_5] : memref<4x1xf32, #tpu.memory_space<vmem>>, vector<4x1xf32>
    %5 = vector.broadcast %4 : vector<4x1xf32> to vector<4x2048xf32>
    %6 = arith.mulf %3, %5 : vector<4x2048xf32>
    %c0_6 = arith.constant 0 : index
    %c0_7 = arith.constant 0 : index
    %7 = vector.load %arg5[%c0_6, %c0_7] : memref<4x1xf32, #tpu.memory_space<vmem>>, vector<4x1xf32>
    %8 = vector.broadcast %7 : vector<4x1xf32> to vector<4x2048xf32>
    %9 = arith.addf %6, %8 : vector<4x2048xf32>
    %cst = arith.constant 0.000000e+00 : f32
    %10 = vector.broadcast %cst : f32 to vector<4x2048xf32>
    %11 = arith.maximumf %9, %10 : vector<4x2048xf32>
    %12 = vector.broadcast %0 : vector<1x2048xf32> to vector<4x2048xf32>
    %13 = arith.mulf %11, %12 : vector<4x2048xf32>
    %c342_i32 = arith.constant 342 : i32
    %14 = tpu.dynamic_rotate %13 by %c342_i32 dim 1 : vector<4x2048xf32>, i32 -> vector<4x2048xf32>
    %c1_i32 = arith.constant 1 : i32
    %15 = tpu.dynamic_rotate %14 by %c1_i32 dim 1 : vector<4x2048xf32>, i32 -> vector<4x2048xf32>
    %c0_8 = arith.constant 0 : index
    %c0_9 = arith.constant 0 : index
    %16 = vector.load %arg10[%c0_8, %c0_9] : memref<108x2048xf32, #tpu.memory_space<vmem>>, vector<4x2048xf32>
    tpu.vector_store %arg10[%c0_8, %c0_9], %15 {strides = array<i32>} : memref<108x2048xf32, #tpu.memory_space<vmem>>, vector<4x2048xf32>,
    %c4 = arith.constant 4 : index
    %c0_10 = arith.constant 0 : index
    %17 = vector.load %arg10[%c4, %c0_10] : memref<108x2048xf32, #tpu.memory_space<vmem>>, vector<4x2048xf32>
    tpu.vector_store %arg10[%c4, %c0_10], %14 {strides = array<i32>} : memref<108x2048xf32, #tpu.memory_space<vmem>>, vector<4x2048xf32>,
    %c2047_i32 = arith.constant 2047 : i32
    %18 = tpu.dynamic_rotate %14 by %c2047_i32 dim 1 : vector<4x2048xf32>, i32 -> vector<4x2048xf32>
    %c8 = arith.constant 8 : index
    %c0_11 = arith.constant 0 : index
    %19 = vector.load %arg10[%c8, %c0_11] : memref<108x2048xf32, #tpu.memory_space<vmem>>, vector<4x2048xf32>
    tpu.vector_store %arg10[%c8, %c0_11], %18 {strides = array<i32>} : memref<108x2048xf32, #tpu.memory_space<vmem>>, vector<4x2048xf32>,
    %c324_i32 = arith.constant 324 : i32
    %20 = tpu.dynamic_rotate %13 by %c324_i32 dim 1 : vector<4x2048xf32>, i32 -> vector<4x2048xf32>
    %c1_i32_12 = arith.constant 1 : i32
    %21 = tpu.dynamic_rotate %20 by %c1_i32_12 dim 1 : vector<4x2048xf32>, i32 -> vector<4x2048xf32>
    %c12 = arith.constant 12 : index
    %c0_13 = arith.constant 0 : index
    %22 = vector.load %arg10[%c12, %c0_13] : memref<108x2048xf32, #tpu.memory_space<vmem>>, vector<4x2048xf32>
    tpu.vector_store %arg10[%c12, %c0_13], %21 {strides = array<i32>} : memref<108x2048xf32, #tpu.memory_space<vmem>>, vector<4x2048xf32>,
    %c16 = arith.constant 16 : index
    %c0_14 = arith.constant 0 : index
    %23 = vector.load %arg10[%c16, %c0_14] : memref<108x2048xf32, #tpu.memory_space<vmem>>, vector<4x2048xf32>
    tpu.vector_store %arg10[%c16, %c0_14], %20 {strides = array<i32>} : memref<108x2048xf32, #tpu.memory_space<vmem>>, vector<4x2048xf32>,
    %c2047_i32_15 = arith.constant 2047 : i32
    %24 = tpu.dynamic_rotate %20 by %c2047_i32_15 dim 1 : vector<4x2048xf32>, i32 -> vector<4x2048xf32>
    %c20 = arith.constant 20 : index
    %c0_16 = arith.constant 0 : index
    %25 = vector.load %arg10[%c20, %c0_16] : memref<108x2048xf32, #tpu.memory_space<vmem>>, vector<4x2048xf32>
    tpu.vector_store %arg10[%c20, %c0_16], %24 {strides = array<i32>} : memref<108x2048xf32, #tpu.memory_space<vmem>>, vector<4x2048xf32>,
    %c306_i32 = arith.constant 306 : i32
    %26 = tpu.dynamic_rotate %13 by %c306_i32 dim 1 : vector<4x2048xf32>, i32 -> vector<4x2048xf32>
    %c1_i32_17 = arith.constant 1 : i32
    %27 = tpu.dynamic_rotate %26 by %c1_i32_17 dim 1 : vector<4x2048xf32>, i32 -> vector<4x2048xf32>
    %c24 = arith.constant 24 : index
    %c0_18 = arith.constant 0 : index
    %28 = vector.load %arg10[%c24, %c0_18] : memref<108x2048xf32, #tpu.memory_space<vmem>>, vector<4x2048xf32>
    tpu.vector_store %arg10[%c24, %c0_18], %27 {strides = array<i32>} : memref<108x2048xf32, #tpu.memory_space<vmem>>, vector<4x2048xf32>,
    %c28 = arith.constant 28 : index
    %c0_19 = arith.constant 0 : index
    %29 = vector.load %arg10[%c28, %c0_19] : memref<108x2048xf32, #tpu.memory_space<vmem>>, vector<4x2048xf32>
    tpu.vector_store %arg10[%c28, %c0_19], %26 {strides = array<i32>} : memref<108x2048xf32, #tpu.memory_space<vmem>>, vector<4x2048xf32>,
    %c2047_i32_20 = arith.constant 2047 : i32
    %30 = tpu.dynamic_rotate %26 by %c2047_i32_20 dim 1 : vector<4x2048xf32>, i32 -> vector<4x2048xf32>
    %c32 = arith.constant 32 : index
    %c0_21 = arith.constant 0 : index
    %31 = vector.load %arg10[%c32, %c0_21] : memref<108x2048xf32, #tpu.memory_space<vmem>>, vector<4x2048xf32>
    tpu.vector_store %arg10[%c32, %c0_21], %30 {strides = array<i32>} : memref<108x2048xf32, #tpu.memory_space<vmem>>, vector<4x2048xf32>,
    %c18_i32 = arith.constant 18 : i32
    %32 = tpu.dynamic_rotate %13 by %c18_i32 dim 1 : vector<4x2048xf32>, i32 -> vector<4x2048xf32>
    %c1_i32_22 = arith.constant 1 : i32
    %33 = tpu.dynamic_rotate %32 by %c1_i32_22 dim 1 : vector<4x2048xf32>, i32 -> vector<4x2048xf32>
    %c36 = arith.constant 36 : index
    %c0_23 = arith.constant 0 : index
    %34 = vector.load %arg10[%c36, %c0_23] : memref<108x2048xf32, #tpu.memory_space<vmem>>, vector<4x2048xf32>
    tpu.vector_store %arg10[%c36, %c0_23], %33 {strides = array<i32>} : memref<108x2048xf32, #tpu.memory_space<vmem>>, vector<4x2048xf32>,
    %c40 = arith.constant 40 : index
    %c0_24 = arith.constant 0 : index
    %35 = vector.load %arg10[%c40, %c0_24] : memref<108x2048xf32, #tpu.memory_space<vmem>>, vector<4x2048xf32>
    tpu.vector_store %arg10[%c40, %c0_24], %32 {strides = array<i32>} : memref<108x2048xf32, #tpu.memory_space<vmem>>, vector<4x2048xf32>,
    %c2047_i32_25 = arith.constant 2047 : i32
    %36 = tpu.dynamic_rotate %32 by %c2047_i32_25 dim 1 : vector<4x2048xf32>, i32 -> vector<4x2048xf32>
    %c44 = arith.constant 44 : index
    %c0_26 = arith.constant 0 : index
    %37 = vector.load %arg10[%c44, %c0_26] : memref<108x2048xf32, #tpu.memory_space<vmem>>, vector<4x2048xf32>
    tpu.vector_store %arg10[%c44, %c0_26], %36 {strides = array<i32>} : memref<108x2048xf32, #tpu.memory_space<vmem>>, vector<4x2048xf32>,
    %c1_i32_27 = arith.constant 1 : i32
    %38 = tpu.dynamic_rotate %13 by %c1_i32_27 dim 1 : vector<4x2048xf32>, i32 -> vector<4x2048xf32>
    %c48 = arith.constant 48 : index
    %c0_28 = arith.constant 0 : index
    %39 = vector.load %arg10[%c48, %c0_28] : memref<108x2048xf32, #tpu.memory_space<vmem>>, vector<4x2048xf32>
    tpu.vector_store %arg10[%c48, %c0_28], %38 {strides = array<i32>} : memref<108x2048xf32, #tpu.memory_space<vmem>>, vector<4x2048xf32>,
    %c52 = arith.constant 52 : index
    %c0_29 = arith.constant 0 : index
    %40 = vector.load %arg10[%c52, %c0_29] : memref<108x2048xf32, #tpu.memory_space<vmem>>, vector<4x2048xf32>
    tpu.vector_store %arg10[%c52, %c0_29], %13 {strides = array<i32>} : memref<108x2048xf32, #tpu.memory_space<vmem>>, vector<4x2048xf32>,
    %c2047_i32_30 = arith.constant 2047 : i32
    %41 = tpu.dynamic_rotate %13 by %c2047_i32_30 dim 1 : vector<4x2048xf32>, i32 -> vector<4x2048xf32>
    %c56 = arith.constant 56 : index
    %c0_31 = arith.constant 0 : index
    %42 = vector.load %arg10[%c56, %c0_31] : memref<108x2048xf32, #tpu.memory_space<vmem>>, vector<4x2048xf32>
    tpu.vector_store %arg10[%c56, %c0_31], %41 {strides = array<i32>} : memref<108x2048xf32, #tpu.memory_space<vmem>>, vector<4x2048xf32>,
    %c2030_i32 = arith.constant 2030 : i32
    %43 = tpu.dynamic_rotate %13 by %c2030_i32 dim 1 : vector<4x2048xf32>, i32 -> vector<4x2048xf32>
    %c1_i32_32 = arith.constant 1 : i32
    %44 = tpu.dynamic_rotate %43 by %c1_i32_32 dim 1 : vector<4x2048xf32>, i32 -> vector<4x2048xf32>
    %c60 = arith.constant 60 : index
    %c0_33 = arith.constant 0 : index
    %45 = vector.load %arg10[%c60, %c0_33] : memref<108x2048xf32, #tpu.memory_space<vmem>>, vector<4x2048xf32>
    tpu.vector_store %arg10[%c60, %c0_33], %44 {strides = array<i32>} : memref<108x2048xf32, #tpu.memory_space<vmem>>, vector<4x2048xf32>,
    %c64 = arith.constant 64 : index
    %c0_34 = arith.constant 0 : index
    %46 = vector.load %arg10[%c64, %c0_34] : memref<108x2048xf32, #tpu.memory_space<vmem>>, vector<4x2048xf32>
    tpu.vector_store %arg10[%c64, %c0_34], %43 {strides = array<i32>} : memref<108x2048xf32, #tpu.memory_space<vmem>>, vector<4x2048xf32>,
    %c2047_i32_35 = arith.constant 2047 : i32
    %47 = tpu.dynamic_rotate %43 by %c2047_i32_35 dim 1 : vector<4x2048xf32>, i32 -> vector<4x2048xf32>
    %c68 = arith.constant 68 : index
    %c0_36 = arith.constant 0 : index
    %48 = vector.load %arg10[%c68, %c0_36] : memref<108x2048xf32, #tpu.memory_space<vmem>>, vector<4x2048xf32>
    tpu.vector_store %arg10[%c68, %c0_36], %47 {strides = array<i32>} : memref<108x2048xf32, #tpu.memory_space<vmem>>, vector<4x2048xf32>,
    %c1742_i32 = arith.constant 1742 : i32
    %49 = tpu.dynamic_rotate %13 by %c1742_i32 dim 1 : vector<4x2048xf32>, i32 -> vector<4x2048xf32>
    %c1_i32_37 = arith.constant 1 : i32
    %50 = tpu.dynamic_rotate %49 by %c1_i32_37 dim 1 : vector<4x2048xf32>, i32 -> vector<4x2048xf32>
    %c72 = arith.constant 72 : index
    %c0_38 = arith.constant 0 : index
    %51 = vector.load %arg10[%c72, %c0_38] : memref<108x2048xf32, #tpu.memory_space<vmem>>, vector<4x2048xf32>
    tpu.vector_store %arg10[%c72, %c0_38], %50 {strides = array<i32>} : memref<108x2048xf32, #tpu.memory_space<vmem>>, vector<4x2048xf32>,
    %c76 = arith.constant 76 : index
    %c0_39 = arith.constant 0 : index
    %52 = vector.load %arg10[%c76, %c0_39] : memref<108x2048xf32, #tpu.memory_space<vmem>>, vector<4x2048xf32>
    tpu.vector_store %arg10[%c76, %c0_39], %49 {strides = array<i32>} : memref<108x2048xf32, #tpu.memory_space<vmem>>, vector<4x2048xf32>,
    %c2047_i32_40 = arith.constant 2047 : i32
    %53 = tpu.dynamic_rotate %49 by %c2047_i32_40 dim 1 : vector<4x2048xf32>, i32 -> vector<4x2048xf32>
    %c80 = arith.constant 80 : index
    %c0_41 = arith.constant 0 : index
    %54 = vector.load %arg10[%c80, %c0_41] : memref<108x2048xf32, #tpu.memory_space<vmem>>, vector<4x2048xf32>
    tpu.vector_store %arg10[%c80, %c0_41], %53 {strides = array<i32>} : memref<108x2048xf32, #tpu.memory_space<vmem>>, vector<4x2048xf32>,
    %c1724_i32 = arith.constant 1724 : i32
    %55 = tpu.dynamic_rotate %13 by %c1724_i32 dim 1 : vector<4x2048xf32>, i32 -> vector<4x2048xf32>
    %c1_i32_42 = arith.constant 1 : i32
    %56 = tpu.dynamic_rotate %55 by %c1_i32_42 dim 1 : vector<4x2048xf32>, i32 -> vector<4x2048xf32>
    %c84 = arith.constant 84 : index
    %c0_43 = arith.constant 0 : index
    %57 = vector.load %arg10[%c84, %c0_43] : memref<108x2048xf32, #tpu.memory_space<vmem>>, vector<4x2048xf32>
    tpu.vector_store %arg10[%c84, %c0_43], %56 {strides = array<i32>} : memref<108x2048xf32, #tpu.memory_space<vmem>>, vector<4x2048xf32>,
    %c88 = arith.constant 88 : index
    %c0_44 = arith.constant 0 : index
    %58 = vector.load %arg10[%c88, %c0_44] : memref<108x2048xf32, #tpu.memory_space<vmem>>, vector<4x2048xf32>
    tpu.vector_store %arg10[%c88, %c0_44], %55 {strides = array<i32>} : memref<108x2048xf32, #tpu.memory_space<vmem>>, vector<4x2048xf32>,
    %c2047_i32_45 = arith.constant 2047 : i32
    %59 = tpu.dynamic_rotate %55 by %c2047_i32_45 dim 1 : vector<4x2048xf32>, i32 -> vector<4x2048xf32>
    %c92 = arith.constant 92 : index
    %c0_46 = arith.constant 0 : index
    %60 = vector.load %arg10[%c92, %c0_46] : memref<108x2048xf32, #tpu.memory_space<vmem>>, vector<4x2048xf32>
    tpu.vector_store %arg10[%c92, %c0_46], %59 {strides = array<i32>} : memref<108x2048xf32, #tpu.memory_space<vmem>>, vector<4x2048xf32>,
    %c1706_i32 = arith.constant 1706 : i32
    %61 = tpu.dynamic_rotate %13 by %c1706_i32 dim 1 : vector<4x2048xf32>, i32 -> vector<4x2048xf32>
    %c1_i32_47 = arith.constant 1 : i32
    %62 = tpu.dynamic_rotate %61 by %c1_i32_47 dim 1 : vector<4x2048xf32>, i32 -> vector<4x2048xf32>
    %c96 = arith.constant 96 : index
    %c0_48 = arith.constant 0 : index
    %63 = vector.load %arg10[%c96, %c0_48] : memref<108x2048xf32, #tpu.memory_space<vmem>>, vector<4x2048xf32>
    tpu.vector_store %arg10[%c96, %c0_48], %62 {strides = array<i32>} : memref<108x2048xf32, #tpu.memory_space<vmem>>, vector<4x2048xf32>,
    %c100 = arith.constant 100 : index
    %c0_49 = arith.constant 0 : index
    %64 = vector.load %arg10[%c100, %c0_49] : memref<108x2048xf32, #tpu.memory_space<vmem>>, vector<4x2048xf32>
    tpu.vector_store %arg10[%c100, %c0_49], %61 {strides = array<i32>} : memref<108x2048xf32, #tpu.memory_space<vmem>>, vector<4x2048xf32>,
    %c2047_i32_50 = arith.constant 2047 : i32
    %65 = tpu.dynamic_rotate %61 by %c2047_i32_50 dim 1 : vector<4x2048xf32>, i32 -> vector<4x2048xf32>
    %c104 = arith.constant 104 : index
    %c0_51 = arith.constant 0 : index
    %66 = vector.load %arg10[%c104, %c0_51] : memref<108x2048xf32, #tpu.memory_space<vmem>>, vector<4x2048xf32>
    tpu.vector_store %arg10[%c104, %c0_51], %65 {strides = array<i32>} : memref<108x2048xf32, #tpu.memory_space<vmem>>, vector<4x2048xf32>,
    %c0_52 = arith.constant 0 : index
    %c0_53 = arith.constant 0 : index
    %67 = vector.load %arg2[%c0_52, %c0_53] : memref<4x108xbf16, #tpu.memory_space<vmem>>, vector<4x108xbf16>
    %c0_54 = arith.constant 0 : index
    %c0_55 = arith.constant 0 : index
    %68 = vector.load %arg10[%c0_54, %c0_55] : memref<108x2048xf32, #tpu.memory_space<vmem>>, vector<108x2048xf32>
    %69 = arith.truncf %68 : vector<108x2048xf32> to vector<108x2048xbf16>
    %cst_56 = arith.constant dense<0.000000e+00> : vector<4x2048xf32>
    %70 = tpu.matmul %67, %69, %cst_56 {dimension_numbers = #tpu.dot_dimension_numbers<[1], [0], [0], [1], [0, 0, 1, 1], [], []>} : vector<4x108xbf16>, vector<108x2048xbf16>, vector<4x2048xf32> -> vector<4x2048xf32>
    %c0_57 = arith.constant 0 : index
    %c0_58 = arith.constant 0 : index
    %71 = vector.load %arg3[%c0_57, %c0_58] : memref<4x1xf32, #tpu.memory_space<vmem>>, vector<4x1xf32>
    %72 = vector.broadcast %71 : vector<4x1xf32> to vector<4x2048xf32>
    %73 = arith.addf %70, %72 : vector<4x2048xf32>
    %74 = vector.broadcast %0 : vector<1x2048xf32> to vector<4x2048xf32>
    %75 = arith.mulf %73, %74 : vector<4x2048xf32>
    %76 = arith.truncf %75 : vector<4x2048xf32> to vector<4x2048xbf16>
    %c0_59 = arith.constant 0 : index
    %c0_60 = arith.constant 0 : index
    %c0_61 = arith.constant 0 : index
    %77 = vector.load %arg7[%c0_59, %c0_60, %c0_61] : memref<1x4x2048xbf16, #tpu.memory_space<vmem>>, vector<1x4x2048xbf16>
    %78 = vector.shape_cast %77 : vector<1x4x2048xbf16> to vector<4x2048xbf16>
    %79 = vector.shape_cast %76 : vector<4x2048xbf16> to vector<1x4x2048xbf16>
    tpu.vector_store %arg7[%c0_59, %c0_60, %c0_61], %79 {strides = array<i32>} : memref<1x4x2048xbf16, #tpu.memory_space<vmem>>, vector<1x4x2048xbf16>,
    %cst_62 = arith.constant dense<0.000000e+00> : vector<4xf32>
    %80 = vector.multi_reduction <add>, %75, %cst_62 [1] : vector<4x2048xf32> to vector<4xf32>
    %81 = vector.shape_cast %80 : vector<4xf32> to vector<4x1xf32>
    %c0_63 = arith.constant 0 : index
    %c0_64 = arith.constant 0 : index
    %c0_65 = arith.constant 0 : index
    %82 = vector.load %arg8[%c0_63, %c0_64, %c0_65] : memref<1x4x1xf32, #tpu.memory_space<vmem>>, vector<1x4x1xf32>
    %83 = vector.shape_cast %82 : vector<1x4x1xf32> to vector<4x1xf32>
    %84 = vector.shape_cast %81 : vector<4x1xf32> to vector<1x4x1xf32>
    tpu.vector_store %arg8[%c0_63, %c0_64, %c0_65], %84 {strides = array<i32>} : memref<1x4x1xf32, #tpu.memory_space<vmem>>, vector<1x4x1xf32>,
    %85 = arith.mulf %75, %75 : vector<4x2048xf32>
    %cst_66 = arith.constant dense<0.000000e+00> : vector<4xf32>
    %86 = vector.multi_reduction <add>, %85, %cst_66 [1] : vector<4x2048xf32> to vector<4xf32>
    %87 = vector.shape_cast %86 : vector<4xf32> to vector<4x1xf32>
    %c0_67 = arith.constant 0 : index
    %c0_68 = arith.constant 0 : index
    %c0_69 = arith.constant 0 : index
    %88 = vector.load %arg9[%c0_67, %c0_68, %c0_69] : memref<1x4x1xf32, #tpu.memory_space<vmem>>, vector<1x4x1xf32>
    %89 = vector.shape_cast %88 : vector<1x4x1xf32> to vector<4x1xf32>
    %90 = vector.shape_cast %87 : vector<4x1xf32> to vector<1x4x1xf32>
    tpu.vector_store %arg9[%c0_67, %c0_68, %c0_69], %90 {strides = array<i32>} : memref<1x4x1xf32, #tpu.memory_space<vmem>>, vector<1x4x1xf32>,
    return
  }
  func.func @transform_0(%arg0: i32) -> (i32, i32, i32) {
    %c0_i32 = arith.constant 0 : i32
    %c0_i32_0 = arith.constant 0 : i32
    %c0_i32_1 = arith.constant 0 : i32
    return %arg0, %c0_i32, %c0_i32_0 : i32, i32, i32
  }
  func.func @transform_1(%arg0: i32) -> (i32, i32) {
    %c0_i32 = arith.constant 0 : i32
    %c0_i32_0 = arith.constant 0 : i32
    %c0_i32_1 = arith.constant 0 : i32
    return %c0_i32, %c0_i32_0 : i32, i32
  }
  func.func @transform_2(%arg0: i32) -> (i32, i32) {
    %c0_i32 = arith.constant 0 : i32
    %c0_i32_0 = arith.constant 0 : i32
    %c0_i32_1 = arith.constant 0 : i32
    return %c0_i32, %c0_i32_0 : i32, i32
  }
  func.func @transform_3(%arg0: i32) -> (i32, i32) {
    %c0_i32 = arith.constant 0 : i32
    %c0_i32_0 = arith.constant 0 : i32
    %c0_i32_1 = arith.constant 0 : i32
    return %c0_i32, %c0_i32_0 : i32, i32
  }
  func.func @transform_4(%arg0: i32) -> (i32, i32) {
    %c0_i32 = arith.constant 0 : i32
    %c0_i32_0 = arith.constant 0 : i32
    %c0_i32_1 = arith.constant 0 : i32
    return %c0_i32, %c0_i32_0 : i32, i32
  }
  func.func @transform_5(%arg0: i32) -> (i32, i32) {
    %c0_i32 = arith.constant 0 : i32
    %c0_i32_0 = arith.constant 0 : i32
    %c0_i32_1 = arith.constant 0 : i32
    return %c0_i32, %c0_i32_0 : i32, i32
  }
  func.func @transform_6(%arg0: i32) -> (i32, i32, i32) {
    %c0_i32 = arith.constant 0 : i32
    %c0_i32_0 = arith.constant 0 : i32
    %c0_i32_1 = arith.constant 0 : i32
    return %arg0, %c0_i32, %c0_i32_0 : i32, i32, i32
  }
  func.func @transform_7(%arg0: i32) -> (i32, i32, i32) {
    %c0_i32 = arith.constant 0 : i32
    %c0_i32_0 = arith.constant 0 : i32
    %c0_i32_1 = arith.constant 0 : i32
    return %arg0, %c0_i32, %c0_i32_0 : i32, i32, i32
  }
  func.func @transform_8(%arg0: i32) -> (i32, i32, i32) {
    %c0_i32 = arith.constant 0 : i32
    %c0_i32_0 = arith.constant 0 : i32
    %c0_i32_1 = arith.constant 0 : i32
    return %arg0, %c0_i32, %c0_i32_0 : i32, i32, i32
  }
}

</mosaic_0001>

<bundles_post_ra>
// kernel: upsample_unet3d_forward.3
= control target key start
LH: loop header
LB: loop body
LE: loop exit
PB: predicated region body
PF: predicated region fallthrough
CT: control target
= control target key end

     0   :  { %s560_s18 = smov 0   ;;  %s598_s0 = inlined_call_operand.vmem [shape: f32[2,8,256], index: 0, kind: input, shape index: {}]   ;;  %s599_s1 = inlined_call_operand.vmem [shape: bf16[16,8], index: 1, kind: input, shape index: {}]   ;;  %s600_s2 = inlined_call_operand.vmem [shape: f32[16,1], index: 2, kind: input, shape index: {}]   ;;  %s601_s3 = inlined_call_operand.vmem [shape: bf16[2,16,256], index: 3, kind: output, shape index: {0}]   ;;  %s602_s4 = inlined_call_operand.vmem [shape: f32[2,16,1], index: 4, kind: output, shape index: {1}]   ;;  %s603_s5 = inlined_call_operand.vmem [shape: f32[2,16,1], index: 5, kind: output, shape index: {2}]  }
   0x1 LB: > { %s484_s19 = sadd.s32 4294967295, %s527_s18   ;;  %p488_p0 = scmp.ge.s32.totalorder %s527_s18, 1  ;;  %s527_s18 = sphi %s560_s18, %s16_s18  }
   0x2   : > { %p192_p1 = scmp.lt.s32.totalorder %s527_s18, 3 }
   0x4   : > { %p193_p2 = pnand %p488_p0, %p192_p1 }
   0x5   : > { %p230_p3 = scmp.lt.s32.totalorder (!%p193_p2), %s484_s19, 1 }
   0x6   : > { %196 = sbr.rel (%p193_p2) target bundleno = 367 (0x16f), region = 32 }
   0xb   : > { %v529_v0 = vmov 0   ;;  %v257_v1 = vld [vmem:[%s600_s2] sm:$0xff]  ;;  %s605_s19 = smov (!%p230_p3, %s484_s19), 1  ;;  %v258_v2 = vld [vmem:[%s600_s2 + $0x8] sm:$0xff]  ;;  %vm278_vm0 = vcmask 1043456   ;;  %vm274_vm1 = vcmask 64512  }
   0xc   : > { %317 = vmatprep.mubr.bf16.mxu0 %v529_v0  ;;  %519 = vset.pattern.permute.xlu0 %v529_v0  ;;  %s574_s24 = sshll.u32 %s605_s19, 4  ;;  %v520_v8 = vld [vmem:[%s599_s1] sm:$0xff]   ;;  %vm348_vm2 = vcmask 7168  }
   0xd   : > { %261 = vperm.xlu0 %519, %v257_v1   ;;  %s234_s27 = scalar_lea.vmem %s598_s0, %s574_s24  ;;  %s239_s7 = scalar_lea.vmem %s601_s3, %s574_s24 }
   0xe   : > { %v254_v3 = vld [vmem:[%s234_s27 + $0x8] sm:$0xff]  ;;  %v253_v4 = vld [vmem:[%s234_s27] sm:$0xff]  ;;  %s244_s10 = scalar_lea.vmem %s602_s4, %s574_s24  ;;  %s249_s13 = scalar_lea.vmem %s603_s5, %s574_s24 }
   0xf   : > { %v256_v5 = vpack.c.bf16 %v254_v3, %v254_v3  ;;  %v255_v6 = vpack.c.bf16 %v253_v4, %v253_v4 }
  0x11   : > { %266 = vperm.xlu0 %519, %v258_v2   ;;  %498 = vmatprep.subr.msk.bf16.mxu0 %vm278_vm0, %v256_v5  ;;  %v280_v7 = vsel %vm278_vm0, %v255_v6, 0 }
  0x12   : > { %300 = vmatpush1.bf16.msra.mxu0 %v280_v7 }
  0x15   : > { %499 = vmatmul.mubr.msk.bf16.vlgmr.msra.gmra.mxu0 %vm274_vm1, %v520_v8 }
  0x88   : > { %v262_v9 = vpop.permute.xlu0 %261 }
  0x8c   : > { %v267_v19 = vpop.permute.xlu0 %266 }
  0xd5   : > { %v319_v10 = vpop.f32.mrf.mxu0 }
  0xd6   : > { %v320_v11 = vadd.f32 %v319_v10, %v262_v9 }
  0xd7   : > { %v321_v12 = vpop.f32.mrf.mxu0 }
  0xd8   : > { %v322_v13 = vadd.f32 %v321_v12, %v262_v9  ;;  %v351_v17 = vmul.f32 %v320_v11, %v320_v11 }
  0xd9   : > { %v323_v14 = vpop.f32.mrf.mxu0 }
  0xda   : > { %v508_v15 = vpack.c.bf16 %v322_v13, %v320_v11  ;;  %v342_v16 = vadd.f32 %v322_v13, %v320_v11  ;;  %v352_v18 = vmul.f32 %v322_v13, %v322_v13  ;;  %v324_v21 = vadd.f32 %v323_v14, %v267_v19 }
  0xdb   : > { %v325_v20 = vpop.f32.mrf.mxu0 }
  0xdc   : > { %340 = vst [vmem:[%s239_s7] sm:$0xff] %v508_v15  ;;  %v326_v22 = vadd.f32 %v325_v20, %v267_v19  ;;  %343 = vadd.xlane.f32.xlu1 %v342_v16  ;;  %v355_v23 = vadd.f32 %v352_v18, %v351_v17  ;;  %v353_v27 = vmul.f32 %v324_v21, %v324_v21 }
  0xde   : > { %v509_v24 = vpack.c.bf16 %v326_v22, %v324_v21  ;;  %356 = vadd.xlane.f32.xlu0 %v355_v23  ;;  %v345_v25 = vadd.f32 %v326_v22, %v324_v21  ;;  %v354_v26 = vmul.f32 %v326_v22, %v326_v22 }
  0xe0   : > { %341 = vst [vmem:[%s239_s7 + $0x8] sm:$0xff] %v509_v24  ;;  %346 = vadd.xlane.f32.xlu1 %v345_v25  ;;  %v358_v28 = vadd.f32 %v354_v26, %v353_v27 }
  0xe4   : > { %359 = vadd.xlane.f32.xlu1 %v358_v28 }
 0x165   : > { %v344_v29 = vpop.xlane.xlu1 %343 }
 0x166   : > { %349 = vst.msk [vmem:[%s244_s10] sm:$0xff] %vm348_vm2, %v344_v29 }
 0x167   : > { %v357_v30 = vpop.xlane.xlu0 %356 }
 0x168   : > { %361 = vst.msk [vmem:[%s249_s13] sm:$0xff] %vm348_vm2, %v357_v30 }
 0x169   : > { %v347_v31 = vpop.xlane.xlu1 %346 }
 0x16a   : > { %350 = vst.msk [vmem:[%s244_s10 + $0x8] sm:$0xff] %vm348_vm2, %v347_v31 }
 0x16d   : > { %v360_v32 = vpop.xlane.xlu1 %359 }
 0x16e   : > { %362 = vst.msk [vmem:[%s249_s13 + $0x8] sm:$0xff] %vm348_vm2, %v360_v32 }
 0x16f PF: > { %s16_s18 = sadd.s32 1, %s527_s18  }
 0x170   : > { %p13_p4 = scmp.ge.s32.totalorder %s16_s18, 4  }
 0x172   :  { %15 = sbr.rel (!%p13_p4) target bundleno = 1 (0x1), region = 86 }

// kernel: upsample_unet3d_forward.4
= control target key start
LH: loop header
LB: loop body
LE: loop exit
PB: predicated region body
PF: predicated region fallthrough
CT: control target
= control target key end

     0   :  { %s4931_s30 = smov 0   ;;  %s8404_s0 = inlined_call_operand.vmem [shape: bf16[2,4,2048], index: 0, kind: input, shape index: {}]   ;;  %s8405_s1 = inlined_call_operand.vmem [shape: bf16[2,4,2048], index: 1, kind: input, shape index: {}]   ;;  %s8406_s2 = inlined_call_operand.vmem [shape: bf16[4,216], index: 2, kind: input, shape index: {}]   ;;  %s8407_s3 = inlined_call_operand.vmem [shape: f32[4,1], index: 3, kind: input, shape index: {}]   ;;  %s8408_s4 = inlined_call_operand.vmem [shape: f32[4,1], index: 4, kind: input, shape index: {}]   ;;  %s8409_s5 = inlined_call_operand.vmem [shape: f32[4,1], index: 5, kind: input, shape index: {}]   ;;  %s8410_s6 = inlined_call_operand.vmem [shape: f32[1,2048], index: 6, kind: input, shape index: {}]   ;;  %s8411_s7 = inlined_call_operand.vmem [shape: bf16[2,4,2048], index: 7, kind: output, shape index: {0}]   ;;  %s8412_s8 = inlined_call_operand.vmem [shape: f32[2,4,1], index: 8, kind: output, shape index: {1}]   ;;  %s8413_s9 = inlined_call_operand.vmem [shape: f32[2,4,1], index: 9, kind: output, shape index: {2}]  }
   0x1 LB: > { %s3737_s10 = sadd.s32 4294967295, %s4866_s30   ;;  %p3741_p0 = scmp.ge.s32.totalorder %s4866_s30, 1  ;;  %s4866_s30 = sphi %s4931_s30, %s20_s30  }
   0x2   : > { %p302_p1 = scmp.lt.s32.totalorder %s4866_s30, 3 }
   0x4   : > { %p303_p2 = pnand %p3741_p0, %p302_p1 }
   0x6   : > { %306 = sbr.rel (%p303_p2) target bundleno = 1155 (0x483), region = 48 }
   0xb   : > { %v389_v0 = vld [vmem:[%s8408_s4] sm:$0xf]  ;;  %p351_p3 = scmp.lt.s32.totalorder %s3737_s10, 1  ;;  %v4868_v1 = vmov 0   ;;  %v397_v23 = vlaneseq  ;;  %v4869_v24 = vmov 839922192  }
   0xc   : > { %3801 = vset.pattern.permute.xlu0 %v4868_v1  ;;  %v410_v2 = vld [vmem:[%s8409_s5] sm:$0xf]  ;;  %v395_v25 = vunpack.c.l.s4 %v4869_v24  ;;  %v376_v41 = vld [vmem:[%s8410_s6 + $0x8] sm:$0xff]  ;;  %s4870_s26 = smov 86   ;;  %s4871_s27 = smov 68   ;;  %vm3018_vm8 = vcmask 719872  }
   0xd   : > { %392 = vperm.xlu0 %3801, %v389_v0   ;;  %s9303_s10 = smov (!%p351_p3, %s3737_s10), 1  ;;  %v4959_v26 = vshrl.u32 %v397_v23, 7  ;;  %v375_v37 = vld [vmem:[%s8410_s6] sm:$0xff]  ;;  %s4872_s28 = smov 50   ;;  %vm3022_vm11 = vcmask 1043456   ;;  %vm3556_vm12 = vcmask 3072  }
   0xe   : > { %s4948_s15 = sshll.u32 %s9303_s10, 5  ;;  %v396_v27 = vunpack.c.0.s8 %v395_v25  ;;  %s4873_s29 = smov 110  }
   0xf   : > { %s360_s18 = scalar_lea.vmem %s8405_s1, %s4948_s15  ;;  %s355_s21 = scalar_lea.vmem %s8404_s0, %s4948_s15  ;;  %8689 = vst [vmem:[#allocation4_spill] sm:$0xff] %v4959_v26  ;;  %v443_v29 = vsub.s32 0, %v4959_v26  ;;  %v447_v30 = vsub.s32 1, %v4959_v26  ;;  %v451_v31 = vsub.s32 2, %v4959_v26  ;;  %v455_v32 = vsub.s32 3, %v4959_v26 }
  0x10   : > { %v585_v3 = vld [vmem:[%s360_s18] sm:$0xff]  ;;  %v586_v4 = vld [vmem:[%s360_s18 + $0x8] sm:$0xff]  ;;  %v587_v5 = vld [vmem:[%s360_s18 + $0x10] sm:$0xff]  ;;  %v459_v33 = vsub.s32 4, %v4959_v26  ;;  %v463_v34 = vsub.s32 5, %v4959_v26  ;;  %v467_v35 = vsub.s32 6, %v4959_v26  ;;  %v399_v38 = vsub.s32 %v396_v27, %v4959_v26 }
  0x11   : > { %413 = vperm.xlu0 %3801, %v410_v2   ;;  %v588_v6 = vld [vmem:[%s360_s18 + $0x18] sm:$0xff]  ;;  %v589_v7 = vunpack.c.l.bf16 %v585_v3  ;;  %v590_v8 = vunpack.c.h.bf16 %v585_v3  ;;  %v591_v9 = vunpack.c.l.bf16 %v586_v4  ;;  %v592_v10 = vunpack.c.h.bf16 %v586_v4  ;;  %v377_v28 = vld [vmem:[%s355_s21] sm:$0xff]  ;;  %v378_v46 = vld [vmem:[%s355_s21 + $0x8] sm:$0xff]  ;;  %s4874_s11 = smov 18   ;;  %s4875_s12 = smov 42  }
  0x12   : > { %v593_v11 = vunpack.c.l.bf16 %v587_v5  ;;  %v594_v12 = vunpack.c.h.bf16 %v587_v5  ;;  %v595_v13 = vunpack.c.l.bf16 %v588_v6  ;;  %v596_v14 = vunpack.c.h.bf16 %v588_v6  ;;  %v379_v47 = vld [vmem:[%s355_s21 + $0x10] sm:$0xff]  ;;  %v380_v52 = vld [vmem:[%s355_s21 + $0x18] sm:$0xff]  ;;  %s4876_s13 = smov 60   ;;  %s4877_s14 = smov 78  }
  0x13   : > { %v605_v15 = vcombine.low %v589_v7, %v589_v7  ;;  %v606_v16 = vcombine.low %v590_v8, %v590_v8  ;;  %v607_v17 = vcombine.low %v591_v9, %v591_v9  ;;  %v608_v18 = vcombine.low %v592_v10, %v592_v10  ;;  %622 = vst [vmem:[#allocation2] sm:$0xf0] %v589_v7  ;;  %s4878_s16 = smov 127   ;;  %s4879_s17 = smov 1  }
  0x14   : > { %624 = vst [vmem:[#allocation2 + $0x18] sm:$0xf0] %v590_v8  ;;  %626 = vst [vmem:[#allocation2 + $0x68] sm:$0xf0] %v591_v9  ;;  %v609_v19 = vcombine.low %v593_v11, %v593_v11  ;;  %v610_v20 = vcombine.low %v594_v12, %v594_v12  ;;  %v611_v21 = vcombine.low %v595_v13, %v595_v13  ;;  %v471_v36 = vsub.s32 7, %v4959_v26 }
  0x15   : > { %628 = vst [vmem:[#allocation2 + $0x48] sm:$0xf0] %v592_v10  ;;  %v612_v22 = vcombine.low %v596_v14, %v596_v14  ;;  %630 = vst [vmem:[#allocation2 + $0x20] sm:$0xf0] %v593_v11  ;;  %v381_v39 = vunpack.c.l.bf16 %v377_v28  ;;  %v382_v40 = vunpack.c.h.bf16 %v377_v28  ;;  %v4976_v42 = vrot.slane %v375_v37, %v443_v29 }
  0x16   : > { %632 = vst [vmem:[#allocation2 + $0x38] sm:$0xf0] %v594_v12  ;;  %634 = vst [vmem:[#allocation2 + $0x70] sm:$0xf0] %v595_v13  ;;  %v4978_v43 = vrot.slane %v375_v37, %v447_v30  ;;  %v4980_v44 = vrot.slane %v375_v37, %v451_v31  ;;  %v4982_v45 = vrot.slane %v375_v37, %v455_v32  ;;  %v383_v62 = vunpack.c.l.bf16 %v378_v46 }
  0x17   : > { %636 = vst [vmem:[#allocation2 + $0x28] sm:$0xf0] %v596_v14  ;;  %621 = vst [vmem:[#allocation2 + $0x30] sm:$0xf0] %v605_v15  ;;  %v4984_v48 = vrot.slane %v375_v37, %v459_v33  ;;  %v4986_v49 = vrot.slane %v375_v37, %v463_v34  ;;  %v4988_v50 = vrot.slane %v375_v37, %v467_v35  ;;  %v384_v63 = vunpack.c.h.bf16 %v378_v46 }
  0x18   : > { %623 = vst [vmem:[#allocation2 + $0x58] sm:$0xf0] %v606_v16  ;;  %625 = vst [vmem:[#allocation2 + $0x50] sm:$0xf0] %v607_v17  ;;  %v4990_v51 = vrot.slane %v375_v37, %v471_v36  ;;  %v4992_v53 = vrot.slane %v376_v41, %v443_v29  ;;  %v4994_v54 = vrot.slane %v376_v41, %v447_v30  ;;  %v385_v0 = vunpack.c.l.bf16 %v379_v47 }
  0x19   : > { %627 = vst [vmem:[#allocation2 + $0x8] sm:$0xf0] %v608_v18  ;;  %629 = vst [vmem:[#allocation2 + $0x40] sm:$0xf0] %v609_v19  ;;  %v4996_v55 = vrot.slane %v376_v41, %v451_v31  ;;  %v4998_v56 = vrot.slane %v376_v41, %v455_v32  ;;  %v5000_v58 = vrot.slane %v376_v41, %v459_v33  ;;  %v386_v2 = vunpack.c.h.bf16 %v379_v47 }
  0x1a   : > { %631 = vst [vmem:[#allocation2 + $0x10] sm:$0xf0] %v610_v20  ;;  %633 = vst [vmem:[#allocation2 + $0x60] sm:$0xf0] %v611_v21  ;;  %v5002_v59 = vrot.slane %v376_v41, %v463_v34  ;;  %v5004_v60 = vrot.slane %v376_v41, %v467_v35  ;;  %v5006_v61 = vrot.slane %v376_v41, %v471_v36  ;;  %v387_v3 = vunpack.c.l.bf16 %v380_v52 }
  0x1b   : > { %635 = vst [vmem:[#allocation2 + $0x78] sm:$0xf0] %v612_v22  ;;  %8690 = vst [vmem:[#allocation5_spill] sm:$0xff] %v4976_v42  ;;  %v388_v4 = vunpack.c.h.bf16 %v380_v52  ;;  %v521_v5 = vcombine.low %v4976_v42, %v4978_v43  ;;  %v522_v6 = vcombine.low %v4980_v44, %v4982_v45  ;;  %v523_v7 = vcombine.low %v4984_v48, %v4986_v49 }
  0x1c   : > { %8691 = vst [vmem:[#allocation6_spill] sm:$0xff] %v4978_v43  ;;  %8692 = vst [vmem:[#allocation7_spill] sm:$0xff] %v4980_v44  ;;  %v524_v8 = vcombine.low %v4988_v50, %v4990_v51  ;;  %v525_v9 = vcombine.low %v4992_v53, %v4994_v54  ;;  %v526_v12 = vcombine.low %v4996_v55, %v4998_v56 }
  0x1d   : > { %8693 = vst [vmem:[#allocation8_spill] sm:$0xff] %v4982_v45  ;;  %8694 = vst [vmem:[#allocation9_spill] sm:$0xff] %v4984_v48  ;;  %v527_v13 = vcombine.low %v5000_v58, %v5002_v59  ;;  %v528_v14 = vcombine.low %v5004_v60, %v5006_v61 }
  0x1e   : > { %8695 = vst [vmem:[#allocation10_spill] sm:$0xff] %v4986_v49  ;;  %8696 = vst [vmem:[#allocation11_spill] sm:$0xff] %v4988_v50 }
  0x1f   : > { %8697 = vst [vmem:[#allocation12_spill] sm:$0xff] %v4990_v51  ;;  %8698 = vst [vmem:[#allocation13_spill] sm:$0xff] %v4992_v53 }
  0x20   : > { %8699 = vst [vmem:[#allocation14_spill] sm:$0xff] %v4994_v54  ;;  %8700 = vst [vmem:[#allocation15_spill] sm:$0xff] %v4996_v55 }
  0x21   : > { %8701 = vst [vmem:[#allocation16_spill] sm:$0xff] %v4998_v56  ;;  %8702 = vst [vmem:[#allocation17_spill] sm:$0xff] %v5000_v58 }
  0x22   : > { %8703 = vst [vmem:[#allocation18_spill] sm:$0xff] %v5002_v59  ;;  %8704 = vst [vmem:[#allocation19_spill] sm:$0xff] %v5004_v60 }
  0x23   : > { %8705 = vst [vmem:[#allocation20_spill] sm:$0xff] %v5006_v61 }
  0x88   : > { %v393_v57 = vpop.permute.xlu0 %392 }
  0x89   : > { %v400_v1 = vrot.slane %v393_v57, %v399_v38 }
  0x8b   : > { %v402_v10 = vmul.f32 %v400_v1, %v381_v39  ;;  %v403_v15 = vmul.f32 %v400_v1, %v382_v40  ;;  %v404_v16 = vmul.f32 %v400_v1, %v383_v62  ;;  %v405_v17 = vmul.f32 %v400_v1, %v384_v63 }
  0x8c   : > { %v414_v11 = vpop.permute.xlu0 %413  ;;  %v406_v19 = vmul.f32 %v400_v1, %v385_v0  ;;  %v407_v20 = vmul.f32 %v400_v1, %v386_v2  ;;  %v408_v21 = vmul.f32 %v400_v1, %v387_v3  ;;  %v409_v22 = vmul.f32 %v400_v1, %v388_v4 }
  0x8d   : > { %v421_v18 = vrot.slane %v414_v11, %v399_v38 }
  0x8f   : > { %v423_v24 = vadd.f32 %v421_v18, %v402_v10  ;;  %v424_v25 = vadd.f32 %v421_v18, %v403_v15  ;;  %v425_v27 = vadd.f32 %v421_v18, %v404_v16  ;;  %v426_v28 = vadd.f32 %v421_v18, %v405_v17 }
  0x90   : > { %v427_v29 = vadd.f32 %v421_v18, %v406_v19  ;;  %v428_v30 = vadd.f32 %v421_v18, %v407_v20  ;;  %v429_v31 = vadd.f32 %v421_v18, %v408_v21  ;;  %v430_v32 = vadd.f32 %v421_v18, %v409_v22 }
  0x91   : > { %v431_v33 = vmax.f32 %v423_v24, 0.0  ;;  %v432_v34 = vmax.f32 %v424_v25, 0.0  ;;  %v433_v35 = vmax.f32 %v425_v27, 0.0  ;;  %v434_v36 = vmax.f32 %v426_v28, 0.0 }
  0x92   : > { %v435_v37 = vmax.f32 %v427_v29, 0.0  ;;  %v436_v39 = vmax.f32 %v428_v30, 0.0  ;;  %v437_v40 = vmax.f32 %v429_v31, 0.0  ;;  %v438_v38 = vmax.f32 %v430_v32, 0.0 }
  0x93   : > { %v537_v41 = vmul.f32 %v521_v5, %v431_v33  ;;  %v538_v46 = vmul.f32 %v522_v6, %v432_v34  ;;  %v539_v47 = vmul.f32 %v523_v7, %v433_v35  ;;  %v540_v52 = vmul.f32 %v524_v8, %v434_v36 }
  0x94   : > { %v541_v57 = vmul.f32 %v525_v9, %v435_v37  ;;  %v542_v62 = vmul.f32 %v526_v12, %v436_v39  ;;  %v543_v63 = vmul.f32 %v527_v13, %v437_v40  ;;  %v544_v0 = vmul.f32 %v528_v14, %v438_v38 }
  0x95   : > { %v553_v1 = vcombine.high %v537_v41, %v537_v41  ;;  %v554_v2 = vcombine.high %v538_v46, %v538_v46  ;;  %v555_v3 = vcombine.high %v539_v47, %v539_v47  ;;  %v556_v4 = vcombine.high %v540_v52, %v540_v52  ;;  %569 = vst [vmem:[#allocation2 + $0x30] sm:$0xf] %v537_v41 }
  0x96   : > { %571 = vst [vmem:[#allocation2 + $0x58] sm:$0xf] %v538_v46  ;;  %573 = vst [vmem:[#allocation2 + $0x50] sm:$0xf] %v539_v47  ;;  %v557_v10 = vcombine.high %v541_v57, %v541_v57  ;;  %v558_v11 = vcombine.high %v542_v62, %v542_v62  ;;  %v559_v15 = vcombine.high %v543_v63, %v543_v63 }
  0x97   : > { %575 = vst [vmem:[#allocation2 + $0x8] sm:$0xf] %v540_v52  ;;  %v560_v16 = vcombine.high %v544_v0, %v544_v0  ;;  %577 = vst [vmem:[#allocation2 + $0x40] sm:$0xf] %v541_v57 }
  0x98   : > { %579 = vst [vmem:[#allocation2 + $0x10] sm:$0xf] %v542_v62  ;;  %581 = vst [vmem:[#allocation2 + $0x60] sm:$0xf] %v543_v63 }
  0x99   : > { %583 = vst [vmem:[#allocation2 + $0x78] sm:$0xf] %v544_v0  ;;  %570 = vst [vmem:[#allocation2] sm:$0xf] %v553_v1 }
  0x9a   : > { %572 = vst [vmem:[#allocation2 + $0x18] sm:$0xf] %v554_v2  ;;  %574 = vst [vmem:[#allocation2 + $0x68] sm:$0xf] %v555_v3 }
  0x9b   : > { %576 = vst [vmem:[#allocation2 + $0x48] sm:$0xf] %v556_v4  ;;  %578 = vst [vmem:[#allocation2 + $0x20] sm:$0xf] %v557_v10  ;;  %v5163_v10 = vand.u32 127, %v397_v23 }
  0x9c   : > { %580 = vst [vmem:[#allocation2 + $0x38] sm:$0xf] %v558_v11  ;;  %582 = vst [vmem:[#allocation2 + $0x70] sm:$0xf] %v559_v15  ;;  %v5028_v7 = vld [vmem:[#allocation2 + $0x30] sm:$0xff] }
  0x9d   : > { %584 = vst [vmem:[#allocation2 + $0x28] sm:$0xf] %v560_v16  ;;  %v5024_v5 = vld [vmem:[#allocation2 + $0x50] sm:$0xff]  ;;  %v5048_v18 = vld [vmem:[#allocation2 + $0x58] sm:$0xff]  ;;  %vm687_vm0 = vcmp.lt.s32.totalorder %v5163_v10, 86  ;;  %vm1075_vm1 = vcmp.lt.s32.totalorder %v5163_v10, 50 }
  0x9e   : > { %v5046_v17 = vld [vmem:[#allocation2 + $0x40] sm:$0xff]  ;;  %v5061_v25 = vld [vmem:[#allocation2 + $0x8] sm:$0xff]  ;;  %vm882_vm2 = vcmp.lt.s32.totalorder %v5163_v10, 68  ;;  %vm1605_vm3 = vcmp.lt.s32.totalorder %v5163_v10, 110  ;;  %vm1268_vm4 = vcmp.lt.s32.totalorder %v5163_v10, 18  ;;  %vm2184_vm5 = vcmp.lt.s32.totalorder %v5163_v10, 42 }
  0x9f   : > { %v5059_v24 = vld [vmem:[#allocation2 + $0x60] sm:$0xff]  ;;  %v5071_v30 = vld [vmem:[#allocation2 + $0x10] sm:$0xff]  ;;  %vm1991_vm6 = vcmp.lt.s32.totalorder %v5163_v10, 60  ;;  %vm1798_vm7 = vcmp.lt.s32.totalorder %v5163_v10, 78  ;;  %vm736_vm9 = vcmp.lt.s32.totalorder %v5163_v10, 1  ;;  %vm817_vm10 = vcmp.lt.s32.totalorder %v5163_v10, 127 }
  0xa0   : > { %v5030_v8 = vld [vmem:[#allocation2] sm:$0xff]  ;;  %v651_v33 = vld [vmem:[#allocation2 + $0x78] sm:$0xff] }
  0xa1   : > { %v5026_v6 = vld [vmem:[#allocation2 + $0x68] sm:$0xff]  ;;  %v5038_v12 = vpack.i.bf16 %v5030_v8, %v5028_v7  ;;  %v5042_v14 = vld [vmem:[#allocation2 + $0x18] sm:$0xff]  ;;  %v3972_v39 = vpack.i.bf16 %v5046_v17, %v5030_v8  ;;  %v4022_v38 = vpack.i.bf16 %v5048_v18, %v5030_v8 }
  0xa2   : > { %v5034_v9 = vpack.i.bf16 %v5026_v6, %v5024_v5  ;;  %v5040_v13 = vld [vmem:[#allocation2 + $0x20] sm:$0xff]  ;;  %v3807_v20 = vpack.i.bf16 %v5042_v14, %v5048_v18  ;;  %v5056_v22 = vld [vmem:[#allocation2 + $0x48] sm:$0xff]  ;;  %v3932_v35 = vpack.i.bf16 %v5024_v5, %v5042_v14  ;;  %v3952_v37 = vpack.i.bf16 %v5026_v6, %v651_v33 }
  0xa3   : > { %3803 = vrot.lane.b32.xlu1 %v5038_v12, %s4870_s26  ;;  %v5052_v19 = vpack.i.bf16 %v5040_v13, %v5046_v17  ;;  %v650_v21 = vld [vmem:[#allocation2 + $0x70] sm:$0xff]  ;;  %v5066_v28 = vpack.i.bf16 %v5056_v22, %v5061_v25  ;;  %v5068_v29 = vld [vmem:[#allocation2 + $0x38] sm:$0xff]  ;;  %v3982_v40 = vpack.i.bf16 %v5048_v18, %v5026_v6  ;;  %v4027_v41 = vpack.i.bf16 %v5042_v14, %v5028_v7 }
  0xa4   : > { %3813 = vrot.lane.b32.xlu0 %v5034_v9, %s4870_s26  ;;  %v3832_v27 = vpack.i.bf16 %v650_v21, %v5059_v24  ;;  %v5075_v31 = vpack.i.bf16 %v5068_v29, %v5071_v30  ;;  %v5077_v32 = vld [vmem:[#allocation2 + $0x28] sm:$0xff]  ;;  %v4017_v46 = vpack.i.bf16 %v5061_v25, %v5026_v6  ;;  %v4032_v47 = vpack.i.bf16 %v5046_v17, %v5056_v22 }
  0xa5   : > { %v3837_v34 = vpack.i.bf16 %v5077_v32, %v651_v33  ;;  %v3942_v36 = vpack.i.bf16 %v5077_v32, %v5048_v18  ;;  %v4047_v52 = vpack.i.bf16 %v5048_v18, %v5077_v32  ;;  %v4067_v57 = vpack.i.bf16 %v5071_v30, %v5040_v13 }
  0xa6   : > { %v4077_v62 = vpack.i.bf16 %v5059_v24, %v5068_v29 }
  0xa7   : > { %3808 = vrot.lane.b32.xlu1 %v3807_v20, %s4870_s26 }
  0xa8   : > { %3823 = vrot.lane.b32.xlu0 %v5052_v19, %s4870_s26 }
  0xab   : > { %3818 = vrot.lane.b32.xlu1 %v5066_v28, %s4870_s26 }
  0xac   : > { %3833 = vrot.lane.b32.xlu0 %v3832_v27, %s4870_s26 }
  0xaf   : > { %3828 = vrot.lane.b32.xlu1 %v5075_v31, %s4870_s26 }
  0xb0   : > { %3843 = vrot.lane.b32.xlu0 %v5038_v12, %s4871_s27 }
  0xb3   : > { %3838 = vrot.lane.b32.xlu1 %v3837_v34, %s4870_s26 }
  0xb4   : > { %3853 = vrot.lane.b32.xlu0 %v5034_v9, %s4871_s27 }
  0xb7   : > { %3848 = vrot.lane.b32.xlu1 %v3807_v20, %s4871_s27 }
  0xb8   : > { %3863 = vrot.lane.b32.xlu0 %v5052_v19, %s4871_s27 }
  0xbb   : > { %3858 = vrot.lane.b32.xlu1 %v5066_v28, %s4871_s27 }
  0xbc   : > { %3873 = vrot.lane.b32.xlu0 %v3832_v27, %s4871_s27 }
  0xbf   : > { %3868 = vrot.lane.b32.xlu1 %v5075_v31, %s4871_s27 }
  0xc0   : > { %3883 = vrot.lane.b32.xlu0 %v5038_v12, %s4872_s28 }
  0xc3   : > { %3878 = vrot.lane.b32.xlu1 %v3837_v34, %s4871_s27 }
  0xc4   : > { %3893 = vrot.lane.b32.xlu0 %v5034_v9, %s4872_s28 }
  0xc7   : > { %3888 = vrot.lane.b32.xlu1 %v3807_v20, %s4872_s28 }
  0xc8   : > { %3903 = vrot.lane.b32.xlu0 %v5052_v19, %s4872_s28 }
  0xcb   : > { %3898 = vrot.lane.b32.xlu1 %v5066_v28, %s4872_s28 }
  0xcc   : > { %3913 = vrot.lane.b32.xlu0 %v3832_v27, %s4872_s28 }
  0xcf   : > { %3908 = vrot.lane.b32.xlu1 %v5075_v31, %s4872_s28 }
  0xd0   : > { %3923 = vrot.lane.b32.xlu0 %v5038_v12, %s4873_s29 }
  0xd3   : > { %3918 = vrot.lane.b32.xlu1 %v3837_v34, %s4872_s28  ;;  %s8328_s28 = scalar_lea.vmem %s8411_s7, %s4948_s15  ;;  %s3748_s15 = sshll.u32 %s9303_s10, 2 }
  0xd4   : > { %3933 = vrot.lane.b32.xlu0 %v3932_v35, %s4873_s29 }
  0xd7   : > { %3928 = vrot.lane.b32.xlu1 %v3942_v36, %s4873_s29 }
  0xd8   : > { %3943 = vrot.lane.b32.xlu0 %v3942_v36, %s4874_s11 }
  0xdb   : > { %3938 = vrot.lane.b32.xlu1 %v5038_v12, %s4874_s11 }
  0xdc   : > { %3953 = vrot.lane.b32.xlu0 %v3952_v37, %s4874_s11 }
  0xdf   : > { %3948 = vrot.lane.b32.xlu1 %v3932_v35, %s4874_s11 }
  0xe0   : > { %3963 = vrot.lane.b32.xlu0 %v5034_v9, %s4875_s12 }
  0xe3   : > { %3958 = vrot.lane.b32.xlu1 %v3807_v20, %s4875_s12 }
  0xe4   : > { %3973 = vrot.lane.b32.xlu0 %v3972_v39, %s4875_s12 }
  0xe7   : > { %3968 = vrot.lane.b32.xlu1 %v5066_v28, %s4875_s12 }
  0xe8   : > { %3983 = vrot.lane.b32.xlu0 %v3982_v40, %s4876_s13 }
  0xeb   : > { %3978 = vrot.lane.b32.xlu1 %v3932_v35, %s4876_s13 }
  0xec   : > { %3993 = vrot.lane.b32.xlu0 %v3982_v40, %s4877_s14 }
  0xef   : > { %3988 = vrot.lane.b32.xlu1 %v3932_v35, %s4877_s14 }
  0xf0   : > { %4003 = vrot.lane.b32.xlu0 %v3972_v39, %s4876_s13 }
  0xf3   : > { %3998 = vrot.lane.b32.xlu1 %v5066_v28, %s4876_s13 }
  0xf4   : > { %4013 = vrot.lane.b32.xlu0 %v3972_v39, %s4877_s14 }
  0xf7   : > { %4008 = vrot.lane.b32.xlu1 %v5066_v28, %s4877_s14 }
  0xf8   : > { %4023 = vrot.lane.b32.xlu0 %v4022_v38, %s4878_s16 }
  0xfb   : > { %4018 = vrot.lane.b32.xlu1 %v4017_v46, %s4873_s29 }
  0xfc   : > { %4028 = vrot.lane.b32.xlu0 %v4027_v41, %s4878_s16 }
  0xff   : > { %4033 = vrot.lane.b32.xlu1 %v4032_v47, %s4873_s29 }
 0x100   : > { %4038 = vrot.lane.b32.xlu0 %v5038_v12, %s4879_s17 }
 0x103   : > { %4043 = vrot.lane.b32.xlu1 %v5066_v28, %s4874_s11 }
 0x104   : > { %4048 = vrot.lane.b32.xlu0 %v4047_v52, %s4879_s17 }
 0x107   : > { %4053 = vrot.lane.b32.xlu1 %v5052_v19, %s4874_s11 }
 0x108   : > { %4068 = vrot.lane.b32.xlu0 %v4067_v57, %s4876_s13 }
 0x10b   : > { %4058 = vrot.lane.b32.xlu1 %v4067_v57, %s4875_s12 }
 0x10c   : > { %4078 = vrot.lane.b32.xlu0 %v4077_v62, %s4876_s13 }
 0x10f   : > { %4063 = vrot.lane.b32.xlu1 %v4077_v62, %s4875_s12 }
 0x110   : > { %4088 = vrot.lane.b32.xlu0 %v4067_v57, %s4873_s29 }
 0x113   : > { %4073 = vrot.lane.b32.xlu1 %v4067_v57, %s4877_s14 }
 0x114   : > { %4098 = vrot.lane.b32.xlu0 %v5034_v9, %s4879_s17 }
 0x115   : > { %v3804_v0 = vpop.permute.xlu1 %3803 }
 0x116   : > { %v3814_v63 = vpop.permute.xlu0 %3813  ;;  %v3806_v16 = vunpack.i.h.bf16 %v3804_v0  ;;  %v3805_v7 = vunpack.i.l.bf16 %v3804_v0 }
 0x117   : > { %4083 = vrot.lane.b32.xlu1 %v4077_v62, %s4877_s14  ;;  %v3816_v21 = vunpack.i.h.bf16 %v3814_v63  ;;  %v3815_v24 = vunpack.i.l.bf16 %v3814_v63 }
 0x118   : > { %v5180_v28 = vsel %vm687_vm0, %v3805_v7, %v3806_v16 }
 0x119   : > { %v3809_v2 = vpop.permute.xlu1 %3808  ;;  %8708 = vst [vmem:[#allocation23_spill] sm:$0xff] %v5180_v28  ;;  %v5210_v41 = vsel %vm687_vm0, %v3815_v24, %v3816_v21 }
 0x11a   : > { %v3824_v1 = vpop.permute.xlu0 %3823  ;;  %v3811_v8 = vunpack.i.h.bf16 %v3809_v2  ;;  %v3810_v13 = vunpack.i.l.bf16 %v3809_v2  ;;  %8713 = vst [vmem:[#allocation28_spill] sm:$0xff] %v5210_v41 }
 0x11b   : > { %4093 = vrot.lane.b32.xlu1 %v4077_v62, %s4873_s29  ;;  %v3826_v40 = vunpack.i.h.bf16 %v3824_v1  ;;  %v3825_v38 = vunpack.i.l.bf16 %v3824_v1 }
 0x11c   : > { %v5196_v36 = vsel %vm687_vm0, %v3810_v13, %v3811_v8  ;;  %v5200_v37 = vsel %vm687_vm0, %v3806_v16, %v3810_v13  ;;  %v5204_v39 = vsel %vm687_vm0, %v3811_v8, %v3815_v24 }
 0x11d   : > { %v3819_v4 = vpop.permute.xlu1 %3818  ;;  %8710 = vst [vmem:[#allocation25_spill] sm:$0xff] %v5196_v36  ;;  %8711 = vst [vmem:[#allocation26_spill] sm:$0xff] %v5200_v37  ;;  %v4117_v52 = vpack.i.bf16 %v5196_v36, %v5200_v37  ;;  %v4122_v57 = vpack.i.bf16 %v5210_v41, %v5204_v39  ;;  %v5236_v16 = vsel %vm687_vm0, %v3825_v38, %v3826_v40 }
 0x11e   : > { %v3834_v3 = vpop.permute.xlu0 %3833  ;;  %v3821_v30 = vunpack.i.h.bf16 %v3819_v4  ;;  %8712 = vst [vmem:[#allocation27_spill] sm:$0xff] %v5204_v39  ;;  %8717 = vst [vmem:[#allocation32_spill] sm:$0xff] %v5236_v16 }
 0x11f   : > { %4103 = vrot.lane.b32.xlu1 %v5075_v31, %s4874_s11  ;;  %v3836_v18 = vunpack.i.h.bf16 %v3834_v3  ;;  %v3820_v31 = vunpack.i.l.bf16 %v3819_v4  ;;  %v3835_v4 = vunpack.i.l.bf16 %v3834_v3 }
 0x120   : > { %v5230_v2 = vsel %vm687_vm0, %v3821_v30, %v3825_v38 }
 0x121   : > { %v3829_v15 = vpop.permute.xlu1 %3828  ;;  %v5222_v62 = vsel %vm687_vm0, %v3820_v31, %v3821_v30  ;;  %v5226_v1 = vsel %vm687_vm0, %v3816_v21, %v3820_v31  ;;  %8716 = vst [vmem:[#allocation31_spill] sm:$0xff] %v5230_v2 }
 0x122   : > { %v5165_v11 = vpop.permute.xlu0 %3843  ;;  %8714 = vst [vmem:[#allocation29_spill] sm:$0xff] %v5222_v62  ;;  %v3831_v63 = vunpack.i.h.bf16 %v3829_v15  ;;  %v3830_v0 = vunpack.i.l.bf16 %v3829_v15  ;;  %8715 = vst [vmem:[#allocation30_spill] sm:$0xff] %v5226_v1  ;;  %v4127_v8 = vpack.i.bf16 %v5222_v62, %v5226_v1 }
 0x124   : > { %v5248_v13 = vsel %vm687_vm0, %v3830_v0, %v3831_v63  ;;  %v5252_v3 = vsel %vm687_vm0, %v3826_v40, %v3830_v0 }
 0x125   : > { %v3839_v12 = vpop.permute.xlu1 %3838  ;;  %8718 = vst [vmem:[#allocation33_spill] sm:$0xff] %v5248_v13  ;;  %8719 = vst [vmem:[#allocation34_spill] sm:$0xff] %v5252_v3  ;;  %v4137_v30 = vpack.i.bf16 %v5248_v13, %v5252_v3 }
 0x126   : > { %v5167_v9 = vpop.permute.xlu0 %3853  ;;  %v3841_v19 = vunpack.i.h.bf16 %v3839_v12  ;;  %v3840_v20 = vunpack.i.l.bf16 %v3839_v12  ;;  %v4132_v12 = vpack.i.bf16 %v5236_v16, %v5230_v2 }
 0x128   : > { %v5172_v23 = vsel %vm687_vm0, %v3840_v20, %v3841_v19  ;;  %v5176_v27 = vsel %vm687_vm0, %v3836_v18, %v3840_v20  ;;  %v5184_v29 = vsel %vm687_vm0, %v3841_v19, %v3805_v7  ;;  %v5256_v19 = vsel %vm687_vm0, %v3831_v63, %v3835_v4 }
 0x129   : > { %8706 = vst [vmem:[#allocation21_spill] sm:$0xff] %v5172_v23  ;;  %8707 = vst [vmem:[#allocation22_spill] sm:$0xff] %v5176_v27  ;;  %v5188_v33 = vpop.permute.xlu1 %3848  ;;  %v4107_v34 = vpack.i.bf16 %v5172_v23, %v5176_v27  ;;  %v4112_v35 = vpack.i.bf16 %v5180_v28, %v5184_v29  ;;  %v5262_v20 = vsel %vm687_vm0, %v3835_v4, %v3836_v18 }
 0x12a   : > { %8709 = vst [vmem:[#allocation24_spill] sm:$0xff] %v5184_v29  ;;  %v5186_v32 = vpop.permute.xlu0 %3863  ;;  %8720 = vst [vmem:[#allocation35_spill] sm:$0xff] %v5256_v19  ;;  %v4142_v31 = vpack.i.bf16 %v5262_v20, %v5256_v19  ;;  %v3851_v56 = vunpack.i.h.bf16 %v5188_v33 }
 0x12b   : > { %4108 = vrot.lane.b32.xlu0 %v4107_v34, %s4879_s17  ;;  %4113 = vrot.lane.b32.xlu1 %v4112_v35, %s4879_s17  ;;  %8721 = vst [vmem:[#allocation36_spill] sm:$0xff] %v5262_v20  ;;  %v3866_v49 = vunpack.i.h.bf16 %v5186_v32  ;;  %v3865_v48 = vunpack.i.l.bf16 %v5186_v32 }
 0x12d   : > { %v5214_v47 = vpop.permute.xlu1 %3858  ;;  %v5398_v20 = vsel %vm882_vm2, %v3865_v48, %v3866_v49 }
 0x12e   : > { %v5212_v46 = vpop.permute.xlu0 %3873  ;;  %v3861_v51 = vunpack.i.h.bf16 %v5214_v47  ;;  %8738 = vst [vmem:[#allocation53_spill] sm:$0xff] %v5398_v20 }
 0x12f   : > { %4118 = vrot.lane.b32.xlu0 %v4117_v52, %s4879_s17  ;;  %4123 = vrot.lane.b32.xlu1 %v4122_v57, %s4879_s17  ;;  %v3875_v19 = vunpack.i.l.bf16 %v5212_v46 }
 0x130   : > { %v5391_v26 = vsel %vm882_vm2, %v3861_v51, %v3865_v48 }
 0x131   : > { %v5240_v15 = vpop.permute.xlu1 %3868  ;;  %8737 = vst [vmem:[#allocation52_spill] sm:$0xff] %v5391_v26 }
 0x132   : > { %v5238_v7 = vpop.permute.xlu0 %3883  ;;  %v3871_v32 = vunpack.i.h.bf16 %v5240_v15  ;;  %v3870_v42 = vunpack.i.l.bf16 %v5240_v15 }
 0x133   : > { %4128 = vrot.lane.b32.xlu0 %v4127_v8, %s4879_s17  ;;  %4133 = vrot.lane.b32.xlu1 %v4132_v12, %s4879_s17 }
 0x134   : > { %v5418_v48 = vsel %vm882_vm2, %v3871_v32, %v3875_v19 }
 0x135   : > { %v3879_v24 = vpop.permute.xlu1 %3878  ;;  %8741 = vst [vmem:[#allocation56_spill] sm:$0xff] %v5418_v48 }
 0x136   : > { %v5264_v21 = vpop.permute.xlu0 %3893  ;;  %v3880_v59 = vunpack.i.l.bf16 %v3879_v24 }
 0x137   : > { %v8416_v40 = vunpack.i.h.bf16 %v5264_v21  ;;  %v8417_v38 = vunpack.i.l.bf16 %v5264_v21  ;;  %4138 = vrot.lane.b32.xlu0 %v4137_v30, %s4879_s17  ;;  %4143 = vrot.lane.b32.xlu1 %v4142_v31, %s4879_s17  ;;  %v8753_v39 = vunpack.i.l.bf16 %v5264_v21 }
 0x139   : > { %v5281_v18 = vsel %vm1075_vm1, %v8417_v38, %v8416_v40  ;;  %v5285_v0 = vpop.permute.xlu1 %3888  ;;  %v3881_v38 = vunpack.i.h.bf16 %v3879_v24 }
 0x13a   : > { %8722 = vst [vmem:[#allocation37_spill] sm:$0xff] %v5281_v18  ;;  %v5283_v63 = vpop.permute.xlu0 %3903 }
 0x13b   : > { %4148 = vrot.lane.b32.xlu0 %v4107_v34, %s4878_s16  ;;  %4153 = vrot.lane.b32.xlu1 %v4112_v35, %s4878_s16  ;;  %v3846_v35 = vunpack.i.h.bf16 %v5165_v11 }
 0x13d   : > { %v5291_v61 = vpop.permute.xlu1 %3898 }
 0x13e   : > { %v5289_v4 = vpop.permute.xlu0 %3913 }
 0x13f   : > { %4158 = vrot.lane.b32.xlu0 %v4117_v52, %s4878_s16  ;;  %4163 = vrot.lane.b32.xlu1 %v4122_v57, %s4878_s16  ;;  %v8424_v58 = vunpack.i.l.bf16 %v5289_v4  ;;  %v3845_v52 = vunpack.i.l.bf16 %v5165_v11  ;;  %v3876_v57 = vunpack.i.h.bf16 %v5212_v46  ;;  %v3850_v11 = vunpack.i.l.bf16 %v5188_v33 }
 0x140   : > { %v3855_v33 = vunpack.i.l.bf16 %v5167_v9  ;;  %v5414_v46 = vsel %vm882_vm2, %v3866_v49, %v3870_v42 }
 0x141   : > { %v5297_v40 = vpop.permute.xlu1 %3908  ;;  %v5327_v53 = vsel %vm882_vm2, %v3876_v57, %v3880_v59  ;;  %v5339_v54 = vsel %vm882_vm2, %v3845_v52, %v3846_v35  ;;  %8740 = vst [vmem:[#allocation55_spill] sm:$0xff] %v5414_v46  ;;  %v5424_v13 = vsel %vm882_vm2, %v3875_v19, %v3876_v57 }
 0x142   : > { %v5295_v60 = vpop.permute.xlu0 %3923  ;;  %8723 = vst [vmem:[#allocation38_spill] sm:$0xff] %v5297_v40  ;;  %v8423_v34 = vunpack.i.h.bf16 %v5297_v40  ;;  %8726 = vst [vmem:[#allocation41_spill] sm:$0xff] %v5327_v53  ;;  %v4222_v49 = vpack.i.bf16 %v5424_v13, %v5418_v48 }
 0x143   : > { %4168 = vrot.lane.b32.xlu0 %v4127_v8, %s4878_s16  ;;  %4173 = vrot.lane.b32.xlu1 %v4132_v12, %s4878_s16  ;;  %v5323_v12 = vsel %vm882_vm2, %v3880_v59, %v3881_v38  ;;  %8728 = vst [vmem:[#allocation43_spill] sm:$0xff] %v5339_v54  ;;  %v3860_v59 = vunpack.i.l.bf16 %v5214_v47  ;;  %v5361_v47 = vsel %vm882_vm2, %v3851_v56, %v3855_v33  ;;  %8742 = vst [vmem:[#allocation57_spill] sm:$0xff] %v5424_v13 }
 0x144   : > { %v5312_v24 = vsel %vm1075_vm1, %v8423_v34, %v8424_v58  ;;  %8725 = vst [vmem:[#allocation40_spill] sm:$0xff] %v5323_v12  ;;  %v5331_v34 = vsel %vm882_vm2, %v3881_v38, %v3845_v52  ;;  %v3856_v58 = vunpack.i.h.bf16 %v5167_v9  ;;  %v5353_v9 = vsel %vm882_vm2, %v3850_v11, %v3851_v56  ;;  %8732 = vst [vmem:[#allocation47_spill] sm:$0xff] %v5361_v47 }
 0x145   : > { %8724 = vst [vmem:[#allocation39_spill] sm:$0xff] %v5312_v24  ;;  %v5317_v8 = vpop.permute.xlu1 %3918  ;;  %8727 = vst [vmem:[#allocation42_spill] sm:$0xff] %v5331_v34  ;;  %v5357_v52 = vsel %vm882_vm2, %v3846_v35, %v3850_v11  ;;  %v5381_v43 = vsel %vm882_vm2, %v3860_v59, %v3861_v51  ;;  %v4212_v51 = vpack.i.bf16 %v5398_v20, %v5391_v26  ;;  %v3890_v20 = vunpack.i.l.bf16 %v5285_v0 }
 0x146   : > { %v5315_v55 = vpop.permute.xlu0 %3933  ;;  %8730 = vst [vmem:[#allocation45_spill] sm:$0xff] %v5353_v9  ;;  %8731 = vst [vmem:[#allocation46_spill] sm:$0xff] %v5357_v52  ;;  %v5369_v45 = vsel %vm882_vm2, %v3855_v33, %v3856_v58  ;;  %v4197_v56 = vpack.i.bf16 %v5353_v9, %v5357_v52  ;;  %v5387_v33 = vsel %vm882_vm2, %v3856_v58, %v3860_v59  ;;  %v3921_v13 = vunpack.i.h.bf16 %v5317_v8 }
 0x147   : > { %4178 = vrot.lane.b32.xlu0 %v4137_v30, %s4878_s16  ;;  %4183 = vrot.lane.b32.xlu1 %v4142_v31, %s4878_s16  ;;  %v4187_v30 = vpack.i.bf16 %v5323_v12, %v5327_v53  ;;  %v4192_v31 = vpack.i.bf16 %v5339_v54, %v5331_v34  ;;  %8733 = vst [vmem:[#allocation48_spill] sm:$0xff] %v5369_v45  ;;  %8735 = vst [vmem:[#allocation50_spill] sm:$0xff] %v5381_v43  ;;  %v3926_v1 = vunpack.i.h.bf16 %v5295_v60 }
 0x148   : > { %v4202_v11 = vpack.i.bf16 %v5369_v45, %v5361_v47  ;;  %8736 = vst [vmem:[#allocation51_spill] sm:$0xff] %v5387_v33  ;;  %v4207_v58 = vpack.i.bf16 %v5381_v43, %v5387_v33  ;;  %v5410_v59 = vsel %vm882_vm2, %v3870_v42, %v3871_v32  ;;  %v3935_v24 = vunpack.i.l.bf16 %v5315_v55 }
 0x149   : > { %v5345_v38 = vpop.permute.xlu1 %3928  ;;  %8739 = vst [vmem:[#allocation54_spill] sm:$0xff] %v5410_v59  ;;  %v4217_v42 = vpack.i.bf16 %v5410_v59, %v5414_v46  ;;  %v3920_v46 = vunpack.i.l.bf16 %v5317_v8  ;;  %v3925_v8 = vunpack.i.l.bf16 %v5295_v60 }
 0x14a   : > { %v5343_v50 = vpop.permute.xlu0 %3943  ;;  %8729 = vst [vmem:[#allocation44_spill] sm:$0xff] %v5345_v38 }
 0x14b   : > { %4188 = vrot.lane.b32.xlu0 %v4187_v30, %s4879_s17  ;;  %4193 = vrot.lane.b32.xlu1 %v4192_v31, %s4879_s17 }
 0x14d   : > { %v5373_v35 = vpop.permute.xlu1 %3938 }
 0x14e   : > { %v5371_v44 = vpop.permute.xlu0 %3953 }
 0x14f   : > { %8734 = vst [vmem:[#allocation49_spill] sm:$0xff] %v5371_v44  ;;  %4198 = vrot.lane.b32.xlu0 %v4197_v56, %s4879_s17  ;;  %4203 = vrot.lane.b32.xlu1 %v4202_v11, %s4879_s17 }
 0x151   : > { %v5402_v15 = vpop.permute.xlu1 %3948 }
 0x152   : > { %v5400_v3 = vpop.permute.xlu0 %3963 }
 0x153   : > { %4208 = vrot.lane.b32.xlu0 %v4207_v58, %s4879_s17  ;;  %4213 = vrot.lane.b32.xlu1 %v4212_v51, %s4879_s17  ;;  %v3965_v23 = vunpack.i.l.bf16 %v5400_v3  ;;  %v3966_v34 = vunpack.i.h.bf16 %v5400_v3 }
 0x155   : > { %v5428_v16 = vpop.permute.xlu1 %3958 }
 0x156   : > { %v5426_v2 = vpop.permute.xlu0 %3973 }
 0x157   : > { %8743 = vst [vmem:[#allocation58_spill] sm:$0xff] %v5426_v2  ;;  %4218 = vrot.lane.b32.xlu0 %v4217_v42, %s4879_s17  ;;  %4223 = vrot.lane.b32.xlu1 %v4222_v49, %s4879_s17 }
 0x159   : > { %v5438_v26 = vpop.permute.xlu1 %3968 }
 0x15a   : > { %v5436_v32 = vpop.permute.xlu0 %3983  ;;  %v3970_v27 = vunpack.i.l.bf16 %v5438_v26 }
 0x15b   : > { %4228 = vrot.lane.b32.xlu0 %v4187_v30, %s4878_s16  ;;  %4233 = vrot.lane.b32.xlu1 %v4192_v31, %s4878_s16  ;;  %v3886_v30 = vunpack.i.h.bf16 %v5238_v7  ;;  %v3885_v31 = vunpack.i.l.bf16 %v5238_v7  ;;  %v3986_v12 = vunpack.i.h.bf16 %v5436_v32 }
 0x15c   : > { %v5666_v3 = vsel %vm2184_vm5, %v3966_v34, %v3970_v27 }
 0x15d   : > { %v5444_v57 = vpop.permute.xlu1 %3978  ;;  %v5484_v60 = vsel %vm1075_vm1, %v3885_v31, %v3886_v30  ;;  %8774 = vst [vmem:[#allocation83_spill] sm:$0xff] %v5666_v3 }
 0x15e   : > { %v5442_v19 = vpop.permute.xlu0 %3993  ;;  %8748 = vst [vmem:[#allocation63_spill] sm:$0xff] %v5484_v60 }
 0x15f   : > { %4238 = vrot.lane.b32.xlu0 %v4197_v56, %s4878_s16  ;;  %4243 = vrot.lane.b32.xlu1 %v4202_v11, %s4878_s16  ;;  %v8450_v56 = vunpack.i.h.bf16 %v5289_v4  ;;  %v3891_v11 = vunpack.i.h.bf16 %v5285_v0  ;;  %v5506_v0 = vsel %vm1605_vm3, %v3925_v8, %v3926_v1 }
 0x160   : > { %8752 = vst [vmem:[#allocation67_spill] sm:$0xff] %v5506_v0 }
 0x161   : > { %v5448_v48 = vpop.permute.xlu1 %3988  ;;  %v5473_v7 = vsel %vm1075_vm1, %v8450_v56, %v3920_v46 }
 0x162   : > { %v5452_v59 = vpop.permute.xlu0 %4003  ;;  %8746 = vst [vmem:[#allocation61_spill] sm:$0xff] %v5473_v7  ;;  %v4327_v28 = vpack.i.bf16 %v5484_v60, %v5473_v7  ;;  %v3990_v53 = vunpack.i.l.bf16 %v5448_v48 }
 0x163   : > { %8744 = vst [vmem:[#allocation59_spill] sm:$0xff] %v5452_v59  ;;  %4248 = vrot.lane.b32.xlu0 %v4207_v58, %s4878_s16  ;;  %4253 = vrot.lane.b32.xlu1 %v4212_v51, %s4878_s16  ;;  %v5467_v58 = vsel %vm1075_vm1, %v3920_v46, %v3921_v13  ;;  %v5477_v51 = vsel %vm1075_vm1, %v3921_v13, %v3885_v31  ;;  %v3930_v31 = vunpack.i.l.bf16 %v5345_v38 }
 0x164   : > { %8745 = vst [vmem:[#allocation60_spill] sm:$0xff] %v5467_v58  ;;  %8747 = vst [vmem:[#allocation62_spill] sm:$0xff] %v5477_v51  ;;  %v4267_v13 = vpack.i.bf16 %v5467_v58, %v5473_v7  ;;  %v4272_v56 = vpack.i.bf16 %v5484_v60, %v5477_v51 }
 0x165   : > { %v5462_v62 = vpop.permute.xlu1 %3998  ;;  %v5532_v43 = vsel %vm1605_vm3, %v3930_v31, %v3935_v24 }
 0x166   : > { %v5487_v33 = vpop.permute.xlu0 %4013  ;;  %8757 = vst [vmem:[#allocation70_spill] sm:$0xff] %v5532_v43 }
 0x167   : > { %4258 = vrot.lane.b32.xlu0 %v4217_v42, %s4878_s16  ;;  %4263 = vrot.lane.b32.xlu1 %v4222_v49, %s4878_s16  ;;  %8749 = vst [vmem:[#allocation64_spill] sm:$0xff] %v5487_v33  ;;  %v5497_v42 = vsel %vm1075_vm1, %v3890_v20, %v3891_v11  ;;  %v5501_v49 = vsel %vm1075_vm1, %v3886_v30, %v3890_v20  ;;  %v8755_v30 = vunpack.i.h.bf16 %v5345_v38  ;;  %v8759_v38 = vunpack.i.h.bf16 %v5315_v55 }
 0x168   : > { %8750 = vst [vmem:[#allocation65_spill] sm:$0xff] %v5497_v42  ;;  %8751 = vst [vmem:[#allocation66_spill] sm:$0xff] %v5501_v49  ;;  %v5516_v20 = vsel %vm1075_vm1, %v3891_v11, %v8753_v39  ;;  %v5536_v39 = vsel %vm1605_vm3, %v3926_v1, %v3930_v31  ;;  %v3941_v11 = vunpack.i.h.bf16 %v5373_v35  ;;  %v3946_v1 = vunpack.i.h.bf16 %v5343_v50 }
 0x169   : > { %v5489_v46 = vpop.permute.xlu1 %4008  ;;  %8754 = vst [vmem:[#allocation68_spill] sm:$0xff] %v5516_v20  ;;  %v5522_v47 = vsel %vm1605_vm3, %v8755_v30, %v3925_v8  ;;  %8758 = vst [vmem:[#allocation71_spill] sm:$0xff] %v5536_v39  ;;  %v3940_v8 = vunpack.i.l.bf16 %v5373_v35  ;;  %v5549_v37 = vsel %vm1605_vm3, %v3935_v24, %v8759_v38  ;;  %v3945_v24 = vunpack.i.l.bf16 %v5343_v50 }
 0x16a   : > { %8756 = vst [vmem:[#allocation69_spill] sm:$0xff] %v5522_v47  ;;  %v5541_v30 = vpop.permute.xlu0 %4023  ;;  %8760 = vst [vmem:[#allocation72_spill] sm:$0xff] %v5549_v37  ;;  %v4297_v35 = vpack.i.bf16 %v5549_v37, %v5532_v43  ;;  %v4287_v36 = vpack.i.bf16 %v5522_v47, %v5536_v39  ;;  %v8464_v38 = vunpack.i.l.bf16 %v5371_v44  ;;  %v3950_v50 = vunpack.i.l.bf16 %v5402_v15 }
 0x16b   : > { %4268 = vrot.lane.b32.xlu0 %v4267_v13, %s4879_s17  ;;  %4273 = vrot.lane.b32.xlu1 %v4272_v56, %s4879_s17  ;;  %v4282_v56 = vpack.i.bf16 %v5506_v0, %v5516_v20  ;;  %v4277_v13 = vpack.i.bf16 %v5497_v42, %v5501_v49 }
 0x16d   : > { %v5524_v41 = vpop.permute.xlu1 %4018 }
 0x16e   : > { %v5570_v45 = vpop.permute.xlu0 %4028 }
 0x16f   : > { %4283 = vrot.lane.b32.xlu0 %v4282_v56, %s4879_s17  ;;  %4278 = vrot.lane.b32.xlu1 %v4277_v13, %s4879_s17  ;;  %v5560_v56 = vsel %vm1268_vm4, %v3940_v8, %v3941_v11  ;;  %v5564_v13 = vsel %vm1268_vm4, %v3946_v1, %v3940_v8  ;;  %8761 = vst [vmem:[#allocation73_spill] sm:$0xff] %v5570_v45 }
 0x170   : > { %v4307_v47 = vpack.i.bf16 %v5564_v13, %v5042_v14  ;;  %v4292_v9 = vpack.i.bf16 %v5560_v56, %v5024_v5  ;;  %v5580_v8 = vsel %vm1268_vm4, %v3941_v11, %v3945_v24  ;;  %v5590_v14 = vsel %vm1268_vm4, %v8464_v38, %v3946_v1 }
 0x171   : > { %v5552_v31 = vpop.permute.xlu1 %4033  ;;  %8762 = vst [vmem:[#allocation74_spill] sm:$0xff] %v5580_v8  ;;  %8763 = vst [vmem:[#allocation75_spill] sm:$0xff] %v5590_v14  ;;  %v4312_v5 = vpack.i.bf16 %v5477_v51, %v5467_v58  ;;  %v4302_v11 = vpack.i.bf16 %v5564_v13, %v5580_v8  ;;  %v3961_v1 = vunpack.i.h.bf16 %v5428_v16  ;;  %v3960_v38 = vunpack.i.l.bf16 %v5428_v16 }
 0x172   : > { %v5610_v40 = vpop.permute.xlu0 %4038 }
 0x173   : > { %4298 = vrot.lane.b32.xlu0 %v4297_v35, %s4879_s17  ;;  %4288 = vrot.lane.b32.xlu1 %v4287_v36, %s4879_s17  ;;  %v8468_v36 = vunpack.i.h.bf16 %v5402_v15  ;;  %v5652_v54 = vsel %vm2184_vm5, %v3961_v1, %v3965_v23 }
 0x174   : > { %8771 = vst [vmem:[#allocation81_spill] sm:$0xff] %v5652_v54 }
 0x175   : > { %v5572_v52 = vpop.permute.xlu1 %4043 }
 0x176   : > { %v5627_v16 = vpop.permute.xlu0 %4048 }
 0x177   : > { %4308 = vrot.lane.b32.xlu0 %v4307_v47, %s4879_s17  ;;  %4293 = vrot.lane.b32.xlu1 %v4292_v9, %s4878_s16  ;;  %v5602_v47 = vsel %vm1268_vm4, %v3950_v50, %v8468_v36  ;;  %v5606_v9 = vsel %vm1268_vm4, %v3945_v24, %v3950_v50  ;;  %v4317_v24 = vpack.i.bf16 %v5590_v14, %v5560_v56 }
 0x178   : > { %8764 = vst [vmem:[#allocation76_spill] sm:$0xff] %v5602_v47  ;;  %v4322_v36 = vpack.i.bf16 %v5602_v47, %v5606_v9  ;;  %v5623_v50 = vsel %vm2184_vm5, %v3960_v38, %v3961_v1  ;;  %8766 = vst [vmem:[#allocation78_spill] sm:$0xff] %v5627_v16  ;;  %v3980_v1 = vunpack.i.l.bf16 %v5444_v57 }
 0x179   : > { %v5592_v35 = vpop.permute.xlu1 %4053  ;;  %8765 = vst [vmem:[#allocation77_spill] sm:$0xff] %v5623_v50 }
 0x17a   : > { %v5671_v14 = vpop.permute.xlu0 %4068 }
 0x17b   : > { %4313 = vrot.lane.b32.xlu0 %v4312_v5, %s4878_s16  ;;  %4303 = vrot.lane.b32.xlu1 %v4302_v11, %s4878_s16  ;;  %v4332_v11 = vpack.i.bf16 %v5623_v50, %v5501_v49 }
 0x17d   : > { %v5615_v29 = vpop.permute.xlu1 %4058 }
 0x17f   : > { %4323 = vrot.lane.b32.xlu0 %v4322_v36, %s4878_s16  ;;  %4318 = vrot.lane.b32.xlu1 %v4317_v24, %s4879_s17  ;;  %v8768_v36 = vunpack.i.h.bf16 %v5289_v4  ;;  %v8769_v24 = vunpack.i.l.bf16 %v5289_v4  ;;  %v8772_v4 = vunpack.i.h.bf16 %v5438_v26 }
 0x181   : > { %v5629_v5 = vpop.permute.xlu1 %4063  ;;  %v5646_v49 = vsel %vm1075_vm1, %v8769_v24, %v8768_v36  ;;  %v5662_v36 = vsel %vm2184_vm5, %v3970_v27, %v8772_v4  ;;  %v3981_v24 = vunpack.i.h.bf16 %v5444_v57  ;;  %v5679_v4 = vsel %vm2184_vm5, %v3965_v23, %v3966_v34 }
 0x182   : > { %8767 = vst [vmem:[#allocation79_spill] sm:$0xff] %v5629_v5  ;;  %8770 = vst [vmem:[#allocation80_spill] sm:$0xff] %v5646_v49  ;;  %v3985_v27 = vunpack.i.l.bf16 %v5436_v32  ;;  %v4347_v51 = vpack.i.bf16 %v5679_v4, %v5652_v54  ;;  %v3991_v34 = vunpack.i.h.bf16 %v5448_v48 }
 0x183   : > { %4333 = vrot.lane.b32.xlu0 %v4332_v11, %s4878_s16  ;;  %4328 = vrot.lane.b32.xlu1 %v4327_v28, %s4878_s16  ;;  %v4342_v11 = vpack.i.bf16 %v5623_v50, %v5646_v49  ;;  %v4337_v28 = vpack.i.bf16 %v5606_v9, %v5580_v8  ;;  %8773 = vst [vmem:[#allocation82_spill] sm:$0xff] %v5662_v36  ;;  %8775 = vst [vmem:[#allocation84_spill] sm:$0xff] %v5679_v4  ;;  %v8776_v50 = vunpack.i.l.bf16 %v5426_v2 }
 0x184   : > { %v5698_v23 = vsel %vm1991_vm6, %v3980_v1, %v3981_v24  ;;  %v5716_v48 = vsel %vm1798_vm7, %v3990_v53, %v3991_v34 }
 0x185   : > { %v5673_v49 = vpop.permute.xlu1 %4073  ;;  %v5686_v57 = vsel %vm2184_vm5, %v8776_v50, %v3960_v38  ;;  %v5705_v38 = vpop.permute.xlu0 %4078  ;;  %8781 = vst [vmem:[#allocation89_spill] sm:$0xff] %v5716_v48 }
 0x186   : > { %8777 = vst [vmem:[#allocation85_spill] sm:$0xff] %v5686_v57  ;;  %8779 = vst [vmem:[#allocation87_spill] sm:$0xff] %v5705_v38  ;;  %v4352_v60 = vpack.i.bf16 %v5686_v57, %v5652_v54  ;;  %v4367_v57 = vpack.i.bf16 %v5666_v3, %v5679_v4  ;;  %v3995_v54 = vunpack.i.l.bf16 %v5442_v19 }
 0x187   : > { %4343 = vrot.lane.b32.xlu0 %v4342_v11, %s4879_s17  ;;  %4338 = vrot.lane.b32.xlu1 %v4337_v28, %s4879_s17  ;;  %v4357_v11 = vpack.i.bf16 %v5662_v36, %v5666_v3  ;;  %v5694_v28 = vsel %vm1991_vm6, %v3981_v24, %v3985_v27 }
 0x188   : > { %8778 = vst [vmem:[#allocation86_spill] sm:$0xff] %v5694_v28  ;;  %v4362_v24 = vpack.i.bf16 %v5694_v28, %v5698_v23  ;;  %v4397_v3 = vpack.i.bf16 %v5694_v28, %v5716_v48 }
 0x189   : > { %v5707_v50 = vpop.permute.xlu1 %4083 }
 0x18a   : > { %8780 = vst [vmem:[#allocation88_spill] sm:$0xff] %v5707_v50 }
 0x18b   : > { %4348 = vrot.lane.b32.xlu0 %v4347_v51, %s4878_s16  ;;  %4358 = vrot.lane.b32.xlu1 %v4357_v11, %s4878_s16  ;;  %v4000_v51 = vunpack.i.l.bf16 %v5462_v62  ;;  %v5723_v11 = vsel %vm1991_vm6, %v3986_v12, %v3980_v1  ;;  %v5743_v1 = vsel %vm1798_vm7, %v3991_v34, %v3995_v54 }
 0x18c   : > { %8782 = vst [vmem:[#allocation90_spill] sm:$0xff] %v5723_v11  ;;  %v4372_v32 = vpack.i.bf16 %v5716_v48, %v5723_v11  ;;  %8783 = vst [vmem:[#allocation91_spill] sm:$0xff] %v5743_v1  ;;  %v4382_v7 = vpack.i.bf16 %v5698_v23, %v5723_v11 }
 0x18d   : > { %v5733_v58 = vsel %vm1991_vm6, %v3985_v27, %v4000_v51  ;;  %v3996_v27 = vunpack.i.h.bf16 %v5442_v19 }
 0x18e   : > { %v4377_v4 = vpack.i.bf16 %v5733_v58, %v5743_v1 }
 0x18f   : > { %4353 = vrot.lane.b32.xlu0 %v4352_v60, %s4879_s17  ;;  %4363 = vrot.lane.b32.xlu1 %v4362_v24, %s4878_s16  ;;  %v5735_v60 = vpop.permute.xlu0 %4088  ;;  %v5737_v24 = vpop.permute.xlu1 %4093  ;;  %v5762_v34 = vsel %vm1798_vm7, %v3996_v27, %v3990_v53 }
 0x190   : > { %8786 = vst [vmem:[#allocation93_spill] sm:$0xff] %v5762_v34 }
 0x193   : > { %4368 = vrot.lane.b32.xlu0 %v4367_v57, %s4879_s17  ;;  %4373 = vrot.lane.b32.xlu1 %v4372_v32, %s4878_s16  ;;  %v8784_v57 = vunpack.i.h.bf16 %v5462_v62  ;;  %v5764_v11 = vpop.permute.xlu0 %4098  ;;  %v5766_v19 = vpop.permute.xlu1 %4103 }
 0x194   : > { %8787 = vst [vmem:[#allocation94_spill] sm:$0xff] %v5764_v11  ;;  %v4010_v11 = vunpack.i.l.bf16 %v5489_v46 }
 0x195   : > { %v5756_v32 = vsel %vm1991_vm6, %v4000_v51, %v8784_v57  ;;  %v8788_v51 = vunpack.i.l.bf16 %v5452_v59  ;;  %v8500_v57 = vunpack.i.h.bf16 %v5489_v46 }
 0x196   : > { %8785 = vst [vmem:[#allocation92_spill] sm:$0xff] %v5756_v32  ;;  %v4387_v8 = vpack.i.bf16 %v5762_v34, %v5756_v32 }
 0x197   : > { %4378 = vrot.lane.b32.xlu0 %v4377_v4, %s4878_s16  ;;  %4383 = vrot.lane.b32.xlu1 %v4382_v7, %s4879_s17  ;;  %v5776_v4 = vsel %vm1991_vm6, %v8788_v51, %v3986_v12  ;;  %v8790_v7 = vunpack.i.l.bf16 %v5487_v33 }
 0x198   : > { %8789 = vst [vmem:[#allocation95_spill] sm:$0xff] %v5776_v4  ;;  %v4392_v12 = vpack.i.bf16 %v5762_v34, %v5776_v4  ;;  %v4020_v34 = vunpack.i.l.bf16 %v5524_v41 }
 0x199   : > { %v5782_v53 = vsel %vm1798_vm7, %v8790_v7, %v3996_v27  ;;  %v5800_v27 = vsel %vm1798_vm7, %v4010_v11, %v8500_v57  ;;  %v4021_v57 = vunpack.i.h.bf16 %v5524_v41  ;;  %v8799_v41 = vunpack.i.h.bf16 %v5315_v55 }
 0x19a   : > { %8791 = vst [vmem:[#allocation96_spill] sm:$0xff] %v5782_v53  ;;  %v4407_v51 = vpack.i.bf16 %v5782_v53, %v5733_v58  ;;  %8792 = vst [vmem:[#allocation97_spill] sm:$0xff] %v5800_v27 }
 0x19b   : > { %4388 = vrot.lane.b32.xlu0 %v4387_v8, %s4878_s16  ;;  %4398 = vrot.lane.b32.xlu1 %v4397_v3, %s4879_s17  ;;  %v5804_v8 = vsel %vm1798_vm7, %v3995_v54, %v4010_v11 }
 0x19c   : > { %8793 = vst [vmem:[#allocation98_spill] sm:$0xff] %v5804_v8  ;;  %v4402_v4 = vpack.i.bf16 %v5800_v27, %v5804_v8  ;;  %v4417_v53 = vpack.i.bf16 %v5804_v8, %v5743_v1 }
 0x19d   : > { %v5788_v48 = vpop.permute.xlu0 %4108  ;;  %v5790_v28 = vpop.permute.xlu1 %4113 }
 0x19f   : > { %4393 = vrot.lane.b32.xlu0 %v4392_v12, %s4879_s17  ;;  %4408 = vrot.lane.b32.xlu1 %v4407_v51, %s4879_s17  ;;  %v4412_v12 = vpack.i.bf16 %v5532_v43, %v5536_v39  ;;  %v4422_v51 = vpack.i.bf16 %v5026_v6, %v5506_v0  ;;  %v4427_v6 = vpack.i.bf16 %v5549_v37, %v5061_v25  ;;  %v4833_v43 = vld [vmem:[#allocation2 + $0x8] sm:$0xff]  ;;  %v8816_v0 = vunpack.i.h.bf16 %v5438_v26 }
 0x1a0   : > { %v4060_v26 = vunpack.i.l.bf16 %v5615_v29 }
 0x1a1   : > { %v5808_v3 = vpop.permute.xlu0 %4118  ;;  %v5810_v7 = vpop.permute.xlu1 %4123 }
 0x1a2   : > { %8794 = vst [vmem:[#allocation99_spill] sm:$0xff] %v5808_v3  ;;  %8795 = vst [vmem:[#allocation100_spill] sm:$0xff] %v5810_v7  ;;  %v5830_v7 = vsel %vm1605_vm3, %v4020_v34, %v4021_v57 }
 0x1a3   : > { %4403 = vrot.lane.b32.xlu0 %v4402_v4, %s4878_s16  ;;  %4418 = vrot.lane.b32.xlu1 %v4417_v53, %s4879_s17  ;;  %8798 = vst [vmem:[#allocation103_spill] sm:$0xff] %v5830_v7  ;;  %v5836_v4 = vsel %vm1605_vm3, %v8799_v41, %v4020_v34  ;;  %v3956_v53 = vunpack.i.h.bf16 %v5371_v44  ;;  %v3750_v34 = vld.sshfl [vmem:[%s8406_s2] sm:$0x33 pattern:$0x76325410]  ;;  %v8509_v41 = vunpack.i.h.bf16 %v5552_v31 }
 0x1a4   : > { %8800 = vst [vmem:[#allocation104_spill] sm:$0xff] %v5836_v4  ;;  %v4432_v55 = vpack.i.bf16 %v5830_v7, %v5836_v4  ;;  %v5862_v25 = vcombine.high %v3750_v34, %v3750_v34 }
 0x1a5   : > { %v5820_v54 = vpop.permute.xlu0 %4128  ;;  %v5822_v11 = vpop.permute.xlu1 %4133 }
 0x1a6   : > { %8796 = vst [vmem:[#allocation101_spill] sm:$0xff] %v5820_v54  ;;  %8797 = vst [vmem:[#allocation102_spill] sm:$0xff] %v5822_v11  ;;  %3752 = vmatprep.mubr.msk.bf16.mxu0 %vm3018_vm8, %v5862_v25  ;;  %3754 = vmatprep.mubr.msk.bf16.mxu1 %vm3018_vm8, %v5862_v25 }
 0x1a7   : > { %4413 = vrot.lane.b32.xlu0 %v4412_v12, %s4878_s16  ;;  %4423 = vrot.lane.b32.xlu1 %v4422_v51, %s4878_s16  ;;  %v8803_v12 = vunpack.i.h.bf16 %v5402_v15  ;;  %8805 = vst [vmem:[#allocation108_spill] sm:$0xff] %v5862_v25  ;;  %v4437_v15 = vpack.i.bf16 %v5056_v22, %v5836_v4  ;;  %v4046_v22 = vunpack.i.h.bf16 %v5572_v52  ;;  %v4832_v25 = vld [vmem:[#allocation2 + $0x48] sm:$0xff] }
 0x1a8   : > { %v4457_v37 = vpack.i.bf16 %v4832_v25, %v4833_v43 }
 0x1a9   : > { %v5841_v11 = vpop.permute.xlu0 %4138  ;;  %v5843_v54 = vpop.permute.xlu1 %4143  ;;  %v5856_v51 = vsel %vm1268_vm4, %v8803_v12, %v3956_v53 }
 0x1aa   : > { %8801 = vst [vmem:[#allocation105_spill] sm:$0xff] %v5841_v11  ;;  %8802 = vst [vmem:[#allocation106_spill] sm:$0xff] %v5843_v54  ;;  %v4035_v11 = vunpack.i.l.bf16 %v5552_v31  ;;  %v4442_v12 = vpack.i.bf16 %v5856_v51, %v5046_v17  ;;  %v4045_v17 = vunpack.i.l.bf16 %v5572_v52 }
 0x1ab   : > { %8804 = vst [vmem:[#allocation107_spill] sm:$0xff] %v5856_v51  ;;  %4428 = vrot.lane.b32.xlu0 %v4427_v6, %s4878_s16  ;;  %4433 = vrot.lane.b32.xlu1 %v4432_v55, %s4879_s17 }
 0x1ac   : > { %v5880_v6 = vsel %vm1605_vm3, %v4035_v11, %v8509_v41  ;;  %v5884_v55 = vsel %vm1605_vm3, %v4021_v57, %v4035_v11  ;;  %v5898_v57 = vsel %vm1268_vm4, %v4045_v17, %v4046_v22  ;;  %v5902_v52 = vsel %vm1268_vm4, %v3956_v53, %v4045_v17  ;;  %v4834_v17 = vld [vmem:[#allocation2 + $0x70] sm:$0xff] }
 0x1ad   : > { %v5864_v44 = vpop.permute.xlu0 %4148  ;;  %v5866_v3 = vpop.permute.xlu1 %4153  ;;  %8806 = vst [vmem:[#allocation109_spill] sm:$0xff] %v5880_v6  ;;  %8807 = vst [vmem:[#allocation110_spill] sm:$0xff] %v5884_v55  ;;  %v4447_v41 = vpack.i.bf16 %v5880_v6, %v5884_v55  ;;  %v8517_v11 = vunpack.i.l.bf16 %v5592_v35  ;;  %v4452_v43 = vpack.i.bf16 %v5497_v42, %v5902_v52  ;;  %v4467_v25 = vpack.i.bf16 %v5898_v57, %v5516_v20 }
 0x1ae   : > { %8809 = vst [vmem:[#allocation112_spill] sm:$0xff] %v5898_v57  ;;  %8810 = vst [vmem:[#allocation113_spill] sm:$0xff] %v5902_v52  ;;  %v4487_v1 = vpack.i.bf16 %v5898_v57, %v5902_v52  ;;  %v4061_v57 = vunpack.i.h.bf16 %v5615_v29 }
 0x1af   : > { %4438 = vrot.lane.b32.xlu0 %v4437_v15, %s4878_s16  ;;  %4443 = vrot.lane.b32.xlu1 %v4442_v12, %s4878_s16  ;;  %v5919_v53 = vsel %vm1268_vm4, %v4046_v22, %v8517_v11  ;;  %v8526_v22 = vunpack.i.l.bf16 %v5291_v61 }
 0x1b0   : > { %8813 = vst [vmem:[#allocation116_spill] sm:$0xff] %v5919_v53  ;;  %v4477_v20 = vpack.i.bf16 %v5281_v18, %v5919_v53 }
 0x1b1   : > { %v5890_v34 = vpop.permute.xlu0 %4158  ;;  %v5892_v4 = vpop.permute.xlu1 %4163 }
 0x1b2   : > { %8808 = vst [vmem:[#allocation111_spill] sm:$0xff] %v5892_v4  ;;  %v4472_v4 = vpack.i.bf16 %v5856_v51, %v5602_v47 }
 0x1b3   : > { %4448 = vrot.lane.b32.xlu0 %v4447_v41, %s4879_s17  ;;  %4458 = vrot.lane.b32.xlu1 %v4457_v37, %s4879_s17 }
 0x1b5   : > { %v5907_v15 = vpop.permute.xlu0 %4168  ;;  %v5909_v12 = vpop.permute.xlu1 %4173 }
 0x1b6   : > { %8811 = vst [vmem:[#allocation114_spill] sm:$0xff] %v5907_v15  ;;  %8812 = vst [vmem:[#allocation115_spill] sm:$0xff] %v5909_v12  ;;  %v5927_v12 = vld [vmem:[#allocation2 + $0x60] sm:$0xff]  ;;  %v8833_v39 = vunpack.i.l.bf16 %v5907_v15 }
 0x1b7   : > { %4453 = vrot.lane.b32.xlu0 %v4452_v43, %s4878_s16  ;;  %4468 = vrot.lane.b32.xlu1 %v4467_v25, %s4878_s16  ;;  %v4462_v42 = vpack.i.bf16 %v4834_v17, %v5927_v12  ;;  %v3976_v43 = vunpack.i.h.bf16 %v5426_v2 }
 0x1b9   : > { %v5923_v37 = vpop.permute.xlu0 %4178  ;;  %v5925_v41 = vpop.permute.xlu1 %4183 }
 0x1ba   : > { %8814 = vst [vmem:[#allocation117_spill] sm:$0xff] %v5923_v37  ;;  %8815 = vst [vmem:[#allocation118_spill] sm:$0xff] %v5925_v41 }
 0x1bb   : > { %4463 = vrot.lane.b32.xlu0 %v4462_v42, %s4874_s11  ;;  %4478 = vrot.lane.b32.xlu1 %v4477_v20, %s4878_s16  ;;  %v5948_v42 = vsel %vm2184_vm5, %v8816_v0, %v3976_v43  ;;  %v8818_v20 = vunpack.i.h.bf16 %v5264_v21  ;;  %v5989_v21 = vld [vmem:[#allocation2 + $0x30] sm:$0xff] }
 0x1bc   : > { %8817 = vst [vmem:[#allocation119_spill] sm:$0xff] %v5948_v42 }
 0x1bd   : > { %v5936_v25 = vpop.permute.xlu0 %4188  ;;  %v5938_v11 = vpop.permute.xlu1 %4193  ;;  %v5958_v2 = vsel %vm1075_vm1, %v8818_v20, %v8526_v22  ;;  %v4006_v22 = vunpack.i.h.bf16 %v5452_v59  ;;  %v5996_v20 = vsel %vm2184_vm5, %v3976_v43, %v4060_v26  ;;  %v8826_v59 = vunpack.i.l.bf16 %v5629_v5 }
 0x1be   : > { %8819 = vst [vmem:[#allocation120_spill] sm:$0xff] %v5958_v2  ;;  %8825 = vst [vmem:[#allocation126_spill] sm:$0xff] %v5996_v20 }
 0x1bf   : > { %4473 = vrot.lane.b32.xlu0 %v4472_v4, %s4879_s17  ;;  %4488 = vrot.lane.b32.xlu1 %v4487_v1, %s4879_s17  ;;  %v4482_v4 = vpack.i.bf16 %v5948_v42, %v5958_v2  ;;  %v4836_v1 = vld [vmem:[#allocation2 + $0x78] sm:$0xff]  ;;  %v6002_v8 = vsel %vm2184_vm5, %v4061_v57, %v8826_v59 }
 0x1c0   : > { %v5968_v47 = vpack.i.bf16 %v4836_v1, %v4834_v17  ;;  %v5981_v17 = vsel %vm2184_vm5, %v4060_v26, %v4061_v57  ;;  %8827 = vst [vmem:[#allocation127_spill] sm:$0xff] %v6002_v8  ;;  %v8830_v26 = vunpack.i.l.bf16 %v5671_v14  ;;  %v8832_v57 = vunpack.i.h.bf16 %v5907_v15 }
 0x1c1   : > { %v5962_v52 = vpop.permute.xlu0 %4198  ;;  %v5964_v0 = vpop.permute.xlu1 %4203  ;;  %8822 = vst [vmem:[#allocation123_spill] sm:$0xff] %v5981_v17 }
 0x1c2   : > { %8820 = vst [vmem:[#allocation121_spill] sm:$0xff] %v5962_v52  ;;  %8821 = vst [vmem:[#allocation122_spill] sm:$0xff] %v5964_v0  ;;  %v4838_v52 = vld [vmem:[#allocation2 + $0x28] sm:$0xff]  ;;  %v6018_v59 = vsel %vm1991_vm6, %v4006_v22, %v8830_v26  ;;  %v8836_v26 = vunpack.i.h.bf16 %v5964_v0 }
 0x1c3   : > { %4483 = vrot.lane.b32.xlu0 %v4482_v4, %s4878_s16  ;;  %4498 = vrot.lane.b32.xlu1 %v5968_v47, %s4875_s12  ;;  %v4492_v4 = vpack.i.bf16 %v5662_v36, %v5281_v18  ;;  %v5992_v29 = vpack.i.bf16 %v5989_v21, %v4838_v52  ;;  %v4016_v18 = vunpack.i.h.bf16 %v5487_v33  ;;  %v8828_v52 = vunpack.i.h.bf16 %v5462_v62  ;;  %8831 = vst [vmem:[#allocation129_spill] sm:$0xff] %v6018_v59 }
 0x1c4   : > { %v6029_v62 = vsel %vm817_vm10, %v8833_v39, %v8832_v57  ;;  %v4502_v39 = vpack.i.bf16 %v5981_v17, %v5996_v20  ;;  %v4512_v36 = vpack.i.bf16 %v5996_v20, %v5948_v42  ;;  %v4041_v20 = vunpack.i.h.bf16 %v5610_v40 }
 0x1c5   : > { %v5983_v1 = vpop.permute.xlu0 %4208  ;;  %v5985_v51 = vpop.permute.xlu1 %4213  ;;  %v6012_v43 = vsel %vm1991_vm6, %v8828_v52, %v4006_v22  ;;  %8834 = vst [vmem:[#allocation130_spill] sm:$0xff] %v6029_v62  ;;  %v8842_v52 = vunpack.i.h.bf16 %v5923_v37  ;;  %v8853_v62 = vunpack.i.h.bf16 %v5925_v41  ;;  %v8866_v42 = vunpack.i.l.bf16 %v5291_v61 }
 0x1c6   : > { %8823 = vst [vmem:[#allocation124_spill] sm:$0xff] %v5983_v1  ;;  %8824 = vst [vmem:[#allocation125_spill] sm:$0xff] %v5985_v51  ;;  %v8835_v22 = vunpack.i.l.bf16 %v5983_v1  ;;  %v4517_v57 = vpack.i.bf16 %v6012_v43, %v6002_v8  ;;  %v8840_v1 = vunpack.i.h.bf16 %v5489_v46 }
 0x1c7   : > { %8829 = vst [vmem:[#allocation128_spill] sm:$0xff] %v6012_v43  ;;  %4493 = vrot.lane.b32.xlu0 %v4492_v4, %s4879_s17  ;;  %4508 = vrot.lane.b32.xlu1 %v5992_v29, %s4875_s12  ;;  %s369_s12 = scalar_lea.vmem %s8412_s8, %s3748_s15 }
 0x1c8   : > { %v6039_v4 = vsel %vm736_vm9, %v8836_v26, %v8835_v22  ;;  %v6062_v0 = vsel %vm1798_vm7, %v8840_v1, %v4016_v18  ;;  %v8843_v22 = vunpack.i.l.bf16 %v5923_v37 }
 0x1c9   : > { %8837 = vst [vmem:[#allocation131_spill] sm:$0xff] %v6039_v4  ;;  %v6042_v5 = vpop.permute.xlu0 %4218  ;;  %v6044_v15 = vpop.permute.xlu1 %4223  ;;  %8841 = vst [vmem:[#allocation134_spill] sm:$0xff] %v6062_v0  ;;  %v4527_v37 = vpack.i.bf16 %v6062_v0, %v6018_v59 }
 0x1ca   : > { %8838 = vst [vmem:[#allocation132_spill] sm:$0xff] %v6042_v5  ;;  %8839 = vst [vmem:[#allocation133_spill] sm:$0xff] %v6044_v15  ;;  %v6071_v26 = vsel %vm817_vm10, %v8843_v22, %v8842_v52  ;;  %v8849_v22 = vunpack.i.h.bf16 %v6044_v15 }
 0x1cb   : > { %4503 = vrot.lane.b32.xlu0 %v4502_v39, %s4878_s16  ;;  %4518 = vrot.lane.b32.xlu1 %v4517_v57, %s4878_s16  ;;  %8844 = vst [vmem:[#allocation135_spill] sm:$0xff] %v6071_v26  ;;  %v8845_v39 = vunpack.i.l.bf16 %v6042_v5  ;;  %v8846_v57 = vunpack.i.h.bf16 %v5985_v51  ;;  %v8850_v5 = vunpack.i.l.bf16 %v6044_v15  ;;  %v8852_v51 = vunpack.i.l.bf16 %v5864_v44 }
 0x1cd   : > { %v6079_v46 = vsel %vm736_vm9, %v8846_v57, %v8845_v39  ;;  %v6081_v1 = vpop.permute.xlu0 %4228  ;;  %v6083_v33 = vpop.permute.xlu1 %4233  ;;  %v6097_v39 = vsel %vm736_vm9, %v8850_v5, %v8849_v22  ;;  %v4075_v57 = vunpack.i.l.bf16 %v5673_v49  ;;  %v6106_v4 = vsel %vm817_vm10, %v8853_v62, %v8852_v51 }
 0x1ce   : > { %8847 = vst [vmem:[#allocation136_spill] sm:$0xff] %v6079_v46  ;;  %8848 = vst [vmem:[#allocation137_spill] sm:$0xff] %v6081_v1  ;;  %v4071_v5 = vunpack.i.h.bf16 %v5671_v14  ;;  %v4076_v46 = vunpack.i.h.bf16 %v5673_v49 }
 0x1cf   : > { %8851 = vst [vmem:[#allocation138_spill] sm:$0xff] %v6097_v39  ;;  %8854 = vst [vmem:[#allocation139_spill] sm:$0xff] %v6106_v4  ;;  %4513 = vrot.lane.b32.xlu0 %v4512_v36, %s4879_s17  ;;  %4528 = vrot.lane.b32.xlu1 %v4527_v37, %s4878_s16  ;;  %v6120_v41 = vsel %vm1798_vm7, %v4016_v18, %v4075_v57  ;;  %v8857_v36 = vunpack.i.l.bf16 %v5671_v14  ;;  %v8557_v37 = vunpack.i.l.bf16 %v5705_v38 }
 0x1d0   : > { %8856 = vst [vmem:[#allocation141_spill] sm:$0xff] %v6120_v41  ;;  %v4532_v18 = vpack.i.bf16 %v5756_v32, %v5981_v17  ;;  %v6143_v4 = vsel %vm1798_vm7, %v4075_v57, %v4076_v46  ;;  %v4026_v57 = vunpack.i.h.bf16 %v5541_v30  ;;  %v8570_v17 = vunpack.i.l.bf16 %v5707_v50  ;;  %v6304_v50 = vld [vmem:[#allocation2 + $0x38] sm:$0xff] }
 0x1d1   : > { %v6113_v22 = vpop.permute.xlu0 %4238  ;;  %v6115_v26 = vpop.permute.xlu1 %4243  ;;  %v6130_v51 = vsel %vm1991_vm6, %v8857_v36, %v4071_v5  ;;  %8861 = vst [vmem:[#allocation145_spill] sm:$0xff] %v6143_v4  ;;  %v6151_v14 = vsel %vm1991_vm6, %v4071_v5, %v8557_v37 }
 0x1d2   : > { %8855 = vst [vmem:[#allocation140_spill] sm:$0xff] %v6115_v26  ;;  %8858 = vst [vmem:[#allocation142_spill] sm:$0xff] %v6130_v51  ;;  %v4547_v52 = vpack.i.bf16 %v6130_v51, %v6120_v41 }
 0x1d3   : > { %4523 = vrot.lane.b32.xlu0 %v5968_v47, %s4876_s13  ;;  %4538 = vrot.lane.b32.xlu1 %v5968_v47, %s4877_s14  ;;  %8862 = vst [vmem:[#allocation146_spill] sm:$0xff] %v6151_v14 }
 0x1d5   : > { %v6133_v62 = vpop.permute.xlu0 %4248  ;;  %v6135_v49 = vpop.permute.xlu1 %4253 }
 0x1d6   : > { %8859 = vst [vmem:[#allocation143_spill] sm:$0xff] %v6133_v62  ;;  %8860 = vst [vmem:[#allocation144_spill] sm:$0xff] %v6135_v49  ;;  %v4557_v49 = vpack.i.bf16 %v6143_v4, %v6151_v14 }
 0x1d7   : > { %4533 = vrot.lane.b32.xlu0 %v4532_v18, %s4879_s17  ;;  %4548 = vrot.lane.b32.xlu1 %v4547_v52, %s4878_s16  ;;  %v3901_v52 = vunpack.i.h.bf16 %v5291_v61  ;;  %v4025_v18 = vunpack.i.l.bf16 %v5541_v30  ;;  %v8568_v30 = vunpack.i.l.bf16 %v5283_v63 }
 0x1d9   : > { %v6153_v36 = vpop.permute.xlu0 %4258  ;;  %v6155_v39 = vpop.permute.xlu1 %4263  ;;  %v6189_v32 = vsel %vm1075_vm1, %v3901_v52, %v8568_v30  ;;  %v6195_v14 = vsel %vm1075_vm1, %v8866_v42, %v3901_v52  ;;  %v1554_v61 = vsel %vm817_vm10, %v4025_v18, %v4026_v57  ;;  %v8871_v52 = vunpack.i.l.bf16 %v5627_v16 }
 0x1da   : > { %8863 = vst [vmem:[#allocation147_spill] sm:$0xff] %v6153_v36  ;;  %8864 = vst [vmem:[#allocation148_spill] sm:$0xff] %v6155_v39  ;;  %v4552_v39 = vpack.i.bf16 %v5800_v27, %v6012_v43  ;;  %v4567_v36 = vpack.i.bf16 %v6018_v59, %v6062_v0  ;;  %v4577_v27 = vpack.i.bf16 %v6120_v41, %v6130_v51  ;;  %v4091_v41 = vunpack.i.h.bf16 %v5735_v60 }
 0x1db   : > { %4543 = vrot.lane.b32.xlu0 %v5992_v29, %s4876_s13  ;;  %4558 = vrot.lane.b32.xlu1 %v4557_v49, %s4878_s16  ;;  %v4040_v49 = vunpack.i.l.bf16 %v5610_v40  ;;  %v4090_v40 = vunpack.i.l.bf16 %v5735_v60  ;;  %8865 = vst [vmem:[#allocation149_spill] sm:$0xff] %v6189_v32  ;;  %8867 = vst [vmem:[#allocation150_spill] sm:$0xff] %v6195_v14  ;;  %v6207_v0 = vsel %vm1798_vm7, %v4076_v46, %v8570_v17  ;;  %v6225_v46 = vld [vmem:[#allocation2 + $0x20] sm:$0xff]  ;;  %v8872_v59 = vunpack.i.l.bf16 %v5570_v45 }
 0x1dc   : > { %8870 = vst [vmem:[#allocation153_spill] sm:$0xff] %v6207_v0  ;;  %v4582_v17 = vpack.i.bf16 %v6225_v46, %v5884_v55  ;;  %v8877_v55 = vunpack.i.h.bf16 %v5552_v31  ;;  %v4572_v31 = vpack.i.bf16 %v5830_v7, %v6207_v0 }
 0x1dd   : > { %v6165_v5 = vpop.permute.xlu0 %4268  ;;  %v6167_v37 = vpop.permute.xlu1 %4273  ;;  %v6213_v42 = vsel %vm736_vm9, %v4040_v49, %v4041_v20  ;;  %v6219_v30 = vsel %vm736_vm9, %v8871_v52, %v4040_v49  ;;  %v1555_v51 = vsel %vm817_vm10, %v8872_v59, %v4025_v18  ;;  %v8873_v49 = vunpack.i.h.bf16 %v5570_v45  ;;  %v6253_v59 = vld [vmem:[#allocation2 + $0x10] sm:$0xff] }
 0x1de   : > { %v6251_v43 = vsel %vm1605_vm3, %v8877_v55, %v4090_v40  ;;  %v8879_v18 = vunpack.i.h.bf16 %v5627_v16  ;;  %v6280_v7 = vsel %vm1605_vm3, %v4090_v40, %v4091_v41 }
 0x1df   : > { %4553 = vrot.lane.b32.xlu0 %v4552_v39, %s4879_s17  ;;  %4568 = vrot.lane.b32.xlu1 %v4567_v36, %s4879_s17  ;;  %v6237_v60 = vsel %vm817_vm10, %v4026_v57, %v8873_v49  ;;  %8878 = vst [vmem:[#allocation155_spill] sm:$0xff] %v6251_v43  ;;  %v4597_v57 = vpack.i.bf16 %v5880_v6, %v6253_v59 }
 0x1e0   : > { %v6261_v49 = vsel %vm736_vm9, %v4041_v20, %v8879_v18  ;;  %v4587_v55 = vpack.i.bf16 %v6251_v43, %v6143_v4  ;;  %v2874_v6 = vpack.c.bf16 %v5989_v21, %v6219_v30  ;;  %v6287_v30 = vld [vmem:[#allocation2 + $0x58] sm:$0xff] }
 0x1e1   : > { %v6197_v39 = vpop.permute.xlu0 %4283  ;;  %v6199_v36 = vpop.permute.xlu1 %4278 }
 0x1e2   : > { %8868 = vst [vmem:[#allocation151_spill] sm:$0xff] %v6197_v39  ;;  %8869 = vst [vmem:[#allocation152_spill] sm:$0xff] %v6199_v36  ;;  %v4095_v36 = vunpack.i.l.bf16 %v5737_v24  ;;  %v4286_v20 = vunpack.i.h.bf16 %v6197_v39 }
 0x1e3   : > { %4563 = vrot.lane.b32.xlu0 %v5992_v29, %s4877_s14  ;;  %4578 = vrot.lane.b32.xlu1 %v4577_v27, %s4879_s17  ;;  %v8874_v29 = vunpack.i.h.bf16 %v5592_v35  ;;  %v8875_v27 = vunpack.i.l.bf16 %v5592_v35 }
 0x1e4   : > { %v6310_v38 = vsel %vm1605_vm3, %v4091_v41, %v4095_v36 }
 0x1e5   : > { %v6245_v52 = vsel %vm1268_vm4, %v8875_v27, %v8874_v29  ;;  %v6263_v62 = vpop.permute.xlu0 %4298  ;;  %v6265_v29 = vpop.permute.xlu1 %4288  ;;  %v4841_v27 = vld [vmem:[#allocation2] sm:$0xff]  ;;  %8882 = vst [vmem:[#allocation157_spill] sm:$0xff] %v6310_v38 }
 0x1e6   : > { %8876 = vst [vmem:[#allocation154_spill] sm:$0xff] %v6245_v52  ;;  %8880 = vst [vmem:[#allocation156_spill] sm:$0xff] %v6265_v29  ;;  %v2875_v26 = vpack.c.bf16 %v4841_v27, %v6213_v42  ;;  %v4290_v8 = vunpack.i.l.bf16 %v6265_v29  ;;  %v4300_v18 = vunpack.i.l.bf16 %v6263_v62  ;;  %v8881_v4 = vunpack.i.h.bf16 %v6265_v29 }
 0x1e7   : > { %4573 = vrot.lane.b32.xlu0 %v4572_v31, %s4878_s16  ;;  %4588 = vrot.lane.b32.xlu1 %v4587_v55, %s4879_s17  ;;  %v4105_v55 = vunpack.i.l.bf16 %v5766_v19  ;;  %v8886_v29 = vunpack.i.h.bf16 %v6263_v62 }
 0x1e8   : > { %v1668_v40 = vsel %vm736_vm9, %v4286_v20, %v4290_v8  ;;  %v1669_v31 = vsel %vm736_vm9, %v8881_v4, %v4286_v20  ;;  %v1667_v41 = vsel %vm736_vm9, %v4290_v8, %v4300_v18  ;;  %v8887_v4 = vunpack.i.h.bf16 %v5592_v35 }
 0x1e9   : > { %v6300_v21 = vpop.permute.xlu0 %4308  ;;  %v6302_v39 = vpop.permute.xlu1 %4293  ;;  %v2891_v0 = vpack.c.bf16 %v1668_v40, %v1554_v61  ;;  %v2890_v42 = vpack.c.bf16 %v1669_v31, %v1555_v51  ;;  %v4607_v51 = vpack.i.bf16 %v6304_v50, %v6251_v43  ;;  %v4844_v61 = vld [vmem:[#allocation2 + $0x40] sm:$0xff]  ;;  %v8883_v31 = vunpack.i.h.bf16 %v5737_v24 }
 0x1ea   : > { %v8591_v20 = vunpack.i.l.bf16 %v6302_v39  ;;  %v4602_v40 = vpack.i.bf16 %v4844_v61, %v6280_v7  ;;  %v1666_v61 = vsel %vm736_vm9, %v4300_v18, %v8886_v29  ;;  %v4612_v35 = vpack.i.bf16 %v6310_v38, %v6225_v46 }
 0x1eb   : > { %4583 = vrot.lane.b32.xlu0 %v4582_v17, %s4878_s16  ;;  %4598 = vrot.lane.b32.xlu1 %v4597_v57, %s4878_s16  ;;  %v6326_v27 = vsel %vm1605_vm3, %v4095_v36, %v8883_v31  ;;  %v8885_v17 = vunpack.i.h.bf16 %v5570_v45  ;;  %v8891_v45 = vunpack.i.h.bf16 %v5627_v16  ;;  %v8892_v8 = vunpack.i.h.bf16 %v5766_v19  ;;  %v8900_v16 = vld [vmem:[#allocation74_spill] sm:$0xff] }
 0x1ec   : > { %8884 = vst [vmem:[#allocation158_spill] sm:$0xff] %v6326_v27  ;;  %3071 = vmatprep.subr.bf16.mxu0 %v2891_v0  ;;  %v6344_v0 = vsel %vm1268_vm4, %v8887_v4, %v4105_v55  ;;  %v2892_v46 = vpack.c.bf16 %v1667_v41, %v6237_v60 }
 0x1ed   : > { %v1552_v57 = vsel %vm817_vm10, %v8885_v17, %v8591_v20  ;;  %8888 = vst [vmem:[#allocation159_spill] sm:$0xff] %v6344_v0  ;;  %3072 = vmatpush1.bf16.msra.mxu0 %v2890_v42  ;;  %v6346_v36 = vpop.permute.xlu0 %4313  ;;  %v6348_v31 = vpop.permute.xlu1 %4303  ;;  %v8890_v20 = vunpack.i.l.bf16 %v6300_v21  ;;  %v6362_v18 = vsel %vm1268_vm4, %v4105_v55, %v8892_v8  ;;  %v4296_v42 = vunpack.i.h.bf16 %v6302_v39 }
 0x1ee   : > { %8889 = vst [vmem:[#allocation160_spill] sm:$0xff] %v6348_v31  ;;  %v2893_v17 = vpack.c.bf16 %v1666_v61, %v1552_v57  ;;  %8893 = vst [vmem:[#allocation161_spill] sm:$0xff] %v6362_v18  ;;  %v8593_v4 = vunpack.i.h.bf16 %v6348_v31  ;;  %v4305_v57 = vunpack.i.l.bf16 %v6348_v31  ;;  %3073 = vmatprep.subr.bf16.mxu0 %v2875_v26  ;;  %v4270_v55 = vunpack.i.l.bf16 %v6165_v5 }
 0x1ef   : > { %v1473_v29 = vsel %vm736_vm9, %v8891_v45, %v8890_v20  ;;  %v4315_v45 = vunpack.i.l.bf16 %v6346_v36  ;;  %4593 = vrot.lane.b32.xlu0 %v5968_v47, %s4873_s29  ;;  %4608 = vrot.lane.b32.xlu1 %v4607_v51, %s4878_s16  ;;  %v4845_v20 = vld [vmem:[#allocation2 + $0x18] sm:$0xff]  ;;  %v4627_v47 = vpack.i.bf16 %v6195_v14, %v6344_v0 }
 0x1f0   : > { %3112 = vmatprep.subr.bf16.mxu1 %v2893_v17  ;;  %v2877_v8 = vpack.c.bf16 %v4845_v20, %v1473_v29  ;;  %v1410_v26 = vsel %vm817_vm10, %v4296_v42, %v4305_v57  ;;  %v1411_v61 = vsel %vm817_vm10, %v8593_v4, %v4296_v42  ;;  %v4637_v29 = vpack.i.bf16 %v6362_v18, %v6189_v32 }
 0x1f1   : > { %3074 = vmatpush1.bf16.msra.mxu0 %v2874_v6  ;;  %3113 = vmatpush1.bf16.msra.mxu1 %v2892_v46  ;;  %v6383_v60 = vpop.permute.xlu0 %4323  ;;  %v6385_v51 = vpop.permute.xlu1 %4318  ;;  %v2859_v41 = vpack.c.bf16 %v1410_v26, %v5560_v56  ;;  %v2858_v17 = vpack.c.bf16 %v1411_v61, %v5564_v13  ;;  %v4311_v20 = vunpack.i.h.bf16 %v6300_v21  ;;  %v8895_v56 = vpack.i.bf16 %v6245_v52, %v5927_v12 }
 0x1f2   : > { %8894 = vst [vmem:[#allocation162_spill] sm:$0xff] %v6385_v51  ;;  %v8597_v42 = vunpack.i.h.bf16 %v6383_v60  ;;  %v4325_v4 = vunpack.i.l.bf16 %v6383_v60  ;;  %v4320_v6 = vunpack.i.l.bf16 %v6385_v51  ;;  %3114 = vmatprep.subr.bf16.mxu1 %v2877_v8  ;;  %v8896_v13 = vunpack.i.h.bf16 %v6346_v36 }
 0x1f3   : > { %4603 = vrot.lane.b32.xlu0 %v4602_v40, %s4879_s17  ;;  %4618 = vrot.lane.b32.xlu1 %v8895_v56, %s4878_s16 }
 0x1f4   : > { %v1217_v61 = vsel %vm817_vm10, %v4315_v45, %v8896_v13  ;;  %3075 = vmatprep.subr.bf16.mxu0 %v2859_v41  ;;  %v1331_v46 = vsel %vm736_vm9, %v4311_v20, %v4320_v6  ;;  %v1408_v12 = vsel %vm817_vm10, %v4325_v4, %v8597_v42  ;;  %v1409_v40 = vsel %vm817_vm10, %v4305_v57, %v4325_v4 }
 0x1f5   : > { %3076 = vmatpush1.bf16.msra.mxu0 %v2858_v17  ;;  %v8897_v13 = vpack.c.bf16 %v6287_v30, %v6261_v49  ;;  %v6421_v26 = vpop.permute.xlu0 %4333  ;;  %v6423_v41 = vpop.permute.xlu1 %4328  ;;  %v2843_v8 = vpack.c.bf16 %v1331_v46, %v1217_v61  ;;  %v2861_v31 = vpack.c.bf16 %v1408_v12, %v5606_v9  ;;  %v2860_v43 = vpack.c.bf16 %v1409_v40, %v8900_v16 }
 0x1f6   : > { %8898 = vst [vmem:[#allocation163_spill] sm:$0xff] %v6421_v26  ;;  %8899 = vst [vmem:[#allocation164_spill] sm:$0xff] %v6423_v41  ;;  %v4231_v4 = vunpack.i.h.bf16 %v6081_v1  ;;  %v8599_v57 = vunpack.i.l.bf16 %v6083_v33  ;;  %v8598_v17 = vunpack.i.l.bf16 %v6423_v41  ;;  %v8600_v49 = vunpack.i.h.bf16 %v6167_v37 }
 0x1f7   : > { %3115 = vmatpush1.bf16.msra.mxu1 %v8897_v13  ;;  %v4275_v30 = vunpack.i.l.bf16 %v6167_v37  ;;  %v8601_v13 = vunpack.i.l.bf16 %v6421_v26  ;;  %v4331_v46 = vunpack.i.h.bf16 %v6423_v41  ;;  %4613 = vrot.lane.b32.xlu0 %v4612_v35, %s4879_s17  ;;  %v8901_v61 = vunpack.i.h.bf16 %v6385_v51 }
 0x1f8   : > { %4628 = vrot.lane.b32.xlu1 %v4627_v47, %s4878_s16  ;;  %3077 = vmatprep.subr.bf16.mxu0 %v2843_v8  ;;  %v1218_v16 = vsel %vm817_vm10, %v8598_v17, %v4315_v45  ;;  %v8902_v40 = vunpack.i.h.bf16 %v6165_v5  ;;  %v4190_v8 = vunpack.i.l.bf16 %v5936_v25 }
 0x1f9   : > { %3116 = vmatprep.subr.bf16.mxu1 %v2861_v31  ;;  %v1332_v12 = vsel %vm736_vm9, %v8901_v61, %v4311_v20  ;;  %v6453_v9 = vpop.permute.xlu0 %4343  ;;  %v6455_v45 = vpop.permute.xlu1 %4338  ;;  %v1215_v47 = vsel %vm817_vm10, %v4331_v46, %v8601_v13 }
 0x1fa   : > { %v1138_v35 = vsel %vm736_vm9, %v4270_v55, %v8902_v40  ;;  %8903 = vst [vmem:[#allocation74_spill] sm:$0xff] %v6453_v9  ;;  %v2842_v17 = vpack.c.bf16 %v1332_v12, %v1218_v16  ;;  %v8602_v42 = vunpack.i.l.bf16 %v6453_v9  ;;  %v8603_v20 = vunpack.i.h.bf16 %v6455_v45  ;;  %v8905_v16 = vld [vmem:[#allocation60_spill] sm:$0xff] }
 0x1fb   : > { %3117 = vmatpush1.bf16.msra.mxu1 %v2860_v43  ;;  %v4340_v61 = vunpack.i.l.bf16 %v6455_v45  ;;  %v1024_v40 = vsel %vm817_vm10, %v4231_v4, %v8599_v57  ;;  %v8904_v43 = vpack.i.bf16 %v6253_v59, %v6326_v27  ;;  %v2827_v12 = vpack.c.bf16 %v8905_v16, %v1138_v35 }
 0x1fc   : > { %4638 = vrot.lane.b32.xlu1 %v4637_v29, %s4878_s16  ;;  %v1136_v57 = vsel %vm736_vm9, %v4275_v30, %v8600_v49  ;;  %3078 = vmatpush1.bf16.msra.mxu0 %v2842_v17  ;;  %v1139_v59 = vsel %vm736_vm9, %v8602_v42, %v4270_v55  ;;  %v8906_v35 = vunpack.i.h.bf16 %v6346_v36  ;;  %v8604_v17 = vunpack.i.l.bf16 %v5790_v28  ;;  %v8907_v55 = vld [vmem:[#allocation61_spill] sm:$0xff] }
 0x1fd   : > { %4623 = vrot.lane.b32.xlu0 %v8904_v43, %s4879_s17  ;;  %v1329_v29 = vsel %vm736_vm9, %v4340_v61, %v8603_v20  ;;  %v1330_v16 = vsel %vm736_vm9, %v4320_v6, %v4340_v61  ;;  %3079 = vmatprep.subr.bf16.mxu0 %v2827_v12  ;;  %v6494_v49 = vpop.permute.xlu0 %4348  ;;  %v6496_v13 = vpop.permute.xlu1 %4358  ;;  %v2826_v42 = vpack.c.bf16 %v8907_v55, %v1139_v59  ;;  %v4151_v20 = vunpack.i.h.bf16 %v5864_v44  ;;  %v8910_v12 = vld [vmem:[#allocation40_spill] sm:$0xff]  ;;  %v8911_v59 = vld [vmem:[#allocation63_spill] sm:$0xff] }
 0x1fe   : > { %v1216_v43 = vsel %vm817_vm10, %v8906_v35, %v4331_v46  ;;  %v2845_v56 = vpack.c.bf16 %v1329_v29, %v1215_v47  ;;  %v4236_v46 = vunpack.i.h.bf16 %v6083_v33  ;;  %v8908_v35 = vunpack.i.l.bf16 %v6081_v1 }
 0x1ff   : > { %v2844_v31 = vpack.c.bf16 %v1330_v16, %v1216_v43  ;;  %v8909_v61 = vpack.i.bf16 %v5919_v53, %v6304_v50  ;;  %v2811_v47 = vpack.c.bf16 %v1024_v40, %v8910_v12  ;;  %v2829_v29 = vpack.c.bf16 %v8911_v59, %v1136_v57 }
 0x200   : > { %v1025_v6 = vsel %vm817_vm10, %v8908_v35, %v4231_v4  ;;  %3118 = vmatprep.subr.bf16.mxu1 %v2845_v56  ;;  %v8912_v43 = vunpack.i.h.bf16 %v6165_v5  ;;  %v4195_v36 = vunpack.i.l.bf16 %v5938_v11  ;;  %3080 = vmatpush1.bf16.msra.mxu0 %v2826_v42  ;;  %v8913_v4 = vunpack.i.h.bf16 %v5936_v25 }
 0x201   : > { %4633 = vrot.lane.b32.xlu0 %v8909_v61, %s4879_s17  ;;  %3119 = vmatpush1.bf16.msra.mxu1 %v2844_v31  ;;  %v8914_v56 = vunpack.i.l.bf16 %v6113_v22  ;;  %v6528_v40 = vpop.permute.xlu0 %4353  ;;  %v6530_v35 = vpop.permute.xlu1 %4363  ;;  %v8916_v42 = vunpack.i.h.bf16 %v5788_v48  ;;  %v8917_v31 = vunpack.i.l.bf16 %v5788_v48  ;;  %v8918_v12 = vunpack.i.h.bf16 %v5790_v28 }
 0x202   : > { %v1137_v16 = vsel %vm736_vm9, %v8912_v43, %v4275_v30  ;;  %v945_v50 = vsel %vm736_vm9, %v4190_v8, %v8913_v4  ;;  %3081 = vmatprep.subr.bf16.mxu0 %v2811_v47  ;;  %8915 = vst [vmem:[#allocation60_spill] sm:$0xff] %v6528_v40  ;;  %3120 = vmatprep.subr.bf16.mxu1 %v2829_v29  ;;  %v8919_v47 = vld [vmem:[#allocation41_spill] sm:$0xff]  ;;  %v8920_v4 = vunpack.i.l.bf16 %v5866_v3  ;;  %v8922_v30 = vunpack.i.h.bf16 %v6044_v15 }
 0x203   : > { %v1022_v57 = vsel %vm817_vm10, %v4236_v46, %v8914_v56  ;;  %v751_v61 = vsel %vm736_vm9, %v8917_v31, %v8916_v42  ;;  %v6544_v59 = vsel %vm736_vm9, %v8604_v17, %v8918_v12  ;;  %v2810_v43 = vpack.c.bf16 %v1025_v6, %v8919_v47  ;;  %v8921_v56 = vld [vmem:[#allocation62_spill] sm:$0xff]  ;;  %v8924_v47 = vld [vmem:[#allocation43_spill] sm:$0xff] }
 0x204   : > { %v831_v29 = vsel %vm817_vm10, %v4151_v20, %v8920_v4  ;;  %v2828_v5 = vpack.c.bf16 %v8921_v56, %v1137_v16  ;;  %v946_v42 = vsel %vm736_vm9, %v8922_v30, %v4190_v8  ;;  %v4156_v31 = vunpack.i.h.bf16 %v5866_v3 }
 0x205   : > { %v8923_v12 = vpack.i.bf16 %v5958_v2, %v6245_v52  ;;  %v2795_v6 = vpack.c.bf16 %v945_v50, %v831_v29  ;;  %v2813_v17 = vpack.c.bf16 %v1022_v57, %v8924_v47  ;;  %v8925_v55 = vunpack.i.l.bf16 %v6083_v33  ;;  %3082 = vmatpush1.bf16.msra.mxu0 %v2810_v43  ;;  %v6576_v33 = vpop.permute.xlu0 %4368 }
 0x206   : > { %v4351_v4 = vunpack.i.h.bf16 %v6494_v49  ;;  %v4350_v56 = vunpack.i.l.bf16 %v6494_v49  ;;  %3121 = vmatpush1.bf16.msra.mxu1 %v2828_v5  ;;  %v8926_v8 = vunpack.i.l.bf16 %v5864_v44  ;;  %v8927_v50 = vunpack.i.h.bf16 %v5938_v11 }
 0x207   : > { %4643 = vrot.lane.b32.xlu0 %v8923_v12, %s4879_s17  ;;  %v1023_v16 = vsel %vm817_vm10, %v8925_v55, %v4236_v46  ;;  %3083 = vmatprep.subr.bf16.mxu0 %v2795_v6  ;;  %v6578_v46 = vpop.permute.xlu1 %4373  ;;  %v8929_v49 = vunpack.i.l.bf16 %v5890_v34  ;;  %v8930_v5 = vunpack.i.l.bf16 %v5788_v48  ;;  %v8605_v29 = vunpack.i.h.bf16 %v6421_v26 }
 0x208   : > { %v832_v30 = vsel %vm817_vm10, %v8926_v8, %v4151_v20  ;;  %v943_v57 = vsel %vm736_vm9, %v4195_v36, %v8927_v50  ;;  %8928 = vst [vmem:[#allocation61_spill] sm:$0xff] %v6578_v46  ;;  %3122 = vmatprep.subr.bf16.mxu1 %v2813_v17  ;;  %v8931_v20 = vunpack.i.h.bf16 %v5843_v54  ;;  %v4360_v6 = vunpack.i.l.bf16 %v6496_v13  ;;  %v8932_v17 = vld [vmem:[#allocation42_spill] sm:$0xff]  ;;  %v8934_v8 = vld [vmem:[#allocation21_spill] sm:$0xff]  ;;  %v8970_v54 = vld [vmem:[#allocation91_spill] sm:$0xff] }
 0x209   : > { %v2794_v55 = vpack.c.bf16 %v946_v42, %v832_v30  ;;  %v829_v44 = vsel %vm817_vm10, %v4156_v31, %v8929_v49  ;;  %v2812_v42 = vpack.c.bf16 %v1023_v16, %v8932_v17  ;;  %v8933_v47 = vpack.i.bf16 %v6344_v0, %v6195_v14  ;;  %v8938_v17 = vld [vmem:[#allocation22_spill] sm:$0xff]  ;;  %v9012_v14 = vld [vmem:[#allocation113_spill] sm:$0xff] }
 0x20a   : > { %v752_v43 = vsel %vm736_vm9, %v8931_v20, %v8930_v5  ;;  %v2779_v30 = vpack.c.bf16 %v8934_v8, %v751_v61  ;;  %v2797_v50 = vpack.c.bf16 %v943_v57, %v829_v44  ;;  %v4662_v49 = vpack.i.bf16 %v6189_v32, %v6362_v18  ;;  %v8940_v8 = vld [vmem:[#allocation23_spill] sm:$0xff] }
 0x20b   : > { %4653 = vrot.lane.b32.xlu0 %v8933_v47, %s4879_s17  ;;  %v8935_v5 = vunpack.i.h.bf16 %v5936_v25  ;;  %v4355_v12 = vunpack.i.l.bf16 %v6528_v40  ;;  %3084 = vmatpush1.bf16.msra.mxu0 %v2794_v55  ;;  %v2326_v16 = vsel %vm817_vm10, %v4350_v56, %v4351_v4  ;;  %v2327_v61 = vsel %vm817_vm10, %v8605_v29, %v4350_v56  ;;  %v6620_v55 = vpop.permute.xlu1 %4383 }
 0x20c   : > { %3123 = vmatpush1.bf16.msra.mxu1 %v2812_v42  ;;  %v8936_v57 = vunpack.i.l.bf16 %v5790_v28  ;;  %v8937_v44 = vunpack.i.h.bf16 %v5788_v48  ;;  %3085 = vmatprep.subr.bf16.mxu0 %v2779_v30  ;;  %v2778_v42 = vpack.c.bf16 %v8938_v17, %v752_v43  ;;  %v8939_v47 = vunpack.i.l.bf16 %v5866_v3 }
 0x20d   : > { %v944_v20 = vsel %vm736_vm9, %v8935_v5, %v4195_v36  ;;  %v6618_v36 = vpop.permute.xlu0 %4378  ;;  %3124 = vmatprep.subr.bf16.mxu1 %v2797_v50  ;;  %v2781_v48 = vpack.c.bf16 %v8940_v8, %v6544_v59  ;;  %v4346_v5 = vunpack.i.h.bf16 %v6453_v9  ;;  %v8606_v30 = vunpack.i.h.bf16 %v6528_v40 }
 0x20e   : > { %v750_v25 = vsel %vm736_vm9, %v8937_v44, %v8936_v57  ;;  %v830_v56 = vsel %vm817_vm10, %v8939_v47, %v4156_v31  ;;  %v8941_v44 = vunpack.i.h.bf16 %v6496_v13  ;;  %v4366_v43 = vunpack.i.h.bf16 %v6530_v35 }
 0x20f   : > { %v2796_v57 = vpack.c.bf16 %v944_v20, %v830_v56  ;;  %v4365_v3 = vunpack.i.l.bf16 %v6530_v35  ;;  %4663 = vrot.lane.b32.xlu0 %v4662_v49, %s4879_s17  ;;  %v2987_v31 = vpack.c.bf16 %v2326_v16, %v2326_v16  ;;  %v2986_v17 = vpack.c.bf16 %v2327_v61, %v2327_v61  ;;  %3086 = vmatpush1.bf16.msra.mxu0 %v2778_v42  ;;  %v6648_v49 = vpop.permute.xlu1 %4398  ;;  %v8943_v16 = vld [vmem:[#allocation24_spill] sm:$0xff] }
 0x210   : > { %v2324_v50 = vsel %vm817_vm10, %v4360_v6, %v8941_v44  ;;  %v8607_v59 = vunpack.i.h.bf16 %v6576_v33  ;;  %v4370_v47 = vunpack.i.l.bf16 %v6576_v33  ;;  %v2247_v20 = vsel %vm736_vm9, %v4346_v5, %v4355_v12 }
 0x211   : > { %3125 = vmatpush1.bf16.msra.mxu1 %v2796_v57  ;;  %v2325_v56 = vsel %vm817_vm10, %v4351_v4, %v4360_v6  ;;  %3751 = vmatprep.subr.msk.bf16.mxu0 %vm3022_vm11, %v2987_v31  ;;  %v6646_v35 = vpop.permute.xlu0 %4388  ;;  %v2780_v61 = vpack.c.bf16 %v8943_v16, %v750_v25  ;;  %v2989_v44 = vpack.c.bf16 %v2324_v50, %v2324_v50  ;;  %v8609_v42 = vunpack.i.l.bf16 %v6618_v36  ;;  %v8944_v31 = vld [vmem:[#allocation81_spill] sm:$0xff] }
 0x212   : > { %8942 = vst [vmem:[#allocation40_spill] sm:$0xff] %v6646_v35  ;;  %3126 = vmatprep.subr.bf16.mxu1 %v2781_v48  ;;  %v4385_v29 = vunpack.i.l.bf16 %v6620_v55  ;;  %v2248_v4 = vsel %vm736_vm9, %v8606_v30, %v4346_v5  ;;  %v3024_v6 = vsel %vm3022_vm11, %v2986_v17, 0  ;;  %v2971_v8 = vpack.c.bf16 %v8944_v31, %v2247_v20 }
 0x213   : > { %v2133_v48 = vsel %vm817_vm10, %v4365_v3, %v4366_v43  ;;  %v2988_v25 = vpack.c.bf16 %v2325_v56, %v2325_v56  ;;  %v4376_v50 = vunpack.i.h.bf16 %v6578_v46  ;;  %v4381_v16 = vunpack.i.h.bf16 %v6618_v36  ;;  %3092 = vmatpush2.bf16.msra.mxu0 %v3024_v6  ;;  %v6671_v20 = vpop.permute.xlu1 %4408  ;;  %v8947_v56 = vld [vmem:[#allocation77_spill] sm:$0xff] }
 0x214   : > { %v2245_v5 = vsel %vm736_vm9, %v4370_v47, %v8607_v59  ;;  %3093 = vmatprep.subr.bf16.mxu0 %v2971_v8  ;;  %8946 = vst [vmem:[#allocation41_spill] sm:$0xff] %v6671_v20  ;;  %v2970_v31 = vpack.c.bf16 %v8947_v56, %v2248_v4  ;;  %v8948_v30 = vunpack.i.l.bf16 %v6578_v46  ;;  %v8949_v59 = vunpack.i.h.bf16 %v6620_v55 }
 0x215   : > { %3127 = vmatpush1.bf16.msra.mxu1 %v2780_v61  ;;  %v6669_v17 = vpop.permute.xlu0 %4393  ;;  %v1940_v8 = vsel %vm817_vm10, %v4376_v50, %v8609_v42  ;;  %v8612_v4 = vunpack.i.h.bf16 %v6646_v35  ;;  %v2955_v56 = vpack.c.bf16 %v2133_v48, %v5698_v23  ;;  %v8951_v42 = vld [vmem:[#allocation90_spill] sm:$0xff]  ;;  %v8952_v15 = vunpack.i.l.bf16 %v6646_v35 }
 0x216   : > { %8945 = vst [vmem:[#allocation63_spill] sm:$0xff] %v6669_v17  ;;  %3753 = vmatprep.subr.msk.bf16.mxu1 %vm3022_vm11, %v2989_v44  ;;  %v2134_v6 = vsel %vm817_vm10, %v8948_v30, %v4365_v3  ;;  %v2054_v57 = vsel %vm736_vm9, %v4385_v29, %v8949_v59  ;;  %v2246_v44 = vsel %vm736_vm9, %v4355_v12, %v4370_v47  ;;  %v3030_v30 = vsel %vm3022_vm11, %v2988_v25, 0  ;;  %v8950_v3 = vld [vmem:[#allocation83_spill] sm:$0xff] }
 0x217   : > { %v2973_v61 = vpack.c.bf16 %v8950_v3, %v2245_v5  ;;  %v4396_v46 = vunpack.i.h.bf16 %v6669_v17  ;;  %3094 = vmatpush2.bf16.msra.mxu0 %v2970_v31  ;;  %v2954_v40 = vpack.c.bf16 %v2134_v6, %v8951_v42  ;;  %v2131_v59 = vsel %vm817_vm10, %v4381_v16, %v8952_v15  ;;  %v6706_v25 = vpop.permute.xlu1 %4418  ;;  %v8953_v42 = vld [vmem:[#allocation84_spill] sm:$0xff] }
 0x218   : > { %v2132_v12 = vsel %vm817_vm10, %v4366_v43, %v4381_v16  ;;  %v8615_v23 = vunpack.i.h.bf16 %v6671_v20  ;;  %v8614_v47 = vunpack.i.l.bf16 %v6671_v20  ;;  %3095 = vmatprep.subr.bf16.mxu0 %v2955_v56  ;;  %v2939_v5 = vpack.c.bf16 %v2054_v57, %v1940_v8 }
 0x219   : > { %3133 = vmatpush2.bf16.msra.mxu1 %v3030_v30  ;;  %v6704_v48 = vpop.permute.xlu0 %4403  ;;  %v2972_v31 = vpack.c.bf16 %v8953_v42, %v2246_v44  ;;  %v4400_v6 = vunpack.i.l.bf16 %v6648_v49  ;;  %v8954_v43 = vunpack.i.l.bf16 %v6669_v17  ;;  %v4401_v56 = vunpack.i.h.bf16 %v6648_v49  ;;  %v8964_v17 = vld [vmem:[#allocation87_spill] sm:$0xff] }
 0x21a   : > { %3134 = vmatprep.subr.bf16.mxu1 %v2973_v61  ;;  %v8613_v15 = vunpack.i.h.bf16 %v6704_v48  ;;  %v4405_v30 = vunpack.i.l.bf16 %v6704_v48  ;;  %v2957_v3 = vpack.c.bf16 %v2131_v59, %v5733_v58  ;;  %v1941_v57 = vsel %vm817_vm10, %v8612_v4, %v4376_v50  ;;  %v8955_v61 = vld [vmem:[#allocation86_spill] sm:$0xff] }
 0x21b   : > { %v2055_v16 = vsel %vm736_vm9, %v8954_v43, %v4385_v29  ;;  %v2956_v8 = vpack.c.bf16 %v2132_v12, %v8955_v61  ;;  %v4420_v42 = vunpack.i.l.bf16 %v6706_v25  ;;  %3096 = vmatpush2.bf16.msra.mxu0 %v2954_v40  ;;  %v1861_v29 = vsel %vm736_vm9, %v4396_v46, %v4400_v6  ;;  %v6731_v59 = vpop.permute.xlu1 %4423 }
 0x21c   : > { %v1938_v58 = vsel %vm817_vm10, %v4405_v30, %v8613_v15  ;;  %3097 = vmatprep.subr.bf16.mxu0 %v2939_v5  ;;  %8956 = vst [vmem:[#allocation62_spill] sm:$0xff] %v6731_v59  ;;  %v2938_v50 = vpack.c.bf16 %v2055_v16, %v1941_v57  ;;  %v2052_v40 = vsel %vm736_vm9, %v4401_v56, %v8614_v47  ;;  %v8620_v61 = vunpack.i.l.bf16 %v6731_v59  ;;  %v8958_v16 = vld [vmem:[#allocation89_spill] sm:$0xff] }
 0x21d   : > { %3135 = vmatpush2.bf16.msra.mxu1 %v2972_v31  ;;  %v4414_v49 = vpop.permute.xlu0 %4413  ;;  %v1862_v12 = vsel %vm736_vm9, %v8615_v23, %v4396_v46  ;;  %v8957_v5 = vunpack.i.l.bf16 %v6618_v36  ;;  %v2923_v57 = vpack.c.bf16 %v8958_v16, %v1861_v29  ;;  %v2941_v4 = vpack.c.bf16 %v2052_v40, %v1938_v58  ;;  %v8960_v46 = vld [vmem:[#allocation93_spill] sm:$0xff] }
 0x21e   : > { %3136 = vmatprep.subr.bf16.mxu1 %v2957_v3  ;;  %v4416_v31 = vunpack.i.h.bf16 %v4414_v49  ;;  %v4415_v43 = vunpack.i.l.bf16 %v4414_v49  ;;  %v8959_v15 = vunpack.i.h.bf16 %v6620_v55  ;;  %v3906_v44 = vunpack.i.h.bf16 %v5283_v63 }
 0x21f   : > { %v1939_v3 = vsel %vm817_vm10, %v8957_v5, %v4405_v30  ;;  %3098 = vmatpush2.bf16.msra.mxu0 %v2938_v50  ;;  %v2922_v49 = vpack.c.bf16 %v8960_v46, %v1862_v12  ;;  %v8961_v23 = vunpack.i.h.bf16 %v6706_v25  ;;  %v4426_v29 = vunpack.i.h.bf16 %v6731_v59  ;;  %v4434_v58 = vpop.permute.xlu1 %4433  ;;  %v8963_v46 = vld [vmem:[#allocation38_spill] sm:$0xff] }
 0x220   : > { %v2053_v47 = vsel %vm736_vm9, %v8959_v15, %v4401_v56  ;;  %v1747_v36 = vsel %vm817_vm10, %v4415_v43, %v4416_v31  ;;  %3099 = vmatprep.subr.bf16.mxu0 %v2923_v57  ;;  %v8962_v15 = vld [vmem:[#allocation71_spill] sm:$0xff]  ;;  %v4436_v5 = vunpack.i.h.bf16 %v4434_v58  ;;  %v4435_v16 = vunpack.i.l.bf16 %v4434_v58  ;;  %v8965_v57 = vld [vmem:[#allocation98_spill] sm:$0xff] }
 0x221   : > { %3137 = vmatpush2.bf16.msra.mxu1 %v2956_v8  ;;  %v1859_v30 = vsel %vm736_vm9, %v4420_v42, %v8961_v23  ;;  %v4429_v55 = vpop.permute.xlu0 %4428  ;;  %v2907_v56 = vpack.c.bf16 %v1747_v36, %v8962_v15  ;;  %v2940_v50 = vpack.c.bf16 %v2053_v47, %v1939_v3  ;;  %v1748_v8 = vsel %vm817_vm10, %v8620_v61, %v4415_v43  ;;  %v8966_v36 = vld [vmem:[#allocation94_spill] sm:$0xff]  ;;  %v8967_v58 = vld [vmem:[#allocation79_spill] sm:$0xff] }
 0x222   : > { %3138 = vmatprep.subr.bf16.mxu1 %v2941_v4  ;;  %v4431_v40 = vunpack.i.h.bf16 %v4429_v55  ;;  %v4430_v12 = vunpack.i.l.bf16 %v4429_v55  ;;  %v2925_v1 = vpack.c.bf16 %v8965_v57, %v1859_v30  ;;  %v1860_v4 = vsel %vm736_vm9, %v4400_v6, %v4420_v42  ;;  %v8968_v6 = vld [vmem:[#allocation67_spill] sm:$0xff] }
 0x223   : > { %v4100_v3 = vunpack.i.l.bf16 %v8966_v36  ;;  %3100 = vmatpush2.bf16.msra.mxu0 %v2922_v49  ;;  %v1664_v55 = vsel %vm736_vm9, %v4435_v16, %v4436_v5  ;;  %v6779_v30 = vpop.permute.xlu1 %4443  ;;  %v2906_v42 = vpack.c.bf16 %v1748_v8, %v8968_v6  ;;  %v8969_v49 = vunpack.i.h.bf16 %v6263_v62 }
 0x224   : > { %v1550_v43 = vsel %vm817_vm10, %v4426_v29, %v4430_v12  ;;  %3101 = vmatprep.subr.bf16.mxu0 %v2907_v56  ;;  %v2924_v23 = vpack.c.bf16 %v8970_v54, %v1860_v4  ;;  %v1746_v56 = vsel %vm817_vm10, %v4416_v31, %v4431_v40  ;;  %v8971_v15 = vunpack.i.l.bf16 %v5283_v63 }
 0x225   : > { %3139 = vmatpush2.bf16.msra.mxu1 %v2940_v50  ;;  %v6777_v61 = vpop.permute.xlu0 %4438  ;;  %v2895_v57 = vpack.c.bf16 %v1664_v55, %v1550_v43  ;;  %v1665_v50 = vsel %vm736_vm9, %v8969_v49, %v4435_v16  ;;  %v8973_v8 = vunpack.i.l.bf16 %v8963_v46  ;;  %v8974_v16 = vunpack.i.h.bf16 %v8964_v17 }
 0x226   : > { %3140 = vmatprep.subr.bf16.mxu1 %v2925_v1  ;;  %v8621_v47 = vunpack.i.l.bf16 %v6777_v61  ;;  %v6794_v1 = vsel %vm1075_vm1, %v8971_v15, %v3906_v44  ;;  %v8975_v43 = vunpack.i.l.bf16 %v8964_v17  ;;  %v4441_v63 = vunpack.i.h.bf16 %v6777_v61 }
 0x227   : > { %8972 = vst [vmem:[#allocation43_spill] sm:$0xff] %v6794_v1  ;;  %v6800_v62 = vsel %vm1075_vm1, %v3906_v44, %v8973_v8  ;;  %v8976_v31 = vunpack.i.l.bf16 %v6302_v39  ;;  %3102 = vmatpush2.bf16.msra.mxu0 %v2906_v42  ;;  %v8977_v15 = vunpack.i.h.bf16 %v8966_v36  ;;  %v8978_v49 = vunpack.i.h.bf16 %v8967_v58  ;;  %v6834_v8 = vpop.permute.xlu1 %4458 }
 0x228   : > { %v6808_v54 = vsel %vm1991_vm6, %v8975_v43, %v8974_v16  ;;  %v1745_v44 = vsel %vm817_vm10, %v4431_v40, %v8621_v47  ;;  %v8979_v39 = vunpack.i.l.bf16 %v8967_v58  ;;  %3153 = vmatprep.subr.bf16.mxu0 %v2895_v57  ;;  %8981 = vst [vmem:[#allocation21_spill] sm:$0xff] %v6834_v8  ;;  %v8982_v40 = vld [vmem:[#allocation72_spill] sm:$0xff]  ;;  %v8983_v43 = vld [vmem:[#allocation70_spill] sm:$0xff]  ;;  %v8625_v55 = vunpack.i.h.bf16 %v6834_v8 }
 0x229   : > { %v1551_v4 = vsel %vm817_vm10, %v8976_v31, %v4426_v29  ;;  %3141 = vmatpush2.bf16.msra.mxu1 %v2924_v23  ;;  %v1471_v6 = vsel %vm736_vm9, %v4100_v3, %v8977_v15  ;;  %v6832_v23 = vpop.permute.xlu0 %4448  ;;  %v2909_v16 = vpack.c.bf16 %v1745_v44, %v8982_v40  ;;  %v2908_v31 = vpack.c.bf16 %v1746_v56, %v8983_v43  ;;  %v6852_v56 = vld.sshfl [vmem:[%s8406_s2] sm:$0x33 pattern:$0x76325410]  ;;  %v4847_v44 = vld [vmem:[#allocation2 + $0x68] sm:$0xff] }
 0x22a   : > { %v6830_v29 = vsel %vm2184_vm5, %v8979_v39, %v8978_v49  ;;  %v2894_v42 = vpack.c.bf16 %v1665_v50, %v1551_v4  ;;  %v8623_v15 = vunpack.i.h.bf16 %v6832_v23  ;;  %v4450_v47 = vunpack.i.l.bf16 %v6832_v23  ;;  %8985 = vst [vmem:[#allocation22_spill] sm:$0xff] %v6852_v56  ;;  %3104 = vmatmul.mubr.bf16.vlgmr.msra.gmra.mxu0 %v6852_v56  ;;  %v8986_v40 = vld [vmem:[#allocation88_spill] sm:$0xff] }
 0x22b   : > { %8980 = vst [vmem:[#allocation42_spill] sm:$0xff] %v6830_v29  ;;  %v4460_v59 = vunpack.i.l.bf16 %v6834_v8  ;;  %v8984_v49 = vunpack.i.l.bf16 %v6300_v21  ;;  %v1549_v50 = vsel %vm817_vm10, %v4430_v12, %v4441_v63  ;;  %v4446_v4 = vunpack.i.h.bf16 %v6779_v30  ;;  %3142 = vmatprep.subr.bf16.mxu1 %v2909_v16 }
 0x22c   : > { %v2879_v39 = vpack.c.bf16 %v4847_v44, %v1471_v6  ;;  %3154 = vmatpush1.bf16.msra.mxu0 %v2894_v42  ;;  %v8987_v12 = vunpack.i.l.bf16 %v6779_v30  ;;  %v6868_v44 = vpop.permute.xlu1 %4468  ;;  %v8988_v42 = vld [vmem:[#allocation99_spill] sm:$0xff]  ;;  %v8995_v9 = vunpack.i.h.bf16 %v8966_v36  ;;  %v9005_v18 = vunpack.i.h.bf16 %v5766_v19 }
 0x22d   : > { %v1472_v57 = vsel %vm736_vm9, %v8984_v49, %v4100_v3  ;;  %v1663_v3 = vsel %vm736_vm9, %v4436_v5, %v4450_v47  ;;  %3143 = vmatpush2.bf16.msra.mxu1 %v2908_v31  ;;  %v1662_v49 = vsel %vm736_vm9, %v4450_v47, %v8623_v15  ;;  %v6866_v6 = vpop.permute.xlu0 %4453  ;;  %v1469_v5 = vsel %vm736_vm9, %v4460_v59, %v8625_v55  ;;  %v4848_v47 = vld [vmem:[#allocation2 + $0x50] sm:$0xff]  ;;  %v8990_v15 = vld [vmem:[#allocation108_spill] sm:$0xff]  ;;  %v4849_v31 = vld [vmem:[#allocation2 + $0x48] sm:$0xff] }
 0x22e   : > { %v1548_v43 = vsel %vm817_vm10, %v4441_v63, %v8987_v12  ;;  %v2896_v16 = vpack.c.bf16 %v1663_v3, %v1549_v50  ;;  %3155 = vmatprep.subr.bf16.mxu0 %v2879_v39  ;;  %v4455_v12 = vunpack.i.l.bf16 %v6866_v6  ;;  %v2878_v50 = vpack.c.bf16 %v4848_v47, %v1472_v57  ;;  %v8989_v39 = vld [vmem:[#allocation127_spill] sm:$0xff]  ;;  %3756 = vmatprep.mubr.msk.bf16.mxu0 %vm3018_vm8, %v8990_v15 }
 0x22f   : > { %v2897_v21 = vpack.c.bf16 %v1662_v49, %v1548_v43  ;;  %v8991_v49 = vld [vmem:[#allocation100_spill] sm:$0xff]  ;;  %v8992_v55 = vunpack.i.h.bf16 %v6383_v60  ;;  %v2881_v57 = vpack.c.bf16 %v4849_v31, %v1469_v5  ;;  %v8993_v47 = vunpack.i.h.bf16 %v8986_v40  ;;  %v8997_v36 = vld [vmem:[#allocation107_spill] sm:$0xff] }
 0x230   : > { %3145 = vmatmul.mubr.bf16.vlgmr.msra.gmra.mxu1 %v6852_v56  ;;  %v8994_v3 = vunpack.i.l.bf16 %v8986_v40  ;;  %v1470_v60 = vsel %vm736_vm9, %v8995_v9, %v4460_v59  ;;  %3156 = vmatpush1.bf16.msra.mxu0 %v2878_v50  ;;  %v8996_v31 = vld [vmem:[#allocation152_spill] sm:$0xff]  ;;  %v8998_v9 = vld [vmem:[#allocation153_spill] sm:$0xff]  ;;  %v9000_v32 = vunpack.i.l.bf16 %v8988_v42  ;;  %v9003_v59 = vunpack.i.h.bf16 %v8988_v42 }
 0x231   : > { %v1407_v63 = vsel %vm817_vm10, %v8992_v55, %v4446_v4  ;;  %3194 = vmatprep.subr.bf16.mxu1 %v2897_v21  ;;  %v4471_v55 = vunpack.i.h.bf16 %v6868_v44  ;;  %v1406_v21 = vsel %vm817_vm10, %v4446_v4, %v4455_v12  ;;  %v6906_v41 = vpop.permute.xlu0 %4463  ;;  %3758 = vmatprep.mubr.msk.bf16.mxu1 %vm3018_vm8, %v8990_v15  ;;  %v8999_v4 = vld [vmem:[#allocation76_spill] sm:$0xff]  ;;  %v4456_v43 = vunpack.i.h.bf16 %v6866_v6  ;;  %v9008_v6 = vld [vmem:[#allocation121_spill] sm:$0xff]  ;;  %v9016_v15 = vld [vmem:[#allocation151_spill] sm:$0xff] }
 0x232   : > { %v6895_v51 = vsel %vm1798_vm7, %v8994_v3, %v8993_v47  ;;  %3195 = vmatpush1.bf16.msra.mxu1 %v2896_v16  ;;  %v6908_v3 = vpop.permute.xlu1 %4478  ;;  %v2863_v47 = vpack.c.bf16 %v1406_v21, %v8997_v36  ;;  %v4280_v16 = vunpack.i.l.bf16 %v8996_v31  ;;  %v2862_v50 = vpack.c.bf16 %v1407_v63, %v8999_v4  ;;  %v4850_v63 = vld [vmem:[#allocation2 + $0x8] sm:$0xff] }
 0x233   : > { %3196 = vmatprep.subr.bf16.mxu1 %v2881_v57  ;;  %v9001_v57 = vunpack.i.h.bf16 %v5790_v28  ;;  %v9002_v36 = vunpack.i.l.bf16 %v8991_v49  ;;  %v2880_v4 = vpack.c.bf16 %v4850_v63, %v1470_v60  ;;  %v1405_v28 = vsel %vm817_vm10, %v4455_v12, %v4471_v55  ;;  %v9007_v60 = vld [vmem:[#allocation111_spill] sm:$0xff] }
 0x234   : > { %3157 = vmatprep.subr.bf16.mxu0 %v2863_v47  ;;  %v9009_v12 = vunpack.i.l.bf16 %v6908_v3  ;;  %v9011_v47 = vunpack.i.l.bf16 %v6421_v26  ;;  %v2864_v53 = vpack.c.bf16 %v1405_v28, %v9012_v14  ;;  %v4241_v14 = vunpack.i.h.bf16 %v6113_v22  ;;  %v9015_v28 = vld [vmem:[#allocation140_spill] sm:$0xff] }
 0x235   : > { %v6925_v21 = vsel %vm736_vm9, %v9001_v57, %v9000_v32  ;;  %v6933_v0 = vsel %vm736_vm9, %v9003_v59, %v9002_v36  ;;  %v4470_v32 = vunpack.i.l.bf16 %v6868_v44  ;;  %v9004_v57 = vunpack.i.l.bf16 %v6906_v41  ;;  %3158 = vmatpush1.bf16.msra.mxu0 %v2862_v50  ;;  %v4474_v63 = vpop.permute.xlu0 %4473 }
 0x236   : > { %3197 = vmatpush1.bf16.msra.mxu1 %v2880_v4  ;;  %v6950_v5 = vpop.permute.xlu1 %4488  ;;  %v1404_v19 = vsel %vm817_vm10, %v4471_v55, %v9009_v12  ;;  %v4475_v50 = vunpack.i.l.bf16 %v4474_v63  ;;  %v9010_v36 = vunpack.i.h.bf16 %v8996_v31  ;;  %v1214_v2 = vsel %vm817_vm10, %v9011_v47, %v4456_v43  ;;  %v9013_v55 = vld [vmem:[#allocation112_spill] sm:$0xff] }
 0x237   : > { %v6946_v59 = vsel %vm1268_vm4, %v9005_v18, %v9004_v57  ;;  %v4476_v57 = vunpack.i.h.bf16 %v4474_v63  ;;  %v2865_v12 = vpack.c.bf16 %v1404_v19, %v9013_v55  ;;  %v9014_v63 = vunpack.i.h.bf16 %v6455_v45 }
 0x238   : > { %9006 = vst [vmem:[#allocation23_spill] sm:$0xff] %v6946_v59  ;;  %v4647_v44 = vpack.i.bf16 %v6794_v1, %v6946_v59  ;;  %v1134_v4 = vsel %vm736_vm9, %v4280_v16, %v9010_v36  ;;  %v4490_v59 = vunpack.i.l.bf16 %v6950_v5  ;;  %v1213_v26 = vsel %vm817_vm10, %v4456_v43, %v4470_v32 }
 0x239   : > { %v1328_v18 = vsel %vm736_vm9, %v9014_v63, %v4475_v50  ;;  %v1327_v47 = vsel %vm736_vm9, %v4475_v50, %v4476_v57  ;;  %3198 = vmatprep.subr.bf16.mxu1 %v2865_v12  ;;  %v6982_v19 = vpop.permute.xlu0 %4483  ;;  %v4481_v63 = vunpack.i.h.bf16 %v6908_v3  ;;  %v4285_v56 = vunpack.i.l.bf16 %v9016_v15 }
 0x23a   : > { %4648 = vrot.lane.b32.xlu1 %v4647_v44, %s4878_s16  ;;  %v2846_v44 = vpack.c.bf16 %v1328_v18, %v1214_v2  ;;  %v4499_v45 = vpop.permute.xlu1 %4498  ;;  %v2847_v55 = vpack.c.bf16 %v1327_v47, %v1213_v26  ;;  %3199 = vmatpush1.bf16.msra.mxu1 %v2864_v53  ;;  %v8642_v36 = vunpack.i.l.bf16 %v6982_v19  ;;  %v9017_v50 = vunpack.i.h.bf16 %v6167_v37  ;;  %v9019_v53 = vld [vmem:[#allocation65_spill] sm:$0xff]  ;;  %v9023_v47 = vld [vmem:[#allocation122_spill] sm:$0xff] }
 0x23b   : > { %v4501_v8 = vunpack.i.h.bf16 %v4499_v45  ;;  %v4500_v43 = vunpack.i.l.bf16 %v4499_v45  ;;  %v1326_v2 = vsel %vm736_vm9, %v4476_v57, %v4490_v59  ;;  %v9018_v26 = vpack.i.bf16 %v6830_v29, %v6800_v62 }
 0x23c   : > { %v1135_v52 = vsel %vm736_vm9, %v9017_v50, %v4280_v16  ;;  %3159 = vmatprep.subr.bf16.mxu0 %v2847_v55  ;;  %v2831_v18 = vpack.c.bf16 %v9019_v53, %v1134_v4  ;;  %v9020_v37 = vunpack.i.h.bf16 %v8967_v58  ;;  %v1211_v16 = vsel %vm817_vm10, %v4481_v63, %v8642_v36  ;;  %v9025_v53 = vld [vmem:[#allocation143_spill] sm:$0xff] }
 0x23d   : > { %v7000_v12 = vsel %vm2184_vm5, %v4500_v43, %v4501_v8  ;;  %3160 = vmatpush1.bf16.msra.mxu0 %v2846_v44  ;;  %v9022_v57 = vunpack.i.h.bf16 %v6950_v5  ;;  %v7017_v55 = vpop.permute.xlu0 %4493  ;;  %v9024_v50 = vunpack.i.l.bf16 %v9015_v28 }
 0x23e   : > { %4658 = vrot.lane.b32.xlu1 %v9018_v26, %s4878_s16  ;;  %v7006_v15 = vsel %vm2184_vm5, %v9020_v37, %v4500_v43  ;;  %v7019_v58 = vpop.permute.xlu1 %4508  ;;  %3161 = vmatprep.subr.bf16.mxu0 %v2831_v18  ;;  %v4246_v18 = vunpack.i.h.bf16 %v9015_v28  ;;  %v9028_v37 = vunpack.i.h.bf16 %v9008_v6 }
 0x23f   : > { %9021 = vst [vmem:[#allocation24_spill] sm:$0xff] %v7006_v15  ;;  %v1325_v4 = vsel %vm736_vm9, %v4490_v59, %v9022_v57  ;;  %v4672_v44 = vpack.i.bf16 %v7000_v12, %v7006_v15  ;;  %v1020_v26 = vsel %vm817_vm10, %v4241_v14, %v9024_v50  ;;  %v1212_v59 = vsel %vm817_vm10, %v4470_v32, %v4481_v63 }
 0x240   : > { %v2849_v43 = vpack.c.bf16 %v1325_v4, %v1211_v16  ;;  %v8643_v36 = vunpack.i.l.bf16 %v7019_v58  ;;  %v2848_v45 = vpack.c.bf16 %v1326_v2, %v1212_v59  ;;  %v9026_v16 = vpack.i.bf16 %v8989_v39, %v6794_v1  ;;  %v9027_v4 = vld [vmem:[#allocation66_spill] sm:$0xff] }
 0x241   : > { %4673 = vrot.lane.b32.xlu0 %v4672_v44, %s4878_s16  ;;  %v2830_v50 = vpack.c.bf16 %v9027_v4, %v1135_v52  ;;  %v9029_v32 = vunpack.i.l.bf16 %v9008_v6  ;;  %v9030_v57 = vunpack.i.l.bf16 %v6113_v22  ;;  %v9031_v59 = vunpack.i.h.bf16 %v8996_v31  ;;  %v9032_v44 = vld [vmem:[#allocation45_spill] sm:$0xff]  ;;  %v7060_v22 = vpop.permute.xlu0 %4503 }
 0x242   : > { %4668 = vrot.lane.b32.xlu1 %v9026_v16, %s4879_s17  ;;  %v7057_v52 = vsel %vm2184_vm5, %v4501_v8, %v8643_v36  ;;  %3200 = vmatprep.subr.bf16.mxu1 %v2849_v43  ;;  %v2815_v4 = vpack.c.bf16 %v1020_v26, %v9032_v44  ;;  %v4677_v31 = vpack.i.bf16 %v7006_v15, %v6830_v29  ;;  %v9034_v43 = vunpack.i.l.bf16 %v9007_v60  ;;  %v9044_v15 = vld [vmem:[#allocation46_spill] sm:$0xff] }
 0x243   : > { %v941_v63 = vsel %vm736_vm9, %v9029_v32, %v9028_v37  ;;  %v1021_v2 = vsel %vm817_vm10, %v9030_v57, %v4241_v14  ;;  %v1133_v16 = vsel %vm736_vm9, %v9031_v59, %v4285_v56  ;;  %3162 = vmatpush1.bf16.msra.mxu0 %v2830_v50  ;;  %3201 = vmatpush1.bf16.msra.mxu1 %v2848_v45  ;;  %v7062_v37 = vpop.permute.xlu1 %4518  ;;  %v9033_v57 = vunpack.i.l.bf16 %v7017_v55 }
 0x244   : > { %v4682_v14 = vpack.i.bf16 %v6808_v54, %v7057_v52  ;;  %3163 = vmatprep.subr.bf16.mxu0 %v2815_v4  ;;  %v9035_v45 = vunpack.i.h.bf16 %v5890_v34  ;;  %v9036_v50 = vunpack.i.l.bf16 %v9025_v53  ;;  %v9037_v59 = vunpack.i.h.bf16 %v8988_v42 }
 0x245   : > { %v1132_v8 = vsel %vm736_vm9, %v4285_v56, %v9033_v57  ;;  %v9038_v44 = vunpack.i.l.bf16 %v8988_v42  ;;  %v9039_v4 = vunpack.i.h.bf16 %v8991_v49  ;;  %v9040_v57 = vunpack.i.l.bf16 %v8991_v49 }
 0x246   : > { %v827_v26 = vsel %vm817_vm10, %v9035_v45, %v9034_v43  ;;  %v1018_v32 = vsel %vm817_vm10, %v4246_v18, %v9036_v50  ;;  %v4166_v43 = vunpack.i.h.bf16 %v9007_v60  ;;  %v9041_v45 = vunpack.i.l.bf16 %v9008_v6  ;;  %4678 = vrot.lane.b32.xlu1 %v4677_v31, %s4879_s17  ;;  %4683 = vrot.lane.b32.xlu0 %v4682_v14, %s4878_s16 }
 0x247   : > { %v747_v56 = vsel %vm736_vm9, %v9038_v44, %v9037_v59  ;;  %v7094_v36 = vsel %vm736_vm9, %v9040_v57, %v9039_v4  ;;  %v9042_v50 = vunpack.i.h.bf16 %v5938_v11  ;;  %v9043_v59 = vld [vmem:[#allocation37_spill] sm:$0xff]  ;;  %v2814_v39 = vpack.c.bf16 %v1021_v2, %v9044_v15  ;;  %v9045_v57 = vld [vmem:[#allocation68_spill] sm:$0xff]  ;;  %v7120_v15 = vpop.permute.xlu0 %4513  ;;  %v7122_v2 = vpop.permute.xlu1 %4528 }
 0x248   : > { %v2833_v44 = vpack.c.bf16 %v9043_v59, %v1132_v8  ;;  %v4486_v4 = vunpack.i.h.bf16 %v6982_v19  ;;  %v2832_v29 = vpack.c.bf16 %v9045_v57, %v1133_v16  ;;  %v2799_v1 = vpack.c.bf16 %v941_v63, %v827_v26  ;;  %v9049_v63 = vld [vmem:[#allocation48_spill] sm:$0xff]  ;;  %v9050_v26 = vld [vmem:[#allocation146_spill] sm:$0xff]  ;;  %v9053_v59 = vld [vmem:[#allocation25_spill] sm:$0xff] }
 0x249   : > { %v942_v42 = vsel %vm736_vm9, %v9042_v50, %v9041_v45  ;;  %v9046_v49 = vunpack.i.h.bf16 %v9023_v47  ;;  %v9047_v11 = vunpack.i.l.bf16 %v9023_v47  ;;  %v9048_v31 = vunpack.i.l.bf16 %v9015_v28  ;;  %3164 = vmatpush1.bf16.msra.mxu0 %v2814_v39 }
 0x24a   : > { %v4505_v8 = vunpack.i.l.bf16 %v7060_v22  ;;  %3202 = vmatprep.subr.bf16.mxu1 %v2833_v44  ;;  %v2817_v16 = vpack.c.bf16 %v1018_v32, %v9049_v63  ;;  %v4692_v50 = vpack.i.bf16 %v9050_v26, %v7000_v12  ;;  %v9052_v28 = vunpack.i.l.bf16 %v5890_v34  ;;  %3165 = vmatprep.subr.bf16.mxu0 %v2799_v1  ;;  %v9054_v44 = vld [vmem:[#allocation26_spill] sm:$0xff] }
 0x24b   : > { %v939_v45 = vsel %vm736_vm9, %v9047_v11, %v9046_v49  ;;  %v1019_v14 = vsel %vm817_vm10, %v9048_v31, %v4246_v18  ;;  %v9051_v49 = vunpack.i.h.bf16 %v5890_v34  ;;  %3203 = vmatpush1.bf16.msra.mxu1 %v2832_v29  ;;  %v2783_v39 = vpack.c.bf16 %v9053_v59, %v747_v56  ;;  %v9055_v31 = vld [vmem:[#allocation114_spill] sm:$0xff] }
 0x24c   : > { %v2782_v57 = vpack.c.bf16 %v9054_v44, %v6925_v21  ;;  %v4496_v11 = vunpack.i.h.bf16 %v7017_v55  ;;  %3204 = vmatprep.subr.bf16.mxu1 %v2817_v16  ;;  %4693 = vrot.lane.b32.xlu0 %v4692_v50, %s4879_s17  ;;  %v9056_v63 = vunpack.i.l.bf16 %v9055_v31  ;;  %v9058_v1 = vunpack.i.l.bf16 %v9023_v47  ;;  %v7160_v44 = vpop.permute.xlu0 %4523 }
 0x24d   : > { %v828_v18 = vsel %vm817_vm10, %v9052_v28, %v9051_v49  ;;  %v9057_v49 = vld [vmem:[#allocation28_spill] sm:$0xff]  ;;  %v9059_v56 = vunpack.i.h.bf16 %v9008_v6  ;;  %v9060_v28 = vld [vmem:[#allocation47_spill] sm:$0xff]  ;;  %v8650_v47 = vunpack.i.l.bf16 %v7062_v37  ;;  %v4515_v6 = vunpack.i.l.bf16 %v7120_v15 }
 0x24e   : > { %v2798_v32 = vpack.c.bf16 %v942_v42, %v828_v18  ;;  %v825_v34 = vsel %vm817_vm10, %v4166_v43, %v9056_v63  ;;  %v2785_v29 = vpack.c.bf16 %v9057_v49, %v7094_v36  ;;  %v2816_v16 = vpack.c.bf16 %v1019_v14, %v9060_v28  ;;  %v7162_v63 = vpop.permute.xlu1 %4538 }
 0x24f   : > { %v940_v21 = vsel %vm736_vm9, %v9059_v56, %v9058_v1  ;;  %v2801_v59 = vpack.c.bf16 %v939_v45, %v825_v34  ;;  %v9061_v42 = vunpack.i.h.bf16 %v6496_v13  ;;  %v4506_v18 = vunpack.i.h.bf16 %v7060_v22 }
 0x250   : > { %v2322_v36 = vsel %vm817_vm10, %v4486_v4, %v4505_v8  ;;  %3166 = vmatpush1.bf16.msra.mxu0 %v2798_v32  ;;  %v9062_v45 = vunpack.i.l.bf16 %v9007_v60  ;;  %3205 = vmatpush1.bf16.msra.mxu1 %v2816_v16  ;;  %v4526_v22 = vunpack.i.h.bf16 %v7160_v44  ;;  %v4525_v14 = vunpack.i.l.bf16 %v7160_v44 }
 0x251   : > { %v2323_v50 = vsel %vm817_vm10, %v9061_v42, %v4486_v4  ;;  %v4540_v4 = vunpack.i.l.bf16 %v7162_v63  ;;  %3167 = vmatprep.subr.bf16.mxu0 %v2783_v39  ;;  %v9063_v34 = vunpack.i.h.bf16 %v6576_v33  ;;  %3206 = vmatprep.subr.bf16.mxu1 %v2801_v59  ;;  %v9064_v60 = vpack.i.bf16 %v8998_v9, %v6808_v54  ;;  %v7191_v59 = vpop.permute.xlu0 %4533 }
 0x252   : > { %v826_v13 = vsel %vm817_vm10, %v9062_v45, %v4166_v43  ;;  %v2990_v49 = vpack.c.bf16 %v2323_v50, %v2323_v50  ;;  %v2991_v1 = vpack.c.bf16 %v2322_v36, %v2322_v36  ;;  %v4521_v56 = vunpack.i.h.bf16 %v7062_v37 }
 0x253   : > { %v2244_v32 = vsel %vm736_vm9, %v9063_v34, %v4496_v11  ;;  %4703 = vrot.lane.b32.xlu0 %v9064_v60, %s4879_s17  ;;  %v2800_v43 = vpack.c.bf16 %v940_v21, %v826_v13  ;;  %v4530_v28 = vunpack.i.l.bf16 %v7122_v2  ;;  %v9065_v39 = vunpack.i.h.bf16 %v8964_v17  ;;  %v7193_v21 = vpop.permute.xlu1 %4548  ;;  %v9068_v60 = vld [vmem:[#allocation82_spill] sm:$0xff] }
 0x254   : > { %v2320_v16 = vsel %vm817_vm10, %v4506_v18, %v8650_v47  ;;  %3168 = vmatpush1.bf16.msra.mxu0 %v2782_v57  ;;  %v2243_v50 = vsel %vm736_vm9, %v4496_v11, %v4515_v6  ;;  %v7203_v36 = vsel %vm1991_vm6, %v4525_v14, %v4526_v22  ;;  %v9066_v44 = vunpack.i.h.bf16 %v8986_v40  ;;  %v9067_v40 = vld [vmem:[#allocation27_spill] sm:$0xff]  ;;  %v9075_v47 = vld [vmem:[#allocation126_spill] sm:$0xff] }
 0x255   : > { %v7185_v33 = vsel %vm1991_vm6, %v9065_v39, %v4525_v14  ;;  %3207 = vmatpush1.bf16.msra.mxu1 %v2800_v43  ;;  %v8649_v45 = vunpack.i.l.bf16 %v7191_v59  ;;  %3755 = vmatprep.subr.msk.bf16.mxu0 %vm3022_vm11, %v2991_v1  ;;  %v2321_v13 = vsel %vm817_vm10, %v4505_v8, %v4506_v18  ;;  %v4516_v11 = vunpack.i.h.bf16 %v7120_v15  ;;  %v9069_v1 = vld [vmem:[#allocation119_spill] sm:$0xff] }
 0x256   : > { %v4687_v42 = vpack.i.bf16 %v6895_v51, %v7185_v33  ;;  %v4712_v17 = vpack.i.bf16 %v7185_v33, %v6895_v51  ;;  %v7209_v57 = vsel %vm1798_vm7, %v9066_v44, %v4540_v4  ;;  %v4541_v34 = vunpack.i.h.bf16 %v7162_v63  ;;  %3208 = vmatprep.subr.bf16.mxu1 %v2785_v29 }
 0x257   : > { %v2784_v14 = vpack.c.bf16 %v9067_v40, %v6933_v0  ;;  %v2974_v39 = vpack.c.bf16 %v9068_v60, %v2244_v32  ;;  %v3036_v43 = vsel %vm3022_vm11, %v2990_v49, 0  ;;  %v2975_v44 = vpack.c.bf16 %v9069_v1, %v2243_v50  ;;  %v7232_v0 = vpop.permute.xlu0 %4543  ;;  %v7234_v32 = vpop.permute.xlu1 %4558 }
 0x258   : > { %4688 = vrot.lane.b32.xlu1 %v4687_v42, %s4878_s16  ;;  %4713 = vrot.lane.b32.xlu0 %v4712_v17, %s4879_s17  ;;  %v2129_v8 = vsel %vm817_vm10, %v4521_v56, %v4530_v28  ;;  %v9070_v15 = vunpack.i.l.bf16 %v6646_v35  ;;  %v2993_v18 = vpack.c.bf16 %v2320_v16, %v2320_v16  ;;  %v4697_v49 = vpack.i.bf16 %v7203_v36, %v7209_v57 }
 0x259   : > { %3174 = vmatpush2.bf16.msra.mxu0 %v3036_v43  ;;  %v2992_v42 = vpack.c.bf16 %v2321_v13, %v2321_v13  ;;  %3209 = vmatpush1.bf16.msra.mxu1 %v2784_v14  ;;  %v8651_v17 = vunpack.i.l.bf16 %v7232_v0  ;;  %v8652_v50 = vunpack.i.l.bf16 %v7234_v32  ;;  %v4722_v40 = vpack.i.bf16 %v7209_v57, %v7203_v36  ;;  %v9071_v14 = vld [vmem:[#allocation128_spill] sm:$0xff] }
 0x25a   : > { %v2130_v29 = vsel %vm817_vm10, %v9070_v15, %v4521_v56  ;;  %3175 = vmatprep.subr.bf16.mxu0 %v2975_v44  ;;  %v2241_v56 = vsel %vm736_vm9, %v4516_v11, %v8649_v45  ;;  %v2242_v16 = vsel %vm736_vm9, %v4515_v6, %v4516_v11  ;;  %v7252_v13 = vsel %vm1798_vm7, %v4540_v4, %v4541_v34 }
 0x25b   : > { %3757 = vmatprep.subr.msk.bf16.mxu1 %vm3022_vm11, %v2993_v18  ;;  %v2959_v60 = vpack.c.bf16 %v2129_v8, %v9071_v14  ;;  %v4536_v43 = vunpack.i.h.bf16 %v7191_v59  ;;  %v4551_v1 = vunpack.i.h.bf16 %v7193_v21  ;;  %v4550_v44 = vunpack.i.l.bf16 %v7193_v21  ;;  %v4554_v8 = vpop.permute.xlu0 %4553  ;;  %v7269_v15 = vpop.permute.xlu1 %4568  ;;  %v9073_v18 = vld [vmem:[#allocation123_spill] sm:$0xff] }
 0x25c   : > { %4698 = vrot.lane.b32.xlu1 %v4697_v49, %s4878_s16  ;;  %v7264_v6 = vsel %vm1991_vm6, %v4526_v22, %v8651_v17  ;;  %4723 = vrot.lane.b32.xlu0 %v4722_v40, %s4879_s17  ;;  %v4531_v4 = vunpack.i.h.bf16 %v7122_v2  ;;  %v3042_v11 = vsel %vm3022_vm11, %v2992_v42, 0  ;;  %v2977_v49 = vpack.c.bf16 %v9073_v18, %v2241_v56  ;;  %v9074_v42 = vld [vmem:[#allocation92_spill] sm:$0xff]  ;;  %v9077_v18 = vld [vmem:[#allocation142_spill] sm:$0xff] }
 0x25d   : > { %9072 = vst [vmem:[#allocation81_spill] sm:$0xff] %v7264_v6  ;;  %3176 = vmatpush2.bf16.msra.mxu0 %v2974_v39  ;;  %v4707_v21 = vpack.i.bf16 %v7252_v13, %v7264_v6  ;;  %3215 = vmatpush2.bf16.msra.mxu1 %v3042_v11  ;;  %v4556_v14 = vunpack.i.h.bf16 %v4554_v8  ;;  %v4555_v45 = vunpack.i.l.bf16 %v4554_v8  ;;  %v4570_v22 = vunpack.i.l.bf16 %v7269_v15 }
 0x25e   : > { %3177 = vmatprep.subr.bf16.mxu0 %v2959_v60  ;;  %v2127_v39 = vsel %vm817_vm10, %v4551_v1, %v8652_v50  ;;  %v2958_v40 = vpack.c.bf16 %v2130_v29, %v9074_v42  ;;  %v2976_v17 = vpack.c.bf16 %v9075_v47, %v2242_v16  ;;  %3216 = vmatprep.subr.bf16.mxu1 %v2977_v49  ;;  %v9076_v56 = vunpack.i.l.bf16 %v6671_v20 }
 0x25f   : > { %v2128_v60 = vsel %vm817_vm10, %v4530_v28, %v4551_v1  ;;  %v1936_v8 = vsel %vm817_vm10, %v4531_v4, %v4550_v44  ;;  %v2050_v29 = vsel %vm736_vm9, %v4536_v43, %v4555_v45  ;;  %v7294_v47 = vpop.permute.xlu0 %4563  ;;  %v7296_v16 = vpop.permute.xlu1 %4578  ;;  %v2961_v49 = vpack.c.bf16 %v2127_v39, %v9077_v18 }
 0x260   : > { %4708 = vrot.lane.b32.xlu1 %v4707_v21, %s4878_s16  ;;  %v2051_v11 = vsel %vm736_vm9, %v9076_v56, %v4536_v43  ;;  %v2943_v21 = vpack.c.bf16 %v2050_v29, %v1936_v8  ;;  %v1857_v2 = vsel %vm736_vm9, %v4556_v14, %v4570_v22  ;;  %v9078_v28 = vunpack.i.h.bf16 %v6704_v48 }
 0x261   : > { %3178 = vmatpush2.bf16.msra.mxu0 %v2958_v40  ;;  %3217 = vmatpush2.bf16.msra.mxu1 %v2976_v17  ;;  %v8656_v43 = vunpack.i.l.bf16 %v7294_v47  ;;  %v9079_v40 = vld [vmem:[#allocation129_spill] sm:$0xff]  ;;  %v4571_v50 = vunpack.i.h.bf16 %v7269_v15  ;;  %v9080_v39 = vunpack.i.h.bf16 %v6706_v25  ;;  %v8653_v17 = vunpack.i.l.bf16 %v7296_v16 }
 0x262   : > { %v1937_v1 = vsel %vm817_vm10, %v9078_v28, %v4531_v4  ;;  %v2960_v56 = vpack.c.bf16 %v2128_v60, %v9079_v40  ;;  %3218 = vmatprep.subr.bf16.mxu1 %v2961_v49  ;;  %3179 = vmatprep.subr.bf16.mxu0 %v2943_v21  ;;  %v9082_v4 = vld [vmem:[#allocation134_spill] sm:$0xff]  ;;  %v4561_v60 = vunpack.i.h.bf16 %v7234_v32  ;;  %v4581_v63 = vunpack.i.h.bf16 %v7296_v16  ;;  %v9083_v49 = vld [vmem:[#allocation97_spill] sm:$0xff] }
 0x263   : > { %v2942_v42 = vpack.c.bf16 %v2051_v11, %v1937_v1  ;;  %v1858_v8 = vsel %vm736_vm9, %v9080_v39, %v4556_v14  ;;  %v7320_v48 = vsel %vm1798_vm7, %v4541_v34, %v8656_v43  ;;  %v2927_v11 = vpack.c.bf16 %v9082_v4, %v1857_v2  ;;  %v7325_v29 = vpop.permute.xlu0 %4573  ;;  %v7327_v25 = vpop.permute.xlu1 %4588  ;;  %v7356_v4 = vld [vmem:[#allocation2 + $0x70] sm:$0xff] }
 0x264   : > { %9081 = vst [vmem:[#allocation77_spill] sm:$0xff] %v7320_v48  ;;  %v4717_v14 = vpack.i.bf16 %v6280_v7, %v7320_v48  ;;  %v8654_v34 = vunpack.i.l.bf16 %v7325_v29  ;;  %v8655_v18 = vunpack.i.l.bf16 %v7327_v25  ;;  %v2926_v21 = vpack.c.bf16 %v9083_v49, %v1858_v8  ;;  %9084 = vst [vmem:[#allocation83_spill] sm:$0xff] %v7356_v4 }
 0x265   : > { %3180 = vmatpush2.bf16.msra.mxu0 %v2942_v42  ;;  %3219 = vmatpush2.bf16.msra.mxu1 %v2960_v56  ;;  %v2049_v2 = vsel %vm736_vm9, %v4555_v45, %v4571_v50  ;;  %v4576_v28 = vunpack.i.h.bf16 %v7325_v29  ;;  %v8657_v1 = vunpack.i.h.bf16 %v7327_v25  ;;  %v2048_v40 = vsel %vm736_vm9, %v4571_v50, %v8653_v17 }
 0x266   : > { %3181 = vmatprep.subr.bf16.mxu0 %v2927_v11  ;;  %4718 = vrot.lane.b32.xlu1 %v4717_v14, %s4878_s16  ;;  %v1934_v42 = vsel %vm817_vm10, %v4561_v60, %v8654_v34  ;;  %v1855_v45 = vsel %vm736_vm9, %v4581_v63, %v8655_v18  ;;  %v1935_v56 = vsel %vm817_vm10, %v4550_v44, %v4561_v60  ;;  %v9085_v34 = vunpack.i.l.bf16 %v6777_v61  ;;  %v9086_v44 = vld [vmem:[#allocation145_spill] sm:$0xff] }
 0x267   : > { %v4584_v39 = vpop.permute.xlu0 %4583  ;;  %v7354_v8 = vpop.permute.xlu1 %4598  ;;  %v4727_v11 = vpack.i.bf16 %v7356_v4, %v6310_v38  ;;  %v2945_v14 = vpack.c.bf16 %v2048_v40, %v1934_v42  ;;  %v2944_v49 = vpack.c.bf16 %v2049_v2, %v1935_v56  ;;  %v2929_v60 = vpack.c.bf16 %v9086_v44, %v1855_v45 }
 0x268   : > { %v4586_v50 = vunpack.i.h.bf16 %v4584_v39  ;;  %v4585_v17 = vunpack.i.l.bf16 %v4584_v39  ;;  %v1744_v18 = vsel %vm817_vm10, %v9085_v34, %v4576_v28  ;;  %v1856_v2 = vsel %vm736_vm9, %v4570_v22, %v4581_v63 }
 0x269   : > { %3182 = vmatpush2.bf16.msra.mxu0 %v2926_v21  ;;  %3220 = vmatprep.subr.bf16.mxu1 %v2945_v14  ;;  %v7366_v21 = vld [vmem:[#allocation2 + $0x78] sm:$0xff]  ;;  %v9087_v61 = vunpack.i.h.bf16 %v6832_v23  ;;  %v9088_v42 = vunpack.i.l.bf16 %v6779_v30  ;;  %v4466_v22 = vunpack.i.h.bf16 %v6906_v41  ;;  %v4601_v23 = vunpack.i.h.bf16 %v7354_v8 }
 0x26a   : > { %4728 = vrot.lane.b32.xlu1 %v4727_v11, %s4878_s16  ;;  %v4737_v43 = vpack.i.bf16 %v6326_v27, %v7366_v21  ;;  %3221 = vmatpush2.bf16.msra.mxu1 %v2944_v49  ;;  %v1743_v15 = vsel %vm817_vm10, %v4576_v28, %v4585_v17  ;;  %v9089_v30 = vld [vmem:[#allocation103_spill] sm:$0xff]  ;;  %v9090_v11 = vld [vmem:[#allocation104_spill] sm:$0xff]  ;;  %v9091_v28 = vld [vmem:[#allocation141_spill] sm:$0xff]  ;;  %v9105_v20 = vunpack.i.h.bf16 %v7327_v25 }
 0x26b   : > { %v7380_v34 = vsel %vm736_vm9, %v9087_v61, %v8657_v1  ;;  %v7386_v40 = vsel %vm817_vm10, %v9088_v42, %v4586_v50  ;;  %v4594_v45 = vpop.permute.xlu0 %4593  ;;  %v7394_v56 = vpop.permute.xlu1 %4608  ;;  %3222 = vmatprep.subr.bf16.mxu1 %v2929_v60  ;;  %v2911_v39 = vpack.c.bf16 %v1743_v15, %v9089_v30  ;;  %v2910_v14 = vpack.c.bf16 %v1744_v18, %v9090_v11 }
 0x26c   : > { %v2898_v63 = vpack.c.bf16 %v7380_v34, %v7386_v40  ;;  %v4596_v44 = vunpack.i.h.bf16 %v4594_v45  ;;  %v4595_v49 = vunpack.i.l.bf16 %v4594_v45  ;;  %v8658_v61 = vunpack.i.l.bf16 %v7394_v56 }
 0x26d   : > { %v2928_v42 = vpack.c.bf16 %v9091_v28, %v1856_v2  ;;  %3183 = vmatprep.subr.bf16.mxu0 %v2911_v39  ;;  %v8660_v34 = vunpack.i.l.bf16 %v7354_v8  ;;  %v9092_v40 = vunpack.i.h.bf16 %v5737_v24  ;;  %v1742_v18 = vsel %vm817_vm10, %v4585_v17, %v4601_v23  ;;  %v7412_v2 = vld [vmem:[#allocation2 + $0x28] sm:$0xff] }
 0x26e   : > { %4738 = vrot.lane.b32.xlu1 %v4737_v43, %s4878_s16  ;;  %3184 = vmatpush2.bf16.msra.mxu0 %v2910_v14  ;;  %9095 = vst [vmem:[#allocation86_spill] sm:$0xff] %v7412_v2  ;;  %v1741_v30 = vsel %vm817_vm10, %v4601_v23, %v8658_v61  ;;  %v9096_v39 = vld [vmem:[#allocation49_spill] sm:$0xff]  ;;  %v9098_v14 = vunpack.i.l.bf16 %v6906_v41  ;;  %v9100_v1 = vunpack.i.h.bf16 %v8963_v46  ;;  %v9101_v23 = vunpack.i.l.bf16 %v8963_v46 }
 0x26f   : > { %v7406_v60 = vsel %vm1605_vm3, %v9092_v40, %v4595_v49  ;;  %3223 = vmatpush2.bf16.msra.mxu1 %v2928_v42  ;;  %v4604_v15 = vpop.permute.xlu0 %4603  ;;  %v7410_v45 = vpop.permute.xlu1 %4618  ;;  %v9097_v11 = vunpack.i.l.bf16 %v9096_v39  ;;  %v7436_v42 = vsel %vm1605_vm3, %v4595_v49, %v4596_v44  ;;  %v9102_v41 = vld [vmem:[#allocation109_spill] sm:$0xff]  ;;  %v9104_v49 = vld [vmem:[#allocation22_spill] sm:$0xff]  ;;  %v1546_v46 = vsel %vm817_vm10, %v4586_v50, %v8660_v34  ;;  %v9108_v50 = vld [vmem:[#allocation44_spill] sm:$0xff] }
 0x270   : > { %9093 = vst [vmem:[#allocation90_spill] sm:$0xff] %v7406_v60  ;;  %9094 = vst [vmem:[#allocation84_spill] sm:$0xff] %v7410_v45  ;;  %v4747_v43 = vpack.i.bf16 %v7412_v2, %v7406_v60  ;;  %v4732_v24 = vpack.i.bf16 %v7406_v60, %v7252_v13  ;;  %v7432_v28 = vsel %vm1268_vm4, %v9098_v14, %v4466_v22  ;;  %v4605_v40 = vunpack.i.l.bf16 %v4604_v15 }
 0x271   : > { %v7426_v17 = vsel %vm1268_vm4, %v4466_v22, %v9097_v11  ;;  %9099 = vst [vmem:[#allocation89_spill] sm:$0xff] %v7436_v42  ;;  %v7444_v39 = vsel %vm1075_vm1, %v9101_v23, %v9100_v1  ;;  %v2913_v22 = vpack.c.bf16 %v1741_v30, %v9102_v41  ;;  %v9103_v11 = vld [vmem:[#allocation110_spill] sm:$0xff]  ;;  %v4606_v61 = vunpack.i.h.bf16 %v4604_v15  ;;  %3186 = vmatmul.mubr.bf16.vlgmr.msra.gmra.mxu0 %v9104_v49  ;;  %v7463_v15 = vld [vmem:[#allocation2 + $0x60] sm:$0xff] }
 0x272   : > { %4748 = vrot.lane.b32.xlu1 %v4747_v43, %s4878_s16  ;;  %4733 = vrot.lane.b32.xlu0 %v4732_v24, %s4879_s17  ;;  %v2912_v14 = vpack.c.bf16 %v1742_v18, %v9103_v11  ;;  %v1660_v1 = vsel %vm736_vm9, %v9105_v20, %v4605_v40  ;;  %v4757_v18 = vpack.i.bf16 %v7426_v17, %v7432_v28  ;;  %v9107_v41 = vld [vmem:[#allocation108_spill] sm:$0xff]  ;;  %v9109_v11 = vunpack.i.h.bf16 %v9108_v50 }
 0x273   : > { %3224 = vmatprep.subr.bf16.mxu1 %v2913_v22  ;;  %v4614_v43 = vpop.permute.xlu0 %4613  ;;  %v7459_v24 = vpop.permute.xlu1 %4628  ;;  %9106 = vst [vmem:[#allocation93_spill] sm:$0xff] %v7463_v15  ;;  %v4742_v30 = vpack.i.bf16 %v7463_v15, %v7436_v42  ;;  %v2899_v23 = vpack.c.bf16 %v1660_v1, %v1546_v46  ;;  %3760 = vmatprep.mubr.msk.bf16.mxu0 %vm3018_vm8, %v9107_v41  ;;  %v4621_v60 = vunpack.i.h.bf16 %v7410_v45  ;;  %v9111_v46 = vld [vmem:[#allocation21_spill] sm:$0xff]  ;;  %v4611_v34 = vunpack.i.h.bf16 %v7394_v56 }
 0x274   : > { %v7473_v20 = vsel %vm1605_vm3, %v4596_v44, %v9109_v11  ;;  %3225 = vmatpush2.bf16.msra.mxu1 %v2912_v14  ;;  %v4615_v22 = vunpack.i.l.bf16 %v4614_v43  ;;  %v9112_v1 = vunpack.i.h.bf16 %v9111_v46  ;;  %v4616_v2 = vunpack.i.h.bf16 %v4614_v43  ;;  %v9113_v44 = vld [vmem:[#allocation39_spill] sm:$0xff]  ;;  %v4855_v46 = vld [vmem:[#allocation2 + $0x20] sm:$0xff] }
 0x275   : > { %9110 = vst [vmem:[#allocation71_spill] sm:$0xff] %v7473_v20  ;;  %3235 = vmatprep.subr.bf16.mxu0 %v2899_v23  ;;  %v4767_v14 = vpack.i.bf16 %v9113_v44, %v7444_v39  ;;  %v9115_v43 = vunpack.i.l.bf16 %v7459_v24 }
 0x276   : > { %4758 = vrot.lane.b32.xlu1 %v4757_v18, %s4878_s16  ;;  %4743 = vrot.lane.b32.xlu0 %v4742_v30, %s4879_s17  ;;  %v1468_v50 = vsel %vm736_vm9, %v9112_v1, %v4606_v61  ;;  %v1467_v11 = vsel %vm736_vm9, %v4606_v61, %v4615_v22  ;;  %v4752_v30 = vpack.i.bf16 %v7473_v20, %v7356_v4  ;;  %v4856_v61 = vld [vmem:[#allocation2 + $0x40] sm:$0xff]  ;;  %v4631_v4 = vunpack.i.h.bf16 %v7459_v24 }
 0x277   : > { %3227 = vmatmul.mubr.bf16.vlgmr.msra.gmra.mxu1 %v9104_v49  ;;  %3236 = vmatpush1.bf16.msra.mxu0 %v2898_v63  ;;  %v7490_v18 = vpop.permute.xlu0 %4623  ;;  %v2883_v1 = vpack.c.bf16 %v4855_v46, %v1467_v11  ;;  %v1402_v23 = vsel %vm817_vm10, %v4621_v60, %v9115_v43  ;;  %v2882_v49 = vpack.c.bf16 %v4856_v61, %v1468_v50  ;;  %v9116_v63 = vunpack.i.l.bf16 %v6908_v3  ;;  %v9118_v3 = vld [vmem:[#allocation154_spill] sm:$0xff] }
 0x278   : > { %9114 = vst [vmem:[#allocation38_spill] sm:$0xff] %v7490_v18  ;;  %v8669_v35 = vunpack.i.l.bf16 %v7490_v18  ;;  %3762 = vmatprep.mubr.msk.bf16.mxu1 %vm3018_vm8, %v9107_v41  ;;  %v9117_v11 = vunpack.i.l.bf16 %v7410_v45  ;;  %v1659_v43 = vsel %vm736_vm9, %v4605_v40, %v4616_v2  ;;  %v4626_v50 = vunpack.i.h.bf16 %v7490_v18  ;;  %v9121_v40 = vld [vmem:[#allocation23_spill] sm:$0xff] }
 0x279   : > { %v1403_v15 = vsel %vm817_vm10, %v9116_v63, %v4621_v60  ;;  %3237 = vmatprep.subr.bf16.mxu0 %v2883_v1  ;;  %v2867_v61 = vpack.c.bf16 %v1402_v23, %v9118_v3  ;;  %v9119_v63 = vld [vmem:[#allocation75_spill] sm:$0xff]  ;;  %v4762_v45 = vpack.i.bf16 %v9121_v40, %v7366_v21  ;;  %v4772_v1 = vpack.i.bf16 %v6800_v62, %v7432_v28 }
 0x27a   : > { %4768 = vrot.lane.b32.xlu1 %v4767_v14, %s4878_s16  ;;  %4753 = vrot.lane.b32.xlu0 %v4752_v30, %s4879_s17  ;;  %v1544_v46 = vsel %vm817_vm10, %v4611_v34, %v9117_v11  ;;  %v1658_v60 = vsel %vm736_vm9, %v4616_v2, %v8669_v35  ;;  %v7520_v14 = vpop.permute.xlu1 %4638  ;;  %v9120_v11 = vld [vmem:[#allocation80_spill] sm:$0xff]  ;;  %v4511_v23 = vunpack.i.h.bf16 %v7019_v58  ;;  %v9122_v3 = vunpack.i.l.bf16 %v7354_v8 }
 0x27b   : > { %3238 = vmatpush1.bf16.msra.mxu0 %v2882_v49  ;;  %v7522_v30 = vpop.permute.xlu0 %4633  ;;  %v4777_v38 = vpack.i.bf16 %v9120_v11, %v9119_v63  ;;  %v2901_v27 = vpack.c.bf16 %v1658_v60, %v1544_v46  ;;  %v9123_v11 = vld [vmem:[#allocation116_spill] sm:$0xff]  ;;  %v9124_v46 = vunpack.i.l.bf16 %v6982_v19  ;;  %v1466_v8 = vsel %vm736_vm9, %v4615_v22, %v4626_v50  ;;  %v4857_v22 = vld [vmem:[#allocation2 + $0x38] sm:$0xff] }
 0x27c   : > { %v1545_v2 = vsel %vm817_vm10, %v9122_v3, %v4611_v34  ;;  %v4636_v49 = vunpack.i.h.bf16 %v7522_v30  ;;  %v8671_v35 = vunpack.i.l.bf16 %v7522_v30  ;;  %3239 = vmatprep.subr.bf16.mxu0 %v2867_v61  ;;  %v2866_v63 = vpack.c.bf16 %v1403_v15, %v9123_v11 }
 0x27d   : > { %v2900_v18 = vpack.c.bf16 %v1659_v43, %v1545_v2  ;;  %v1210_v60 = vsel %vm817_vm10, %v9124_v46, %v4631_v4  ;;  %v8673_v34 = vunpack.i.l.bf16 %v7520_v14  ;;  %v9125_v3 = vunpack.i.h.bf16 %v6950_v5  ;;  %3276 = vmatprep.subr.bf16.mxu1 %v2901_v27  ;;  %v9126_v5 = vld [vmem:[#allocation58_spill] sm:$0xff] }
 0x27e   : > { %4778 = vrot.lane.b32.xlu1 %v4777_v38, %s4878_s16  ;;  %4763 = vrot.lane.b32.xlu0 %v4762_v45, %s4879_s17  ;;  %v1465_v19 = vsel %vm736_vm9, %v4626_v50, %v8671_v35  ;;  %v4787_v45 = vpack.i.bf16 %v7057_v52, %v9113_v44  ;;  %v9127_v11 = vunpack.i.l.bf16 %v9126_v5  ;;  %v9129_v2 = vunpack.i.l.bf16 %v7019_v58 }
 0x27f   : > { %v1324_v15 = vsel %vm736_vm9, %v9125_v3, %v4636_v49  ;;  %3240 = vmatpush1.bf16.msra.mxu0 %v2866_v63  ;;  %3277 = vmatpush1.bf16.msra.mxu1 %v2900_v18  ;;  %v7555_v38 = vpop.permute.xlu0 %4643  ;;  %v2885_v61 = vpack.c.bf16 %v4857_v22, %v1465_v19  ;;  %v4566_v18 = vunpack.i.h.bf16 %v7294_v47  ;;  %v4251_v46 = vunpack.i.h.bf16 %v9025_v53 }
 0x280   : > { %v2850_v43 = vpack.c.bf16 %v1324_v15, %v1210_v60  ;;  %v7563_v27 = vsel %vm2184_vm5, %v4511_v23, %v9127_v11  ;;  %v7569_v50 = vsel %vm2184_vm5, %v9129_v2, %v4511_v23  ;;  %v8672_v63 = vunpack.i.l.bf16 %v7555_v38  ;;  %v4858_v60 = vld [vmem:[#allocation2 + $0x10] sm:$0xff]  ;;  %v9133_v2 = vld [vmem:[#allocation124_spill] sm:$0xff] }
 0x281   : > { %9128 = vst [vmem:[#allocation87_spill] sm:$0xff] %v7563_v27  ;;  %v2884_v3 = vpack.c.bf16 %v4858_v60, %v1466_v8  ;;  %v4546_v15 = vunpack.i.h.bf16 %v7232_v0  ;;  %v4646_v58 = vunpack.i.h.bf16 %v7555_v38  ;;  %3278 = vmatprep.subr.bf16.mxu1 %v2885_v61  ;;  %v1209_v23 = vsel %vm817_vm10, %v4631_v4, %v8673_v34  ;;  %v9130_v8 = vld [vmem:[#allocation144_spill] sm:$0xff] }
 0x282   : > { %4788 = vrot.lane.b32.xlu1 %v4787_v45, %s4879_s17  ;;  %4773 = vrot.lane.b32.xlu0 %v4772_v1, %s4879_s17  ;;  %v1323_v19 = vsel %vm736_vm9, %v4636_v49, %v8672_v63  ;;  %v8675_v22 = vunpack.i.l.bf16 %v9130_v8  ;;  %v4797_v1 = vpack.i.bf16 %v7563_v27, %v7569_v50  ;;  %v4782_v61 = vpack.i.bf16 %v7426_v17, %v7444_v39 }
 0x283   : > { %3279 = vmatpush1.bf16.msra.mxu1 %v2884_v3  ;;  %v7587_v45 = vpop.permute.xlu0 %4653  ;;  %v2851_v5 = vpack.c.bf16 %v1323_v19, %v1209_v23  ;;  %v9131_v11 = vunpack.i.l.bf16 %v7294_v47  ;;  %v9134_v3 = vld [vmem:[#allocation59_spill] sm:$0xff]  ;;  %v9137_v47 = vunpack.i.l.bf16 %v7017_v55  ;;  %v9139_v55 = vunpack.i.l.bf16 %v7232_v0  ;;  %v9144_v0 = vld [vmem:[#allocation50_spill] sm:$0xff] }
 0x284   : > { %v8674_v49 = vunpack.i.l.bf16 %v7587_v45  ;;  %v9135_v35 = vunpack.i.l.bf16 %v9134_v3 }
 0x285   : > { %v7597_v4 = vsel %vm1798_vm7, %v9131_v11, %v4566_v18  ;;  %v1131_v23 = vsel %vm736_vm9, %v9137_v47, %v4646_v58  ;;  %3241 = vmatprep.subr.bf16.mxu0 %v2851_v5  ;;  %v9138_v11 = vld [vmem:[#allocation150_spill] sm:$0xff]  ;;  %v7628_v5 = vsel %vm1991_vm6, %v9139_v55, %v4546_v15  ;;  %v9140_v47 = vld [vmem:[#allocation115_spill] sm:$0xff]  ;;  %v9145_v55 = vld [vmem:[#allocation85_spill] sm:$0xff] }
 0x286   : > { %9132 = vst [vmem:[#allocation98_spill] sm:$0xff] %v7597_v4  ;;  %4798 = vrot.lane.b32.xlu1 %v4797_v1, %s4879_s17  ;;  %4783 = vrot.lane.b32.xlu0 %v4782_v61, %s4879_s17  ;;  %v7607_v63 = vsel %vm1991_vm6, %v4546_v15, %v9135_v35  ;;  %v1130_v19 = vsel %vm736_vm9, %v4646_v58, %v8674_v49  ;;  %v8676_v34 = vunpack.i.l.bf16 %v9140_v47  ;;  %v9141_v58 = vld [vmem:[#allocation120_spill] sm:$0xff]  ;;  %v9143_v49 = vunpack.i.l.bf16 %v9025_v53 }
 0x287   : > { %9136 = vst [vmem:[#allocation94_spill] sm:$0xff] %v7607_v63  ;;  %3242 = vmatpush1.bf16.msra.mxu0 %v2850_v43  ;;  %v4807_v61 = vpack.i.bf16 %v7597_v4, %v7607_v63  ;;  %v2835_v3 = vpack.c.bf16 %v9138_v11, %v1130_v19  ;;  %v1016_v35 = vsel %vm817_vm10, %v4251_v46, %v8675_v22  ;;  %v9142_v19 = vld [vmem:[#allocation101_spill] sm:$0xff] }
 0x288   : > { %v2834_v43 = vpack.c.bf16 %v9141_v58, %v1131_v23  ;;  %v8677_v11 = vunpack.i.h.bf16 %v9142_v19  ;;  %v1017_v22 = vsel %vm817_vm10, %v9143_v49, %v4251_v46  ;;  %v2819_v60 = vpack.c.bf16 %v1016_v35, %v9144_v0  ;;  %v9148_v46 = vld [vmem:[#allocation64_spill] sm:$0xff]  ;;  %v9151_v35 = vld [vmem:[#allocation51_spill] sm:$0xff] }
 0x289   : > { %3243 = vmatprep.subr.bf16.mxu0 %v2835_v3  ;;  %v4130_v15 = vunpack.i.l.bf16 %v9142_v19  ;;  %v4817_v23 = vpack.i.bf16 %v7628_v5, %v7264_v6  ;;  %v9147_v58 = vunpack.i.l.bf16 %v9133_v2  ;;  %v9149_v49 = vunpack.i.l.bf16 %v9148_v46  ;;  %v9153_v46 = vld [vmem:[#allocation96_spill] sm:$0xff] }
 0x28a   : > { %4808 = vrot.lane.b32.xlu1 %v4807_v61, %s4878_s16  ;;  %4793 = vrot.lane.b32.xlu0 %v4797_v1, %s4878_s16  ;;  %v4802_v61 = vpack.i.bf16 %v7628_v5, %v9145_v55  ;;  %v9146_v1 = vunpack.i.h.bf16 %v9133_v2  ;;  %v9152_v0 = vunpack.i.h.bf16 %v9055_v31  ;;  %v9155_v31 = vld [vmem:[#allocation100_spill] sm:$0xff] }
 0x28b   : > { %3244 = vmatpush1.bf16.msra.mxu0 %v2834_v43  ;;  %v7655_v3 = vsel %vm1798_vm7, %v4566_v18, %v9149_v49  ;;  %v2818_v43 = vpack.c.bf16 %v1017_v22, %v9151_v35  ;;  %v4827_v18 = vpack.i.bf16 %v7436_v42, %v9153_v46  ;;  %v743_v22 = vsel %vm736_vm9, %v4130_v15, %v8677_v11  ;;  %v9165_v11 = vld [vmem:[#allocation159_spill] sm:$0xff]  ;;  %v9171_v42 = vld [vmem:[#allocation125_spill] sm:$0xff] }
 0x28c   : > { %v937_v53 = vsel %vm736_vm9, %v9147_v58, %v9146_v1  ;;  %9150 = vst [vmem:[#allocation79_spill] sm:$0xff] %v7655_v3  ;;  %3245 = vmatprep.subr.bf16.mxu0 %v2819_v60  ;;  %v823_v1 = vsel %vm817_vm10, %v9152_v0, %v8676_v34  ;;  %v9154_v60 = vld [vmem:[#allocation95_spill] sm:$0xff]  ;;  %v9159_v0 = vld [vmem:[#allocation130_spill] sm:$0xff]  ;;  %v4822_v34 = vpack.i.bf16 %v7597_v4, %v7320_v48  ;;  %v9172_v4 = vunpack.i.l.bf16 %v7587_v45 }
 0x28d   : > { %v2803_v58 = vpack.c.bf16 %v937_v53, %v823_v1  ;;  %v4812_v49 = vpack.i.bf16 %v9154_v60, %v7655_v3  ;;  %v9157_v53 = vld [vmem:[#allocation29_spill] sm:$0xff]  ;;  %v9176_v60 = vld [vmem:[#allocation102_spill] sm:$0xff] }
 0x28e   : > { %4818 = vrot.lane.b32.xlu1 %v4817_v23, %s4879_s17  ;;  %4803 = vrot.lane.b32.xlu0 %v4802_v61, %s4878_s16  ;;  %v9156_v23 = vunpack.i.h.bf16 %v9155_v31  ;;  %v2787_v35 = vpack.c.bf16 %v9157_v53, %v743_v22  ;;  %v4641_v22 = vunpack.i.h.bf16 %v7520_v14 }
 0x28f   : > { %3246 = vmatpush1.bf16.msra.mxu0 %v2818_v43  ;;  %v9158_v43 = vld [vmem:[#allocation131_spill] sm:$0xff] }
 0x290   : > { %3247 = vmatprep.subr.bf16.mxu0 %v2803_v58  ;;  %v744_v61 = vsel %vm736_vm9, %v9156_v23, %v4130_v15  ;;  %v9160_v1 = vpack.c.bf16 %v9158_v43, %v9159_v0  ;;  %v9161_v58 = vld [vmem:[#allocation30_spill] sm:$0xff]  ;;  %v9162_v15 = vld [vmem:[#allocation69_spill] sm:$0xff]  ;;  %v9166_v43 = vunpack.i.l.bf16 %v7520_v14 }
 0x292   : > { %4828 = vrot.lane.b32.xlu1 %v4827_v18, %s4878_s16  ;;  %4813 = vrot.lane.b32.xlu0 %v4812_v49, %s4878_s16  ;;  %v2786_v18 = vpack.c.bf16 %v9161_v58, %v744_v61  ;;  %v3002_v49 = vld [vmem:[%s8407_s3] sm:$0xf]  ;;  %v9163_v61 = vunpack.i.l.bf16 %v7459_v24 }
 0x293   : > { %3248 = vmatpush1.bf16.msra.mxu0 %v9160_v1  ;;  %v4656_v1 = vunpack.i.h.bf16 %v7587_v45 }
 0x294   : > { %3249 = vmatprep.subr.bf16.mxu0 %v2787_v35  ;;  %v1401_v53 = vsel %vm817_vm10, %v9163_v61, %v4641_v22 }
 0x295   : > { %v2868_v24 = vpack.c.bf16 %v1401_v53, %v9165_v11 }
 0x296   : > { %1730 = vrot.lane.b32.xlu1 %v7473_v20, %s4878_s16  ;;  %4823 = vrot.lane.b32.xlu0 %v4822_v34, %s4879_s17  ;;  %v7700_v34 = vpop.permute.xlu0 %4663 }
 0x297   : > { %3250 = vmatpush1.bf16.msra.mxu0 %v2786_v18  ;;  %v9164_v18 = vld [vmem:[#allocation161_spill] sm:$0xff]  ;;  %v9168_v53 = vunpack.i.l.bf16 %v7700_v34 }
 0x29a   : > { %1732 = vrot.lane.b32.xlu1 %v9162_v15, %s4878_s16  ;;  %2036 = vrot.lane.b32.xlu0 %v7607_v63, %s4879_s17  ;;  %v9175_v63 = vld [vmem:[#allocation149_spill] sm:$0xff]  ;;  %s373_s16 = scalar_lea.vmem %s8413_s9, %s3748_s15 }
 0x29e   : > { %1843 = vrot.lane.b32.xlu0 %v7655_v3, %s4879_s17  ;;  %v4666_v3 = vunpack.i.h.bf16 %v7700_v34 }
 0x2a2   : > { %3005 = vperm.xlu0 %3801, %v3002_v49  }
 0x2ac   : > { %v7702_v31 = vpop.permute.xlu1 %4648 }
 0x2ad   : > { %v8680_v23 = vunpack.i.l.bf16 %v7702_v31  ;;  %v4651_v35 = vunpack.i.h.bf16 %v7702_v31 }
 0x2af   : > { %v1400_v0 = vsel %vm817_vm10, %v4641_v22, %v8680_v23  ;;  %v1208_v46 = vsel %vm817_vm10, %v9166_v43, %v4651_v35  ;;  %v9167_v22 = vld [vmem:[#allocation147_spill] sm:$0xff]  ;;  %v9170_v43 = vunpack.i.l.bf16 %v7555_v38  ;;  %v1129_v38 = vsel %vm736_vm9, %v9172_v4, %v4666_v3 }
 0x2b0   : > { %v7716_v58 = vpop.permute.xlu1 %4658  ;;  %v2869_v49 = vpack.c.bf16 %v1400_v0, %v9164_v18  ;;  %v1321_v0 = vsel %vm736_vm9, %v4656_v1, %v9168_v53  ;;  %v9169_v18 = vunpack.i.l.bf16 %v7062_v37  ;;  %v4215_v37 = vunpack.i.l.bf16 %v9171_v42 }
 0x2b1   : > { %v4661_v20 = vunpack.i.h.bf16 %v7716_v58  ;;  %v8681_v61 = vunpack.i.l.bf16 %v7716_v58 }
 0x2b2   : > { %3280 = vmatprep.subr.bf16.mxu1 %v2869_v49  ;;  %v1322_v49 = vsel %vm736_vm9, %v9170_v43, %v4656_v1 }
 0x2b3   : > { %3281 = vmatpush1.bf16.msra.mxu1 %v2868_v24  ;;  %v1207_v11 = vsel %vm817_vm10, %v4651_v35, %v8681_v61  ;;  %v2319_v14 = vsel %vm817_vm10, %v9169_v18, %v4661_v20  ;;  %v4674_v23 = vpop.permute.xlu0 %4673  ;;  %v4256_v35 = vunpack.i.h.bf16 %v9130_v8  ;;  %v2852_v61 = vpack.c.bf16 %v1322_v49, %v1208_v46 }
 0x2b4   : > { %v7744_v24 = vpop.permute.xlu1 %4668  ;;  %v2853_v15 = vpack.c.bf16 %v1321_v0, %v1207_v11  ;;  %v4675_v53 = vunpack.i.l.bf16 %v4674_v23  ;;  %v2994_v18 = vpack.c.bf16 %v2319_v14, %v2319_v14  ;;  %v9173_v0 = vunpack.i.l.bf16 %v9167_v22  ;;  %v9174_v14 = vld [vmem:[#allocation43_spill] sm:$0xff] }
 0x2b5   : > { %v8687_v48 = vunpack.i.l.bf16 %v7744_v24  ;;  %v4671_v1 = vunpack.i.h.bf16 %v7744_v24  ;;  %v4676_v27 = vunpack.i.h.bf16 %v4674_v23 }
 0x2b6   : > { %3282 = vmatprep.subr.bf16.mxu1 %v2853_v15  ;;  %v2318_v11 = vsel %vm817_vm10, %v4661_v20, %v4675_v53  ;;  %v1014_v45 = vsel %vm817_vm10, %v4256_v35, %v9173_v0  ;;  %v2836_v20 = vpack.c.bf16 %v9175_v63, %v1129_v38  ;;  %v9178_v0 = vld [vmem:[#allocation53_spill] sm:$0xff]  ;;  %v4176_v63 = vunpack.i.h.bf16 %v9140_v47 }
 0x2b7   : > { %3283 = vmatpush1.bf16.msra.mxu1 %v2852_v61  ;;  %v1128_v46 = vsel %vm736_vm9, %v4666_v3, %v8687_v48  ;;  %v2995_v43 = vpack.c.bf16 %v2318_v11, %v2318_v11  ;;  %v9177_v3 = vunpack.i.l.bf16 %v9130_v8  ;;  %v3048_v11 = vsel %vm3022_vm11, %v2994_v18, 0 }
 0x2b8   : > { %v7764_v4 = vpop.permute.xlu1 %4678  ;;  %v7766_v15 = vpop.permute.xlu0 %4683  ;;  %v2837_v49 = vpack.c.bf16 %v9174_v14, %v1128_v46  ;;  %v2821_v6 = vpack.c.bf16 %v1014_v45, %v9178_v0  ;;  %v4135_v46 = vunpack.i.l.bf16 %v9176_v60  ;;  %v9179_v38 = vunpack.i.l.bf16 %v7191_v59  ;;  %v9181_v45 = vld [vmem:[#allocation42_spill] sm:$0xff]  ;;  %v9183_v0 = vld [vmem:[#allocation117_spill] sm:$0xff] }
 0x2b9   : > { %v4680_v61 = vunpack.i.l.bf16 %v7764_v4  ;;  %v1015_v48 = vsel %vm817_vm10, %v9177_v3, %v4256_v35  ;;  %3759 = vmatprep.subr.msk.bf16.mxu0 %vm3022_vm11, %v2995_v43  ;;  %v9180_v8 = vunpack.i.h.bf16 %v9171_v42 }
 0x2ba   : > { %3284 = vmatprep.subr.bf16.mxu1 %v2837_v49  ;;  %v2240_v14 = vsel %vm736_vm9, %v9179_v38, %v4671_v1  ;;  %3256 = vmatpush2.bf16.msra.mxu0 %v3048_v11  ;;  %v9182_v49 = vld [vmem:[#allocation52_spill] sm:$0xff]  ;;  %v9184_v11 = vunpack.i.l.bf16 %v9183_v0 }
 0x2bb   : > { %3285 = vmatpush1.bf16.msra.mxu1 %v2836_v20  ;;  %v935_v35 = vsel %vm736_vm9, %v4215_v37, %v9180_v8  ;;  %v2239_v18 = vsel %vm736_vm9, %v4671_v1, %v4680_v61  ;;  %v2820_v3 = vpack.c.bf16 %v1015_v48, %v9182_v49  ;;  %v9185_v20 = vunpack.i.h.bf16 %v9133_v2  ;;  %v9190_v49 = vld [vmem:[#allocation32_spill] sm:$0xff] }
 0x2bc   : > { %3286 = vmatprep.subr.bf16.mxu1 %v2821_v6  ;;  %v2979_v59 = vpack.c.bf16 %v9181_v45, %v2239_v18  ;;  %v821_v42 = vsel %vm817_vm10, %v4176_v63, %v9184_v11  ;;  %v9186_v6 = vld [vmem:[#allocation127_spill] sm:$0xff]  ;;  %v4685_v1 = vunpack.i.l.bf16 %v7766_v15  ;;  %v9187_v48 = vunpack.i.h.bf16 %v9176_v60 }
 0x2bd   : > { %v936_v38 = vsel %vm736_vm9, %v9185_v20, %v4215_v37  ;;  %v2978_v8 = vpack.c.bf16 %v9186_v6, %v2240_v14  ;;  %v2805_v55 = vpack.c.bf16 %v935_v35, %v821_v42  ;;  %v9188_v45 = vunpack.i.l.bf16 %v9140_v47  ;;  %v9191_v20 = vld [vmem:[#allocation31_spill] sm:$0xff] }
 0x2be   : > { %v7789_v43 = vpop.permute.xlu0 %4693  ;;  %3257 = vmatprep.subr.bf16.mxu0 %v2979_v59  ;;  %v741_v18 = vsel %vm736_vm9, %v4135_v46, %v9187_v48  ;;  %v9189_v14 = vunpack.i.h.bf16 %v9142_v19  ;;  %v4686_v59 = vunpack.i.h.bf16 %v7766_v15  ;;  %v2317_v47 = vsel %vm817_vm10, %v4675_v53, %v4676_v27 }
 0x2bf   : > { %3287 = vmatpush1.bf16.msra.mxu1 %v2820_v3  ;;  %v822_v2 = vsel %vm817_vm10, %v9188_v45, %v4176_v63  ;;  %3258 = vmatpush2.bf16.msra.mxu0 %v2978_v8  ;;  %v2789_v3 = vpack.c.bf16 %v9190_v49, %v741_v18  ;;  %v2316_v63 = vsel %vm817_vm10, %v4676_v27, %v4685_v1  ;;  %v4681_v19 = vunpack.i.h.bf16 %v7764_v4 }
 0x2c0   : > { %3288 = vmatprep.subr.bf16.mxu1 %v2805_v55  ;;  %v2804_v23 = vpack.c.bf16 %v936_v38, %v822_v2  ;;  %v742_v35 = vsel %vm736_vm9, %v9189_v14, %v4135_v46  ;;  %v4695_v55 = vunpack.i.l.bf16 %v7789_v43  ;;  %v2996_v6 = vpack.c.bf16 %v2317_v47, %v2317_v47 }
 0x2c1   : > { %v2788_v38 = vpack.c.bf16 %v9191_v20, %v742_v35  ;;  %v9192_v53 = vunpack.i.l.bf16 %v7234_v32  ;;  %v2997_v48 = vpack.c.bf16 %v2316_v63, %v2316_v63  ;;  %v4696_v32 = vunpack.i.h.bf16 %v7789_v43 }
 0x2c2   : > { %v3054_v63 = vsel %vm3022_vm11, %v2996_v6, 0  ;;  %v9195_v6 = vld [vmem:[#allocation24_spill] sm:$0xff] }
 0x2c3   : > { %3289 = vmatpush1.bf16.msra.mxu1 %v2804_v23  ;;  %v2126_v8 = vsel %vm817_vm10, %v9192_v53, %v4686_v59  ;;  %v2237_v23 = vsel %vm736_vm9, %v4681_v19, %v4695_v55 }
 0x2c4   : > { %3290 = vmatprep.subr.bf16.mxu1 %v2789_v3  ;;  %v2962_v49 = vpack.c.bf16 %v2126_v8, %v9050_v26 }
 0x2c5   : > { %v7815_v37 = vpop.permute.xlu0 %4703 }
 0x2c6   : > { %v4705_v18 = vunpack.i.l.bf16 %v7815_v37  ;;  %v4706_v3 = vunpack.i.h.bf16 %v7815_v37 }
 0x2c7   : > { %3291 = vmatpush1.bf16.msra.mxu1 %v2788_v38 }
 0x2c8   : > { %3761 = vmatprep.subr.msk.bf16.mxu1 %vm3022_vm11, %v2997_v48  ;;  %v2046_v4 = vsel %vm736_vm9, %v4696_v32, %v4705_v18 }
 0x2ca   : > { %v4689_v11 = vpop.permute.xlu1 %4688  ;;  %v7831_v42 = vpop.permute.xlu0 %4713 }
 0x2cb   : > { %v4690_v46 = vunpack.i.l.bf16 %v4689_v11  ;;  %v4691_v27 = vunpack.i.h.bf16 %v4689_v11  ;;  %v4715_v45 = vunpack.i.l.bf16 %v7831_v42  ;;  %v9193_v11 = vunpack.i.l.bf16 %v7325_v29  ;;  %3297 = vmatpush2.bf16.msra.mxu1 %v3054_v63 }
 0x2cd   : > { %v2125_v2 = vsel %vm817_vm10, %v4686_v59, %v4690_v46  ;;  %v2238_v59 = vsel %vm736_vm9, %v4680_v61, %v4681_v19  ;;  %v1933_v20 = vsel %vm817_vm10, %v9193_v11, %v4691_v27  ;;  %v1853_v29 = vsel %vm736_vm9, %v4706_v3, %v4715_v45 }
 0x2ce   : > { %v4699_v14 = vpop.permute.xlu1 %4698  ;;  %v2963_v35 = vpack.c.bf16 %v2125_v2, %v6808_v54  ;;  %v2981_v54 = vpack.c.bf16 %v7000_v12, %v2237_v23  ;;  %v9194_v61 = vunpack.i.l.bf16 %v7296_v16  ;;  %v2980_v53 = vpack.c.bf16 %v9195_v6, %v2238_v59  ;;  %v9198_v6 = vld [vmem:[#allocation155_spill] sm:$0xff] }
 0x2cf   : > { %v4700_v47 = vunpack.i.l.bf16 %v4699_v14  ;;  %v4701_v38 = vunpack.i.h.bf16 %v4699_v14  ;;  %v2931_v23 = vpack.c.bf16 %v6895_v51, %v1853_v29  ;;  %v7888_v14 = vpop.permute.xlu0 %4723 }
 0x2d0   : > { %3259 = vmatprep.subr.bf16.mxu0 %v2963_v35  ;;  %v2047_v37 = vsel %vm736_vm9, %v9194_v61, %v4696_v32  ;;  %3298 = vmatprep.subr.bf16.mxu1 %v2981_v54  ;;  %v4725_v51 = vunpack.i.l.bf16 %v7888_v14 }
 0x2d1   : > { %3260 = vmatpush2.bf16.msra.mxu0 %v2962_v49  ;;  %v1932_v26 = vsel %vm817_vm10, %v4691_v27, %v4700_v47  ;;  %v2946_v8 = vpack.c.bf16 %v2047_v37, %v1933_v20  ;;  %v9196_v27 = vunpack.i.l.bf16 %v7327_v25  ;;  %v2124_v16 = vsel %vm817_vm10, %v4690_v46, %v4701_v38  ;;  %3299 = vmatpush2.bf16.msra.mxu1 %v2980_v53 }
 0x2d2   : > { %v7873_v19 = vpop.permute.xlu1 %4708  ;;  %v2947_v12 = vpack.c.bf16 %v2046_v4, %v1932_v26  ;;  %v2964_v49 = vpack.c.bf16 %v2124_v16, %v7185_v33 }
 0x2d3   : > { %v4710_v48 = vunpack.i.l.bf16 %v7873_v19  ;;  %v1854_v2 = vsel %vm736_vm9, %v9196_v27, %v4706_v3  ;;  %v4711_v46 = vunpack.i.h.bf16 %v7873_v19  ;;  %v4716_v3 = vunpack.i.h.bf16 %v7831_v42 }
 0x2d4   : > { %3261 = vmatprep.subr.bf16.mxu0 %v2947_v12  ;;  %v2930_v35 = vpack.c.bf16 %v8998_v9, %v1854_v2 }
 0x2d5   : > { %3262 = vmatpush2.bf16.msra.mxu0 %v2946_v8  ;;  %v2123_v32 = vsel %vm817_vm10, %v4701_v38, %v4710_v48  ;;  %v2044_v11 = vsel %vm736_vm9, %v4716_v3, %v4725_v51  ;;  %v2045_v20 = vsel %vm736_vm9, %v4705_v18, %v4716_v3  ;;  %v4726_v18 = vunpack.i.h.bf16 %v7888_v14 }
 0x2d6   : > { %3263 = vmatprep.subr.bf16.mxu0 %v2931_v23  ;;  %v2965_v25 = vpack.c.bf16 %v2123_v32, %v7203_v36  ;;  %v1931_v36 = vsel %vm817_vm10, %v4700_v47, %v4711_v46  ;;  %v9197_v47 = vunpack.i.l.bf16 %v7394_v56  ;;  %v7935_v32 = vld.sshfl [vmem:[%s8406_s2] sm:$0x33 pattern:$0x76325410] }
 0x2d7   : > { %v2948_v26 = vpack.c.bf16 %v2045_v20, %v1931_v36 }
 0x2d8   : > { %3300 = vmatprep.subr.bf16.mxu1 %v2965_v25  ;;  %v7896_v63 = vpop.permute.xlu1 %4718 }
 0x2d9   : > { %3264 = vmatpush2.bf16.msra.mxu0 %v2930_v35  ;;  %3301 = vmatpush2.bf16.msra.mxu1 %v2964_v49  ;;  %v4720_v59 = vunpack.i.l.bf16 %v7896_v63  ;;  %v4721_v9 = vunpack.i.h.bf16 %v7896_v63 }
 0x2db   : > { %v1930_v33 = vsel %vm817_vm10, %v4711_v46, %v4720_v59  ;;  %v1740_v29 = vsel %vm817_vm10, %v9197_v47, %v4721_v9  ;;  %v9201_v47 = vld [vmem:[#allocation158_spill] sm:$0xff] }
 0x2dc   : > { %v4729_v38 = vpop.permute.xlu1 %4728  ;;  %v2949_v54 = vpack.c.bf16 %v2044_v11, %v1930_v33  ;;  %v2914_v53 = vpack.c.bf16 %v1740_v29, %v9198_v6  ;;  %v9199_v11 = vld [vmem:[#allocation38_spill] sm:$0xff] }
 0x2dd   : > { %v4730_v4 = vunpack.i.l.bf16 %v4729_v38  ;;  %v9200_v20 = vunpack.i.l.bf16 %v9199_v11 }
 0x2de   : > { %3302 = vmatprep.subr.bf16.mxu1 %v2949_v54 }
 0x2df   : > { %3303 = vmatpush2.bf16.msra.mxu1 %v2948_v26  ;;  %v1739_v61 = vsel %vm817_vm10, %v4721_v9, %v4730_v4 }
 0x2e0   : > { %v4739_v37 = vpop.permute.xlu1 %4738  ;;  %v2915_v12 = vpack.c.bf16 %v1739_v61, %v6280_v7  ;;  %v1852_v7 = vsel %vm736_vm9, %v4715_v45, %v4726_v18  ;;  %v4731_v45 = vunpack.i.h.bf16 %v4729_v38 }
 0x2e1   : > { %v4741_v27 = vunpack.i.h.bf16 %v4739_v37  ;;  %v4740_v25 = vunpack.i.l.bf16 %v4739_v37  ;;  %v2932_v36 = vpack.c.bf16 %v7209_v57, %v1852_v7  ;;  %v9204_v7 = vld [vmem:[#allocation157_spill] sm:$0xff] }
 0x2e2   : > { %3265 = vmatprep.subr.bf16.mxu0 %v2915_v12 }
 0x2e3   : > { %3266 = vmatpush2.bf16.msra.mxu0 %v2914_v53  ;;  %v1738_v33 = vsel %vm817_vm10, %v4730_v4, %v4741_v27  ;;  %v1542_v57 = vsel %vm817_vm10, %v4731_v45, %v4740_v25  ;;  %v9202_v4 = vld [vmem:[#allocation84_spill] sm:$0xff] }
 0x2e4   : > { %v7921_v8 = vpop.permute.xlu1 %4748  ;;  %v7923_v56 = vpop.permute.xlu0 %4733  ;;  %v9203_v37 = vunpack.i.l.bf16 %v9202_v4  ;;  %v9209_v4 = vld [vmem:[#allocation93_spill] sm:$0xff] }
 0x2e5   : > { %v4750_v2 = vunpack.i.l.bf16 %v7921_v8  ;;  %v4735_v16 = vunpack.i.l.bf16 %v7923_v56  ;;  %v4736_v23 = vunpack.i.h.bf16 %v7923_v56  ;;  %v4751_v6 = vunpack.i.h.bf16 %v7921_v8 }
 0x2e6   : > { %3268 = vmatmul.mubr.bf16.vlgmr.msra.gmra.mxu0 %v7935_v32  ;;  %v1543_v12 = vsel %vm817_vm10, %v9203_v37, %v4731_v45 }
 0x2e7   : > { %v1851_v35 = vsel %vm736_vm9, %v4726_v18, %v4735_v16  ;;  %v1737_v42 = vsel %vm817_vm10, %v4741_v27, %v4750_v2  ;;  %3764 = vmatprep.mubr.msk.bf16.mxu0 %vm3018_vm8, %v9107_v41  ;;  %v1657_v54 = vsel %vm736_vm9, %v9200_v20, %v4736_v23 }
 0x2e8   : > { %v7948_v49 = vpop.permute.xlu1 %4758  ;;  %v4744_v46 = vpop.permute.xlu0 %4743  ;;  %v2933_v3 = vpack.c.bf16 %v7252_v13, %v1851_v35  ;;  %v2917_v38 = vpack.c.bf16 %v1737_v42, %v9201_v47  ;;  %v2916_v35 = vpack.c.bf16 %v1738_v33, %v9204_v7  ;;  %v2902_v42 = vpack.c.bf16 %v1657_v54, %v1543_v12  ;;  %v9206_v47 = vld [vmem:[#allocation83_spill] sm:$0xff] }
 0x2e9   : > { %v4745_v9 = vunpack.i.l.bf16 %v4744_v46  ;;  %v4746_v26 = vunpack.i.h.bf16 %v4744_v46  ;;  %v4761_v29 = vunpack.i.h.bf16 %v7948_v49  ;;  %v4760_v61 = vunpack.i.l.bf16 %v7948_v49 }
 0x2ea   : > { %3304 = vmatprep.subr.bf16.mxu1 %v2933_v3 }
 0x2eb   : > { %3305 = vmatpush2.bf16.msra.mxu1 %v2932_v36  ;;  %v1656_v13 = vsel %vm736_vm9, %v4736_v23, %v4745_v9  ;;  %v9205_v36 = vunpack.i.l.bf16 %v7522_v30  ;;  %v1398_v33 = vsel %vm817_vm10, %v4760_v61, %v4761_v29  ;;  %v1541_v30 = vsel %vm817_vm10, %v4740_v25, %v4751_v6 }
 0x2ec   : > { %v7970_v53 = vpop.permute.xlu1 %4768  ;;  %v4754_v18 = vpop.permute.xlu0 %4753  ;;  %3306 = vmatprep.subr.bf16.mxu1 %v2917_v38  ;;  %v2903_v27 = vpack.c.bf16 %v1656_v13, %v1542_v57  ;;  %v9207_v57 = vld [vmem:[#allocation156_spill] sm:$0xff]  ;;  %v9212_v25 = vunpack.i.l.bf16 %v7702_v31 }
 0x2ed   : > { %v4756_v46 = vunpack.i.h.bf16 %v4754_v18  ;;  %v4755_v3 = vunpack.i.l.bf16 %v4754_v18  ;;  %v1464_v23 = vsel %vm736_vm9, %v9205_v36, %v4746_v26  ;;  %v9210_v18 = vld [vmem:[#allocation73_spill] sm:$0xff]  ;;  %v2871_v36 = vpack.c.bf16 %v1398_v33, %v7432_v28 }
 0x2ee   : > { %3317 = vmatprep.subr.bf16.mxu0 %v2903_v27  ;;  %v9211_v27 = vunpack.i.l.bf16 %v9210_v18  ;;  %v9218_v18 = vld [vmem:[#allocation86_spill] sm:$0xff] }
 0x2ef   : > { %v1655_v45 = vsel %vm736_vm9, %v4745_v9, %v4756_v46  ;;  %3307 = vmatpush2.bf16.msra.mxu1 %v2916_v35  ;;  %3318 = vmatpush1.bf16.msra.mxu0 %v2902_v42  ;;  %v1463_v11 = vsel %vm736_vm9, %v4746_v26, %v4755_v3  ;;  %v9208_v9 = vunpack.i.h.bf16 %v9207_v57  ;;  %v2886_v26 = vpack.c.bf16 %v9209_v4, %v1464_v23  ;;  %v8006_v23 = vpop.f32.mrf.mxu0  ;;  %v9215_v57 = vld [vmem:[#allocation160_spill] sm:$0xff] }
 0x2f0   : > { %v7987_v20 = vpop.permute.xlu1 %4778  ;;  %v4764_v54 = vpop.permute.xlu0 %4763  ;;  %v2887_v38 = vpack.c.bf16 %v9206_v47, %v1463_v11  ;;  %v2904_v37 = vpack.c.bf16 %v1655_v45, %v1541_v30  ;;  %v1556_v7 = vsel %vm817_vm10, %v4751_v6, %v9211_v27  ;;  %v1399_v35 = vsel %vm817_vm10, %v9212_v25, %v4760_v61 }
 0x2f1   : > { %v1654_v13 = vsel %vm736_vm9, %v4756_v46, %v9208_v9  ;;  %v4765_v12 = vunpack.i.l.bf16 %v4764_v54  ;;  %v4780_v42 = vunpack.i.l.bf16 %v7987_v20  ;;  %v4771_v45 = vunpack.i.h.bf16 %v7970_v53  ;;  %v8015_v33 = vpop.f32.mrf.mxu0 }
 0x2f2   : > { %3309 = vmatmul.mubr.bf16.vlgmr.msra.gmra.mxu1 %v7935_v32  ;;  %3319 = vmatprep.subr.bf16.mxu0 %v2887_v38  ;;  %v2905_v46 = vpack.c.bf16 %v1654_v13, %v1556_v7  ;;  %v4770_v11 = vunpack.i.l.bf16 %v7970_v53  ;;  %v4766_v6 = vunpack.i.h.bf16 %v4764_v54  ;;  %v2870_v47 = vpack.c.bf16 %v1399_v35, %v9121_v40  ;;  %v9213_v38 = vld [vmem:[#allocation78_spill] sm:$0xff]  ;;  %v8028_v40 = vpop.f32.mrf.mxu1 }
 0x2f3   : > { %v1462_v31 = vsel %vm736_vm9, %v4755_v3, %v4765_v12  ;;  %3320 = vmatpush1.bf16.msra.mxu0 %v2886_v26  ;;  %3766 = vmatprep.mubr.msk.bf16.mxu1 %vm3018_vm8, %v9107_v41  ;;  %v9214_v3 = vunpack.i.l.bf16 %v9213_v38  ;;  %v9216_v9 = vunpack.i.h.bf16 %v9215_v57  ;;  %v4261_v4 = vunpack.i.h.bf16 %v9167_v22  ;;  %v9217_v26 = vld [vmem:[#allocation148_spill] sm:$0xff]  ;;  %v3109_v27 = vpop.f32.mrf.mxu0 }
 0x2f4   : > { %3358 = vmatprep.subr.bf16.mxu1 %v2905_v46  ;;  %v8012_v61 = vpop.permute.xlu1 %4788  ;;  %v4774_v30 = vpop.permute.xlu0 %4773  ;;  %3321 = vmatprep.subr.bf16.mxu0 %v2871_v36  ;;  %v2888_v53 = vpack.c.bf16 %v7366_v21, %v1462_v31  ;;  %v1205_v21 = vsel %vm817_vm10, %v4770_v11, %v4771_v45  ;;  %v9219_v7 = vunpack.i.l.bf16 %v7700_v34 }
 0x2f5   : > { %3359 = vmatpush1.bf16.msra.mxu1 %v2904_v37  ;;  %v4775_v28 = vunpack.i.l.bf16 %v4774_v30  ;;  %v1461_v54 = vsel %vm736_vm9, %v4765_v12, %v9214_v3  ;;  %v1412_v13 = vsel %vm817_vm10, %v4780_v42, %v9216_v9  ;;  %v4265_v37 = vunpack.i.l.bf16 %v9217_v26  ;;  %v9220_v3 = vld [vmem:[#allocation75_spill] sm:$0xff]  ;;  %v3110_v57 = vpop.f32.mrf.mxu0 }
 0x2f6   : > { %v2889_v41 = vpack.c.bf16 %v9218_v18, %v1461_v54  ;;  %v4781_v12 = vunpack.i.h.bf16 %v7987_v20  ;;  %v1320_v25 = vsel %vm736_vm9, %v9219_v7, %v4766_v6  ;;  %v4776_v35 = vunpack.i.h.bf16 %v4774_v30  ;;  %v8049_v54 = vpop.f32.mrf.mxu1  ;;  %v9228_v57 = vld [vmem:[#allocation74_spill] sm:$0xff] }
 0x2f7   : > { %3322 = vmatpush1.bf16.msra.mxu0 %v2870_v47  ;;  %v1319_v31 = vsel %vm736_vm9, %v4766_v6, %v4775_v28  ;;  %v1397_v47 = vsel %vm817_vm10, %v4761_v29, %v4780_v42  ;;  %v2873_v34 = vpack.c.bf16 %v1412_v13, %v9220_v3  ;;  %v9221_v30 = vunpack.i.l.bf16 %v7716_v58  ;;  %v9226_v3 = vld [vmem:[#allocation162_spill] sm:$0xff] }
 0x2f8   : > { %v8040_v46 = vpop.permute.xlu1 %4798  ;;  %v4784_v36 = vpop.permute.xlu0 %4783  ;;  %3360 = vmatprep.subr.bf16.mxu1 %v2889_v41  ;;  %v4790_v6 = vunpack.i.l.bf16 %v8012_v61  ;;  %v2855_v49 = vpack.c.bf16 %v1319_v31, %v1205_v21  ;;  %v2872_v41 = vpack.c.bf16 %v1397_v47, %v7426_v17  ;;  %v9222_v58 = vunpack.i.l.bf16 %v7744_v24 }
 0x2f9   : > { %v4786_v38 = vunpack.i.h.bf16 %v4784_v36  ;;  %v4785_v20 = vunpack.i.l.bf16 %v4784_v36  ;;  %v1206_v9 = vsel %vm817_vm10, %v9221_v30, %v4770_v11  ;;  %3361 = vmatpush1.bf16.msra.mxu1 %v2888_v53  ;;  %v3150_v13 = vpop.f32.mrf.mxu1  ;;  %v9224_v36 = vld [vmem:[#allocation164_spill] sm:$0xff]  ;;  %v4266_v47 = vunpack.i.h.bf16 %v9217_v26 }
 0x2fa   : > { %v2854_v18 = vpack.c.bf16 %v1320_v25, %v1206_v9  ;;  %3362 = vmatprep.subr.bf16.mxu1 %v2873_v34  ;;  %v1127_v11 = vsel %vm736_vm9, %v9222_v58, %v4776_v35  ;;  %3323 = vmatprep.subr.bf16.mxu0 %v2855_v49  ;;  %v1204_v25 = vsel %vm817_vm10, %v4771_v45, %v4781_v12  ;;  %v9225_v17 = vunpack.i.l.bf16 %v9224_v36  ;;  %v9230_v9 = vld [vmem:[#allocation118_spill] sm:$0xff] }
 0x2fb   : > { %v1318_v29 = vsel %vm736_vm9, %v4775_v28, %v4786_v38  ;;  %v1126_v42 = vsel %vm736_vm9, %v4776_v35, %v4785_v20  ;;  %v9223_v28 = vld [vmem:[#allocation132_spill] sm:$0xff]  ;;  %v1012_v35 = vsel %vm817_vm10, %v4261_v4, %v4265_v37  ;;  %v3151_v31 = vpop.f32.mrf.mxu1  ;;  %v9227_v34 = vunpack.i.h.bf16 %v9226_v3  ;;  %v9233_v36 = vld [vmem:[#allocation54_spill] sm:$0xff] }
 0x2fc   : > { %v8065_v27 = vpop.permute.xlu1 %4808  ;;  %v8067_v53 = vpop.permute.xlu0 %4793  ;;  %v2839_v21 = vpack.c.bf16 %v7444_v39, %v1126_v42  ;;  %v4221_v7 = vunpack.i.h.bf16 %v9223_v28  ;;  %3324 = vmatpush1.bf16.msra.mxu0 %v2854_v18  ;;  %v1219_v24 = vsel %vm817_vm10, %v4781_v12, %v9225_v17  ;;  %v2856_v39 = vpack.c.bf16 %v1318_v29, %v1204_v25  ;;  %v9231_v29 = vld [vmem:[#allocation105_spill] sm:$0xff] }
 0x2fd   : > { %3363 = vmatpush1.bf16.msra.mxu1 %v2872_v41  ;;  %v1317_v45 = vsel %vm736_vm9, %v4786_v38, %v9227_v34  ;;  %v9229_v30 = vunpack.i.l.bf16 %v9228_v57  ;;  %v4185_v49 = vunpack.i.l.bf16 %v9230_v9  ;;  %v2838_v18 = vpack.c.bf16 %v6800_v62, %v1127_v11  ;;  %v9236_v34 = vld [vmem:[#allocation137_spill] sm:$0xff] }
 0x2fe   : > { %3325 = vmatprep.subr.bf16.mxu0 %v2839_v21  ;;  %v4811_v42 = vunpack.i.h.bf16 %v8065_v27  ;;  %v2857_v13 = vpack.c.bf16 %v1317_v45, %v1219_v24  ;;  %v4141_v41 = vunpack.i.h.bf16 %v9231_v29  ;;  %v4140_v58 = vunpack.i.l.bf16 %v9231_v29  ;;  %v9234_v24 = vld [vmem:[#allocation80_spill] sm:$0xff]  ;;  %v9241_v29 = vld [vmem:[#allocation106_spill] sm:$0xff] }
 0x2ff   : > { %v1124_v12 = vsel %vm736_vm9, %v4790_v6, %v9229_v30  ;;  %v9232_v21 = vunpack.i.l.bf16 %v9167_v22  ;;  %v2823_v17 = vpack.c.bf16 %v1012_v35, %v9233_v36  ;;  %v1125_v31 = vsel %vm736_vm9, %v4785_v20, %v4790_v6 }
 0x300   : > { %v8099_v25 = vpop.permute.xlu1 %4818  ;;  %3364 = vmatprep.subr.bf16.mxu1 %v2857_v13  ;;  %3326 = vmatpush1.bf16.msra.mxu0 %v2838_v18  ;;  %v8105_v11 = vpop.permute.xlu0 %4803  ;;  %v2841_v3 = vpack.c.bf16 %v9234_v24, %v1124_v12  ;;  %v9235_v22 = vunpack.i.l.bf16 %v9223_v28  ;;  %v9237_v35 = vunpack.i.l.bf16 %v9236_v34  ;;  %v8122_v6 = vsel %vm817_vm10, %v4720_v59, %v4811_v42  ;;  %v9240_v18 = vld [vmem:[#allocation57_spill] sm:$0xff]  ;;  %v9248_v34 = vld [vmem:[#allocation135_spill] sm:$0xff] }
 0x301   : > { %v1013_v38 = vsel %vm817_vm10, %v9232_v21, %v4261_v4  ;;  %v4820_v62 = vunpack.i.l.bf16 %v8099_v25  ;;  %3365 = vmatpush1.bf16.msra.mxu1 %v2856_v39  ;;  %3327 = vmatprep.subr.bf16.mxu0 %v2823_v17  ;;  %v9238_v39 = vld [vmem:[#allocation55_spill] sm:$0xff]  ;;  %v9239_v57 = vunpack.i.h.bf16 %v9183_v0  ;;  %v2840_v30 = vpack.c.bf16 %v9113_v44, %v1125_v31  ;;  %v9244_v17 = vld [vmem:[#allocation33_spill] sm:$0xff] }
 0x302   : > { %v933_v4 = vsel %vm736_vm9, %v9235_v22, %v4221_v7  ;;  %v1026_v20 = vsel %vm817_vm10, %v4266_v47, %v9237_v35  ;;  %3366 = vmatprep.subr.bf16.mxu1 %v2841_v3  ;;  %v2822_v45 = vpack.c.bf16 %v1013_v38, %v9238_v39  ;;  %v1011_v14 = vsel %vm817_vm10, %v4265_v37, %v4266_v47  ;;  %v9243_v47 = vld [vmem:[#allocation56_spill] sm:$0xff]  ;;  %v9245_v24 = vld [vmem:[#allocation133_spill] sm:$0xff] }
 0x303   : > { %v8130_v28 = vsel %vm736_vm9, %v4725_v51, %v4820_v62  ;;  %v819_v63 = vsel %vm817_vm10, %v9239_v57, %v4185_v49  ;;  %v4795_v51 = vunpack.i.l.bf16 %v8067_v53  ;;  %v2825_v13 = vpack.c.bf16 %v1026_v20, %v9240_v18 }
 0x304   : > { %v2950_v59 = vpack.c.bf16 %v8130_v28, %v8122_v6  ;;  %v2807_v12 = vpack.c.bf16 %v933_v4, %v819_v63  ;;  %3328 = vmatpush1.bf16.msra.mxu0 %v2822_v45  ;;  %v739_v0 = vsel %vm736_vm9, %v4140_v58, %v4141_v41  ;;  %v4145_v21 = vunpack.i.l.bf16 %v9241_v29  ;;  %v8150_v38 = vpop.permute.xlu0 %4813  ;;  %v9247_v4 = vld [vmem:[#allocation136_spill] sm:$0xff]  ;;  %v9253_v63 = vld [vmem:[#allocation139_spill] sm:$0xff] }
 0x305   : > { %v4796_v44 = vunpack.i.h.bf16 %v8067_v53  ;;  %3367 = vmatpush1.bf16.msra.mxu1 %v2840_v30  ;;  %v9242_v26 = vunpack.i.h.bf16 %v9176_v60  ;;  %v2824_v36 = vpack.c.bf16 %v1011_v14, %v9243_v47  ;;  %v2791_v31 = vpack.c.bf16 %v9244_v17, %v739_v0  ;;  %v9259_v17 = vld [vmem:[#allocation35_spill] sm:$0xff] }
 0x306   : > { %3329 = vmatprep.subr.bf16.mxu0 %v2807_v12  ;;  %3368 = vmatprep.subr.bf16.mxu1 %v2825_v13  ;;  %v9246_v3 = vunpack.i.l.bf16 %v9245_v24  ;;  %v4800_v53 = vunpack.i.l.bf16 %v8040_v46  ;;  %v9249_v35 = vpack.c.bf16 %v9247_v4, %v9248_v34  ;;  %v2315_v60 = vsel %vm817_vm10, %v4685_v1, %v4795_v51  ;;  %v9252_v1 = vld [vmem:[#allocation138_spill] sm:$0xff]  ;;  %v9260_v4 = vld [vmem:[#allocation60_spill] sm:$0xff] }
 0x307   : > { %v740_v37 = vsel %vm736_vm9, %v9242_v26, %v4140_v58  ;;  %v2314_v58 = vsel %vm817_vm10, %v4795_v51, %v4796_v44  ;;  %v4805_v20 = vunpack.i.l.bf16 %v8105_v11  ;;  %v9251_v45 = vunpack.i.h.bf16 %v9230_v9  ;;  %v9255_v12 = vld [vmem:[#allocation34_spill] sm:$0xff] }
 0x308   : > { %v932_v22 = vsel %vm736_vm9, %v4221_v7, %v9246_v3  ;;  %3330 = vmatpush1.bf16.msra.mxu0 %v9249_v35  ;;  %v9250_v7 = vunpack.i.h.bf16 %v9241_v29  ;;  %v4791_v57 = vunpack.i.h.bf16 %v8012_v61  ;;  %v9254_v30 = vpack.c.bf16 %v9252_v1, %v9253_v63  ;;  %v8190_v26 = vpop.permute.xlu0 %4823  ;;  %v9256_v61 = vld [vmem:[#allocation36_spill] sm:$0xff]  ;;  %v9262_v63 = vld [vmem:[#allocation85_spill] sm:$0xff] }
 0x309   : > { %3369 = vmatpush1.bf16.msra.mxu1 %v2824_v36  ;;  %3331 = vmatprep.subr.bf16.mxu0 %v2791_v31  ;;  %v818_v15 = vsel %vm817_vm10, %v4185_v49, %v9251_v45  ;;  %v2790_v14 = vpack.c.bf16 %v9255_v12, %v740_v37  ;;  %v738_v51 = vsel %vm736_vm9, %v4141_v41, %v4145_v21  ;;  %v4801_v18 = vunpack.i.h.bf16 %v8040_v46  ;;  %v9257_v36 = vld [vmem:[#allocation163_spill] sm:$0xff] }
 0x30a   : > { %v737_v39 = vsel %vm736_vm9, %v4145_v21, %v9250_v7  ;;  %3370 = vmatprep.subr.bf16.mxu1 %v9254_v30  ;;  %v2808_v13 = vpack.c.bf16 %v932_v22, %v818_v15  ;;  %v2998_v0 = vpack.c.bf16 %v2315_v60, %v2315_v60  ;;  %v2999_v29 = vpack.c.bf16 %v2314_v58, %v2314_v58  ;;  %v8199_v21 = vpop.permute.xlu1 %4828 }
 0x30b   : > { %v4806_v9 = vunpack.i.h.bf16 %v8105_v11  ;;  %v2793_v49 = vpack.c.bf16 %v9256_v61, %v737_v39  ;;  %v2235_v47 = vsel %vm736_vm9, %v4791_v57, %v4800_v53  ;;  %v9258_v37 = vunpack.i.h.bf16 %v9257_v36 }
 0x30c   : > { %3332 = vmatpush1.bf16.msra.mxu0 %v2790_v14  ;;  %v2313_v46 = vsel %vm817_vm10, %v4796_v44, %v4805_v20  ;;  %v4810_v11 = vunpack.i.l.bf16 %v8065_v27  ;;  %v2792_v31 = vpack.c.bf16 %v9259_v17, %v738_v51  ;;  %v2236_v24 = vsel %vm736_vm9, %v4695_v55, %v4791_v57  ;;  %v2037_v7 = vpop.permute.xlu0 %2036 }
 0x30d   : > { %v2328_v41 = vsel %vm817_vm10, %v4805_v20, %v9258_v37  ;;  %3371 = vmatpush1.bf16.msra.mxu1 %v2808_v13  ;;  %3763 = vmatprep.subr.msk.bf16.mxu0 %vm3022_vm11, %v2999_v29  ;;  %v3060_v3 = vsel %vm3022_vm11, %v2998_v0, 0  ;;  %v2983_v22 = vpack.c.bf16 %v7569_v50, %v2235_v47  ;;  %v9261_v34 = vunpack.i.h.bf16 %v9260_v4  ;;  %v9266_v29 = vld [vmem:[#allocation87_spill] sm:$0xff] }
 0x30e   : > { %3372 = vmatprep.subr.bf16.mxu1 %v2793_v49  ;;  %v3001_v35 = vpack.c.bf16 %v2328_v41, %v2328_v41  ;;  %v4815_v60 = vunpack.i.l.bf16 %v8150_v38  ;;  %v3000_v58 = vpack.c.bf16 %v2313_v46, %v2313_v46  ;;  %v2121_v43 = vsel %vm817_vm10, %v4806_v9, %v4810_v11  ;;  %v9267_v47 = vld [vmem:[#allocation95_spill] sm:$0xff] }
 0x30f   : > { %v2233_v44 = vsel %vm736_vm9, %v4801_v18, %v9261_v34  ;;  %v4816_v20 = vunpack.i.h.bf16 %v8150_v38  ;;  %v2982_v55 = vpack.c.bf16 %v7057_v52, %v2236_v24  ;;  %v4821_v50 = vunpack.i.h.bf16 %v8099_v25  ;;  %v1731_v38 = vpop.permute.xlu1 %1730  ;;  %v9268_v41 = vld [vmem:[#allocation63_spill] sm:$0xff] }
 0x310   : > { %3338 = vmatpush2.bf16.msra.mxu0 %v3060_v3  ;;  %v4880_v39 = vmov 1983009808   ;;  %v2234_v15 = vsel %vm736_vm9, %v4800_v53, %v4801_v18  ;;  %v2122_v57 = vsel %vm817_vm10, %v4710_v48, %v4806_v9  ;;  %v2967_v1 = vpack.c.bf16 %v2121_v43, %v7628_v5  ;;  %v9263_v48 = vld [vmem:[#allocation61_spill] sm:$0xff]  ;;  %v1844_v49 = vpop.permute.xlu0 %1843  ;;  %v9275_v43 = vld [vmem:[#allocation90_spill] sm:$0xff] }
 0x311   : > { %3373 = vmatpush1.bf16.msra.mxu1 %v2792_v31  ;;  %3339 = vmatprep.subr.bf16.mxu0 %v2983_v22  ;;  %v3450_v45 = vunpack.c.l.s4 %v4880_v39  ;;  %v2985_v52 = vpack.c.bf16 %v9262_v63, %v2233_v44  ;;  %v4826_v30 = vunpack.i.h.bf16 %v8190_v26  ;;  %v4825_v12 = vunpack.i.l.bf16 %v8190_v26  ;;  %v9265_v18 = vld [vmem:[#allocation81_spill] sm:$0xff]  ;;  %v9271_v31 = vld [vmem:[#allocation40_spill] sm:$0xff] }
 0x312   : > { %3765 = vmatprep.subr.msk.bf16.mxu1 %vm3022_vm11, %v3001_v35  ;;  %v3066_v14 = vsel %vm3022_vm11, %v3000_v58, 0  ;;  %v1928_v19 = vsel %vm817_vm10, %v4811_v42, %v4815_v60  ;;  %v4831_v53 = vunpack.i.h.bf16 %v8199_v21  ;;  %v9264_v5 = vunpack.i.l.bf16 %v9263_v48  ;;  %v9274_v35 = vld [vmem:[#allocation98_spill] sm:$0xff]  ;;  %v9280_v63 = vld [vmem:[#allocation89_spill] sm:$0xff] }
 0x313   : > { %v2966_v13 = vpack.c.bf16 %v2122_v57, %v9265_v18  ;;  %v4830_v0 = vunpack.i.l.bf16 %v8199_v21  ;;  %v2042_v27 = vsel %vm736_vm9, %v4820_v62, %v4821_v50  ;;  %v3451_v42 = vunpack.c.0.s8 %v3450_v45  ;;  %v1733_v62 = vpop.permute.xlu1 %1732 }
 0x314   : > { %3340 = vmatpush2.bf16.msra.mxu0 %v2982_v55  ;;  %v2135_v51 = vsel %vm817_vm10, %v4816_v20, %v9264_v5  ;;  %v2984_v9 = vpack.c.bf16 %v9266_v29, %v2234_v15  ;;  %v2120_v26 = vsel %vm817_vm10, %v4810_v11, %v4816_v20  ;;  %v2951_v61 = vpack.c.bf16 %v2042_v27, %v1928_v19  ;;  %v9270_v11 = vld [vmem:[#allocation94_spill] sm:$0xff]  ;;  %v9278_v15 = vld [vmem:[#allocation41_spill] sm:$0xff]  ;;  %v9287_v27 = vld [vmem:[#allocation8_spill] sm:$0xff] }
 0x315   : > { %3379 = vmatpush2.bf16.msra.mxu1 %v3066_v14  ;;  %3341 = vmatprep.subr.bf16.mxu0 %v2967_v1  ;;  %v2969_v36 = vpack.c.bf16 %v2135_v51, %v9267_v47  ;;  %v1849_v37 = vsel %vm736_vm9, %v4825_v12, %v4826_v30  ;;  %v1736_v25 = vsel %vm817_vm10, %v4750_v2, %v4831_v53  ;;  %v9269_v21 = vunpack.i.l.bf16 %v9268_v41  ;;  %v9273_v2 = vld [vmem:[#allocation4_spill] sm:$0xff]  ;;  %v9285_v51 = vld [vmem:[#allocation69_spill] sm:$0xff] }
 0x316   : > { %3380 = vmatprep.subr.bf16.mxu1 %v2985_v52  ;;  %v2968_v17 = vpack.c.bf16 %v2120_v26, %v9270_v11  ;;  %v9272_v24 = vunpack.i.h.bf16 %v9271_v31  ;;  %v1927_v8 = vsel %vm817_vm10, %v4815_v60, %v4830_v0  ;;  %v8271_v22 = vsub.s32 %v3451_v42, %v9273_v2  ;;  %v9276_v60 = vld [vmem:[#allocation62_spill] sm:$0xff]  ;;  %v9288_v26 = vld [vmem:[#allocation79_spill] sm:$0xff] }
 0x317   : > { %v2040_v46 = vsel %vm736_vm9, %v2037_v7, %v9269_v21  ;;  %v1735_v4 = vsel %vm817_vm10, %v4831_v53, %v1731_v38  ;;  %v1850_v34 = vsel %vm736_vm9, %v4735_v16, %v4825_v12  ;;  %v2041_v44 = vsel %vm736_vm9, %v4821_v50, %v2037_v7  ;;  %v9281_v12 = vld [vmem:[#allocation77_spill] sm:$0xff]  ;;  %v9283_v53 = vld [vmem:[#allocation6_spill] sm:$0xff] }
 0x318   : > { %3342 = vmatpush2.bf16.msra.mxu0 %v2966_v13  ;;  %v1942_v3 = vsel %vm817_vm10, %v4830_v0, %v9272_v24  ;;  %v2935_v58 = vpack.c.bf16 %v9274_v35, %v1849_v37  ;;  %v2918_v20 = vpack.c.bf16 %v1736_v25, %v9275_v43  ;;  %v9277_v55 = vunpack.i.l.bf16 %v9276_v60  ;;  %v9286_v13 = vld [vmem:[#allocation96_spill] sm:$0xff] }
 0x319   : > { %3381 = vmatpush2.bf16.msra.mxu1 %v2984_v9  ;;  %3343 = vmatprep.subr.bf16.mxu0 %v2951_v61  ;;  %v2953_v45 = vpack.c.bf16 %v2040_v46, %v1942_v3  ;;  %v9279_v57 = vunpack.i.h.bf16 %v9278_v15  ;;  %v2919_v52 = vpack.c.bf16 %v1735_v4, %v9280_v63  ;;  %v2934_v14 = vpack.c.bf16 %v9281_v12, %v1850_v34 }
 0x31a   : > { %3382 = vmatprep.subr.bf16.mxu1 %v2969_v36  ;;  %v1749_v39 = vsel %vm817_vm10, %v1733_v62, %v9277_v55  ;;  %v2952_v19 = vpack.c.bf16 %v2041_v44, %v1927_v8  ;;  %v1848_v28 = vsel %vm736_vm9, %v4826_v30, %v1844_v49  ;;  %v9289_v8 = vld [vmem:[#allocation71_spill] sm:$0xff] }
 0x31b   : > { %v1847_v56 = vsel %vm736_vm9, %v1844_v49, %v9279_v57  ;;  %v2921_v18 = vpack.c.bf16 %v1749_v39, %v9285_v51  ;;  %v2936_v61 = vpack.c.bf16 %v9288_v26, %v1848_v28  ;;  %v9291_v57 = vld [vmem:[#allocation10_spill] sm:$0xff]  ;;  %v9292_v28 = vld [vmem:[#allocation11_spill] sm:$0xff] }
 0x31c   : > { %3344 = vmatpush2.bf16.msra.mxu0 %v2950_v59  ;;  %v9282_v59 = vld [vmem:[#allocation5_spill] sm:$0xff]  ;;  %v2937_v0 = vpack.c.bf16 %v9286_v13, %v1847_v56 }
 0x31d   : > { %v8294_v16 = vpop.permute.xlu0 %3005  ;;  %3383 = vmatpush2.bf16.msra.mxu1 %v2968_v17  ;;  %3345 = vmatprep.subr.bf16.mxu0 %v2935_v58 }
 0x31e   : > { %v3106_v50 = vadd.f32 %v8006_v23, %v8294_v16  ;;  %v3108_v7 = vadd.f32 %v8015_v33, %v8294_v16  ;;  %v3147_v1 = vadd.f32 %v8028_v40, %v8294_v16  ;;  %3384 = vmatprep.subr.bf16.mxu1 %v2953_v45  ;;  %v3149_v6 = vadd.f32 %v8049_v54, %v8294_v16  ;;  %v9284_v33 = vld [vmem:[#allocation7_spill] sm:$0xff] }
 0x31f   : > { %v1734_v40 = vsel %vm817_vm10, %v1731_v38, %v1733_v62 }
 0x320   : > { %v3399_v23 = vmul.f32 %v3106_v50, %v9282_v59  ;;  %v3400_v48 = vmul.f32 %v3108_v7, %v9283_v53  ;;  %v3401_v5 = vmul.f32 %v3147_v1, %v9284_v33  ;;  %v3402_v42 = vmul.f32 %v3149_v6, %v9287_v27  ;;  %3346 = vmatpush2.bf16.msra.mxu0 %v2934_v14 }
 0x321   : > { %3385 = vmatpush2.bf16.msra.mxu1 %v2952_v19  ;;  %3347 = vmatprep.subr.bf16.mxu0 %v2919_v52  ;;  %v2920_v2 = vpack.c.bf16 %v1734_v40, %v9289_v8 }
 0x322   : > { %v3767_v54 = vpack.c.bf16 %v3400_v48, %v3399_v23  ;;  %v3523_v29 = vsel %vm3022_vm11, %v3399_v23, 0.0  ;;  %v3524_v30 = vsel %vm3022_vm11, %v3400_v48, 0.0  ;;  %v3558_v9 = vmul.f32 %v3399_v23, %v3399_v23  ;;  %3386 = vmatprep.subr.bf16.mxu1 %v2937_v0 }
 0x323   : > { %v3525_v10 = vadd.f32 %v3524_v30, %v3523_v29  ;;  %v3559_v38 = vmul.f32 %v3400_v48, %v3400_v48  ;;  %v3768_v49 = vpack.c.bf16 %v3402_v42, %v3401_v5  ;;  %v3526_v37 = vsel %vm3022_vm11, %v3401_v5, 0.0 }
 0x324   : > { %v3455_v47 = vrot.slane %v3767_v54, %v8271_v22  ;;  %v3574_v36 = vsel %vm3022_vm11, %v3558_v9, 0.0  ;;  %v3560_v25 = vmul.f32 %v3401_v5, %v3401_v5  ;;  %v3561_v46 = vmul.f32 %v3402_v42, %v3402_v42  ;;  %3348 = vmatpush2.bf16.msra.mxu0 %v2918_v20  ;;  %v9290_v20 = vld [vmem:[#allocation9_spill] sm:$0xff] }
 0x325   : > { %v3575_v62 = vsel %vm3022_vm11, %v3559_v38, 0.0  ;;  %v3462_v41 = vrot.slane %v3768_v49, %v8271_v22  ;;  %v3527_v21 = vadd.f32 %v3526_v37, %v3525_v10  ;;  %v3528_v17 = vsel %vm3022_vm11, %v3402_v42, 0.0  ;;  %3387 = vmatpush2.bf16.msra.mxu1 %v2936_v61 }
 0x326   : > { %v3576_v11 = vadd.f32 %v3575_v62, %v3574_v36  ;;  %v3577_v3 = vsel %vm3022_vm11, %v3560_v25, 0.0  ;;  %3388 = vmatprep.subr.bf16.mxu1 %v2921_v18  ;;  %v3579_v34 = vsel %vm3022_vm11, %v3561_v46, 0.0  ;;  %v9293_v18 = vld [vmem:[#allocation12_spill] sm:$0xff] }
 0x327   : > { %v3463_v31 = vcombine.low %v3455_v47, %v3462_v41  ;;  %v3529_v24 = vadd.f32 %v3528_v17, %v3527_v21  ;;  %3350 = vmatmul.mubr.bf16.vlgmr.msra.gmra.mxu0 %v7935_v32 }
 0x328   : > { %v3578_v4 = vadd.f32 %v3577_v3, %v3576_v11  ;;  %v9294_v11 = vld [vmem:[#allocation14_spill] sm:$0xff]  ;;  %v9295_v3 = vld [vmem:[#allocation13_spill] sm:$0xff] }
 0x329   : > { %3519 = vst [vmem:[%s8328_s28] sm:$0xff] %v3463_v31  ;;  %3389 = vmatpush2.bf16.msra.mxu1 %v2920_v2 }
 0x32a   : > { %v3580_v44 = vadd.f32 %v3579_v34, %v3578_v4 }
 0x32c   : > { %3391 = vmatmul.mubr.bf16.vlgmr.msra.gmra.mxu1 %v7935_v32 }
 0x331   : > { %v3187_v35 = vpop.f32.mrf.mxu0 }
 0x332   : > { %v3188_v58 = vadd.f32 %v3187_v35, %v8294_v16 }
 0x333   : > { %v3189_v43 = vpop.f32.mrf.mxu0 }
 0x334   : > { %v3403_v60 = vmul.f32 %v3188_v58, %v9290_v20  ;;  %v3190_v55 = vadd.f32 %v3189_v43, %v8294_v16  ;;  %v9297_v58 = vld [vmem:[#allocation16_spill] sm:$0xff] }
 0x335   : > { %v3191_v39 = vpop.f32.mrf.mxu0 }
 0x336   : > { %v3530_v45 = vsel %vm3022_vm11, %v3403_v60, 0.0  ;;  %v3562_v15 = vmul.f32 %v3403_v60, %v3403_v60  ;;  %v3404_v56 = vmul.f32 %v3190_v55, %v9291_v57 }
 0x337   : > { %v3228_v50 = vpop.f32.mrf.mxu1  ;;  %v3531_v7 = vadd.f32 %v3530_v45, %v3529_v24  ;;  %v3192_v63 = vpop.f32.mrf.mxu0 }
 0x338   : > { %v3229_v1 = vadd.f32 %v3228_v50, %v8294_v16  ;;  %v3581_v32 = vsel %vm3022_vm11, %v3562_v15, 0.0  ;;  %v3532_v52 = vsel %vm3022_vm11, %v3404_v56, 0.0  ;;  %v3563_v12 = vmul.f32 %v3404_v56, %v3404_v56 }
 0x339   : > { %v3230_v14 = vpop.f32.mrf.mxu1  ;;  %v3582_v19 = vadd.f32 %v3581_v32, %v3580_v44  ;;  %v3533_v6 = vadd.f32 %v3532_v52, %v3531_v7  ;;  %v3769_v53 = vpack.c.bf16 %v3404_v56, %v3403_v60  ;;  %v9296_v44 = vld [vmem:[#allocation15_spill] sm:$0xff] }
 0x33a   : > { %v3405_v59 = vmul.f32 %v3229_v1, %v9292_v28  ;;  %v3231_v23 = vadd.f32 %v3230_v14, %v8294_v16  ;;  %v3583_v48 = vsel %vm3022_vm11, %v3563_v12, 0.0 }
 0x33b   : > { %v3232_v33 = vpop.f32.mrf.mxu1  ;;  %v3584_v5 = vadd.f32 %v3583_v48, %v3582_v19  ;;  %v3472_v61 = vrot.slane %v3769_v53, %v8271_v22 }
 0x33c   : > { %v3534_v40 = vsel %vm3022_vm11, %v3405_v59, 0.0  ;;  %v3564_v51 = vmul.f32 %v3405_v59, %v3405_v59  ;;  %v3406_v13 = vmul.f32 %v3231_v23, %v9293_v18 }
 0x33d   : > { %v3535_v0 = vadd.f32 %v3534_v40, %v3533_v6  ;;  %v3233_v27 = vpop.f32.mrf.mxu1 }
 0x33e   : > { %v3585_v42 = vsel %vm3022_vm11, %v3564_v51, 0.0  ;;  %v3770_v54 = vpack.c.bf16 %v3406_v13, %v3405_v59  ;;  %v3536_v29 = vsel %vm3022_vm11, %v3406_v13, 0.0  ;;  %v3565_v30 = vmul.f32 %v3406_v13, %v3406_v13  ;;  %v9298_v51 = vld [vmem:[#allocation17_spill] sm:$0xff] }
 0x33f   : > { %v3586_v9 = vadd.f32 %v3585_v42, %v3584_v5  ;;  %v3537_v26 = vadd.f32 %v3536_v29, %v3535_v0  ;;  %v9299_v29 = vld [vmem:[#allocation18_spill] sm:$0xff] }
 0x340   : > { %v3479_v10 = vrot.slane %v3770_v54, %v8271_v22  ;;  %v3587_v38 = vsel %vm3022_vm11, %v3565_v30, 0.0 }
 0x341   : > { %v3588_v49 = vadd.f32 %v3587_v38, %v3586_v9 }
 0x342   : > { %v3480_v47 = vcombine.low %v3472_v61, %v3479_v10 }
 0x344   : > { %3520 = vst [vmem:[%s8328_s28 + $0x8] sm:$0xff] %v3480_v47 }
 0x3a6   : > { %v3269_v36 = vpop.f32.mrf.mxu0 }
 0x3a7   : > { %v3270_v21 = vadd.f32 %v3269_v36, %v8294_v16 }
 0x3a8   : > { %v3271_v37 = vpop.f32.mrf.mxu0 }
 0x3a9   : > { %v3272_v41 = vadd.f32 %v3271_v37, %v8294_v16  ;;  %v3407_v8 = vmul.f32 %v3270_v21, %v9295_v3  ;;  %v9301_v3 = vld [vmem:[#allocation20_spill] sm:$0xff] }
 0x3aa   : > { %v3273_v25 = vpop.f32.mrf.mxu0 }
 0x3ab   : > { %v3408_v17 = vmul.f32 %v3272_v41, %v9294_v11  ;;  %v3566_v15 = vmul.f32 %v3407_v8, %v3407_v8  ;;  %v3538_v57 = vsel %vm3022_vm11, %v3407_v8, 0.0  ;;  %v9300_v25 = vld [vmem:[#allocation19_spill] sm:$0xff] }
 0x3ac   : > { %v3274_v62 = vpop.f32.mrf.mxu0  ;;  %v3539_v7 = vadd.f32 %v3538_v57, %v3537_v26 }
 0x3ad   : > { %v3771_v34 = vpack.c.bf16 %v3408_v17, %v3407_v8  ;;  %v3589_v56 = vsel %vm3022_vm11, %v3566_v15, 0.0  ;;  %v3567_v50 = vmul.f32 %v3408_v17, %v3408_v17  ;;  %v3540_v1 = vsel %vm3022_vm11, %v3408_v17, 0.0 }
 0x3ae   : > { %v3590_v32 = vadd.f32 %v3589_v56, %v3588_v49  ;;  %v3541_v14 = vadd.f32 %v3540_v1, %v3539_v7 }
 0x3af   : > { %v3489_v55 = vrot.slane %v3771_v34, %v8271_v22  ;;  %v3591_v52 = vsel %vm3022_vm11, %v3567_v50, 0.0 }
 0x3b0   : > { %v3592_v28 = vadd.f32 %v3591_v52, %v3590_v32 }
 0x3b2   : > { %v3310_v46 = vpop.f32.mrf.mxu1 }
 0x3b3   : > { %v3311_v31 = vadd.f32 %v3310_v46, %v8294_v16 }
 0x3b4   : > { %v3312_v24 = vpop.f32.mrf.mxu1 }
 0x3b5   : > { %v3313_v2 = vadd.f32 %v3312_v24, %v8294_v16  ;;  %v3409_v35 = vmul.f32 %v3311_v31, %v9296_v44 }
 0x3b6   : > { %v3314_v4 = vpop.f32.mrf.mxu1 }
 0x3b7   : > { %v3410_v43 = vmul.f32 %v3313_v2, %v9297_v58  ;;  %v3568_v63 = vmul.f32 %v3409_v35, %v3409_v35  ;;  %v3542_v12 = vsel %vm3022_vm11, %v3409_v35, 0.0 }
 0x3b8   : > { %v3315_v20 = vpop.f32.mrf.mxu1  ;;  %v3543_v59 = vadd.f32 %v3542_v12, %v3541_v14 }
 0x3b9   : > { %v3772_v60 = vpack.c.bf16 %v3410_v43, %v3409_v35  ;;  %v3593_v19 = vsel %vm3022_vm11, %v3568_v63, 0.0  ;;  %v3569_v6 = vmul.f32 %v3410_v43, %v3410_v43  ;;  %v3544_v53 = vsel %vm3022_vm11, %v3410_v43, 0.0 }
 0x3ba   : > { %v3594_v33 = vadd.f32 %v3593_v19, %v3592_v28  ;;  %v3545_v0 = vadd.f32 %v3544_v53, %v3543_v59 }
 0x3bb   : > { %v3496_v39 = vrot.slane %v3772_v60, %v8271_v22  ;;  %v3595_v40 = vsel %vm3022_vm11, %v3569_v6, 0.0 }
 0x3bc   : > { %v3596_v26 = vadd.f32 %v3595_v40, %v3594_v33 }
 0x3bd   : > { %v3497_v45 = vcombine.low %v3489_v55, %v3496_v39 }
 0x3bf   : > { %3521 = vst [vmem:[%s8328_s28 + $0x10] sm:$0xff] %v3497_v45 }
 0x3e7   : > { %v3351_v23 = vpop.f32.mrf.mxu0 }
 0x3e8   : > { %v3352_v48 = vadd.f32 %v3351_v23, %v8294_v16 }
 0x3e9   : > { %v3353_v5 = vpop.f32.mrf.mxu0 }
 0x3ea   : > { %v3411_v18 = vmul.f32 %v3352_v48, %v9298_v51  ;;  %v3354_v13 = vadd.f32 %v3353_v5, %v8294_v16 }
 0x3eb   : > { %v3355_v27 = vpop.f32.mrf.mxu0 }
 0x3ec   : > { %v3546_v42 = vsel %vm3022_vm11, %v3411_v18, 0.0  ;;  %v3570_v54 = vmul.f32 %v3411_v18, %v3411_v18  ;;  %v3412_v30 = vmul.f32 %v3354_v13, %v9299_v29  ;;  %v3392_v9 = vpop.f32.mrf.mxu1 }
 0x3ed   : > { %v3547_v61 = vadd.f32 %v3546_v42, %v3545_v0  ;;  %v3393_v10 = vadd.f32 %v3392_v9, %v8294_v16  ;;  %v3356_v38 = vpop.f32.mrf.mxu0 }
 0x3ee   : > { %v3597_v49 = vsel %vm3022_vm11, %v3570_v54, 0.0  ;;  %v3548_v47 = vsel %vm3022_vm11, %v3412_v30, 0.0  ;;  %v3571_v36 = vmul.f32 %v3412_v30, %v3412_v30  ;;  %v3394_v37 = vpop.f32.mrf.mxu1  ;;  %v3773_v11 = vpack.c.bf16 %v3412_v30, %v3411_v18 }
 0x3ef   : > { %v3413_v62 = vmul.f32 %v3393_v10, %v9300_v25  ;;  %v3395_v41 = vadd.f32 %v3394_v37, %v8294_v16  ;;  %v3549_v21 = vadd.f32 %v3548_v47, %v3547_v61  ;;  %v3598_v46 = vadd.f32 %v3597_v49, %v3596_v26 }
 0x3f0   : > { %v3396_v17 = vpop.f32.mrf.mxu1  ;;  %v3599_v31 = vsel %vm3022_vm11, %v3571_v36, 0.0  ;;  %v3506_v55 = vrot.slane %v3773_v11, %v8271_v22 }
 0x3f1   : > { %v3572_v24 = vmul.f32 %v3413_v62, %v3413_v62  ;;  %v3414_v8 = vmul.f32 %v3395_v41, %v9301_v3  ;;  %v3550_v2 = vsel %vm3022_vm11, %v3413_v62, 0.0  ;;  %v3600_v4 = vadd.f32 %v3599_v31, %v3598_v46 }
 0x3f2   : > { %v3397_v34 = vpop.f32.mrf.mxu1  ;;  %v3551_v44 = vadd.f32 %v3550_v2, %v3549_v21 }
 0x3f3   : > { %v3774_v35 = vpack.c.bf16 %v3414_v8, %v3413_v62  ;;  %v3552_v58 = vsel %vm3022_vm11, %v3414_v8, 0.0  ;;  %v3573_v16 = vmul.f32 %v3414_v8, %v3414_v8  ;;  %v3601_v43 = vsel %vm3022_vm11, %v3572_v24, 0.0 }
 0x3f4   : > { %v3553_v20 = vadd.f32 %v3552_v58, %v3551_v44  ;;  %v3602_v60 = vadd.f32 %v3601_v43, %v3600_v4 }
 0x3f5   : > { %v3513_v39 = vrot.slane %v3774_v35, %v8271_v22  ;;  %v3603_v45 = vsel %vm3022_vm11, %v3573_v16, 0.0 }
 0x3f6   : > { %3554 = vadd.xlane.f32.xlu1 %v3553_v20  ;;  %v3604_v15 = vadd.f32 %v3603_v45, %v3602_v60 }
 0x3f7   : > { %v3514_v57 = vcombine.low %v3506_v55, %v3513_v39 }
 0x3f8   : > { %3605 = vadd.xlane.f32.xlu0 %v3604_v15 }
 0x3f9   : > { %3522 = vst [vmem:[%s8328_s28 + $0x18] sm:$0xff] %v3514_v57 }
 0x47f   : > { %v3555_v56 = vpop.xlane.xlu1 %3554 }
 0x480   : > { %3557 = vst.msk [vmem:[%s369_s12] sm:$0xf] %vm3556_vm12, %v3555_v56 }
 0x481   : > { %v3606_v22 = vpop.xlane.xlu0 %3605 }
 0x482   : > { %3607 = vst.msk [vmem:[%s373_s16] sm:$0xf] %vm3556_vm12, %v3606_v22 }
 0x483 PF: > { %s20_s30 = sadd.s32 1, %s4866_s30  }
 0x484   : > { %p17_p4 = scmp.ge.s32.totalorder %s20_s30, 4  }
 0x486   :  { %19 = sbr.rel (!%p17_p4) target bundleno = 1 (0x1), region = 105 }

// kernel: upsample_unet3d_forward.5
= control target key start
LH: loop header
LB: loop body
LE: loop exit
PB: predicated region body
PF: predicated region fallthrough
CT: control target
= control target key end

     0   :  { %s3985_s27 = smov 0   ;;  %s6794_s0 = inlined_call_operand.vmem [shape: bf16[2,4,2048], index: 0, kind: input, shape index: {}]   ;;  %s6795_s1 = inlined_call_operand.vmem [shape: bf16[4,108], index: 1, kind: input, shape index: {}]   ;;  %s6796_s2 = inlined_call_operand.vmem [shape: f32[4,1], index: 2, kind: input, shape index: {}]   ;;  %s6797_s3 = inlined_call_operand.vmem [shape: f32[4,1], index: 3, kind: input, shape index: {}]   ;;  %s6798_s4 = inlined_call_operand.vmem [shape: f32[4,1], index: 4, kind: input, shape index: {}]   ;;  %s6799_s5 = inlined_call_operand.vmem [shape: f32[1,2048], index: 5, kind: input, shape index: {}]   ;;  %s6800_s6 = inlined_call_operand.vmem [shape: bf16[2,4,2048], index: 6, kind: output, shape index: {0}]   ;;  %s6801_s7 = inlined_call_operand.vmem [shape: f32[2,4,1], index: 7, kind: output, shape index: {1}]   ;;  %s6802_s8 = inlined_call_operand.vmem [shape: f32[2,4,1], index: 8, kind: output, shape index: {2}]  }
   0x1 LB: > { %s3857_s28 = sadd.s32 4294967295, %s3925_s27   ;;  %p3861_p0 = scmp.ge.s32.totalorder %s3925_s27, 1  ;;  %s3925_s27 = sphi %s3985_s27, %s19_s27  }
   0x2   : > { %p267_p1 = scmp.lt.s32.totalorder %s3925_s27, 3 }
   0x4   : > { %p268_p2 = pnand %p3861_p0, %p267_p1 }
   0x6   : > { %271 = sbr.rel (%p268_p2) target bundleno = 1649 (0x671), region = 44 }
   0xb   : > { %v342_v0 = vld [vmem:[%s6797_s3] sm:$0xf]  ;;  %v6803_v1 = vmov 0   ;;  %p309_p3 = scmp.lt.s32.totalorder %s3857_s28, 1  ;;  %v350_v3 = vlaneseq  ;;  %v3928_v4 = vmov 839922192  }
   0xc   : > { %3917 = vset.pattern.permute.xlu0 %v6803_v1  ;;  %3234 = vmatprep.mubr.bf16.mxu0 %v6803_v1  ;;  %v363_v2 = vld [vmem:[%s6798_s4] sm:$0xf]  ;;  %v348_v5 = vunpack.c.l.s4 %v3928_v4  ;;  %v329_v21 = vld [vmem:[%s6799_s5 + $0x8] sm:$0xff]  ;;  %s3929_s19 = smov 86   ;;  %s3930_s20 = smov 68   ;;  %vm3153_vm10 = vcmask 1045504  }
   0xd   : > { %345 = vperm.xlu0 %3917, %v342_v0   ;;  %3275 = vmatprep.mubr.bf16.mxu1 %v6803_v1  ;;  %s6948_s28 = smov (!%p309_p3, %s3857_s28), 1  ;;  %v4011_v6 = vshrl.u32 %v350_v3, 7  ;;  %v328_v17 = vld [vmem:[%s6799_s5] sm:$0xff]  ;;  %s3931_s21 = smov 50   ;;  %vm3149_vm11 = vcmask 883712   ;;  %vm3654_vm12 = vcmask 1043456  }
   0xe   : > { %s3894_s11 = sshll.u32 %s6948_s28, 5  ;;  %v349_v7 = vunpack.c.0.s8 %v348_v5  ;;  %s3932_s22 = smov 1   ;;  %vm3688_vm13 = vcmask 3072  }
   0xf   : > { %s313_s14 = scalar_lea.vmem %s6794_s0, %s3894_s11  ;;  %6860 = vst [vmem:[#allocation3_spill] sm:$0xff] %v4011_v6  ;;  %v396_v9 = vsub.s32 0, %v4011_v6  ;;  %v400_v10 = vsub.s32 1, %v4011_v6  ;;  %v404_v11 = vsub.s32 2, %v4011_v6  ;;  %v408_v12 = vsub.s32 3, %v4011_v6  ;;  %s3933_s23 = smov 127  }
  0x10   : > { %v330_v8 = vld [vmem:[%s313_s14] sm:$0xff]  ;;  %v412_v13 = vsub.s32 4, %v4011_v6  ;;  %v416_v14 = vsub.s32 5, %v4011_v6  ;;  %v420_v15 = vsub.s32 6, %v4011_v6  ;;  %v424_v16 = vsub.s32 7, %v4011_v6  ;;  %v331_v26 = vld [vmem:[%s313_s14 + $0x8] sm:$0xff]  ;;  %s6720_s18 = scalar_lea.vmem %s6800_s6, %s3894_s11 }
  0x11   : > { %366 = vperm.xlu0 %3917, %v363_v2   ;;  %v352_v18 = vsub.s32 %v349_v7, %v4011_v6  ;;  %v334_v19 = vunpack.c.l.bf16 %v330_v8  ;;  %v335_v20 = vunpack.c.h.bf16 %v330_v8  ;;  %v4028_v22 = vrot.slane %v328_v17, %v396_v9  ;;  %v332_v27 = vld [vmem:[%s313_s14 + $0x10] sm:$0xff]  ;;  %v333_v32 = vld [vmem:[%s313_s14 + $0x18] sm:$0xff]  ;;  %s3934_s24 = smov 18   ;;  %s3935_s25 = smov 42  }
  0x12   : > { %v4030_v23 = vrot.slane %v328_v17, %v400_v10  ;;  %v4032_v24 = vrot.slane %v328_v17, %v404_v11  ;;  %v4034_v25 = vrot.slane %v328_v17, %v408_v12  ;;  %v4036_v28 = vrot.slane %v328_v17, %v412_v13  ;;  %s3936_s26 = smov 60   ;;  %s3937_s29 = smov 78  }
  0x13   : > { %6861 = vst [vmem:[#allocation4_spill] sm:$0xff] %v4028_v22  ;;  %v4038_v29 = vrot.slane %v328_v17, %v416_v14  ;;  %v4040_v30 = vrot.slane %v328_v17, %v420_v15  ;;  %v4042_v31 = vrot.slane %v328_v17, %v424_v16  ;;  %v4044_v33 = vrot.slane %v329_v21, %v396_v9  ;;  %s3938_s30 = smov 110   ;;  %s3866_s11 = sshll.u32 %s6948_s28, 2 }
  0x14   : > { %6862 = vst [vmem:[#allocation5_spill] sm:$0xff] %v4030_v23  ;;  %6863 = vst [vmem:[#allocation6_spill] sm:$0xff] %v4032_v24  ;;  %v4046_v34 = vrot.slane %v329_v21, %v400_v10  ;;  %v4048_v35 = vrot.slane %v329_v21, %v404_v11  ;;  %v4050_v36 = vrot.slane %v329_v21, %v408_v12  ;;  %v336_v42 = vunpack.c.l.bf16 %v331_v26 }
  0x15   : > { %6864 = vst [vmem:[#allocation7_spill] sm:$0xff] %v4034_v25  ;;  %6865 = vst [vmem:[#allocation8_spill] sm:$0xff] %v4036_v28  ;;  %v4052_v38 = vrot.slane %v329_v21, %v412_v13  ;;  %v4054_v39 = vrot.slane %v329_v21, %v416_v14  ;;  %v4056_v40 = vrot.slane %v329_v21, %v420_v15  ;;  %v337_v43 = vunpack.c.h.bf16 %v331_v26 }
  0x16   : > { %6866 = vst [vmem:[#allocation9_spill] sm:$0xff] %v4038_v29  ;;  %6867 = vst [vmem:[#allocation10_spill] sm:$0xff] %v4040_v30  ;;  %v4058_v41 = vrot.slane %v329_v21, %v424_v16  ;;  %v338_v44 = vunpack.c.l.bf16 %v332_v27  ;;  %v339_v46 = vunpack.c.h.bf16 %v332_v27  ;;  %v340_v47 = vunpack.c.l.bf16 %v333_v32 }
  0x17   : > { %6868 = vst [vmem:[#allocation11_spill] sm:$0xff] %v4042_v31  ;;  %6869 = vst [vmem:[#allocation12_spill] sm:$0xff] %v4044_v33  ;;  %v341_v48 = vunpack.c.h.bf16 %v333_v32  ;;  %v474_v49 = vcombine.low %v4028_v22, %v4030_v23  ;;  %v475_v50 = vcombine.low %v4032_v24, %v4034_v25  ;;  %v476_v51 = vcombine.low %v4036_v28, %v4038_v29 }
  0x18   : > { %6870 = vst [vmem:[#allocation13_spill] sm:$0xff] %v4046_v34  ;;  %6871 = vst [vmem:[#allocation14_spill] sm:$0xff] %v4048_v35  ;;  %v477_v52 = vcombine.low %v4040_v30, %v4042_v31  ;;  %v478_v53 = vcombine.low %v4044_v33, %v4046_v34  ;;  %v479_v56 = vcombine.low %v4048_v35, %v4050_v36 }
  0x19   : > { %6872 = vst [vmem:[#allocation15_spill] sm:$0xff] %v4050_v36  ;;  %6873 = vst [vmem:[#allocation16_spill] sm:$0xff] %v4052_v38  ;;  %v480_v57 = vcombine.low %v4052_v38, %v4054_v39  ;;  %v481_v58 = vcombine.low %v4056_v40, %v4058_v41 }
  0x1a   : > { %6874 = vst [vmem:[#allocation17_spill] sm:$0xff] %v4054_v39  ;;  %6875 = vst [vmem:[#allocation18_spill] sm:$0xff] %v4056_v40 }
  0x1b   : > { %6876 = vst [vmem:[#allocation19_spill] sm:$0xff] %v4058_v41 }
  0x88   : > { %v346_v37 = vpop.permute.xlu0 %345 }
  0x89   : > { %v353_v45 = vrot.slane %v346_v37, %v352_v18 }
  0x8b   : > { %v355_v54 = vmul.f32 %v353_v45, %v334_v19  ;;  %v356_v59 = vmul.f32 %v353_v45, %v335_v20  ;;  %v357_v60 = vmul.f32 %v353_v45, %v336_v42  ;;  %v358_v61 = vmul.f32 %v353_v45, %v337_v43 }
  0x8c   : > { %v367_v55 = vpop.permute.xlu0 %366  ;;  %v359_v63 = vmul.f32 %v353_v45, %v338_v44  ;;  %v360_v0 = vmul.f32 %v353_v45, %v339_v46  ;;  %v361_v2 = vmul.f32 %v353_v45, %v340_v47  ;;  %v362_v4 = vmul.f32 %v353_v45, %v341_v48 }
  0x8d   : > { %v374_v62 = vrot.slane %v367_v55, %v352_v18 }
  0x8f   : > { %v376_v5 = vadd.f32 %v374_v62, %v355_v54  ;;  %v377_v7 = vadd.f32 %v374_v62, %v356_v59  ;;  %v378_v8 = vadd.f32 %v374_v62, %v357_v60  ;;  %v379_v9 = vadd.f32 %v374_v62, %v358_v61 }
  0x90   : > { %v380_v10 = vadd.f32 %v374_v62, %v359_v63  ;;  %v381_v11 = vadd.f32 %v374_v62, %v360_v0  ;;  %v382_v12 = vadd.f32 %v374_v62, %v361_v2  ;;  %v383_v13 = vadd.f32 %v374_v62, %v362_v4 }
  0x91   : > { %v384_v14 = vmax.f32 %v376_v5, 0.0  ;;  %v385_v15 = vmax.f32 %v377_v7, 0.0  ;;  %v386_v16 = vmax.f32 %v378_v8, 0.0  ;;  %v387_v17 = vmax.f32 %v379_v9, 0.0 }
  0x92   : > { %v388_v19 = vmax.f32 %v380_v10, 0.0  ;;  %v389_v20 = vmax.f32 %v381_v11, 0.0  ;;  %v390_v21 = vmax.f32 %v382_v12, 0.0  ;;  %v391_v18 = vmax.f32 %v383_v13, 0.0 }
  0x93   : > { %v4076_v26 = vmul.f32 %v474_v49, %v384_v14  ;;  %v4078_v27 = vmul.f32 %v475_v50, %v385_v15  ;;  %v4080_v32 = vmul.f32 %v476_v51, %v386_v16  ;;  %v4082_v37 = vmul.f32 %v477_v52, %v387_v17 }
  0x94   : > { %v4084_v42 = vmul.f32 %v478_v53, %v388_v19  ;;  %v4086_v43 = vmul.f32 %v479_v56, %v389_v20  ;;  %v4088_v44 = vmul.f32 %v480_v57, %v390_v21  ;;  %v4090_v45 = vmul.f32 %v481_v58, %v391_v18 }
  0x95   : > { %1667 = vst [vmem:[#allocation2 + $0x418] sm:$0xf0] %v4076_v26  ;;  %1669 = vst [vmem:[#allocation2 + $0x568] sm:$0xf0] %v4078_v27  ;;  %526 = vrot.lane.b32.xlu0 %v4078_v27, %s3929_s19  ;;  %522 = vrot.lane.b32.xlu1 %v4076_v26, %s3929_s19  ;;  %v4106_v46 = vcombine.high %v4076_v26, %v4076_v26  ;;  %v1650_v47 = vcombine.low %v4076_v26, %v4076_v26  ;;  %v4213_v62 = vand.u32 127, %v350_v3 }
  0x96   : > { %6877 = vst [vmem:[#allocation20_spill] sm:$0xff] %v4086_v43  ;;  %6878 = vst [vmem:[#allocation21_spill] sm:$0xff] %v4088_v44  ;;  %v1651_v48 = vcombine.low %v4078_v27, %v4078_v27  ;;  %v1652_v49 = vcombine.low %v4080_v32, %v4080_v32  ;;  %v1653_v50 = vcombine.low %v4082_v37, %v4082_v37 }
  0x97   : > { %6879 = vst [vmem:[#allocation22_spill] sm:$0xff] %v4090_v45  ;;  %1671 = vst [vmem:[#allocation2 + $0x268] sm:$0xf0] %v4080_v32  ;;  %v1654_v51 = vcombine.low %v4084_v42, %v4084_v42  ;;  %v1655_v52 = vcombine.low %v4086_v43, %v4086_v43  ;;  %v1656_v53 = vcombine.low %v4088_v44, %v4088_v44  ;;  %vm556_vm0 = vcmp.lt.s32.totalorder %v4213_v62, 86 }
  0x98   : > { %1673 = vst [vmem:[#allocation2 + $0x28] sm:$0xf0] %v4082_v37  ;;  %1675 = vst [vmem:[#allocation2 + $0x4f8] sm:$0xf0] %v4084_v42  ;;  %v1657_v54 = vcombine.low %v4090_v45, %v4090_v45  ;;  %v4130_v55 = vcombine.high %v4078_v27, %v4078_v27  ;;  %v4138_v56 = vcombine.high %v4080_v32, %v4080_v32  ;;  %vm799_vm1 = vcmp.lt.s32.totalorder %v4213_v62, 68 }
  0x99   : > { %1677 = vst [vmem:[#allocation2 + $0x1b0] sm:$0xf0] %v4086_v43  ;;  %1679 = vst [vmem:[#allocation2 + $0x178] sm:$0xf0] %v4088_v44  ;;  %530 = vrot.lane.b32.xlu0 %v4080_v32, %s3929_s19  ;;  %524 = vrot.lane.b32.xlu1 %v4106_v46, %s3929_s19  ;;  %v4146_v57 = vcombine.high %v4082_v37, %v4082_v37  ;;  %v4154_v58 = vcombine.high %v4084_v42, %v4084_v42  ;;  %vm1088_vm2 = vcmp.lt.s32.totalorder %v4213_v62, 50 }
  0x9a   : > { %1681 = vst [vmem:[#allocation2 + $0x488] sm:$0xf0] %v4090_v45  ;;  %1666 = vst [vmem:[#allocation2 + $0x230] sm:$0xf0] %v1650_v47  ;;  %v4162_v59 = vcombine.high %v4086_v43, %v4086_v43  ;;  %v4170_v60 = vcombine.high %v4088_v44, %v4088_v44  ;;  %v4177_v61 = vcombine.high %v4090_v45, %v4090_v45  ;;  %vm605_vm3 = vcmp.lt.s32.totalorder %v4213_v62, 1 }
  0x9b   : > { %1668 = vst [vmem:[#allocation2 + $0x250] sm:$0xf0] %v1651_v48  ;;  %1670 = vst [vmem:[#allocation2 + $0x3b8] sm:$0xf0] %v1652_v49  ;;  %vm734_vm4 = vcmp.lt.s32.totalorder %v4213_v62, 127  ;;  %vm1329_vm5 = vcmp.lt.s32.totalorder %v4213_v62, 18 }
  0x9c   : > { %1672 = vst [vmem:[#allocation2 + $0x660] sm:$0xf0] %v1653_v50  ;;  %1674 = vst [vmem:[#allocation2 + $0x5f0] sm:$0xf0] %v1654_v51  ;;  %vm2308_vm6 = vcmp.lt.s32.totalorder %v4213_v62, 60  ;;  %vm2597_vm7 = vcmp.lt.s32.totalorder %v4213_v62, 42 }
  0x9d   : > { %1676 = vst [vmem:[#allocation2 + $0x288] sm:$0xf0] %v1655_v52  ;;  %1678 = vst [vmem:[#allocation2 + $0x420] sm:$0xf0] %v1656_v53  ;;  %534 = vrot.lane.b32.xlu0 %v4082_v37, %s3929_s19  ;;  %528 = vrot.lane.b32.xlu1 %v4130_v55, %s3929_s19  ;;  %vm2067_vm8 = vcmp.lt.s32.totalorder %v4213_v62, 78  ;;  %vm1778_vm9 = vcmp.lt.s32.totalorder %v4213_v62, 110 }
  0x9e   : > { %1680 = vst [vmem:[#allocation2 + $0x390] sm:$0xf0] %v1657_v54  ;;  %6880 = vst [vmem:[#allocation23_spill] sm:$0xff] %v4154_v58 }
  0x9f   : > { %6881 = vst [vmem:[#allocation24_spill] sm:$0xff] %v4162_v59  ;;  %6882 = vst [vmem:[#allocation25_spill] sm:$0xff] %v4170_v60 }
  0xa0   : > { %6883 = vst [vmem:[#allocation26_spill] sm:$0xff] %v4177_v61 }
  0xa1   : > { %538 = vrot.lane.b32.xlu0 %v4084_v42, %s3929_s19  ;;  %532 = vrot.lane.b32.xlu1 %v4138_v56, %s3929_s19 }
  0xa5   : > { %542 = vrot.lane.b32.xlu0 %v4086_v43, %s3929_s19  ;;  %536 = vrot.lane.b32.xlu1 %v4146_v57, %s3929_s19 }
  0xa9   : > { %546 = vrot.lane.b32.xlu0 %v4088_v44, %s3929_s19  ;;  %540 = vrot.lane.b32.xlu1 %v4154_v58, %s3929_s19 }
  0xad   : > { %550 = vrot.lane.b32.xlu0 %v4090_v45, %s3929_s19  ;;  %544 = vrot.lane.b32.xlu1 %v4162_v59, %s3929_s19 }
  0xb1   : > { %767 = vrot.lane.b32.xlu0 %v4076_v26, %s3930_s20  ;;  %548 = vrot.lane.b32.xlu1 %v4170_v60, %s3929_s19 }
  0xb5   : > { %771 = vrot.lane.b32.xlu0 %v4078_v27, %s3930_s20  ;;  %552 = vrot.lane.b32.xlu1 %v4177_v61, %s3929_s19 }
  0xb9   : > { %775 = vrot.lane.b32.xlu0 %v4080_v32, %s3930_s20  ;;  %769 = vrot.lane.b32.xlu1 %v4106_v46, %s3930_s20 }
  0xbd   : > { %779 = vrot.lane.b32.xlu0 %v4082_v37, %s3930_s20  ;;  %773 = vrot.lane.b32.xlu1 %v4130_v55, %s3930_s20 }
  0xc1   : > { %783 = vrot.lane.b32.xlu0 %v4084_v42, %s3930_s20  ;;  %777 = vrot.lane.b32.xlu1 %v4138_v56, %s3930_s20 }
  0xc5   : > { %787 = vrot.lane.b32.xlu0 %v4086_v43, %s3930_s20  ;;  %781 = vrot.lane.b32.xlu1 %v4146_v57, %s3930_s20 }
  0xc9   : > { %791 = vrot.lane.b32.xlu0 %v4088_v44, %s3930_s20  ;;  %785 = vrot.lane.b32.xlu1 %v4154_v58, %s3930_s20 }
  0xcd   : > { %795 = vrot.lane.b32.xlu0 %v4090_v45, %s3930_s20  ;;  %789 = vrot.lane.b32.xlu1 %v4162_v59, %s3930_s20 }
  0xd1   : > { %1056 = vrot.lane.b32.xlu0 %v4076_v26, %s3931_s21  ;;  %793 = vrot.lane.b32.xlu1 %v4170_v60, %s3930_s20 }
  0xd5   : > { %1060 = vrot.lane.b32.xlu0 %v4078_v27, %s3931_s21  ;;  %797 = vrot.lane.b32.xlu1 %v4177_v61, %s3930_s20 }
  0xd9   : > { %1064 = vrot.lane.b32.xlu0 %v4080_v32, %s3931_s21  ;;  %1058 = vrot.lane.b32.xlu1 %v4106_v46, %s3931_s21 }
  0xdd   : > { %1068 = vrot.lane.b32.xlu0 %v4082_v37, %s3931_s21  ;;  %1062 = vrot.lane.b32.xlu1 %v4130_v55, %s3931_s21 }
  0xe1   : > { %1072 = vrot.lane.b32.xlu0 %v4084_v42, %s3931_s21  ;;  %1066 = vrot.lane.b32.xlu1 %v4138_v56, %s3931_s21 }
  0xe5   : > { %1076 = vrot.lane.b32.xlu0 %v4086_v43, %s3931_s21  ;;  %1070 = vrot.lane.b32.xlu1 %v4146_v57, %s3931_s21 }
  0xe9   : > { %1080 = vrot.lane.b32.xlu0 %v4088_v44, %s3931_s21  ;;  %1074 = vrot.lane.b32.xlu1 %v4154_v58, %s3931_s21 }
  0xed   : > { %1084 = vrot.lane.b32.xlu0 %v4090_v45, %s3931_s21  ;;  %1078 = vrot.lane.b32.xlu1 %v4162_v59, %s3931_s21 }
  0xf1   : > { %1082 = vrot.lane.b32.xlu1 %v4170_v60, %s3931_s21 }
  0xf5   : > { %1086 = vrot.lane.b32.xlu1 %v4177_v61, %s3931_s21  ;;  %s322_s21 = scalar_lea.vmem %s6801_s7, %s3866_s11 }
 0x107   : > { %v527_v63 = vpop.permute.xlu0 %526  ;;  %v4215_v0 = vpop.permute.xlu1 %522 }
 0x10b   : > { %v531_v2 = vpop.permute.xlu0 %530  ;;  %v525_v4 = vpop.permute.xlu1 %524 }
 0x10c   : > { %v4220_v5 = vsel %vm556_vm0, %v525_v4, %v527_v63  ;;  %v4225_v7 = vsel %vm556_vm0, %v4215_v0, %v525_v4 }
 0x10d   : > { %v658_v8 = vrot.slane %v4220_v5, 4  ;;  %v657_v3 = vrot.slane %v4225_v7, 4 }
 0x10f   : > { %v535_v9 = vpop.permute.xlu0 %534  ;;  %v529_v10 = vpop.permute.xlu1 %528  ;;  %690 = vst [vmem:[#allocation2 + $0x450] sm:$0xf0] %v658_v8  ;;  %689 = vst [vmem:[#allocation2 + $0x18] sm:$0xf0] %v657_v3 }
 0x110   : > { %v4231_v11 = vsel %vm556_vm0, %v529_v10, %v531_v2  ;;  %v4235_v12 = vsel %vm556_vm0, %v527_v63, %v529_v10 }
 0x111   : > { %v660_v13 = vrot.slane %v4231_v11, 4  ;;  %v659_v14 = vrot.slane %v4235_v12, 4 }
 0x113   : > { %v539_v15 = vpop.permute.xlu0 %538  ;;  %v533_v16 = vpop.permute.xlu1 %532  ;;  %692 = vst [vmem:[#allocation2 + $0x440] sm:$0xf0] %v660_v13  ;;  %691 = vst [vmem:[#allocation2 + $0x328] sm:$0xf0] %v659_v14 }
 0x114   : > { %v4241_v17 = vsel %vm556_vm0, %v533_v16, %v535_v9  ;;  %v4245_v19 = vsel %vm556_vm0, %v531_v2, %v533_v16 }
 0x115   : > { %v662_v20 = vrot.slane %v4241_v17, 4  ;;  %v661_v21 = vrot.slane %v4245_v19, 4 }
 0x117   : > { %v543_v18 = vpop.permute.xlu0 %542  ;;  %v537_v47 = vpop.permute.xlu1 %536  ;;  %694 = vst [vmem:[#allocation2 + $0x108] sm:$0xf0] %v662_v20  ;;  %693 = vst [vmem:[#allocation2 + $0x378] sm:$0xf0] %v661_v21 }
 0x118   : > { %v4251_v48 = vsel %vm556_vm0, %v537_v47, %v539_v15  ;;  %v4255_v49 = vsel %vm556_vm0, %v535_v9, %v537_v47 }
 0x119   : > { %v664_v50 = vrot.slane %v4251_v48, 4  ;;  %v663_v51 = vrot.slane %v4255_v49, 4 }
 0x11b   : > { %v547_v52 = vpop.permute.xlu0 %546  ;;  %v541_v53 = vpop.permute.xlu1 %540  ;;  %696 = vst [vmem:[#allocation2 + $0x490] sm:$0xf0] %v664_v50  ;;  %695 = vst [vmem:[#allocation2 + $0x510] sm:$0xf0] %v663_v51 }
 0x11c   : > { %v4261_v54 = vsel %vm556_vm0, %v541_v53, %v543_v18  ;;  %v4265_v63 = vsel %vm556_vm0, %v539_v15, %v541_v53 }
 0x11d   : > { %v666_v2 = vrot.slane %v4261_v54, 4  ;;  %v665_v4 = vrot.slane %v4265_v63, 4 }
 0x11f   : > { %v551_v8 = vpop.permute.xlu0 %550  ;;  %v545_v3 = vpop.permute.xlu1 %544  ;;  %698 = vst [vmem:[#allocation2 + $0x548] sm:$0xf0] %v666_v2  ;;  %697 = vst [vmem:[#allocation2 + $0x318] sm:$0xf0] %v665_v4 }
 0x120   : > { %v4271_v9 = vsel %vm556_vm0, %v545_v3, %v547_v52  ;;  %v4275_v10 = vsel %vm556_vm0, %v543_v18, %v545_v3 }
 0x121   : > { %v668_v13 = vrot.slane %v4271_v9, 4  ;;  %v667_v14 = vrot.slane %v4275_v10, 4 }
 0x123   : > { %v4279_v15 = vpop.permute.xlu0 %767  ;;  %v549_v16 = vpop.permute.xlu1 %548  ;;  %700 = vst [vmem:[#allocation2 + $0x6d0] sm:$0xf0] %v668_v13  ;;  %699 = vst [vmem:[#allocation2 + $0x500] sm:$0xf0] %v667_v14 }
 0x124   : > { %v4283_v20 = vsel %vm556_vm0, %v549_v16, %v551_v8  ;;  %v4287_v21 = vsel %vm556_vm0, %v547_v52, %v549_v16 }
 0x125   : > { %573 = vrot.lane.b32.xlu0 %v4283_v20, %s3932_s22  ;;  %v654_v18 = vrot.slane %v4283_v20, 4  ;;  %v669_v47 = vrot.slane %v4287_v21, 4 }
 0x127   : > { %686 = vst [vmem:[#allocation2 + $0x2b0] sm:$0xf0] %v654_v18  ;;  %v772_v50 = vpop.permute.xlu0 %771  ;;  %v553_v51 = vpop.permute.xlu1 %552  ;;  %701 = vst [vmem:[#allocation2 + $0x320] sm:$0xf0] %v669_v47 }
 0x128   : > { %v4296_v53 = vsel %vm556_vm0, %v553_v51, %v4215_v0  ;;  %v4300_v52 = vsel %vm556_vm0, %v551_v8, %v553_v51 }
 0x129   : > { %577 = vrot.lane.b32.xlu0 %v4296_v53, %s3932_s22  ;;  %v656_v2 = vrot.slane %v4296_v53, 4  ;;  %575 = vrot.lane.b32.xlu1 %v4300_v52, %s3932_s22  ;;  %v655_v4 = vrot.slane %v4300_v52, 4 }
 0x12b   : > { %688 = vst [vmem:[#allocation2 + $0x4d8] sm:$0xf0] %v656_v2  ;;  %687 = vst [vmem:[#allocation2 + $0x3b0] sm:$0xf0] %v655_v4  ;;  %v776_v0 = vpop.permute.xlu0 %775  ;;  %v770_v3 = vpop.permute.xlu1 %769 }
 0x12c   : > { %v4311_v8 = vsel %vm799_vm1, %v770_v3, %v772_v50  ;;  %v4316_v13 = vsel %vm799_vm1, %v4279_v15, %v770_v3 }
 0x12d   : > { %581 = vrot.lane.b32.xlu0 %v4220_v5, %s3932_s22  ;;  %579 = vrot.lane.b32.xlu1 %v4225_v7, %s3932_s22  ;;  %932 = vst [vmem:[#allocation2 + $0x680] sm:$0xf] %v4311_v8  ;;  %931 = vst [vmem:[#allocation2 + $0x3d8] sm:$0xf] %v4316_v13 }
 0x12f   : > { %v780_v14 = vpop.permute.xlu0 %779  ;;  %v774_v16 = vpop.permute.xlu1 %773 }
 0x130   : > { %v4326_v18 = vsel %vm799_vm1, %v774_v16, %v776_v0  ;;  %v4330_v47 = vsel %vm799_vm1, %v772_v50, %v774_v16 }
 0x131   : > { %585 = vrot.lane.b32.xlu0 %v4231_v11, %s3932_s22  ;;  %583 = vrot.lane.b32.xlu1 %v4235_v12, %s3932_s22  ;;  %934 = vst [vmem:[#allocation2 + $0x80] sm:$0xf] %v4326_v18  ;;  %933 = vst [vmem:[#allocation2 + $0x3d0] sm:$0xf] %v4330_v47 }
 0x133   : > { %v784_v51 = vpop.permute.xlu0 %783  ;;  %v778_v2 = vpop.permute.xlu1 %777 }
 0x134   : > { %v4340_v4 = vsel %vm799_vm1, %v778_v2, %v780_v14  ;;  %v4344_v50 = vsel %vm799_vm1, %v776_v0, %v778_v2 }
 0x135   : > { %589 = vrot.lane.b32.xlu0 %v4241_v17, %s3932_s22  ;;  %587 = vrot.lane.b32.xlu1 %v4245_v19, %s3932_s22  ;;  %936 = vst [vmem:[#allocation2 + $0x90] sm:$0xf] %v4340_v4  ;;  %935 = vst [vmem:[#allocation2 + $0x6a0] sm:$0xf] %v4344_v50 }
 0x137   : > { %v788_v3 = vpop.permute.xlu0 %787  ;;  %v782_v16 = vpop.permute.xlu1 %781 }
 0x138   : > { %v4354_v1 = vsel %vm799_vm1, %v782_v16, %v784_v51  ;;  %v4358_v0 = vsel %vm799_vm1, %v780_v14, %v782_v16 }
 0x139   : > { %593 = vrot.lane.b32.xlu0 %v4251_v48, %s3932_s22  ;;  %591 = vrot.lane.b32.xlu1 %v4255_v49, %s3932_s22  ;;  %938 = vst [vmem:[#allocation2 + $0x5d0] sm:$0xf] %v4354_v1  ;;  %937 = vst [vmem:[#allocation2 + $0x5c0] sm:$0xf] %v4358_v0 }
 0x13b   : > { %v792_v2 = vpop.permute.xlu0 %791  ;;  %v786_v41 = vpop.permute.xlu1 %785 }
 0x13c   : > { %v4368_v40 = vsel %vm799_vm1, %v786_v41, %v788_v3  ;;  %v4372_v14 = vsel %vm799_vm1, %v784_v51, %v786_v41 }
 0x13d   : > { %597 = vrot.lane.b32.xlu0 %v4261_v54, %s3932_s22  ;;  %595 = vrot.lane.b32.xlu1 %v4265_v63, %s3932_s22  ;;  %940 = vst [vmem:[#allocation2 + $0x610] sm:$0xf] %v4368_v40  ;;  %939 = vst [vmem:[#allocation2 + $0x4f0] sm:$0xf] %v4372_v14 }
 0x13f   : > { %v796_v16 = vpop.permute.xlu0 %795  ;;  %v790_v39 = vpop.permute.xlu1 %789 }
 0x140   : > { %v4382_v38 = vsel %vm799_vm1, %v790_v39, %v792_v2  ;;  %v4386_v41 = vsel %vm799_vm1, %v788_v3, %v790_v39 }
 0x141   : > { %601 = vrot.lane.b32.xlu0 %v4271_v9, %s3932_s22  ;;  %599 = vrot.lane.b32.xlu1 %v4275_v10, %s3932_s22  ;;  %942 = vst [vmem:[#allocation2 + $0x58] sm:$0xf] %v4382_v38  ;;  %941 = vst [vmem:[#allocation2 + $0x220] sm:$0xf] %v4386_v41 }
 0x143   : > { %v4394_v51 = vpop.permute.xlu0 %1056  ;;  %v794_v36 = vpop.permute.xlu1 %793 }
 0x144   : > { %v4398_v35 = vsel %vm799_vm1, %v794_v36, %v796_v16  ;;  %v4402_v39 = vsel %vm799_vm1, %v792_v2, %v794_v36 }
 0x145   : > { %702 = vrot.lane.b32.xlu0 %v4283_v20, %s3933_s23  ;;  %603 = vrot.lane.b32.xlu1 %v4287_v21, %s3932_s22  ;;  %928 = vst [vmem:[#allocation2 + $0x5f8] sm:$0xf] %v4398_v35  ;;  %943 = vst [vmem:[#allocation2 + $0x3f0] sm:$0xf] %v4402_v39 }
 0x147   : > { %v1061_v3 = vpop.permute.xlu0 %1060  ;;  %v798_v34 = vpop.permute.xlu1 %797 }
 0x148   : > { %v4413_v33 = vsel %vm799_vm1, %v798_v34, %v4279_v15  ;;  %v4417_v36 = vsel %vm799_vm1, %v796_v16, %v798_v34 }
 0x149   : > { %706 = vrot.lane.b32.xlu0 %v4296_v53, %s3933_s23  ;;  %704 = vrot.lane.b32.xlu1 %v4300_v52, %s3933_s23  ;;  %930 = vst [vmem:[#allocation2 + $0x4e8] sm:$0xf] %v4413_v33  ;;  %929 = vst [vmem:[#allocation2 + $0x4a0] sm:$0xf] %v4417_v36 }
 0x14b   : > { %v1065_v20 = vpop.permute.xlu0 %1064  ;;  %v1059_v2 = vpop.permute.xlu1 %1058 }
 0x14c   : > { %v4428_v15 = vsel %vm1088_vm2, %v1059_v2, %v1061_v3  ;;  %v4433_v34 = vsel %vm1088_vm2, %v4394_v51, %v1059_v2 }
 0x14d   : > { %710 = vrot.lane.b32.xlu0 %v4220_v5, %s3933_s23  ;;  %708 = vrot.lane.b32.xlu1 %v4225_v7, %s3933_s23  ;;  %v1189_v53 = vrot.slane %v4428_v15, 4  ;;  %v1188_v52 = vrot.slane %v4433_v34, 4 }
 0x14f   : > { %v1069_v16 = vpop.permute.xlu0 %1068  ;;  %v1063_v31 = vpop.permute.xlu1 %1062  ;;  %1221 = vst [vmem:[#allocation2 + $0x2d8] sm:$0xf0] %v1189_v53  ;;  %1220 = vst [vmem:[#allocation2 + $0x4b0] sm:$0xf0] %v1188_v52 }
 0x150   : > { %v4443_v30 = vsel %vm1088_vm2, %v1063_v31, %v1065_v20  ;;  %v4447_v2 = vsel %vm1088_vm2, %v1061_v3, %v1063_v31 }
 0x151   : > { %714 = vrot.lane.b32.xlu0 %v4231_v11, %s3933_s23  ;;  %712 = vrot.lane.b32.xlu1 %v4235_v12, %s3933_s23  ;;  %v1191_v5 = vrot.slane %v4443_v30, 4  ;;  %v1190_v7 = vrot.slane %v4447_v2, 4 }
 0x153   : > { %v1073_v53 = vpop.permute.xlu0 %1072  ;;  %v1067_v52 = vpop.permute.xlu1 %1066  ;;  %1223 = vst [vmem:[#allocation2 + $0x408] sm:$0xf0] %v1191_v5  ;;  %1222 = vst [vmem:[#allocation2 + $0x410] sm:$0xf0] %v1190_v7 }
 0x154   : > { %v4457_v29 = vsel %vm1088_vm2, %v1067_v52, %v1069_v16  ;;  %v4461_v31 = vsel %vm1088_vm2, %v1065_v20, %v1067_v52 }
 0x155   : > { %718 = vrot.lane.b32.xlu0 %v4241_v17, %s3933_s23  ;;  %716 = vrot.lane.b32.xlu1 %v4245_v19, %s3933_s23  ;;  %v1193_v11 = vrot.slane %v4457_v29, 4  ;;  %v1192_v12 = vrot.slane %v4461_v31, 4 }
 0x157   : > { %v1077_v3 = vpop.permute.xlu0 %1076  ;;  %v1071_v5 = vpop.permute.xlu1 %1070  ;;  %1225 = vst [vmem:[#allocation2 + $0x358] sm:$0xf0] %v1193_v11  ;;  %1224 = vst [vmem:[#allocation2 + $0x4e0] sm:$0xf0] %v1192_v12 }
 0x158   : > { %v4471_v7 = vsel %vm1088_vm2, %v1071_v5, %v1073_v53  ;;  %v4475_v20 = vsel %vm1088_vm2, %v1069_v16, %v1071_v5 }
 0x159   : > { %722 = vrot.lane.b32.xlu0 %v4251_v48, %s3933_s23  ;;  %720 = vrot.lane.b32.xlu1 %v4255_v49, %s3933_s23  ;;  %v1195_v17 = vrot.slane %v4471_v7, 4  ;;  %v1194_v19 = vrot.slane %v4475_v20, 4 }
 0x15b   : > { %v1075_v52 = vpop.permute.xlu1 %1074  ;;  %1227 = vst [vmem:[#allocation2 + $0x188] sm:$0xf0] %v1195_v17  ;;  %1226 = vst [vmem:[#allocation2 + $0x68] sm:$0xf0] %v1194_v19  ;;  %v1081_v12 = vpop.permute.xlu0 %1080 }
 0x15c   : > { %v4485_v11 = vsel %vm1088_vm2, %v1075_v52, %v1077_v3  ;;  %v4489_v16 = vsel %vm1088_vm2, %v1073_v53, %v1075_v52 }
 0x15d   : > { %726 = vrot.lane.b32.xlu0 %v4261_v54, %s3933_s23  ;;  %724 = vrot.lane.b32.xlu1 %v4265_v63, %s3933_s23  ;;  %v1197_v48 = vrot.slane %v4485_v11, 4  ;;  %v1196_v49 = vrot.slane %v4489_v16, 4 }
 0x15f   : > { %v1079_v5 = vpop.permute.xlu1 %1078  ;;  %1229 = vst [vmem:[#allocation2 + $0x528] sm:$0xf0] %v1197_v48  ;;  %1228 = vst [vmem:[#allocation2 + $0x640] sm:$0xf0] %v1196_v49  ;;  %v1085_v19 = vpop.permute.xlu0 %1084 }
 0x160   : > { %v4499_v17 = vsel %vm1088_vm2, %v1079_v5, %v1081_v12  ;;  %v4503_v53 = vsel %vm1088_vm2, %v1077_v3, %v1079_v5 }
 0x161   : > { %730 = vrot.lane.b32.xlu0 %v4271_v9, %s3933_s23  ;;  %728 = vrot.lane.b32.xlu1 %v4275_v10, %s3933_s23  ;;  %v1199_v54 = vrot.slane %v4499_v17, 4  ;;  %v1198_v63 = vrot.slane %v4503_v53, 4 }
 0x163   : > { %v1083_v52 = vpop.permute.xlu1 %1082  ;;  %1231 = vst [vmem:[#allocation2 + $0x650] sm:$0xf0] %v1199_v54  ;;  %1230 = vst [vmem:[#allocation2 + $0x5d8] sm:$0xf0] %v1198_v63 }
 0x164   : > { %v4513_v48 = vsel %vm1088_vm2, %v1083_v52, %v1085_v19  ;;  %v4517_v3 = vsel %vm1088_vm2, %v1081_v12, %v1083_v52 }
 0x165   : > { %732 = vrot.lane.b32.xlu1 %v4287_v21, %s3933_s23  ;;  %816 = vrot.lane.b32.xlu0 %v4398_v35, %s3932_s22  ;;  %v1185_v9 = vrot.slane %v4513_v48, 4  ;;  %v1200_v10 = vrot.slane %v4517_v3, 4 }
 0x167   : > { %v1087_v49 = vpop.permute.xlu1 %1086  ;;  %1217 = vst [vmem:[#allocation2 + $0x5e8] sm:$0xf0] %v1185_v9  ;;  %1232 = vst [vmem:[#allocation2 + $0x340] sm:$0xf0] %v1200_v10 }
 0x168   : > { %v4528_v5 = vsel %vm1088_vm2, %v1087_v49, %v4394_v51  ;;  %v4532_v12 = vsel %vm1088_vm2, %v1085_v19, %v1087_v49 }
 0x169   : > { %820 = vrot.lane.b32.xlu0 %v4413_v33, %s3932_s22  ;;  %818 = vrot.lane.b32.xlu1 %v4417_v36, %s3932_s22  ;;  %v1187_v21 = vrot.slane %v4528_v5, 4  ;;  %v1186_v54 = vrot.slane %v4532_v12, 4 }
 0x16b   : > { %1219 = vst [vmem:[#allocation2 + $0x368] sm:$0xf0] %v1187_v21  ;;  %1218 = vst [vmem:[#allocation2 + $0xb0] sm:$0xf0] %v1186_v54 }
 0x16d   : > { %824 = vrot.lane.b32.xlu0 %v4311_v8, %s3932_s22  ;;  %822 = vrot.lane.b32.xlu1 %v4316_v13, %s3932_s22 }
 0x171   : > { %828 = vrot.lane.b32.xlu0 %v4326_v18, %s3932_s22  ;;  %826 = vrot.lane.b32.xlu1 %v4330_v47, %s3932_s22 }
 0x175   : > { %832 = vrot.lane.b32.xlu0 %v4340_v4, %s3932_s22  ;;  %830 = vrot.lane.b32.xlu1 %v4344_v50, %s3932_s22 }
 0x179   : > { %836 = vrot.lane.b32.xlu0 %v4354_v1, %s3932_s22  ;;  %834 = vrot.lane.b32.xlu1 %v4358_v0, %s3932_s22 }
 0x17d   : > { %840 = vrot.lane.b32.xlu0 %v4368_v40, %s3932_s22  ;;  %838 = vrot.lane.b32.xlu1 %v4372_v14, %s3932_s22 }
 0x181   : > { %844 = vrot.lane.b32.xlu0 %v4382_v38, %s3932_s22  ;;  %842 = vrot.lane.b32.xlu1 %v4386_v41, %s3932_s22 }
 0x185   : > { %944 = vrot.lane.b32.xlu0 %v4398_v35, %s3933_s23  ;;  %846 = vrot.lane.b32.xlu1 %v4402_v39, %s3932_s22 }
 0x189   : > { %948 = vrot.lane.b32.xlu0 %v4413_v33, %s3933_s23  ;;  %946 = vrot.lane.b32.xlu1 %v4417_v36, %s3933_s23 }
 0x18d   : > { %952 = vrot.lane.b32.xlu0 %v4311_v8, %s3933_s23  ;;  %950 = vrot.lane.b32.xlu1 %v4316_v13, %s3933_s23 }
 0x191   : > { %956 = vrot.lane.b32.xlu0 %v4326_v18, %s3933_s23  ;;  %954 = vrot.lane.b32.xlu1 %v4330_v47, %s3933_s23 }
 0x195   : > { %960 = vrot.lane.b32.xlu0 %v4340_v4, %s3933_s23  ;;  %958 = vrot.lane.b32.xlu1 %v4344_v50, %s3933_s23 }
 0x197   : > { %v4584_v33 = vpop.permute.xlu0 %573 }
 0x199   : > { %964 = vrot.lane.b32.xlu0 %v4354_v1, %s3933_s23  ;;  %962 = vrot.lane.b32.xlu1 %v4358_v0, %s3933_s23 }
 0x19b   : > { %v578_v35 = vpop.permute.xlu0 %577  ;;  %v576_v8 = vpop.permute.xlu1 %575 }
 0x19c   : > { %v619_v13 = vsel %vm605_vm3, %v576_v8, %v578_v35  ;;  %v620_v18 = vsel %vm605_vm3, %v4584_v33, %v576_v8 }
 0x19d   : > { %623 = vst [vmem:[#allocation2 + $0x3b0] sm:$0xf] %v620_v18  ;;  %624 = vst [vmem:[#allocation2 + $0x4d8] sm:$0xf] %v619_v13  ;;  %968 = vrot.lane.b32.xlu0 %v4368_v40, %s3933_s23  ;;  %966 = vrot.lane.b32.xlu1 %v4372_v14, %s3933_s23 }
 0x19f   : > { %v582_v1 = vpop.permute.xlu0 %581  ;;  %v580_v47 = vpop.permute.xlu1 %579 }
 0x1a0   : > { %v617_v4 = vsel %vm605_vm3, %v580_v47, %v582_v1  ;;  %v618_v50 = vsel %vm605_vm3, %v578_v35, %v580_v47 }
 0x1a1   : > { %625 = vst [vmem:[#allocation2 + $0x18] sm:$0xf] %v618_v50  ;;  %626 = vst [vmem:[#allocation2 + $0x450] sm:$0xf] %v617_v4  ;;  %972 = vrot.lane.b32.xlu0 %v4382_v38, %s3933_s23  ;;  %970 = vrot.lane.b32.xlu1 %v4386_v41, %s3933_s23 }
 0x1a3   : > { %v586_v40 = vpop.permute.xlu0 %585  ;;  %v584_v0 = vpop.permute.xlu1 %583 }
 0x1a4   : > { %v615_v14 = vsel %vm605_vm3, %v584_v0, %v586_v40  ;;  %v616_v51 = vsel %vm605_vm3, %v582_v1, %v584_v0 }
 0x1a5   : > { %627 = vst [vmem:[#allocation2 + $0x328] sm:$0xf] %v616_v51  ;;  %628 = vst [vmem:[#allocation2 + $0x440] sm:$0xf] %v615_v14  ;;  %974 = vrot.lane.b32.xlu1 %v4402_v39, %s3933_s23  ;;  %1105 = vrot.lane.b32.xlu0 %v4513_v48, %s3932_s22 }
 0x1a7   : > { %v590_v38 = vpop.permute.xlu0 %589  ;;  %v588_v36 = vpop.permute.xlu1 %587 }
 0x1a8   : > { %v613_v41 = vsel %vm605_vm3, %v588_v36, %v590_v38  ;;  %v614_v63 = vsel %vm605_vm3, %v586_v40, %v588_v36 }
 0x1a9   : > { %629 = vst [vmem:[#allocation2 + $0x378] sm:$0xf] %v614_v63  ;;  %630 = vst [vmem:[#allocation2 + $0x108] sm:$0xf] %v613_v41  ;;  %1109 = vrot.lane.b32.xlu0 %v4528_v5, %s3932_s22  ;;  %1107 = vrot.lane.b32.xlu1 %v4532_v12, %s3932_s22 }
 0x1ab   : > { %v594_v39 = vpop.permute.xlu0 %593  ;;  %v592_v19 = vpop.permute.xlu1 %591 }
 0x1ac   : > { %v611_v52 = vsel %vm605_vm3, %v592_v19, %v594_v39  ;;  %v612_v9 = vsel %vm605_vm3, %v590_v38, %v592_v19 }
 0x1ad   : > { %631 = vst [vmem:[#allocation2 + $0x510] sm:$0xf] %v612_v9  ;;  %632 = vst [vmem:[#allocation2 + $0x490] sm:$0xf] %v611_v52  ;;  %1113 = vrot.lane.b32.xlu0 %v4428_v15, %s3932_s22  ;;  %1111 = vrot.lane.b32.xlu1 %v4433_v34, %s3932_s22 }
 0x1af   : > { %v598_v10 = vpop.permute.xlu0 %597  ;;  %v596_v49 = vpop.permute.xlu1 %595 }
 0x1b0   : > { %v609_v21 = vsel %vm605_vm3, %v596_v49, %v598_v10  ;;  %v610_v54 = vsel %vm605_vm3, %v594_v39, %v596_v49 }
 0x1b1   : > { %633 = vst [vmem:[#allocation2 + $0x318] sm:$0xf] %v610_v54  ;;  %634 = vst [vmem:[#allocation2 + $0x548] sm:$0xf] %v609_v21  ;;  %1117 = vrot.lane.b32.xlu0 %v4443_v30, %s3932_s22  ;;  %1115 = vrot.lane.b32.xlu1 %v4447_v2, %s3932_s22 }
 0x1b3   : > { %v602_v35 = vpop.permute.xlu0 %601  ;;  %v600_v8 = vpop.permute.xlu1 %599 }
 0x1b4   : > { %v607_v13 = vsel %vm605_vm3, %v600_v8, %v602_v35  ;;  %v608_v18 = vsel %vm605_vm3, %v598_v10, %v600_v8 }
 0x1b5   : > { %635 = vst [vmem:[#allocation2 + $0x500] sm:$0xf] %v608_v18  ;;  %636 = vst [vmem:[#allocation2 + $0x6d0] sm:$0xf] %v607_v13  ;;  %1121 = vrot.lane.b32.xlu0 %v4457_v29, %s3932_s22  ;;  %1119 = vrot.lane.b32.xlu1 %v4461_v31, %s3932_s22 }
 0x1b7   : > { %v4648_v1 = vpop.permute.xlu0 %702  ;;  %v604_v47 = vpop.permute.xlu1 %603 }
 0x1b8   : > { %v606_v4 = vsel %vm605_vm3, %v602_v35, %v604_v47  ;;  %v621_v50 = vsel %vm605_vm3, %v604_v47, %v4584_v33 }
 0x1b9   : > { %622 = vst [vmem:[#allocation2 + $0x2b0] sm:$0xf] %v621_v50  ;;  %637 = vst [vmem:[#allocation2 + $0x320] sm:$0xf] %v606_v4  ;;  %1125 = vrot.lane.b32.xlu0 %v4471_v7, %s3932_s22  ;;  %1123 = vrot.lane.b32.xlu1 %v4475_v20, %s3932_s22 }
 0x1bb   : > { %v707_v40 = vpop.permute.xlu0 %706  ;;  %v705_v0 = vpop.permute.xlu1 %704 }
 0x1bc   : > { %v748_v14 = vsel %vm734_vm4, %v705_v0, %v707_v40  ;;  %v749_v51 = vsel %vm734_vm4, %v4648_v1, %v705_v0 }
 0x1bd   : > { %751 = vst [vmem:[#allocation2 + $0x2c0] sm:$0xf] %v749_v51  ;;  %752 = vst [vmem:[#allocation2 + $0x588] sm:$0xf] %v748_v14  ;;  %1129 = vrot.lane.b32.xlu0 %v4485_v11, %s3932_s22  ;;  %1127 = vrot.lane.b32.xlu1 %v4489_v16, %s3932_s22 }
 0x1bf   : > { %v711_v33 = vpop.permute.xlu0 %710  ;;  %v709_v38 = vpop.permute.xlu1 %708 }
 0x1c0   : > { %v746_v36 = vsel %vm734_vm4, %v709_v38, %v711_v33  ;;  %v747_v41 = vsel %vm734_vm4, %v707_v40, %v709_v38 }
 0x1c1   : > { %753 = vst [vmem:[#allocation2 + $0x598] sm:$0xf] %v747_v41  ;;  %754 = vst [vmem:[#allocation2 + $0x60] sm:$0xf] %v746_v36  ;;  %1133 = vrot.lane.b32.xlu0 %v4499_v17, %s3932_s22  ;;  %1131 = vrot.lane.b32.xlu1 %v4503_v53, %s3932_s22 }
 0x1c3   : > { %v715_v63 = vpop.permute.xlu0 %714  ;;  %v713_v39 = vpop.permute.xlu1 %712 }
 0x1c4   : > { %v744_v19 = vsel %vm734_vm4, %v713_v39, %v715_v63  ;;  %v745_v52 = vsel %vm734_vm4, %v711_v33, %v713_v39 }
 0x1c5   : > { %755 = vst [vmem:[#allocation2 + $0x3c8] sm:$0xf] %v745_v52  ;;  %756 = vst [vmem:[#allocation2 + $0x6d8] sm:$0xf] %v744_v19  ;;  %1233 = vrot.lane.b32.xlu0 %v4513_v48, %s3933_s23  ;;  %1135 = vrot.lane.b32.xlu1 %v4517_v3, %s3932_s22 }
 0x1c7   : > { %v719_v9 = vpop.permute.xlu0 %718  ;;  %v717_v10 = vpop.permute.xlu1 %716 }
 0x1c8   : > { %v742_v49 = vsel %vm734_vm4, %v717_v10, %v719_v9  ;;  %v743_v21 = vsel %vm734_vm4, %v715_v63, %v717_v10 }
 0x1c9   : > { %757 = vst [vmem:[#allocation2 + $0x670] sm:$0xf] %v743_v21  ;;  %758 = vst [vmem:[#allocation2 + $0x348] sm:$0xf] %v742_v49  ;;  %1237 = vrot.lane.b32.xlu0 %v4528_v5, %s3933_s23  ;;  %1235 = vrot.lane.b32.xlu1 %v4532_v12, %s3933_s23 }
 0x1cb   : > { %v723_v48 = vpop.permute.xlu0 %722  ;;  %v721_v54 = vpop.permute.xlu1 %720 }
 0x1cc   : > { %v740_v35 = vsel %vm734_vm4, %v721_v54, %v723_v48  ;;  %v741_v8 = vsel %vm734_vm4, %v719_v9, %v721_v54 }
 0x1cd   : > { %759 = vst [vmem:[#allocation2 + $0x118] sm:$0xf] %v741_v8  ;;  %760 = vst [vmem:[#allocation2 + $0xa0] sm:$0xf] %v740_v35  ;;  %1241 = vrot.lane.b32.xlu0 %v4428_v15, %s3933_s23  ;;  %1239 = vrot.lane.b32.xlu1 %v4433_v34, %s3933_s23 }
 0x1cf   : > { %v727_v5 = vpop.permute.xlu0 %726  ;;  %v725_v13 = vpop.permute.xlu1 %724 }
 0x1d0   : > { %v738_v12 = vsel %vm734_vm4, %v725_v13, %v727_v5  ;;  %v739_v18 = vsel %vm734_vm4, %v723_v48, %v725_v13 }
 0x1d1   : > { %761 = vst [vmem:[#allocation2 + $0x1a0] sm:$0xf] %v739_v18  ;;  %762 = vst [vmem:[#allocation2 + $0x260] sm:$0xf] %v738_v12  ;;  %1245 = vrot.lane.b32.xlu0 %v4443_v30, %s3933_s23  ;;  %1243 = vrot.lane.b32.xlu1 %v4447_v2, %s3933_s23 }
 0x1d3   : > { %v731_v15 = vpop.permute.xlu0 %730  ;;  %v729_v47 = vpop.permute.xlu1 %728 }
 0x1d4   : > { %v736_v34 = vsel %vm734_vm4, %v729_v47, %v731_v15  ;;  %v737_v4 = vsel %vm734_vm4, %v727_v5, %v729_v47 }
 0x1d5   : > { %763 = vst [vmem:[#allocation2 + $0xe0] sm:$0xf] %v737_v4  ;;  %764 = vst [vmem:[#allocation2 + $0x3a0] sm:$0xf] %v736_v34  ;;  %1249 = vrot.lane.b32.xlu0 %v4457_v29, %s3933_s23  ;;  %1247 = vrot.lane.b32.xlu1 %v4461_v31, %s3933_s23 }
 0x1d7   : > { %v4717_v30 = vpop.permute.xlu0 %816  ;;  %v733_v50 = vpop.permute.xlu1 %732 }
 0x1d8   : > { %v735_v2 = vsel %vm734_vm4, %v731_v15, %v733_v50  ;;  %v750_v40 = vsel %vm734_vm4, %v733_v50, %v4648_v1 }
 0x1d9   : > { %765 = vst [vmem:[#allocation2 + $0x538] sm:$0xf] %v735_v2  ;;  %766 = vst [vmem:[#allocation2 + $0x3c0] sm:$0xf] %v750_v40  ;;  %1253 = vrot.lane.b32.xlu0 %v4471_v7, %s3933_s23  ;;  %1251 = vrot.lane.b32.xlu1 %v4475_v20, %s3933_s23 }
 0x1db   : > { %v821_v29 = vpop.permute.xlu0 %820  ;;  %v819_v31 = vpop.permute.xlu1 %818 }
 0x1dc   : > { %v861_v0 = vsel %vm605_vm3, %v819_v31, %v821_v29  ;;  %v862_v14 = vsel %vm605_vm3, %v4717_v30, %v819_v31 }
 0x1dd   : > { %v881_v51 = vrot.slane %v862_v14, 4  ;;  %v882_v33 = vrot.slane %v861_v0, 4  ;;  %1257 = vrot.lane.b32.xlu0 %v4485_v11, %s3933_s23  ;;  %1255 = vrot.lane.b32.xlu1 %v4489_v16, %s3933_s23 }
 0x1df   : > { %913 = vst [vmem:[#allocation2 + $0x588] sm:$0xf0] %v881_v51  ;;  %914 = vst [vmem:[#allocation2 + $0x598] sm:$0xf0] %v882_v33  ;;  %v825_v7 = vpop.permute.xlu0 %824  ;;  %v823_v20 = vpop.permute.xlu1 %822 }
 0x1e0   : > { %v859_v1 = vsel %vm605_vm3, %v823_v20, %v825_v7  ;;  %v860_v38 = vsel %vm605_vm3, %v821_v29, %v823_v20 }
 0x1e1   : > { %v883_v36 = vrot.slane %v860_v38, 4  ;;  %v884_v41 = vrot.slane %v859_v1, 4  ;;  %1261 = vrot.lane.b32.xlu0 %v4499_v17, %s3933_s23  ;;  %1259 = vrot.lane.b32.xlu1 %v4503_v53, %s3933_s23 }
 0x1e3   : > { %915 = vst [vmem:[#allocation2 + $0x60] sm:$0xf0] %v883_v36  ;;  %916 = vst [vmem:[#allocation2 + $0x3c8] sm:$0xf0] %v884_v41  ;;  %v829_v11 = vpop.permute.xlu0 %828  ;;  %v827_v16 = vpop.permute.xlu1 %826 }
 0x1e4   : > { %v857_v63 = vsel %vm605_vm3, %v827_v16, %v829_v11  ;;  %v858_v39 = vsel %vm605_vm3, %v825_v7, %v827_v16 }
 0x1e5   : > { %v885_v19 = vrot.slane %v858_v39, 4  ;;  %v886_v52 = vrot.slane %v857_v63, 4  ;;  %1297 = vrot.lane.b32.xlu0 %v4076_v26, %s3934_s24  ;;  %1263 = vrot.lane.b32.xlu1 %v4517_v3, %s3933_s23 }
 0x1e7   : > { %917 = vst [vmem:[#allocation2 + $0x6d8] sm:$0xf0] %v885_v19  ;;  %918 = vst [vmem:[#allocation2 + $0x670] sm:$0xf0] %v886_v52  ;;  %v833_v17 = vpop.permute.xlu0 %832  ;;  %v831_v53 = vpop.permute.xlu1 %830 }
 0x1e8   : > { %v855_v9 = vsel %vm605_vm3, %v831_v53, %v833_v17  ;;  %v856_v10 = vsel %vm605_vm3, %v829_v11, %v831_v53 }
 0x1e9   : > { %v887_v49 = vrot.slane %v856_v10, 4  ;;  %v888_v21 = vrot.slane %v855_v9, 4  ;;  %1301 = vrot.lane.b32.xlu0 %v4078_v27, %s3934_s24  ;;  %1299 = vrot.lane.b32.xlu1 %v4106_v46, %s3934_s24 }
 0x1eb   : > { %919 = vst [vmem:[#allocation2 + $0x348] sm:$0xf0] %v887_v49  ;;  %920 = vst [vmem:[#allocation2 + $0x118] sm:$0xf0] %v888_v21  ;;  %v837_v3 = vpop.permute.xlu0 %836  ;;  %v835_v48 = vpop.permute.xlu1 %834 }
 0x1ec   : > { %v853_v54 = vsel %vm605_vm3, %v835_v48, %v837_v3  ;;  %v854_v35 = vsel %vm605_vm3, %v833_v17, %v835_v48 }
 0x1ed   : > { %v889_v8 = vrot.slane %v854_v35, 4  ;;  %v890_v5 = vrot.slane %v853_v54, 4  ;;  %1305 = vrot.lane.b32.xlu0 %v4080_v32, %s3934_s24  ;;  %1303 = vrot.lane.b32.xlu1 %v4130_v55, %s3934_s24 }
 0x1ef   : > { %921 = vst [vmem:[#allocation2 + $0xa0] sm:$0xf0] %v889_v8  ;;  %922 = vst [vmem:[#allocation2 + $0x1a0] sm:$0xf0] %v890_v5  ;;  %v841_v13 = vpop.permute.xlu0 %840  ;;  %v839_v12 = vpop.permute.xlu1 %838 }
 0x1f0   : > { %v851_v18 = vsel %vm605_vm3, %v839_v12, %v841_v13  ;;  %v852_v15 = vsel %vm605_vm3, %v837_v3, %v839_v12 }
 0x1f1   : > { %v891_v47 = vrot.slane %v852_v15, 4  ;;  %v892_v34 = vrot.slane %v851_v18, 4  ;;  %1309 = vrot.lane.b32.xlu0 %v4082_v37, %s3934_s24  ;;  %1307 = vrot.lane.b32.xlu1 %v4138_v56, %s3934_s24 }
 0x1f3   : > { %923 = vst [vmem:[#allocation2 + $0x260] sm:$0xf0] %v891_v47  ;;  %924 = vst [vmem:[#allocation2 + $0xe0] sm:$0xf0] %v892_v34  ;;  %v845_v4 = vpop.permute.xlu0 %844  ;;  %v843_v50 = vpop.permute.xlu1 %842 }
 0x1f4   : > { %v849_v2 = vsel %vm605_vm3, %v843_v50, %v845_v4  ;;  %v850_v40 = vsel %vm605_vm3, %v841_v13, %v843_v50 }
 0x1f5   : > { %v893_v29 = vrot.slane %v850_v40, 4  ;;  %v894_v31 = vrot.slane %v849_v2, 4  ;;  %1313 = vrot.lane.b32.xlu0 %v4084_v42, %s3934_s24  ;;  %1311 = vrot.lane.b32.xlu1 %v4146_v57, %s3934_s24 }
 0x1f7   : > { %925 = vst [vmem:[#allocation2 + $0x3a0] sm:$0xf0] %v893_v29  ;;  %926 = vst [vmem:[#allocation2 + $0x538] sm:$0xf0] %v894_v31  ;;  %v4785_v0 = vpop.permute.xlu0 %944  ;;  %v847_v14 = vpop.permute.xlu1 %846 }
 0x1f8   : > { %v848_v51 = vsel %vm605_vm3, %v845_v4, %v847_v14  ;;  %v863_v33 = vsel %vm605_vm3, %v847_v14, %v4717_v30 }
 0x1f9   : > { %v880_v7 = vrot.slane %v863_v33, 4  ;;  %v895_v20 = vrot.slane %v848_v51, 4  ;;  %1317 = vrot.lane.b32.xlu0 %v4086_v43, %s3934_s24  ;;  %1315 = vrot.lane.b32.xlu1 %v4154_v58, %s3934_s24 }
 0x1fb   : > { %912 = vst [vmem:[#allocation2 + $0x2c0] sm:$0xf0] %v880_v7  ;;  %927 = vst [vmem:[#allocation2 + $0x3c0] sm:$0xf0] %v895_v20  ;;  %v949_v1 = vpop.permute.xlu0 %948  ;;  %v947_v38 = vpop.permute.xlu1 %946 }
 0x1fc   : > { %v989_v36 = vsel %vm734_vm4, %v947_v38, %v949_v1  ;;  %v990_v41 = vsel %vm734_vm4, %v4785_v0, %v947_v38 }
 0x1fd   : > { %v1008_v30 = vrot.slane %v990_v41, 4  ;;  %v1009_v11 = vrot.slane %v989_v36, 4  ;;  %1321 = vrot.lane.b32.xlu0 %v4088_v44, %s3934_s24  ;;  %1319 = vrot.lane.b32.xlu1 %v4162_v59, %s3934_s24 }
 0x1ff   : > { %1040 = vst [vmem:[#allocation2 + $0x5f8] sm:$0xf0] %v1008_v30  ;;  %1041 = vst [vmem:[#allocation2 + $0x4a0] sm:$0xf0] %v1009_v11  ;;  %v953_v16 = vpop.permute.xlu0 %952  ;;  %v951_v63 = vpop.permute.xlu1 %950 }
 0x200   : > { %v987_v39 = vsel %vm734_vm4, %v951_v63, %v953_v16  ;;  %v988_v19 = vsel %vm734_vm4, %v949_v1, %v951_v63 }
 0x201   : > { %v1010_v52 = vrot.slane %v988_v19, 4  ;;  %v1011_v17 = vrot.slane %v987_v39, 4  ;;  %1325 = vrot.lane.b32.xlu0 %v4090_v45, %s3934_s24  ;;  %1323 = vrot.lane.b32.xlu1 %v4170_v60, %s3934_s24 }
 0x203   : > { %1042 = vst [vmem:[#allocation2 + $0x4e8] sm:$0xf0] %v1010_v52  ;;  %1043 = vst [vmem:[#allocation2 + $0x3d8] sm:$0xf0] %v1011_v17  ;;  %v957_v53 = vpop.permute.xlu0 %956  ;;  %v955_v9 = vpop.permute.xlu1 %954 }
 0x204   : > { %v985_v10 = vsel %vm734_vm4, %v955_v9, %v957_v53  ;;  %v986_v49 = vsel %vm734_vm4, %v953_v16, %v955_v9 }
 0x205   : > { %v1012_v21 = vrot.slane %v986_v49, 4  ;;  %v1013_v3 = vrot.slane %v985_v10, 4  ;;  %1327 = vrot.lane.b32.xlu1 %v4177_v61, %s3934_s24  ;;  %s326_s24 = scalar_lea.vmem %s6802_s8, %s3866_s11 }
 0x207   : > { %1044 = vst [vmem:[#allocation2 + $0x680] sm:$0xf0] %v1012_v21  ;;  %1045 = vst [vmem:[#allocation2 + $0x3d0] sm:$0xf0] %v1013_v3  ;;  %v961_v48 = vpop.permute.xlu0 %960  ;;  %v959_v54 = vpop.permute.xlu1 %958 }
 0x208   : > { %v983_v35 = vsel %vm734_vm4, %v959_v54, %v961_v48  ;;  %v984_v8 = vsel %vm734_vm4, %v957_v53, %v959_v54 }
 0x209   : > { %v1014_v5 = vrot.slane %v984_v8, 4  ;;  %v1015_v13 = vrot.slane %v983_v35, 4 }
 0x20b   : > { %1046 = vst [vmem:[#allocation2 + $0x80] sm:$0xf0] %v1014_v5  ;;  %1047 = vst [vmem:[#allocation2 + $0x6a0] sm:$0xf0] %v1015_v13  ;;  %v965_v12 = vpop.permute.xlu0 %964  ;;  %v963_v18 = vpop.permute.xlu1 %962 }
 0x20c   : > { %v981_v15 = vsel %vm734_vm4, %v963_v18, %v965_v12  ;;  %v982_v47 = vsel %vm734_vm4, %v961_v48, %v963_v18 }
 0x20d   : > { %v1016_v34 = vrot.slane %v982_v47, 4  ;;  %v1017_v4 = vrot.slane %v981_v15, 4 }
 0x20f   : > { %1048 = vst [vmem:[#allocation2 + $0x90] sm:$0xf0] %v1016_v34  ;;  %1049 = vst [vmem:[#allocation2 + $0x5c0] sm:$0xf0] %v1017_v4  ;;  %v969_v50 = vpop.permute.xlu0 %968  ;;  %v967_v2 = vpop.permute.xlu1 %966 }
 0x210   : > { %v979_v40 = vsel %vm734_vm4, %v967_v2, %v969_v50  ;;  %v980_v29 = vsel %vm734_vm4, %v965_v12, %v967_v2 }
 0x211   : > { %v1018_v31 = vrot.slane %v980_v29, 4  ;;  %v1019_v14 = vrot.slane %v979_v40, 4 }
 0x213   : > { %1050 = vst [vmem:[#allocation2 + $0x5d0] sm:$0xf0] %v1018_v31  ;;  %1051 = vst [vmem:[#allocation2 + $0x4f0] sm:$0xf0] %v1019_v14  ;;  %v973_v51 = vpop.permute.xlu0 %972  ;;  %v971_v33 = vpop.permute.xlu1 %970 }
 0x214   : > { %v977_v7 = vsel %vm734_vm4, %v971_v33, %v973_v51  ;;  %v978_v20 = vsel %vm734_vm4, %v969_v50, %v971_v33 }
 0x215   : > { %v1020_v1 = vrot.slane %v978_v20, 4  ;;  %v1021_v38 = vrot.slane %v977_v7, 4 }
 0x217   : > { %1052 = vst [vmem:[#allocation2 + $0x610] sm:$0xf0] %v1020_v1  ;;  %1053 = vst [vmem:[#allocation2 + $0x220] sm:$0xf0] %v1021_v38  ;;  %v1106_v36 = vpop.permute.xlu0 %1105  ;;  %v975_v41 = vpop.permute.xlu1 %974 }
 0x218   : > { %v976_v30 = vsel %vm734_vm4, %v973_v51, %v975_v41  ;;  %v991_v11 = vsel %vm734_vm4, %v975_v41, %v4785_v0 }
 0x219   : > { %v1022_v16 = vrot.slane %v976_v30, 4  ;;  %v1023_v63 = vrot.slane %v991_v11, 4 }
 0x21b   : > { %1054 = vst [vmem:[#allocation2 + $0x58] sm:$0xf0] %v1022_v16  ;;  %1055 = vst [vmem:[#allocation2 + $0x3f0] sm:$0xf0] %v1023_v63  ;;  %v1110_v39 = vpop.permute.xlu0 %1109  ;;  %v1108_v19 = vpop.permute.xlu1 %1107 }
 0x21c   : > { %v1150_v52 = vsel %vm605_vm3, %v1108_v19, %v1110_v39  ;;  %v1151_v17 = vsel %vm605_vm3, %v1106_v36, %v1108_v19 }
 0x21d   : > { %1154 = vst [vmem:[#allocation2 + $0xb0] sm:$0xf] %v1151_v17  ;;  %1155 = vst [vmem:[#allocation2 + $0x368] sm:$0xf] %v1150_v52 }
 0x21f   : > { %v1114_v53 = vpop.permute.xlu0 %1113  ;;  %v1112_v9 = vpop.permute.xlu1 %1111 }
 0x220   : > { %v1148_v10 = vsel %vm605_vm3, %v1112_v9, %v1114_v53  ;;  %v1149_v0 = vsel %vm605_vm3, %v1110_v39, %v1112_v9 }
 0x221   : > { %1156 = vst [vmem:[#allocation2 + $0x4b0] sm:$0xf] %v1149_v0  ;;  %1157 = vst [vmem:[#allocation2 + $0x2d8] sm:$0xf] %v1148_v10 }
 0x223   : > { %v1118_v49 = vpop.permute.xlu0 %1117  ;;  %v1116_v21 = vpop.permute.xlu1 %1115 }
 0x224   : > { %v1146_v3 = vsel %vm605_vm3, %v1116_v21, %v1118_v49  ;;  %v1147_v48 = vsel %vm605_vm3, %v1114_v53, %v1116_v21 }
 0x225   : > { %1158 = vst [vmem:[#allocation2 + $0x410] sm:$0xf] %v1147_v48  ;;  %1159 = vst [vmem:[#allocation2 + $0x408] sm:$0xf] %v1146_v3 }
 0x227   : > { %v1122_v54 = vpop.permute.xlu0 %1121  ;;  %v1120_v35 = vpop.permute.xlu1 %1119 }
 0x228   : > { %v1144_v8 = vsel %vm605_vm3, %v1120_v35, %v1122_v54  ;;  %v1145_v5 = vsel %vm605_vm3, %v1118_v49, %v1120_v35 }
 0x229   : > { %1160 = vst [vmem:[#allocation2 + $0x4e0] sm:$0xf] %v1145_v5  ;;  %1161 = vst [vmem:[#allocation2 + $0x358] sm:$0xf] %v1144_v8 }
 0x22b   : > { %v1126_v13 = vpop.permute.xlu0 %1125  ;;  %v1124_v12 = vpop.permute.xlu1 %1123 }
 0x22c   : > { %v1142_v18 = vsel %vm605_vm3, %v1124_v12, %v1126_v13  ;;  %v1143_v15 = vsel %vm605_vm3, %v1122_v54, %v1124_v12 }
 0x22d   : > { %1162 = vst [vmem:[#allocation2 + $0x68] sm:$0xf] %v1143_v15  ;;  %1163 = vst [vmem:[#allocation2 + $0x188] sm:$0xf] %v1142_v18 }
 0x22f   : > { %v1130_v47 = vpop.permute.xlu0 %1129  ;;  %v1128_v34 = vpop.permute.xlu1 %1127 }
 0x230   : > { %v1140_v4 = vsel %vm605_vm3, %v1128_v34, %v1130_v47  ;;  %v1141_v50 = vsel %vm605_vm3, %v1126_v13, %v1128_v34 }
 0x231   : > { %1164 = vst [vmem:[#allocation2 + $0x640] sm:$0xf] %v1141_v50  ;;  %1165 = vst [vmem:[#allocation2 + $0x528] sm:$0xf] %v1140_v4 }
 0x233   : > { %v1134_v2 = vpop.permute.xlu0 %1133  ;;  %v1132_v40 = vpop.permute.xlu1 %1131 }
 0x234   : > { %v1138_v29 = vsel %vm605_vm3, %v1132_v40, %v1134_v2  ;;  %v1139_v31 = vsel %vm605_vm3, %v1130_v47, %v1132_v40 }
 0x235   : > { %1166 = vst [vmem:[#allocation2 + $0x5d8] sm:$0xf] %v1139_v31  ;;  %1167 = vst [vmem:[#allocation2 + $0x650] sm:$0xf] %v1138_v29 }
 0x237   : > { %v1234_v14 = vpop.permute.xlu0 %1233  ;;  %v1136_v51 = vpop.permute.xlu1 %1135 }
 0x238   : > { %v1137_v33 = vsel %vm605_vm3, %v1134_v2, %v1136_v51  ;;  %v1152_v7 = vsel %vm605_vm3, %v1136_v51, %v1106_v36 }
 0x239   : > { %1153 = vst [vmem:[#allocation2 + $0x5e8] sm:$0xf] %v1152_v7  ;;  %1168 = vst [vmem:[#allocation2 + $0x340] sm:$0xf] %v1137_v33 }
 0x23b   : > { %v1238_v20 = vpop.permute.xlu0 %1237  ;;  %v1236_v1 = vpop.permute.xlu1 %1235 }
 0x23c   : > { %v1278_v38 = vsel %vm734_vm4, %v1236_v1, %v1238_v20  ;;  %v1279_v41 = vsel %vm734_vm4, %v1234_v14, %v1236_v1 }
 0x23d   : > { %1281 = vst [vmem:[#allocation2 + $0x6b0] sm:$0xf] %v1279_v41  ;;  %1282 = vst [vmem:[#allocation2 + $0x2b8] sm:$0xf] %v1278_v38 }
 0x23f   : > { %v1242_v30 = vpop.permute.xlu0 %1241  ;;  %v1240_v11 = vpop.permute.xlu1 %1239 }
 0x240   : > { %v1276_v16 = vsel %vm734_vm4, %v1240_v11, %v1242_v30  ;;  %v1277_v36 = vsel %vm734_vm4, %v1238_v20, %v1240_v11 }
 0x241   : > { %1283 = vst [vmem:[#allocation2 + $0x5b0] sm:$0xf] %v1277_v36  ;;  %1284 = vst [vmem:[#allocation2 + $0x6f0] sm:$0xf] %v1276_v16 }
 0x243   : > { %v1246_v63 = vpop.permute.xlu0 %1245  ;;  %v1244_v39 = vpop.permute.xlu1 %1243 }
 0x244   : > { %v1274_v19 = vsel %vm734_vm4, %v1244_v39, %v1246_v63  ;;  %v1275_v52 = vsel %vm734_vm4, %v1242_v30, %v1244_v39 }
 0x245   : > { %1285 = vst [vmem:[#allocation2 + $0x550] sm:$0xf] %v1275_v52  ;;  %1286 = vst [vmem:[#allocation2 + $0x688] sm:$0xf] %v1274_v19 }
 0x247   : > { %v1250_v17 = vpop.permute.xlu0 %1249  ;;  %v1248_v53 = vpop.permute.xlu1 %1247 }
 0x248   : > { %v1272_v9 = vsel %vm734_vm4, %v1248_v53, %v1250_v17  ;;  %v1273_v10 = vsel %vm734_vm4, %v1246_v63, %v1248_v53 }
 0x249   : > { %1287 = vst [vmem:[#allocation2 + $0xb8] sm:$0xf] %v1273_v10  ;;  %1288 = vst [vmem:[#allocation2 + $0x128] sm:$0xf] %v1272_v9 }
 0x24b   : > { %v1254_v0 = vpop.permute.xlu0 %1253  ;;  %v1252_v49 = vpop.permute.xlu1 %1251 }
 0x24c   : > { %v1270_v21 = vsel %vm734_vm4, %v1252_v49, %v1254_v0  ;;  %v1271_v3 = vsel %vm734_vm4, %v1250_v17, %v1252_v49 }
 0x24d   : > { %1289 = vst [vmem:[#allocation2 + $0x648] sm:$0xf] %v1271_v3  ;;  %1290 = vst [vmem:[#allocation2 + $0x190] sm:$0xf] %v1270_v21 }
 0x24f   : > { %v1258_v48 = vpop.permute.xlu0 %1257  ;;  %v1256_v54 = vpop.permute.xlu1 %1255 }
 0x250   : > { %v1268_v35 = vsel %vm734_vm4, %v1256_v54, %v1258_v48  ;;  %v1269_v8 = vsel %vm734_vm4, %v1254_v0, %v1256_v54 }
 0x251   : > { %1291 = vst [vmem:[#allocation2 + $0x88] sm:$0xf] %v1269_v8  ;;  %1292 = vst [vmem:[#allocation2 + $0x148] sm:$0xf] %v1268_v35 }
 0x253   : > { %v1262_v5 = vpop.permute.xlu0 %1261  ;;  %v1260_v13 = vpop.permute.xlu1 %1259 }
 0x254   : > { %v1266_v12 = vsel %vm734_vm4, %v1260_v13, %v1262_v5  ;;  %v1267_v18 = vsel %vm734_vm4, %v1258_v48, %v1260_v13 }
 0x255   : > { %1293 = vst [vmem:[#allocation2 + $0x630] sm:$0xf] %v1267_v18  ;;  %1294 = vst [vmem:[#allocation2 + $0x130] sm:$0xf] %v1266_v12 }
 0x257   : > { %v1298_v15 = vpop.permute.xlu0 %1297  ;;  %v1264_v47 = vpop.permute.xlu1 %1263 }
 0x258   : > { %v1265_v34 = vsel %vm734_vm4, %v1262_v5, %v1264_v47  ;;  %v1280_v4 = vsel %vm734_vm4, %v1264_v47, %v1234_v14 }
 0x259   : > { %1295 = vst [vmem:[#allocation2 + $0x1e8] sm:$0xf] %v1265_v34  ;;  %1296 = vst [vmem:[#allocation2 + $0x1f8] sm:$0xf] %v1280_v4 }
 0x25b   : > { %v1302_v50 = vpop.permute.xlu0 %1301  ;;  %v1300_v2 = vpop.permute.xlu1 %1299 }
 0x25c   : > { %v4907_v40 = vsel %vm1329_vm5, %v1298_v15, %v1300_v2  ;;  %v4911_v29 = vsel %vm1329_vm5, %v1300_v2, %v1302_v50 }
 0x25d   : > { %1348 = vrot.lane.b32.xlu1 %v4907_v40, %s3932_s22  ;;  %1459 = vst [vmem:[#allocation2 + $0x228] sm:$0xf] %v4907_v40  ;;  %1460 = vst [vmem:[#allocation2 + $0x428] sm:$0xf] %v4911_v29 }
 0x25f   : > { %v1306_v31 = vpop.permute.xlu0 %1305  ;;  %v1304_v14 = vpop.permute.xlu1 %1303 }
 0x260   : > { %v4919_v51 = vsel %vm1329_vm5, %v1302_v50, %v1304_v14  ;;  %v4923_v33 = vsel %vm1329_vm5, %v1304_v14, %v1306_v31 }
 0x261   : > { %1352 = vrot.lane.b32.xlu1 %v4919_v51, %s3932_s22  ;;  %1461 = vst [vmem:[#allocation2 + $0x270] sm:$0xf] %v4919_v51  ;;  %1462 = vst [vmem:[#allocation2 + $0x350] sm:$0xf] %v4923_v33 }
 0x263   : > { %v1310_v7 = vpop.permute.xlu0 %1309  ;;  %v1308_v20 = vpop.permute.xlu1 %1307 }
 0x264   : > { %v4931_v1 = vsel %vm1329_vm5, %v1306_v31, %v1308_v20  ;;  %v4935_v38 = vsel %vm1329_vm5, %v1308_v20, %v1310_v7 }
 0x265   : > { %1356 = vrot.lane.b32.xlu1 %v4931_v1, %s3932_s22  ;;  %1463 = vst [vmem:[#allocation2 + $0xf8] sm:$0xf] %v4931_v1  ;;  %1464 = vst [vmem:[#allocation2 + $0x20] sm:$0xf] %v4935_v38 }
 0x267   : > { %v1314_v41 = vpop.permute.xlu0 %1313  ;;  %v1312_v30 = vpop.permute.xlu1 %1311 }
 0x268   : > { %v4943_v11 = vsel %vm1329_vm5, %v1310_v7, %v1312_v30  ;;  %v4947_v16 = vsel %vm1329_vm5, %v1312_v30, %v1314_v41 }
 0x269   : > { %1360 = vrot.lane.b32.xlu1 %v4943_v11, %s3932_s22  ;;  %1465 = vst [vmem:[#allocation2 + $0x208] sm:$0xf] %v4943_v11  ;;  %1466 = vst [vmem:[#allocation2 + $0xd0] sm:$0xf] %v4947_v16 }
 0x26b   : > { %v1318_v36 = vpop.permute.xlu0 %1317  ;;  %v1316_v63 = vpop.permute.xlu1 %1315 }
 0x26c   : > { %v4955_v39 = vsel %vm1329_vm5, %v1314_v41, %v1316_v63  ;;  %v4959_v19 = vsel %vm1329_vm5, %v1316_v63, %v1318_v36 }
 0x26d   : > { %6884 = vst [vmem:[#allocation27_spill] sm:$0xff] %v4955_v39  ;;  %6885 = vst [vmem:[#allocation28_spill] sm:$0xff] %v4959_v19  ;;  %2569 = vrot.lane.b32.xlu1 %v4078_v27, %s3935_s25 }
 0x26e   : > { %1467 = vst [vmem:[#allocation2 + $0x1b8] sm:$0xf] %v4955_v39  ;;  %1468 = vst [vmem:[#allocation2 + $0x1e0] sm:$0xf] %v4959_v19 }
 0x26f   : > { %v1322_v52 = vpop.permute.xlu0 %1321  ;;  %v1320_v17 = vpop.permute.xlu1 %1319 }
 0x270   : > { %v4967_v53 = vsel %vm1329_vm5, %v1318_v36, %v1320_v17  ;;  %v4971_v9 = vsel %vm1329_vm5, %v1320_v17, %v1322_v52 }
 0x271   : > { %6886 = vst [vmem:[#allocation29_spill] sm:$0xff] %v4967_v53  ;;  %6887 = vst [vmem:[#allocation30_spill] sm:$0xff] %v4971_v9  ;;  %2573 = vrot.lane.b32.xlu1 %v4080_v32, %s3935_s25 }
 0x272   : > { %1469 = vst [vmem:[#allocation2 + $0x180] sm:$0xf] %v4967_v53  ;;  %1470 = vst [vmem:[#allocation2 + $0x438] sm:$0xf] %v4971_v9 }
 0x273   : > { %v1326_v10 = vpop.permute.xlu0 %1325  ;;  %v1324_v0 = vpop.permute.xlu1 %1323 }
 0x274   : > { %v4979_v49 = vsel %vm1329_vm5, %v1322_v52, %v1324_v0  ;;  %v4983_v21 = vsel %vm1329_vm5, %v1324_v0, %v1326_v10 }
 0x275   : > { %6888 = vst [vmem:[#allocation31_spill] sm:$0xff] %v4979_v49  ;;  %6889 = vst [vmem:[#allocation32_spill] sm:$0xff] %v4983_v21  ;;  %2280 = vrot.lane.b32.xlu1 %v4078_v27, %s3936_s26 }
 0x276   : > { %1471 = vst [vmem:[#allocation2 + $0x6f8] sm:$0xf] %v4979_v49  ;;  %1472 = vst [vmem:[#allocation2 + $0x158] sm:$0xf] %v4983_v21 }
 0x277   : > { %v1328_v3 = vpop.permute.xlu1 %1327 }
 0x278   : > { %v4991_v48 = vsel %vm1329_vm5, %v1328_v3, %v1298_v15  ;;  %v4995_v54 = vsel %vm1329_vm5, %v1326_v10, %v1328_v3 }
 0x279   : > { %6890 = vst [vmem:[#allocation33_spill] sm:$0xff] %v4995_v54  ;;  %2284 = vrot.lane.b32.xlu1 %v4080_v32, %s3936_s26  ;;  %1346 = vrot.lane.b32.xlu0 %v4991_v48, %s3932_s22  ;;  %1458 = vst [vmem:[#allocation2 + $0x338] sm:$0xf] %v4991_v48 }
 0x27a   : > { %1473 = vst [vmem:[#allocation2 + $0x5a0] sm:$0xf] %v4995_v54 }
 0x27d   : > { %2278 = vrot.lane.b32.xlu1 %v4106_v46, %s3936_s26  ;;  %1350 = vrot.lane.b32.xlu0 %v4911_v29, %s3932_s22 }
 0x281   : > { %2043 = vrot.lane.b32.xlu1 %v4080_v32, %s3937_s29  ;;  %1354 = vrot.lane.b32.xlu0 %v4923_v33, %s3932_s22 }
 0x285   : > { %2577 = vrot.lane.b32.xlu1 %v4082_v37, %s3935_s25  ;;  %1358 = vrot.lane.b32.xlu0 %v4935_v38, %s3932_s22 }
 0x289   : > { %2039 = vrot.lane.b32.xlu1 %v4078_v27, %s3937_s29  ;;  %2567 = vrot.lane.b32.xlu0 %v4106_v46, %s3935_s25 }
 0x28d   : > { %1750 = vrot.lane.b32.xlu1 %v4078_v27, %s3938_s30  ;;  %2571 = vrot.lane.b32.xlu0 %v4130_v55, %s3935_s25 }
 0x291   : > { %2288 = vrot.lane.b32.xlu1 %v4082_v37, %s3936_s26  ;;  %2575 = vrot.lane.b32.xlu0 %v4138_v56, %s3935_s25 }
 0x295   : > { %1746 = vrot.lane.b32.xlu1 %v4076_v26, %s3938_s30  ;;  %2282 = vrot.lane.b32.xlu0 %v4130_v55, %s3936_s26 }
 0x299   : > { %2049 = vrot.lane.b32.xlu1 %v4146_v57, %s3937_s29  ;;  %2286 = vrot.lane.b32.xlu0 %v4138_v56, %s3936_s26 }
 0x29d   : > { %1754 = vrot.lane.b32.xlu1 %v4080_v32, %s3938_s30  ;;  %2041 = vrot.lane.b32.xlu0 %v4130_v55, %s3937_s29 }
 0x2a1   : > { %1776 = vrot.lane.b32.xlu1 %v4177_v61, %s3938_s30  ;;  %2045 = vrot.lane.b32.xlu0 %v4138_v56, %s3937_s29 }
 0x2a5   : > { %2583 = vrot.lane.b32.xlu1 %v4154_v58, %s3935_s25  ;;  %2579 = vrot.lane.b32.xlu0 %v4146_v57, %s3935_s25 }
 0x2a9   : > { %2294 = vrot.lane.b32.xlu1 %v4154_v58, %s3936_s26  ;;  %1748 = vrot.lane.b32.xlu0 %v4106_v46, %s3938_s30 }
 0x2ad   : > { %2053 = vrot.lane.b32.xlu1 %v4154_v58, %s3937_s29  ;;  %1752 = vrot.lane.b32.xlu0 %v4130_v55, %s3938_s30 }
 0x2b1   : > { %2587 = vrot.lane.b32.xlu1 %v4162_v59, %s3935_s25  ;;  %2290 = vrot.lane.b32.xlu0 %v4146_v57, %s3936_s26 }
 0x2b5   : > { %1760 = vrot.lane.b32.xlu1 %v4146_v57, %s3938_s30  ;;  %2047 = vrot.lane.b32.xlu0 %v4082_v37, %s3937_s29 }
 0x2b9   : > { %2298 = vrot.lane.b32.xlu1 %v4162_v59, %s3936_s26  ;;  %2037 = vrot.lane.b32.xlu0 %v4106_v46, %s3937_s29 }
 0x2bd   : > { %2057 = vrot.lane.b32.xlu1 %v4162_v59, %s3937_s29  ;;  %1756 = vrot.lane.b32.xlu0 %v4138_v56, %s3938_s30 }
 0x2c1   : > { %1764 = vrot.lane.b32.xlu1 %v4154_v58, %s3938_s30  ;;  %2581 = vrot.lane.b32.xlu0 %v4084_v42, %s3935_s25 }
 0x2c5   : > { %2591 = vrot.lane.b32.xlu1 %v4170_v60, %s3935_s25  ;;  %2292 = vrot.lane.b32.xlu0 %v4084_v42, %s3936_s26 }
 0x2c9   : > { %2302 = vrot.lane.b32.xlu1 %v4170_v60, %s3936_s26  ;;  %2051 = vrot.lane.b32.xlu0 %v4084_v42, %s3937_s29 }
 0x2cd   : > { %2585 = vrot.lane.b32.xlu0 %v4086_v43, %s3935_s25 }
 0x2cf   : > { %v1349_v35 = vpop.permute.xlu1 %1348 }
 0x2d1   : > { %1758 = vrot.lane.b32.xlu0 %v4082_v37, %s3938_s30 }
 0x2d3   : > { %v1353_v8 = vpop.permute.xlu1 %1352 }
 0x2d5   : > { %2296 = vrot.lane.b32.xlu0 %v4086_v43, %s3936_s26 }
 0x2d7   : > { %v1357_v5 = vpop.permute.xlu1 %1356 }
 0x2d9   : > { %2055 = vrot.lane.b32.xlu0 %v4086_v43, %s3937_s29 }
 0x2db   : > { %v5091_v13 = vpop.permute.xlu1 %1360 }
 0x2dc   : > { %6891 = vst [vmem:[#allocation34_spill] sm:$0xff] %v5091_v13 }
 0x2dd   : > { %1762 = vrot.lane.b32.xlu0 %v4084_v42, %s3938_s30 }
 0x2df   : > { %v2570_v12 = vpop.permute.xlu1 %2569 }
 0x2e1   : > { %2589 = vrot.lane.b32.xlu0 %v4088_v44, %s3935_s25 }
 0x2e3   : > { %v2574_v18 = vpop.permute.xlu1 %2573 }
 0x2e5   : > { %2300 = vrot.lane.b32.xlu0 %v4088_v44, %s3936_s26 }
 0x2e7   : > { %v2281_v15 = vpop.permute.xlu1 %2280 }
 0x2eb   : > { %v5099_v47 = vpop.permute.xlu0 %1346  ;;  %v5101_v34 = vpop.permute.xlu1 %2284 }
 0x2ec   : > { %v1392_v4 = vsel %vm605_vm3, %v5099_v47, %v1349_v35 }
 0x2ed   : > { %v1411_v50 = vrot.slane %v1392_v4, 4 }
 0x2ef   : > { %1443 = vst [vmem:[#allocation2 + $0x2b8] sm:$0xf0] %v1411_v50  ;;  %v1351_v2 = vpop.permute.xlu0 %1350  ;;  %v5107_v31 = vpop.permute.xlu1 %2278 }
 0x2f0   : > { %6892 = vst [vmem:[#allocation35_spill] sm:$0xff] %v5107_v31  ;;  %v1390_v14 = vsel %vm605_vm3, %v1351_v2, %v1353_v8  ;;  %v1391_v7 = vsel %vm605_vm3, %v1349_v35, %v1351_v2  ;;  %v5116_v20 = vsel %vm2308_vm6, %v5107_v31, %v2281_v15 }
 0x2f1   : > { %6893 = vst [vmem:[#allocation36_spill] sm:$0xff] %v5116_v20  ;;  %v1412_v41 = vrot.slane %v1391_v7, 4  ;;  %v1413_v30 = vrot.slane %v1390_v14, 4  ;;  %2452 = vst [vmem:[#allocation2 + $0x1d0] sm:$0xf] %v5116_v20 }
 0x2f3   : > { %1444 = vst [vmem:[#allocation2 + $0x5b0] sm:$0xf0] %v1412_v41  ;;  %1445 = vst [vmem:[#allocation2 + $0x6f0] sm:$0xf0] %v1413_v30  ;;  %v1355_v36 = vpop.permute.xlu0 %1354  ;;  %v5119_v63 = vpop.permute.xlu1 %2043 }
 0x2f4   : > { %v1388_v52 = vsel %vm605_vm3, %v1355_v36, %v1357_v5  ;;  %v1389_v17 = vsel %vm605_vm3, %v1353_v8, %v1355_v36 }
 0x2f5   : > { %v1414_v10 = vrot.slane %v1389_v17, 4  ;;  %v1415_v0 = vrot.slane %v1388_v52, 4 }
 0x2f7   : > { %1446 = vst [vmem:[#allocation2 + $0x550] sm:$0xf0] %v1414_v10  ;;  %1447 = vst [vmem:[#allocation2 + $0x688] sm:$0xf0] %v1415_v0  ;;  %v1359_v3 = vpop.permute.xlu0 %1358  ;;  %v5125_v35 = vpop.permute.xlu1 %2577 }
 0x2f8   : > { %v1386_v4 = vsel %vm605_vm3, %v1359_v3, %v5091_v13  ;;  %v1387_v50 = vsel %vm605_vm3, %v1357_v5, %v1359_v3 }
 0x2f9   : > { %v1416_v2 = vrot.slane %v1387_v50, 4  ;;  %v1417_v14 = vrot.slane %v1386_v4, 4 }
 0x2fb   : > { %1448 = vst [vmem:[#allocation2 + $0xb8] sm:$0xf0] %v1416_v2  ;;  %1449 = vst [vmem:[#allocation2 + $0x128] sm:$0xf0] %v1417_v14  ;;  %v5133_v8 = vpop.permute.xlu0 %2567  ;;  %v5135_v7 = vpop.permute.xlu1 %2039 }
 0x2fc   : > { %v5140_v41 = vsel %vm2597_vm7, %v5133_v8, %v2570_v12 }
 0x2fd   : > { %6894 = vst [vmem:[#allocation37_spill] sm:$0xff] %v5140_v41  ;;  %v2709_v30 = vrot.slane %v5140_v41, 4 }
 0x2ff   : > { %v2572_v36 = vpop.permute.xlu0 %2571  ;;  %v5143_v52 = vpop.permute.xlu1 %1750  ;;  %2741 = vst [vmem:[#allocation2 + $0x2a8] sm:$0xf0] %v2709_v30 }
 0x300   : > { %v2610_v5 = vsel %vm2597_vm7, %v2570_v12, %v2572_v36  ;;  %v2609_v17 = vsel %vm2597_vm7, %v2572_v36, %v2574_v18 }
 0x301   : > { %2614 = vrot.lane.b32.xlu0 %v2610_v5, %s3932_s22  ;;  %v2694_v10 = vrot.slane %v2610_v5, 4  ;;  %2616 = vrot.lane.b32.xlu1 %v2609_v17, %s3932_s22  ;;  %v2695_v0 = vrot.slane %v2609_v17, 4 }
 0x303   : > { %2726 = vst [vmem:[#allocation2 + $0x638] sm:$0xf0] %v2694_v10  ;;  %2727 = vst [vmem:[#allocation2 + $0x578] sm:$0xf0] %v2695_v0  ;;  %v2576_v3 = vpop.permute.xlu0 %2575  ;;  %v5151_v4 = vpop.permute.xlu1 %2288 }
 0x304   : > { %v5155_v50 = vsel %vm2597_vm7, %v2574_v18, %v2576_v3  ;;  %v5160_v12 = vsel %vm2597_vm7, %v2576_v3, %v5125_v35 }
 0x305   : > { %2644 = vrot.lane.b32.xlu0 %v5140_v41, %s3932_s22  ;;  %2742 = vrot.lane.b32.xlu1 %v2610_v5, %s3933_s23  ;;  %v2696_v2 = vrot.slane %v5155_v50, 4  ;;  %v2697_v14 = vrot.slane %v5160_v12, 4 }
 0x307   : > { %v2283_v30 = vpop.permute.xlu0 %2282  ;;  %v1747_v36 = vpop.permute.xlu1 %1746  ;;  %2728 = vst [vmem:[#allocation2 + $0x140] sm:$0xf0] %v2696_v2  ;;  %2729 = vst [vmem:[#allocation2 + $0x3a8] sm:$0xf0] %v2697_v14 }
 0x308   : > { %v2321_v18 = vsel %vm2308_vm6, %v2281_v15, %v2283_v30  ;;  %v2320_v10 = vsel %vm2308_vm6, %v2283_v30, %v5101_v34 }
 0x309   : > { %2744 = vrot.lane.b32.xlu0 %v2609_v17, %s3933_s23  ;;  %2746 = vrot.lane.b32.xlu1 %v5155_v50, %s3933_s23  ;;  %2437 = vst [vmem:[#allocation2 + $0x160] sm:$0xf] %v2321_v18  ;;  %2438 = vst [vmem:[#allocation2 + $0x300] sm:$0xf] %v2320_v10 }
 0x30b   : > { %v2287_v5 = vpop.permute.xlu0 %2286  ;;  %v5175_v0 = vpop.permute.xlu1 %2049 }
 0x30c   : > { %v5180_v3 = vsel %vm2308_vm6, %v5101_v34, %v2287_v5  ;;  %v5185_v15 = vsel %vm2308_vm6, %v2287_v5, %v5151_v4 }
 0x30d   : > { %2059 = vrot.lane.b32.xlu0 %v4088_v44, %s3937_s29  ;;  %2061 = vrot.lane.b32.xlu1 %v4170_v60, %s3937_s29  ;;  %2439 = vst [vmem:[#allocation2 + $0x290] sm:$0xf] %v5180_v3  ;;  %2440 = vst [vmem:[#allocation2 + $0x98] sm:$0xf] %v5185_v15 }
 0x30f   : > { %v2042_v17 = vpop.permute.xlu0 %2041  ;;  %v5194_v34 = vpop.permute.xlu1 %1754 }
 0x310   : > { %v5199_v2 = vsel %vm2067_vm8, %v2042_v17, %v5119_v63  ;;  %v5204_v14 = vsel %vm2067_vm8, %v5135_v7, %v2042_v17 }
 0x311   : > { %2593 = vrot.lane.b32.xlu0 %v4090_v45, %s3935_s25  ;;  %2595 = vrot.lane.b32.xlu1 %v4177_v61, %s3935_s25  ;;  %v2165_v30 = vrot.slane %v5199_v2, 4  ;;  %v2164_v5 = vrot.slane %v5204_v14, 4 }
 0x313   : > { %v2046_v28 = vpop.permute.xlu0 %2045  ;;  %v5213_v25 = vpop.permute.xlu1 %1776  ;;  %2197 = vst [vmem:[#allocation2 + $0x520] sm:$0xf0] %v2165_v30  ;;  %2196 = vst [vmem:[#allocation2 + $0x110] sm:$0xf0] %v2164_v5 }
 0x314   : > { %6895 = vst [vmem:[#allocation38_spill] sm:$0xff] %v5213_v25  ;;  %v5218_v17 = vsel %vm2067_vm8, %v5119_v63, %v2046_v28  ;;  %v5223_v24 = vsel %vm1778_vm9, %v5213_v25, %v1747_v36 }
 0x315   : > { %6896 = vst [vmem:[#allocation39_spill] sm:$0xff] %v5223_v24  ;;  %2325 = vrot.lane.b32.xlu0 %v2321_v18, %s3932_s22  ;;  %2327 = vrot.lane.b32.xlu1 %v2320_v10, %s3932_s22  ;;  %v2166_v23 = vrot.slane %v5218_v17, 4  ;;  %1922 = vst [vmem:[#allocation2 + $0x620] sm:$0xf] %v5223_v24 }
 0x317   : > { %v2580_v30 = vpop.permute.xlu0 %2579  ;;  %2198 = vst [vmem:[#allocation2 + $0x278] sm:$0xf0] %v2166_v23 }
 0x318   : > { %v5232_v63 = vsel %vm2597_vm7, %v5125_v35, %v2580_v30 }
 0x319   : > { %2455 = vrot.lane.b32.xlu0 %v2320_v10, %s3933_s23  ;;  %2457 = vrot.lane.b32.xlu1 %v5180_v3, %s3933_s23  ;;  %v2698_v5 = vrot.slane %v5232_v63, 4 }
 0x31b   : > { %v1749_v22 = vpop.permute.xlu0 %1748  ;;  %2730 = vst [vmem:[#allocation2 + $0x508] sm:$0xf0] %v2698_v5 }
 0x31c   : > { %v5241_v6 = vsel %vm1778_vm9, %v1749_v22, %v5143_v52  ;;  %v5245_v23 = vsel %vm1778_vm9, %v1747_v36, %v1749_v22  ;;  %v2584_v36 = vpop.permute.xlu1 %2583 }
 0x31d   : > { %1766 = vrot.lane.b32.xlu0 %v4086_v43, %s3938_s30  ;;  %1768 = vrot.lane.b32.xlu1 %v4162_v59, %s3938_s30  ;;  %1908 = vst [vmem:[#allocation2 + $0x8] sm:$0xf] %v5241_v6  ;;  %1907 = vst [vmem:[#allocation2 + $0x120] sm:$0xf] %v5245_v23 }
 0x31f   : > { %v1753_v35 = vpop.permute.xlu0 %1752 }
 0x320   : > { %v5256_v10 = vsel %vm1778_vm9, %v5143_v52, %v1753_v35  ;;  %v5261_v22 = vsel %vm1778_vm9, %v1753_v35, %v5194_v34  ;;  %v5278_v35 = vpop.permute.xlu1 %2294 }
 0x321   : > { %2304 = vrot.lane.b32.xlu0 %v4090_v45, %s3936_s26  ;;  %2306 = vrot.lane.b32.xlu1 %v4177_v61, %s3936_s26  ;;  %1909 = vst [vmem:[#allocation2 + $0x4b8] sm:$0xf] %v5256_v10  ;;  %1910 = vst [vmem:[#allocation2 + $0x298] sm:$0xf] %v5261_v22 }
 0x323   : > { %v2291_v5 = vpop.permute.xlu0 %2290 }
 0x324   : > { %v5272_v52 = vsel %vm2308_vm6, %v5151_v4, %v2291_v5 }
 0x325   : > { %2453 = vrot.lane.b32.xlu1 %v2321_v18, %s3933_s23  ;;  %2355 = vrot.lane.b32.xlu0 %v5116_v20, %s3932_s22  ;;  %2441 = vst [vmem:[#allocation2 + $0x518] sm:$0xf] %v5272_v52 }
 0x327   : > { %v2048_v13 = vpop.permute.xlu0 %2047 }
 0x328   : > { %v5282_v21 = vsel %vm2067_vm8, %v2046_v28, %v2048_v13  ;;  %v5287_v49 = vsel %vm2067_vm8, %v2048_v13, %v5175_v0  ;;  %v5303_v13 = vpop.permute.xlu1 %2053 }
 0x329   : > { %2214 = vrot.lane.b32.xlu0 %v5199_v2, %s3933_s23  ;;  %2216 = vrot.lane.b32.xlu1 %v5218_v17, %s3933_s23  ;;  %v2167_v4 = vrot.slane %v5282_v21, 4  ;;  %v2168_v18 = vrot.slane %v5287_v49, 4 }
 0x32b   : > { %v5295_v20 = vpop.permute.xlu0 %2037  ;;  %2199 = vst [vmem:[#allocation2] sm:$0xf0] %v2167_v4  ;;  %2200 = vst [vmem:[#allocation2 + $0x2f0] sm:$0xf0] %v2168_v18 }
 0x32c   : > { %6897 = vst [vmem:[#allocation40_spill] sm:$0xff] %v5295_v20  ;;  %v5301_v28 = vsel %vm2067_vm8, %v5295_v20, %v5135_v7  ;;  %v5320_v7 = vpop.permute.xlu1 %2587 }
 0x32d   : > { %2618 = vrot.lane.b32.xlu0 %v5155_v50, %s3932_s22  ;;  %2620 = vrot.lane.b32.xlu1 %v5160_v12, %s3932_s22  ;;  %v2179_v41 = vrot.slane %v5301_v28, 4 }
 0x32f   : > { %v1757_v9 = vpop.permute.xlu0 %1756  ;;  %2211 = vst [vmem:[#allocation2 + $0xf0] sm:$0xf0] %v2179_v41 }
 0x330   : > { %v5313_v4 = vsel %vm1778_vm9, %v5194_v34, %v1757_v9  ;;  %v1761_v59 = vpop.permute.xlu1 %1760 }
 0x331   : > { %2748 = vrot.lane.b32.xlu0 %v5160_v12, %s3933_s23  ;;  %2750 = vrot.lane.b32.xlu1 %v5232_v63, %s3933_s23  ;;  %1911 = vst [vmem:[#allocation2 + $0x448] sm:$0xf] %v5313_v4 }
 0x333   : > { %v2582_v50 = vpop.permute.xlu0 %2581 }
 0x334   : > { %v5324_v18 = vsel %vm2597_vm7, %v2580_v30, %v2582_v50  ;;  %v5328_v41 = vsel %vm2597_vm7, %v2582_v50, %v2584_v36  ;;  %v2299_v39 = vpop.permute.xlu1 %2298 }
 0x335   : > { %2063 = vrot.lane.b32.xlu0 %v4090_v45, %s3937_s29  ;;  %2065 = vrot.lane.b32.xlu1 %v4177_v61, %s3937_s29  ;;  %v2699_v12 = vrot.slane %v5324_v18, 4  ;;  %v2700_v34 = vrot.slane %v5328_v41, 4 }
 0x337   : > { %v2293_v53 = vpop.permute.xlu0 %2292  ;;  %2731 = vst [vmem:[#allocation2 + $0x480] sm:$0xf0] %v2699_v12  ;;  %2732 = vst [vmem:[#allocation2 + $0x2c8] sm:$0xf0] %v2700_v34 }
 0x338   : > { %v5338_v30 = vsel %vm2308_vm6, %v2291_v5, %v2293_v53  ;;  %v5343_v50 = vsel %vm2308_vm6, %v2293_v53, %v5278_v35  ;;  %v5390_v58 = vpop.permute.xlu1 %2057 }
 0x339   : > { %2212 = vrot.lane.b32.xlu0 %v5204_v14, %s3933_s23  ;;  %1925 = vrot.lane.b32.xlu1 %v5241_v6, %s3933_s23  ;;  %2442 = vst [vmem:[#allocation2 + $0x1c0] sm:$0xf] %v5338_v30  ;;  %2443 = vst [vmem:[#allocation2 + $0x468] sm:$0xf] %v5343_v50 }
 0x33b   : > { %v2052_v12 = vpop.permute.xlu0 %2051 }
 0x33c   : > { %v5354_v5 = vsel %vm2067_vm8, %v5175_v0, %v2052_v12  ;;  %v5359_v53 = vsel %vm2067_vm8, %v2052_v12, %v5303_v13 }
 0x33d   : > { %2329 = vrot.lane.b32.xlu1 %v5180_v3, %s3932_s22  ;;  %1927 = vrot.lane.b32.xlu0 %v5256_v10, %s3933_s23  ;;  %v2169_v34 = vrot.slane %v5354_v5, 4  ;;  %v2170_v19 = vrot.slane %v5359_v53, 4 }
 0x33f   : > { %v2586_v43 = vpop.permute.xlu0 %2585  ;;  %2201 = vst [vmem:[#allocation2 + $0x5c8] sm:$0xf0] %v2169_v34  ;;  %2202 = vst [vmem:[#allocation2 + $0x498] sm:$0xf0] %v2170_v19 }
 0x340   : > { %v5369_v0 = vsel %vm2597_vm7, %v2584_v36, %v2586_v43  ;;  %v5374_v12 = vsel %vm2597_vm7, %v2586_v43, %v5320_v7 }
 0x341   : > { %2459 = vrot.lane.b32.xlu1 %v5185_v15, %s3933_s23  ;;  %2331 = vrot.lane.b32.xlu0 %v5185_v15, %s3932_s22  ;;  %v2701_v3 = vrot.slane %v5369_v0, 4  ;;  %v2702_v34 = vrot.slane %v5374_v12, 4 }
 0x343   : > { %v1759_v19 = vpop.permute.xlu0 %1758  ;;  %2733 = vst [vmem:[#allocation2 + $0x218] sm:$0xf0] %v2701_v3  ;;  %2734 = vst [vmem:[#allocation2 + $0xc0] sm:$0xf0] %v2702_v34  ;;  %v5413_v34 = vpop.permute.xlu1 %1764 }
 0x344   : > { %v5384_v36 = vsel %vm1778_vm9, %v1757_v9, %v1759_v19  ;;  %v5388_v43 = vsel %vm1778_vm9, %v1759_v19, %v1761_v59 }
 0x345   : > { %1770 = vrot.lane.b32.xlu1 %v4088_v44, %s3938_s30  ;;  %2461 = vrot.lane.b32.xlu0 %v5272_v52, %s3933_s23  ;;  %1912 = vst [vmem:[#allocation2 + $0x560] sm:$0xf] %v5384_v36  ;;  %1913 = vst [vmem:[#allocation2 + $0x6c8] sm:$0xf] %v5388_v43 }
 0x347   : > { %v2297_v15 = vpop.permute.xlu0 %2296 }
 0x348   : > { %v5401_v9 = vsel %vm2308_vm6, %v5278_v35, %v2297_v15  ;;  %v5405_v3 = vsel %vm2308_vm6, %v2297_v15, %v2299_v39 }
 0x349   : > { %1772 = vrot.lane.b32.xlu0 %v4170_v60, %s3938_s30  ;;  %1923 = vrot.lane.b32.xlu1 %v5245_v23, %s3933_s23  ;;  %2444 = vst [vmem:[#allocation2 + $0x40] sm:$0xf] %v5401_v9  ;;  %2445 = vst [vmem:[#allocation2 + $0x248] sm:$0xf] %v5405_v3 }
 0x34b   : > { %v2056_v19 = vpop.permute.xlu0 %2055 }
 0x34c   : > { %v5418_v35 = vsel %vm2067_vm8, %v5303_v13, %v2056_v19  ;;  %v5423_v15 = vsel %vm2067_vm8, %v2056_v19, %v5390_v58 }
 0x34d   : > { %2084 = vrot.lane.b32.xlu0 %v5204_v14, %s3932_s22  ;;  %2086 = vrot.lane.b32.xlu1 %v5199_v2, %s3932_s22  ;;  %v2171_v60 = vrot.slane %v5418_v35, 4  ;;  %v2172_v44 = vrot.slane %v5423_v15, 4  ;;  %v5440_v14 = vpop.permute.xlu1 %2591 }
 0x34f   : > { %v1763_v25 = vpop.permute.xlu0 %1762  ;;  %2203 = vst [vmem:[#allocation2 + $0x48] sm:$0xf0] %v2171_v60  ;;  %2204 = vst [vmem:[#allocation2 + $0x570] sm:$0xf0] %v2172_v44 }
 0x350   : > { %v5433_v13 = vsel %vm1778_vm9, %v1761_v59, %v1763_v25  ;;  %v5438_v19 = vsel %vm1778_vm9, %v1763_v25, %v5413_v34 }
 0x351   : > { %2218 = vrot.lane.b32.xlu0 %v5282_v21, %s3933_s23  ;;  %2220 = vrot.lane.b32.xlu1 %v5287_v49, %s3933_s23  ;;  %1914 = vst [vmem:[#allocation2 + $0x50] sm:$0xf] %v5433_v13  ;;  %1915 = vst [vmem:[#allocation2 + $0x6a8] sm:$0xf] %v5438_v19  ;;  %v5464_v20 = vpop.permute.xlu1 %2302 }
 0x353   : > { %v2590_v44 = vpop.permute.xlu0 %2589 }
 0x354   : > { %v5451_v59 = vsel %vm2597_vm7, %v5320_v7, %v2590_v44  ;;  %v5456_v25 = vsel %vm2597_vm7, %v2590_v44, %v5440_v14 }
 0x355   : > { %2114 = vrot.lane.b32.xlu0 %v5301_v28, %s3932_s22  ;;  %1795 = vrot.lane.b32.xlu1 %v5245_v23, %s3932_s22  ;;  %v2703_v60 = vrot.slane %v5451_v59, 4  ;;  %v2704_v2 = vrot.slane %v5456_v25, 4 }
 0x357   : > { %v2301_v31 = vpop.permute.xlu0 %2300  ;;  %2735 = vst [vmem:[#allocation2 + $0x138] sm:$0xf0] %v2703_v60  ;;  %2736 = vst [vmem:[#allocation2 + $0x70] sm:$0xf0] %v2704_v2 }
 0x358   : > { %v5468_v7 = vsel %vm2308_vm6, %v2299_v39, %v2301_v31  ;;  %v5473_v44 = vsel %vm2308_vm6, %v2301_v31, %v5464_v20 }
 0x359   : > { %1797 = vrot.lane.b32.xlu0 %v5241_v6, %s3932_s22  ;;  %1929 = vrot.lane.b32.xlu1 %v5261_v22, %s3933_s23  ;;  %2446 = vst [vmem:[#allocation2 + $0x400] sm:$0xf] %v5468_v7  ;;  %2447 = vst [vmem:[#allocation2 + $0x2f8] sm:$0xf] %v5473_v44 }
 0x35d   : > { %1931 = vrot.lane.b32.xlu0 %v5313_v4, %s3933_s23  ;;  %1825 = vrot.lane.b32.xlu1 %v5223_v24, %s3932_s22 }
 0x361   : > { %1586 = vrot.lane.b32.xlu0 %v4076_v26, %s3932_s22  ;;  %1588 = vrot.lane.b32.xlu1 %v4106_v46, %s3932_s22 }
 0x365   : > { %1684 = vrot.lane.b32.xlu0 %v4106_v46, %s3933_s23  ;;  %1686 = vrot.lane.b32.xlu1 %v4078_v27, %s3933_s23 }
 0x369   : > { %2088 = vrot.lane.b32.xlu0 %v5218_v17, %s3932_s22  ;;  %2090 = vrot.lane.b32.xlu1 %v5282_v21, %s3932_s22 }
 0x36d   : > { %1616 = vrot.lane.b32.xlu0 %v4177_v61, %s3932_s22  ;;  %1682 = vrot.lane.b32.xlu1 %v4076_v26, %s3933_s23 }
 0x371   : > { %1476 = vrot.lane.b32.xlu0 %v4907_v40, %s3933_s23  ;;  %1478 = vrot.lane.b32.xlu1 %v4911_v29, %s3933_s23 }
 0x373   : > { %v2615_v6 = vpop.permute.xlu0 %2614  ;;  %v5505_v46 = vpop.permute.xlu1 %2616 }
 0x374   : > { %v2660_v39 = vsel %vm605_vm3, %v2615_v6, %v5505_v46 }
 0x375   : > { %2663 = vst [vmem:[#allocation2 + $0x578] sm:$0xf] %v2660_v39  ;;  %1799 = vrot.lane.b32.xlu0 %v5256_v10, %s3932_s22  ;;  %1801 = vrot.lane.b32.xlu1 %v5261_v22, %s3932_s22 }
 0x377   : > { %v5514_v21 = vpop.permute.xlu0 %2644  ;;  %v5516_v40 = vpop.permute.xlu1 %2742 }
 0x378   : > { %6898 = vst [vmem:[#allocation41_spill] sm:$0xff] %v5514_v21  ;;  %6899 = vst [vmem:[#allocation42_spill] sm:$0xff] %v5516_v40  ;;  %v2661_v29 = vsel %vm605_vm3, %v5514_v21, %v2615_v6 }
 0x379   : > { %2662 = vst [vmem:[#allocation2 + $0x638] sm:$0xf] %v2661_v29  ;;  %1376 = vrot.lane.b32.xlu0 %v4995_v54, %s3932_s22  ;;  %1474 = vrot.lane.b32.xlu1 %v4991_v48, %s3933_s23 }
 0x37b   : > { %v2745_v31 = vpop.permute.xlu0 %2744  ;;  %v5525_v17 = vpop.permute.xlu1 %2746 }
 0x37c   : > { %v2788_v23 = vsel %vm734_vm4, %v5516_v40, %v2745_v31  ;;  %v2787_v10 = vsel %vm734_vm4, %v2745_v31, %v5525_v17 }
 0x37d   : > { %2790 = vst [vmem:[#allocation2 + $0x470] sm:$0xf] %v2788_v23  ;;  %2791 = vst [vmem:[#allocation2 + $0x2d0] sm:$0xf] %v2787_v10  ;;  %1590 = vrot.lane.b32.xlu0 %v4078_v27, %s3932_s22  ;;  %1592 = vrot.lane.b32.xlu1 %v4130_v55, %s3932_s22 }
 0x37f   : > { %v2060_v48 = vpop.permute.xlu0 %2059  ;;  %v5537_v22 = vpop.permute.xlu1 %2061 }
 0x380   : > { %v5542_v60 = vsel %vm2067_vm8, %v5390_v58, %v2060_v48  ;;  %v5547_v2 = vsel %vm2067_vm8, %v2060_v48, %v5537_v22  ;;  %v3000_v58 = vld [vmem:[#allocation2 + $0x578] sm:$0xff] }
 0x381   : > { %1688 = vrot.lane.b32.xlu0 %v4130_v55, %s3933_s23  ;;  %1690 = vrot.lane.b32.xlu1 %v4080_v32, %s3933_s23  ;;  %v2173_v27 = vrot.slane %v5542_v60, 4  ;;  %v2174_v6 = vrot.slane %v5547_v2, 4  ;;  %v2999_v23 = vld [vmem:[#allocation2 + $0x638] sm:$0xff] }
 0x383   : > { %v2594_v39 = vpop.permute.xlu0 %2593  ;;  %v5555_v29 = vpop.permute.xlu1 %2595  ;;  %2205 = vst [vmem:[#allocation2 + $0x1d8] sm:$0xf0] %v2173_v27  ;;  %2206 = vst [vmem:[#allocation2 + $0x5e0] sm:$0xf0] %v2174_v6 }
 0x384   : > { %v3016_v31 = vld [vmem:[#allocation2 + $0x2d0] sm:$0xf]  ;;  %v5560_v55 = vsel %vm2597_vm7, %v5440_v14, %v2594_v39  ;;  %v5565_v48 = vsel %vm2597_vm7, %v2594_v39, %v5555_v29 }
 0x385   : > { %v3015_v10 = vld [vmem:[#allocation2 + $0x470] sm:$0xf]  ;;  %1480 = vrot.lane.b32.xlu0 %v4919_v51, %s3933_s23  ;;  %1482 = vrot.lane.b32.xlu1 %v4923_v33, %s3933_s23  ;;  %v3128_v27 = vpack.c.bf16 %v3016_v31, %v3000_v58  ;;  %v2705_v40 = vrot.slane %v5560_v55, 4  ;;  %v2706_v21 = vrot.slane %v5565_v48, 4 }
 0x386   : > { %v3127_v6 = vpack.c.bf16 %v3015_v10, %v2999_v23 }
 0x387   : > { %v2326_v54 = vpop.permute.xlu0 %2325  ;;  %3868 = vmatprep.subr.msk.bf16.mxu0 %vm3153_vm10, %v3128_v27  ;;  %v5574_v14 = vpop.permute.xlu1 %2327  ;;  %2737 = vst [vmem:[#allocation2 + $0x6c0] sm:$0xf0] %v2705_v40  ;;  %2738 = vst [vmem:[#allocation2 + $0xc8] sm:$0xf0] %v2706_v21 }
 0x388   : > { %v3155_v39 = vsel %vm3153_vm10, %v3127_v6, 0  ;;  %v2371_v51 = vsel %vm605_vm3, %v2326_v54, %v5574_v14 }
 0x389   : > { %3205 = vmatpush1.bf16.msra.mxu0 %v3155_v39  ;;  %v2390_v33 = vrot.slane %v2371_v51, 4  ;;  %2565 = vrot.lane.b32.xlu0 %v4076_v26, %s3935_s25 }
 0x38a   : > { %2276 = vrot.lane.b32.xlu1 %v4076_v26, %s3936_s26 }
 0x38b   : > { %2422 = vst [vmem:[#allocation2 + $0x170] sm:$0xf0] %v2390_v33  ;;  %v2456_v58 = vpop.permute.xlu0 %2455  ;;  %v5584_v31 = vpop.permute.xlu1 %2457 }
 0x38c   : > { %v2498_v21 = vsel %vm734_vm4, %v2456_v58, %v5584_v31 }
 0x38d   : > { %v2518_v40 = vrot.slane %v2498_v21, 4  ;;  %2622 = vrot.lane.b32.xlu0 %v5232_v63, %s3932_s22 }
 0x38e   : > { %2624 = vrot.lane.b32.xlu1 %v5324_v18, %s3932_s22 }
 0x38f   : > { %2550 = vst [vmem:[#allocation2 + $0x300] sm:$0xf0] %v2518_v40  ;;  %v1767_v23 = vpop.permute.xlu0 %1766  ;;  %v5593_v10 = vpop.permute.xlu1 %1768 }
 0x390   : > { %v5598_v27 = vsel %vm1778_vm9, %v5413_v34, %v1767_v23  ;;  %v5603_v6 = vsel %vm1778_vm9, %v1767_v23, %v5593_v10 }
 0x391   : > { %2752 = vrot.lane.b32.xlu0 %v5324_v18, %s3933_s23  ;;  %1916 = vst [vmem:[#allocation2 + $0x4c8] sm:$0xf] %v5598_v27  ;;  %1917 = vst [vmem:[#allocation2 + $0x360] sm:$0xf] %v5603_v6 }
 0x392   : > { %2754 = vrot.lane.b32.xlu1 %v5328_v41, %s3933_s23 }
 0x393   : > { %v2305_v63 = vpop.permute.xlu0 %2304  ;;  %v5611_v39 = vpop.permute.xlu1 %2306 }
 0x394   : > { %v5616_v34 = vsel %vm2308_vm6, %v5464_v20, %v2305_v63  ;;  %v5621_v51 = vsel %vm2308_vm6, %v2305_v63, %v5611_v39 }
 0x395   : > { %2035 = vrot.lane.b32.xlu0 %v4076_v26, %s3937_s29  ;;  %2448 = vst [vmem:[#allocation2 + $0x3e8] sm:$0xf] %v5616_v34  ;;  %2449 = vst [vmem:[#allocation2 + $0x168] sm:$0xf] %v5621_v51 }
 0x396   : > { %2333 = vrot.lane.b32.xlu1 %v5272_v52, %s3932_s22 }
 0x397   : > { %v5629_v18 = vpop.permute.xlu0 %2355  ;;  %v5631_v33 = vpop.permute.xlu1 %2453 }
 0x398   : > { %6900 = vst [vmem:[#allocation43_spill] sm:$0xff] %v5629_v18  ;;  %6901 = vst [vmem:[#allocation44_spill] sm:$0xff] %v5631_v33  ;;  %v2372_v20 = vsel %vm605_vm3, %v5629_v18, %v2326_v54  ;;  %v2499_v21 = vsel %vm734_vm4, %v5631_v33, %v2456_v58 }
 0x399   : > { %v2389_v26 = vrot.slane %v2372_v20, 4  ;;  %v2517_v40 = vrot.slane %v2499_v21, 4  ;;  %2335 = vrot.lane.b32.xlu0 %v5338_v30, %s3932_s22 }
 0x39a   : > { %2463 = vrot.lane.b32.xlu1 %v5338_v30, %s3933_s23 }
 0x39b   : > { %2421 = vst [vmem:[#allocation2 + $0x150] sm:$0xf0] %v2389_v26  ;;  %2549 = vst [vmem:[#allocation2 + $0x160] sm:$0xf0] %v2517_v40  ;;  %v2215_v52 = vpop.permute.xlu0 %2214  ;;  %v5643_v23 = vpop.permute.xlu1 %2216 }
 0x39c   : > { %v2257_v54 = vsel %vm734_vm4, %v2215_v52, %v5643_v23 }
 0x39d   : > { %2261 = vst [vmem:[#allocation2 + $0x170] sm:$0xf] %v2257_v54  ;;  %2465 = vrot.lane.b32.xlu0 %v5343_v50, %s3933_s23 }
 0x39e   : > { %1774 = vrot.lane.b32.xlu1 %v4090_v45, %s3938_s30 }
 0x39f   : > { %v2619_v58 = vpop.permute.xlu0 %2618  ;;  %v5652_v63 = vpop.permute.xlu1 %2620 }
 0x3a0   : > { %v2659_v30 = vsel %vm605_vm3, %v5505_v46, %v2619_v58  ;;  %v2658_v20 = vsel %vm605_vm3, %v2619_v58, %v5652_v63  ;;  %v2984_v58 = vld [vmem:[#allocation2 + $0x300] sm:$0xff] }
 0x3a1   : > { %2664 = vst [vmem:[#allocation2 + $0x140] sm:$0xf] %v2659_v30  ;;  %2665 = vst [vmem:[#allocation2 + $0x3a8] sm:$0xf] %v2658_v20  ;;  %2222 = vrot.lane.b32.xlu0 %v5354_v5, %s3933_s23 }
 0x3a2   : > { %2224 = vrot.lane.b32.xlu1 %v5359_v53, %s3933_s23 }
 0x3a3   : > { %v2749_v21 = vpop.permute.xlu0 %2748  ;;  %v5664_v26 = vpop.permute.xlu1 %2750 }
 0x3a4   : > { %v2786_v40 = vsel %vm734_vm4, %v5525_v17, %v2749_v21  ;;  %v2785_v46 = vsel %vm734_vm4, %v2749_v21, %v5664_v26  ;;  %v2968_v54 = vld [vmem:[#allocation2 + $0x170] sm:$0xff] }
 0x3a5   : > { %2792 = vst [vmem:[#allocation2 + $0x330] sm:$0xf] %v2786_v40  ;;  %2793 = vst [vmem:[#allocation2 + $0x5b8] sm:$0xf] %v2785_v46  ;;  %2626 = vrot.lane.b32.xlu0 %v5328_v41, %s3932_s22  ;;  %v3112_v30 = vpack.c.bf16 %v2984_v58, %v2968_v54 }
 0x3a6   : > { %2628 = vrot.lane.b32.xlu1 %v5369_v0, %s3932_s22 }
 0x3a7   : > { %v2064_v20 = vpop.permute.xlu0 %2063  ;;  %3206 = vmatprep.subr.bf16.mxu0 %v3112_v30  ;;  %v5676_v33 = vpop.permute.xlu1 %2065 }
 0x3a8   : > { %v5681_v17 = vsel %vm2067_vm8, %v5537_v22, %v2064_v20  ;;  %v5686_v21 = vsel %vm2067_vm8, %v2064_v20, %v5676_v33  ;;  %v3002_v22 = vld [vmem:[#allocation2 + $0x3a8] sm:$0xff]  ;;  %v3001_v20 = vld [vmem:[#allocation2 + $0x140] sm:$0xff] }
 0x3a9   : > { %2756 = vrot.lane.b32.xlu0 %v5369_v0, %s3933_s23  ;;  %v2175_v41 = vrot.slane %v5681_v17, 4  ;;  %v2176_v40 = vrot.slane %v5686_v21, 4 }
 0x3aa   : > { %2758 = vrot.lane.b32.xlu1 %v5374_v12, %s3933_s23 }
 0x3ab   : > { %v5694_v46 = vpop.permute.xlu0 %2212  ;;  %v1926_v54 = vpop.permute.xlu1 %1925  ;;  %2207 = vst [vmem:[#allocation2 + $0x6e0] sm:$0xf0] %v2175_v41  ;;  %2208 = vst [vmem:[#allocation2 + $0x78] sm:$0xf0] %v2176_v40 }
 0x3ac   : > { %6902 = vst [vmem:[#allocation45_spill] sm:$0xff] %v5694_v46  ;;  %v2258_v58 = vsel %vm734_vm4, %v5694_v46, %v2215_v52  ;;  %v3018_v30 = vld [vmem:[#allocation2 + $0x5b8] sm:$0xf]  ;;  %v3017_v0 = vld [vmem:[#allocation2 + $0x330] sm:$0xf] }
 0x3ad   : > { %2260 = vst [vmem:[#allocation2 + $0x150] sm:$0xf] %v2258_v58  ;;  %1933 = vrot.lane.b32.xlu0 %v5384_v36, %s3933_s23  ;;  %v3130_v18 = vpack.c.bf16 %v3018_v30, %v3002_v22  ;;  %v3129_v61 = vpack.c.bf16 %v3017_v0, %v3001_v20  ;;  %v2983_v20 = vld [vmem:[#allocation2 + $0x160] sm:$0xff] }
 0x3ae   : > { %1935 = vrot.lane.b32.xlu1 %v5388_v43, %s3933_s23 }
 0x3af   : > { %v5703_v45 = vpop.permute.xlu0 %1927  ;;  %3870 = vmatprep.subr.msk.bf16.mxu1 %vm3153_vm10, %v3130_v18  ;;  %v2330_v41 = vpop.permute.xlu1 %2329  ;;  %v3161_v40 = vsel %vm3153_vm10, %v3129_v61, 0 }
 0x3b0   : > { %v1968_v52 = vsel %vm734_vm4, %v1926_v54, %v5703_v45  ;;  %v2370_v58 = vsel %vm605_vm3, %v5574_v14, %v2330_v41  ;;  %3246 = vmatpush1.bf16.msra.mxu1 %v3161_v40 }
 0x3b1   : > { %v1988_v46 = vrot.slane %v1968_v52, 4  ;;  %v2391_v24 = vrot.slane %v2370_v58, 4  ;;  %2337 = vrot.lane.b32.xlu0 %v5343_v50, %s3932_s22 }
 0x3b2   : > { %2339 = vrot.lane.b32.xlu1 %v5401_v9, %s3932_s22 }
 0x3b3   : > { %2020 = vst [vmem:[#allocation2 + $0x8] sm:$0xf0] %v1988_v46  ;;  %2423 = vst [vmem:[#allocation2 + $0x1a8] sm:$0xf0] %v2391_v24  ;;  %v5717_v61 = vpop.permute.xlu0 %2331  ;;  %v2460_v18 = vpop.permute.xlu1 %2459 }
 0x3b4   : > { %v2369_v22 = vsel %vm605_vm3, %v2330_v41, %v5717_v61  ;;  %v2497_v14 = vsel %vm734_vm4, %v5584_v31, %v2460_v18  ;;  %v2967_v30 = vld [vmem:[#allocation2 + $0x150] sm:$0xff] }
 0x3b5   : > { %v2392_v0 = vrot.slane %v2369_v22, 4  ;;  %v2519_v50 = vrot.slane %v2497_v14, 4  ;;  %2467 = vrot.lane.b32.xlu0 %v5401_v9, %s3933_s23  ;;  %v3111_v24 = vpack.c.bf16 %v2983_v20, %v2967_v30 }
 0x3b6   : > { %2469 = vrot.lane.b32.xlu1 %v5405_v3, %s3933_s23 }
 0x3b7   : > { %2424 = vst [vmem:[#allocation2 + $0xd8] sm:$0xf0] %v2392_v0  ;;  %2551 = vst [vmem:[#allocation2 + $0x290] sm:$0xf0] %v2519_v50  ;;  %v5729_v46 = vpop.permute.xlu0 %2461  ;;  %3207 = vmatpush1.bf16.msra.mxu0 %v3111_v24  ;;  %v1771_v41 = vpop.permute.xlu1 %1770 }
 0x3b8   : > { %v2496_v31 = vsel %vm734_vm4, %v2460_v18, %v5729_v46  ;;  %v5737_v40 = vsel %vm1778_vm9, %v5593_v10, %v1771_v41 }
 0x3b9   : > { %v2520_v9 = vrot.slane %v2496_v31, 4  ;;  %2092 = vrot.lane.b32.xlu0 %v5287_v49, %s3932_s22  ;;  %1918 = vst [vmem:[#allocation2 + $0xa8] sm:$0xf] %v5737_v40 }
 0x3ba   : > { %2094 = vrot.lane.b32.xlu1 %v5354_v5, %s3932_s22 }
 0x3bb   : > { %2552 = vst [vmem:[#allocation2 + $0x98] sm:$0xf0] %v2520_v9  ;;  %v5744_v52 = vpop.permute.xlu0 %1772  ;;  %v5746_v58 = vpop.permute.xlu1 %1923 }
 0x3bc   : > { %v1969_v18 = vsel %vm734_vm4, %v5746_v58, %v1926_v54  ;;  %v5754_v10 = vsel %vm1778_vm9, %v1771_v41, %v5744_v52 }
 0x3bd   : > { %v1987_v49 = vrot.slane %v1969_v18, 4  ;;  %2226 = vrot.lane.b32.xlu0 %v5418_v35, %s3933_s23  ;;  %1919 = vst [vmem:[#allocation2 + $0x690] sm:$0xf] %v5754_v10 }
 0x3be   : > { %2228 = vrot.lane.b32.xlu1 %v5423_v15, %s3933_s23  ;;  %v2985_v18 = vld [vmem:[#allocation2 + $0x290] sm:$0xff] }
 0x3bf   : > { %2019 = vst [vmem:[#allocation2 + $0x120] sm:$0xf0] %v1987_v49  ;;  %v2085_v5 = vpop.permute.xlu0 %2084  ;;  %v5761_v22 = vpop.permute.xlu1 %2086 }
 0x3c0   : > { %v2130_v54 = vsel %vm605_vm3, %v2085_v5, %v5761_v22 }
 0x3c1   : > { %2133 = vst [vmem:[#allocation2 + $0x520] sm:$0xf] %v2130_v54  ;;  %1803 = vrot.lane.b32.xlu0 %v5313_v4, %s3932_s22 }
 0x3c2   : > { %1805 = vrot.lane.b32.xlu1 %v5384_v36, %s3932_s22 }
 0x3c3   : > { %v2219_v14 = vpop.permute.xlu0 %2218  ;;  %v5770_v30 = vpop.permute.xlu1 %2220 }
 0x3c4   : > { %v2256_v20 = vsel %vm734_vm4, %v5643_v23, %v2219_v14  ;;  %v2255_v0 = vsel %vm734_vm4, %v2219_v14, %v5770_v30  ;;  %v2936_v23 = vld [vmem:[#allocation2 + $0x8] sm:$0xff]  ;;  %v2986_v14 = vld [vmem:[#allocation2 + $0x98] sm:$0xff] }
 0x3c5   : > { %2262 = vst [vmem:[#allocation2 + $0x1a8] sm:$0xf] %v2256_v20  ;;  %2263 = vst [vmem:[#allocation2 + $0xd8] sm:$0xf] %v2255_v0  ;;  %1937 = vrot.lane.b32.xlu0 %v5433_v13, %s3933_s23 }
 0x3c6   : > { %1939 = vrot.lane.b32.xlu1 %v5438_v19, %s3933_s23 }
 0x3c7   : > { %v5782_v4 = vpop.permute.xlu0 %2114  ;;  %v1796_v36 = vpop.permute.xlu1 %1795 }
 0x3c8   : > { %v2131_v50 = vsel %vm605_vm3, %v5782_v4, %v2085_v5  ;;  %v2952_v24 = vld [vmem:[#allocation2 + $0x520] sm:$0xff] }
 0x3c9   : > { %2132 = vst [vmem:[#allocation2 + $0x110] sm:$0xf] %v2131_v50  ;;  %1594 = vrot.lane.b32.xlu0 %v4080_v32, %s3932_s22  ;;  %v3096_v41 = vpack.c.bf16 %v2952_v24, %v2936_v23 }
 0x3ca   : > { %1596 = vrot.lane.b32.xlu1 %v4138_v56, %s3932_s22 }
 0x3cb   : > { %v5791_v31 = vpop.permute.xlu0 %1797  ;;  %3208 = vmatprep.subr.bf16.mxu0 %v3096_v41  ;;  %v1930_v9 = vpop.permute.xlu1 %1929 }
 0x3cc   : > { %v1841_v49 = vsel %vm605_vm3, %v1796_v36, %v5791_v31  ;;  %v1967_v5 = vsel %vm734_vm4, %v5703_v45, %v1930_v9  ;;  %v2970_v54 = vld [vmem:[#allocation2 + $0xd8] sm:$0xff]  ;;  %v2969_v32 = vld [vmem:[#allocation2 + $0x1a8] sm:$0xff] }
 0x3cd   : > { %v1860_v20 = vrot.slane %v1841_v49, 4  ;;  %v1989_v0 = vrot.slane %v1967_v5, 4  ;;  %1692 = vrot.lane.b32.xlu0 %v4138_v56, %s3933_s23  ;;  %v3114_v50 = vpack.c.bf16 %v2986_v14, %v2970_v54  ;;  %v3113_v23 = vpack.c.bf16 %v2985_v18, %v2969_v32  ;;  %v2935_v49 = vld [vmem:[#allocation2 + $0x120] sm:$0xff] }
 0x3ce   : > { %1694 = vrot.lane.b32.xlu1 %v4082_v37, %s3933_s23 }
 0x3cf   : > { %1892 = vst [vmem:[#allocation2 + $0x200] sm:$0xf0] %v1860_v20  ;;  %2021 = vst [vmem:[#allocation2 + $0x4b8] sm:$0xf0] %v1989_v0  ;;  %v5803_v24 = vpop.permute.xlu0 %1931  ;;  %3247 = vmatprep.subr.bf16.mxu1 %v3114_v50  ;;  %v5805_v41 = vpop.permute.xlu1 %1825 }
 0x3d0   : > { %v1966_v45 = vsel %vm734_vm4, %v1930_v9, %v5803_v24  ;;  %v1842_v56 = vsel %vm605_vm3, %v5805_v41, %v1796_v36  ;;  %3248 = vmatpush1.bf16.msra.mxu1 %v3113_v23  ;;  %v2951_v5 = vld [vmem:[#allocation2 + $0x110] sm:$0xff] }
 0x3d1   : > { %v1990_v54 = vrot.slane %v1966_v45, 4  ;;  %v1859_v18 = vrot.slane %v1842_v56, 4  ;;  %2096 = vrot.lane.b32.xlu0 %v5359_v53, %s3932_s22  ;;  %v3095_v14 = vpack.c.bf16 %v2951_v5, %v2935_v49 }
 0x3d2   : > { %2098 = vrot.lane.b32.xlu1 %v5418_v35, %s3932_s22 }
 0x3d3   : > { %2022 = vst [vmem:[#allocation2 + $0x298] sm:$0xf0] %v1990_v54  ;;  %1891 = vst [vmem:[#allocation2 + $0x678] sm:$0xf0] %v1859_v18  ;;  %v1587_v32 = vpop.permute.xlu0 %1586  ;;  %3209 = vmatpush1.bf16.msra.mxu0 %v3095_v14  ;;  %v5817_v9 = vpop.permute.xlu1 %1588 }
 0x3d4   : > { %v1632_v36 = vsel %vm605_vm3, %v1587_v32, %v5817_v9 }
 0x3d5   : > { %1635 = vst [vmem:[#allocation2 + $0x418] sm:$0xf] %v1632_v36  ;;  %1484 = vrot.lane.b32.xlu0 %v4931_v1, %s3933_s23 }
 0x3d6   : > { %1486 = vrot.lane.b32.xlu1 %v4935_v38, %s3933_s23  ;;  %v2937_v54 = vld [vmem:[#allocation2 + $0x4b8] sm:$0xff] }
 0x3d7   : > { %v1685_v53 = vpop.permute.xlu0 %1684  ;;  %v5826_v35 = vpop.permute.xlu1 %1686 }
 0x3d8   : > { %v1727_v20 = vsel %vm734_vm4, %v1685_v53, %v5826_v35 }
 0x3d9   : > { %1731 = vst [vmem:[#allocation2 + $0x200] sm:$0xf] %v1727_v20  ;;  %1807 = vrot.lane.b32.xlu0 %v5388_v43, %s3932_s22 }
 0x3da   : > { %1809 = vrot.lane.b32.xlu1 %v5433_v13, %s3932_s22  ;;  %v2938_v14 = vld [vmem:[#allocation2 + $0x298] sm:$0xff] }
 0x3db   : > { %v2089_v0 = vpop.permute.xlu0 %2088  ;;  %v5835_v50 = vpop.permute.xlu1 %2090 }
 0x3dc   : > { %v2129_v1 = vsel %vm605_vm3, %v5761_v22, %v2089_v0  ;;  %v2128_v38 = vsel %vm605_vm3, %v2089_v0, %v5835_v50  ;;  %v2904_v45 = vld [vmem:[#allocation2 + $0x418] sm:$0xff] }
 0x3dd   : > { %2134 = vst [vmem:[#allocation2 + $0x278] sm:$0xf] %v2129_v1  ;;  %2135 = vst [vmem:[#allocation2] sm:$0xf] %v2128_v38  ;;  %1598 = vrot.lane.b32.xlu0 %v4082_v37, %s3932_s22 }
 0x3de   : > { %1600 = vrot.lane.b32.xlu1 %v4146_v57, %s3932_s22 }
 0x3df   : > { %v5847_v43 = vpop.permute.xlu0 %1616  ;;  %v5849_v13 = vpop.permute.xlu1 %1682 }
 0x3e0   : > { %v1633_v22 = vsel %vm605_vm3, %v5847_v43, %v1587_v32  ;;  %v1728_v23 = vsel %vm734_vm4, %v5849_v13, %v1685_v53  ;;  %v2920_v56 = vld [vmem:[#allocation2 + $0x200] sm:$0xff] }
 0x3e1   : > { %1634 = vst [vmem:[#allocation2 + $0x230] sm:$0xf] %v1633_v22  ;;  %1730 = vst [vmem:[#allocation2 + $0x678] sm:$0xf] %v1728_v23  ;;  %1696 = vrot.lane.b32.xlu0 %v4146_v57, %s3933_s23  ;;  %v3080_v37 = vpack.c.bf16 %v2920_v56, %v2904_v45 }
 0x3e2   : > { %1698 = vrot.lane.b32.xlu1 %v4084_v42, %s3933_s23 }
 0x3e3   : > { %v1477_v49 = vpop.permute.xlu0 %1476  ;;  %3210 = vmatprep.subr.bf16.mxu0 %v3080_v37  ;;  %v5861_v5 = vpop.permute.xlu1 %1478 }
 0x3e4   : > { %v1519_v18 = vsel %vm734_vm4, %v1477_v49, %v5861_v5  ;;  %v2954_v32 = vld [vmem:[#allocation2] sm:$0xff]  ;;  %v2953_v36 = vld [vmem:[#allocation2 + $0x278] sm:$0xff] }
 0x3e5   : > { %v1539_v53 = vrot.slane %v1519_v18, 4  ;;  %1488 = vrot.lane.b32.xlu0 %v4943_v11, %s3933_s23  ;;  %v3098_v57 = vpack.c.bf16 %v2954_v32, %v2938_v14  ;;  %v3097_v20 = vpack.c.bf16 %v2953_v36, %v2937_v54  ;;  %v2872_v36 = vld [vmem:[#allocation2 + $0x2b8] sm:$0xff] }
 0x3e6   : > { %1490 = vrot.lane.b32.xlu1 %v4947_v16, %s3933_s23 }
 0x3e7   : > { %1571 = vst [vmem:[#allocation2 + $0x228] sm:$0xf0] %v1539_v53  ;;  %v1800_v0 = vpop.permute.xlu0 %1799  ;;  %3249 = vmatprep.subr.bf16.mxu1 %v3098_v57  ;;  %v5870_v1 = vpop.permute.xlu1 %1801 }
 0x3e8   : > { %v1840_v38 = vsel %vm605_vm3, %v5791_v31, %v1800_v0  ;;  %v1839_v22 = vsel %vm605_vm3, %v1800_v0, %v5870_v1  ;;  %3250 = vmatpush1.bf16.msra.mxu1 %v3097_v20  ;;  %v2903_v11 = vld [vmem:[#allocation2 + $0x230] sm:$0xff]  ;;  %v2919_v23 = vld [vmem:[#allocation2 + $0x678] sm:$0xff] }
 0x3e9   : > { %v1861_v45 = vrot.slane %v1840_v38, 4  ;;  %v1862_v56 = vrot.slane %v1839_v22, 4  ;;  %2630 = vrot.lane.b32.xlu0 %v5374_v12, %s3932_s22  ;;  %v3079_v37 = vpack.c.bf16 %v2919_v23, %v2903_v11  ;;  %v2856_v23 = vld [vmem:[#allocation2 + $0xb0] sm:$0xff] }
 0x3ea   : > { %2632 = vrot.lane.b32.xlu1 %v5451_v59, %s3932_s22 }
 0x3eb   : > { %1893 = vst [vmem:[#allocation2 + $0x5a8] sm:$0xf0] %v1861_v45  ;;  %1894 = vst [vmem:[#allocation2 + $0x478] sm:$0xf0] %v1862_v56  ;;  %v5882_v54 = vpop.permute.xlu0 %1376  ;;  %3211 = vmatpush1.bf16.msra.mxu0 %v3079_v37  ;;  %v5884_v31 = vpop.permute.xlu1 %1474 }
 0x3ec   : > { %v1393_v18 = vsel %vm605_vm3, %v5882_v54, %v5099_v47  ;;  %v1520_v12 = vsel %vm734_vm4, %v5884_v31, %v1477_v49 }
 0x3ed   : > { %v1410_v14 = vrot.slane %v1393_v18, 4  ;;  %v1538_v32 = vrot.slane %v1520_v12, 4  ;;  %2760 = vrot.lane.b32.xlu0 %v5451_v59, %s3933_s23  ;;  %v2840_v12 = vld [vmem:[#allocation2 + $0x4a0] sm:$0xff] }
 0x3ee   : > { %2762 = vrot.lane.b32.xlu1 %v5456_v25, %s3933_s23  ;;  %v2888_v53 = vld [vmem:[#allocation2 + $0x228] sm:$0xff] }
 0x3ef   : > { %1442 = vst [vmem:[#allocation2 + $0x6b0] sm:$0xf0] %v1410_v14  ;;  %1570 = vst [vmem:[#allocation2 + $0x338] sm:$0xf0] %v1538_v32  ;;  %v1591_v57 = vpop.permute.xlu0 %1590  ;;  %v5897_v20 = vpop.permute.xlu1 %1592  ;;  %v3064_v47 = vpack.c.bf16 %v2888_v53, %v2872_v36  ;;  %v2824_v14 = vld [vmem:[#allocation2 + $0x588] sm:$0xff]  ;;  %v3048_v53 = vpack.c.bf16 %v2856_v23, %v2840_v12 }
 0x3f0   : > { %v1631_v49 = vsel %vm605_vm3, %v5817_v9, %v1591_v57  ;;  %v1630_v0 = vsel %vm605_vm3, %v1591_v57, %v5897_v20  ;;  %v2839_v57 = vld [vmem:[#allocation2 + $0x5f8] sm:$0xff] }
 0x3f1   : > { %1636 = vst [vmem:[#allocation2 + $0x250] sm:$0xf] %v1631_v49  ;;  %1637 = vst [vmem:[#allocation2 + $0x568] sm:$0xf] %v1630_v0  ;;  %2341 = vrot.lane.b32.xlu0 %v5405_v3, %s3932_s22  ;;  %3212 = vmatprep.subr.bf16.mxu0 %v3064_v47  ;;  %v2808_v47 = vld [vmem:[#allocation2 + $0x3b0] sm:$0xff] }
 0x3f2   : > { %2343 = vrot.lane.b32.xlu1 %v5468_v7, %s3932_s22 }
 0x3f3   : > { %v1689_v59 = vpop.permute.xlu0 %1688  ;;  %v5909_v38 = vpop.permute.xlu1 %1690 }
 0x3f4   : > { %v1726_v9 = vsel %vm734_vm4, %v5826_v35, %v1689_v59  ;;  %v1725_v22 = vsel %vm734_vm4, %v1689_v59, %v5909_v38  ;;  %v3032_v59 = vpack.c.bf16 %v2824_v14, %v2808_v47  ;;  %v2874_v47 = vld [vmem:[#allocation2 + $0x6f0] sm:$0xff] }
 0x3f5   : > { %1732 = vst [vmem:[#allocation2 + $0x5a8] sm:$0xf] %v1726_v9  ;;  %1733 = vst [vmem:[#allocation2 + $0x478] sm:$0xf] %v1725_v22  ;;  %2471 = vrot.lane.b32.xlu0 %v5468_v7, %s3933_s23  ;;  %v2855_v7 = vld [vmem:[#allocation2 + $0x5e8] sm:$0xff] }
 0x3f6   : > { %2473 = vrot.lane.b32.xlu1 %v5473_v44, %s3933_s23  ;;  %v2871_v3 = vld [vmem:[#allocation2 + $0x6b0] sm:$0xff]  ;;  %v2887_v11 = vld [vmem:[#allocation2 + $0x338] sm:$0xff]  ;;  %v3047_v0 = vpack.c.bf16 %v2855_v7, %v2839_v57 }
 0x3f7   : > { %v1481_v45 = vpop.permute.xlu0 %1480  ;;  %v5921_v56 = vpop.permute.xlu1 %1482  ;;  %v3063_v37 = vpack.c.bf16 %v2887_v11, %v2871_v3 }
 0x3f8   : > { %v1518_v35 = vsel %vm734_vm4, %v5861_v5, %v1481_v45  ;;  %v1517_v18 = vsel %vm734_vm4, %v1481_v45, %v5921_v56  ;;  %v2906_v9 = vld [vmem:[#allocation2 + $0x568] sm:$0xff]  ;;  %v2905_v3 = vld [vmem:[#allocation2 + $0x250] sm:$0xff] }
 0x3f9   : > { %v1540_v32 = vrot.slane %v1518_v35, 4  ;;  %v1541_v36 = vrot.slane %v1517_v18, 4  ;;  %2230 = vrot.lane.b32.xlu0 %v5542_v60, %s3933_s23  ;;  %3213 = vmatpush1.bf16.msra.mxu0 %v3063_v37  ;;  %v6903_v35 = vld [vmem:[#allocation35_spill] sm:$0xff] }
 0x3fa   : > { %2232 = vrot.lane.b32.xlu1 %v5547_v2, %s3933_s23  ;;  %3214 = vmatprep.subr.bf16.mxu0 %v3048_v53 }
 0x3fb   : > { %1572 = vst [vmem:[#allocation2 + $0x428] sm:$0xf0] %v1540_v32  ;;  %1573 = vst [vmem:[#allocation2 + $0x270] sm:$0xf0] %v1541_v36  ;;  %v2566_v5 = vpop.permute.xlu0 %2565 }
 0x3fc   : > { %v2277_v49 = vpop.permute.xlu1 %2276  ;;  %v2922_v22 = vld [vmem:[#allocation2 + $0x478] sm:$0xff]  ;;  %v2921_v11 = vld [vmem:[#allocation2 + $0x5a8] sm:$0xff]  ;;  %v5936_v45 = vsel %vm2597_vm7, %v5555_v29, %v2566_v5  ;;  %v5941_v23 = vsel %vm2597_vm7, %v2566_v5, %v5133_v8  ;;  %v2823_v8 = vld [vmem:[#allocation2 + $0x2c0] sm:$0xff] }
 0x3fd   : > { %v5946_v37 = vsel %vm2308_vm6, %v5611_v39, %v2277_v49  ;;  %v5951_v18 = vsel %vm2308_vm6, %v2277_v49, %v6903_v35  ;;  %2634 = vrot.lane.b32.xlu0 %v5456_v25, %s3932_s22  ;;  %v3082_v29 = vpack.c.bf16 %v2922_v22, %v2906_v9  ;;  %v3081_v12 = vpack.c.bf16 %v2921_v11, %v2905_v3  ;;  %v2807_v25 = vld [vmem:[#allocation2 + $0x2b0] sm:$0xff]  ;;  %v5978_v11 = vld [vmem:[%s6795_s1] sm:$0x3] }
 0x3fe   : > { %2636 = vrot.lane.b32.xlu1 %v5560_v55, %s3932_s22  ;;  %v2707_v7 = vrot.slane %v5936_v45, 4  ;;  %v2708_v14 = vrot.slane %v5941_v23, 4  ;;  %2450 = vst [vmem:[#allocation2 + $0x530] sm:$0xf] %v5946_v37  ;;  %2451 = vst [vmem:[#allocation2 + $0x38] sm:$0xf] %v5951_v18  ;;  %3215 = vmatpush1.bf16.msra.mxu0 %v3047_v0  ;;  %v3031_v57 = vpack.c.bf16 %v2823_v8, %v2807_v25 }
 0x3ff   : > { %3216 = vmatprep.subr.bf16.mxu0 %v3032_v59  ;;  %v2623_v39 = vpop.permute.xlu0 %2622  ;;  %3251 = vmatprep.subr.bf16.mxu1 %v3082_v29  ;;  %v2873_v49 = vld [vmem:[#allocation2 + $0x5b0] sm:$0xff]  ;;  %v2842_v29 = vld [vmem:[#allocation2 + $0x3d8] sm:$0xff]  ;;  %v2857_v8 = vld [vmem:[#allocation2 + $0x368] sm:$0xff] }
 0x400   : > { %v5961_v32 = vpop.permute.xlu1 %2624  ;;  %2739 = vst [vmem:[#allocation2 + $0x1c8] sm:$0xf0] %v2707_v7  ;;  %2740 = vst [vmem:[#allocation2 + $0x4d0] sm:$0xf0] %v2708_v14  ;;  %v2657_v36 = vsel %vm605_vm3, %v5652_v63, %v2623_v39  ;;  %3252 = vmatpush1.bf16.msra.mxu1 %v3081_v12  ;;  %v2858_v3 = vld [vmem:[#allocation2 + $0x4b0] sm:$0xff]  ;;  %v2826_v14 = vld [vmem:[#allocation2 + $0x60] sm:$0xff] }
 0x401   : > { %v2656_v53 = vsel %vm605_vm3, %v2623_v39, %v5961_v32  ;;  %2666 = vst [vmem:[#allocation2 + $0x508] sm:$0xf] %v2657_v36  ;;  %2764 = vrot.lane.b32.xlu0 %v5560_v55, %s3933_s23  ;;  %v3050_v12 = vpack.c.bf16 %v2858_v3, %v2842_v29  ;;  %v6904_v39 = vmov 0   ;;  %v2841_v36 = vld [vmem:[#allocation2 + $0x4e8] sm:$0xff] }
 0x402   : > { %2667 = vst [vmem:[#allocation2 + $0x480] sm:$0xf] %v2656_v53  ;;  %2766 = vrot.lane.b32.xlu1 %v5565_v48, %s3933_s23  ;;  %3217 = vmatpush1.bf16.msra.mxu0 %v3031_v57  ;;  %v2890_v5 = vld [vmem:[#allocation2 + $0x270] sm:$0xff]  ;;  %v2889_v0 = vld [vmem:[#allocation2 + $0x428] sm:$0xff] }
 0x403   : > { %v2753_v63 = vpop.permute.xlu0 %2752  ;;  %v3066_v9 = vpack.c.bf16 %v2890_v5, %v2874_v47  ;;  %v3065_v22 = vpack.c.bf16 %v2889_v0, %v2873_v49  ;;  %v6905_v57 = vld [vmem:[#allocation40_spill] sm:$0xff]  ;;  %v3049_v49 = vpack.c.bf16 %v2857_v8, %v2841_v36  ;;  %v2825_v0 = vld [vmem:[#allocation2 + $0x598] sm:$0xff] }
 0x404   : > { %v5973_v59 = vpop.permute.xlu1 %2754  ;;  %v2784_v55 = vsel %vm734_vm4, %v5664_v26, %v2753_v63 }
 0x405   : > { %v2783_v35 = vsel %vm734_vm4, %v2753_v63, %v5973_v59  ;;  %2794 = vst [vmem:[#allocation2 + $0x198] sm:$0xf] %v2784_v55  ;;  %1941 = vrot.lane.b32.xlu0 %v5598_v27, %s3933_s23  ;;  %3253 = vmatprep.subr.bf16.mxu1 %v3066_v9  ;;  %v2809_v55 = vld [vmem:[#allocation2 + $0x4d8] sm:$0xff] }
 0x406   : > { %2795 = vst [vmem:[#allocation2 + $0x258] sm:$0xf] %v2783_v35  ;;  %1943 = vrot.lane.b32.xlu1 %v5603_v6, %s3933_s23  ;;  %3869 = vmatmul.mubr.msk.bf16.vlgmr.msra.gmra.mxu0 %vm3149_vm11, %v5978_v11 }
 0x407   : > { %3254 = vmatpush1.bf16.msra.mxu1 %v3065_v22  ;;  %v2036_v26 = vpop.permute.xlu0 %2035  ;;  %3316 = vmatprep.mubr.bf16.mxu0 %v6904_v39 }
 0x408   : > { %v2334_v7 = vpop.permute.xlu1 %2333  ;;  %3255 = vmatprep.subr.bf16.mxu1 %v3050_v12  ;;  %v5999_v53 = vsel %vm2067_vm8, %v5676_v33, %v2036_v26  ;;  %v6004_v47 = vsel %vm2067_vm8, %v2036_v26, %v6905_v57  ;;  %v3033_v12 = vpack.c.bf16 %v2825_v0, %v2809_v55  ;;  %v3003_v26 = vld [vmem:[#allocation2 + $0x508] sm:$0xff]  ;;  %v6906_v0 = vld [vmem:[#allocation38_spill] sm:$0xff] }
 0x409   : > { %v2368_v25 = vsel %vm605_vm3, %v5717_v61, %v2334_v7  ;;  %2345 = vrot.lane.b32.xlu0 %v5473_v44, %s3932_s22  ;;  %v2810_v61 = vld [vmem:[#allocation2 + $0x18] sm:$0xff]  ;;  %v2177_v63 = vrot.slane %v5999_v53, 4  ;;  %v2178_v33 = vrot.slane %v6004_v47, 4  ;;  %v3004_v35 = vld [vmem:[#allocation2 + $0x480] sm:$0xff] }
 0x40a   : > { %v2393_v5 = vrot.slane %v2368_v25, 4  ;;  %2347 = vrot.lane.b32.xlu1 %v5616_v34, %s3932_s22  ;;  %v3034_v9 = vpack.c.bf16 %v2826_v14, %v2810_v61 }
 0x40b   : > { %3256 = vmatpush1.bf16.msra.mxu1 %v3049_v49  ;;  %v6012_v22 = vpop.permute.xlu0 %2335  ;;  %2209 = vst [vmem:[#allocation2 + $0x580] sm:$0xf0] %v2177_v63  ;;  %2210 = vst [vmem:[#allocation2 + $0x668] sm:$0xf0] %v2178_v33 }
 0x40c   : > { %2425 = vst [vmem:[#allocation2 + $0x280] sm:$0xf0] %v2393_v5  ;;  %v2464_v3 = vpop.permute.xlu1 %2463  ;;  %v2367_v44 = vsel %vm605_vm3, %v2334_v7, %v6012_v22  ;;  %3257 = vmatprep.subr.bf16.mxu1 %v3034_v9  ;;  %v3019_v14 = vld [vmem:[#allocation2 + $0x198] sm:$0xf] }
 0x40d   : > { %v2495_v29 = vsel %vm734_vm4, %v5729_v46, %v2464_v3  ;;  %v3020_v8 = vld [vmem:[#allocation2 + $0x258] sm:$0xf]  ;;  %v2394_v25 = vrot.slane %v2367_v44, 4  ;;  %2475 = vrot.lane.b32.xlu0 %v5616_v34, %s3933_s23  ;;  %v3131_v5 = vpack.c.bf16 %v3019_v14, %v3003_v26 }
 0x40e   : > { %v2521_v36 = vrot.slane %v2495_v29, 4  ;;  %2477 = vrot.lane.b32.xlu1 %v5621_v51, %s3933_s23  ;;  %v3132_v57 = vpack.c.bf16 %v3020_v8, %v3004_v35 }
 0x40f   : > { %2426 = vst [vmem:[#allocation2 + $0x430] sm:$0xf0] %v2394_v25  ;;  %3258 = vmatpush1.bf16.msra.mxu1 %v3033_v12  ;;  %v6024_v7 = vpop.permute.xlu0 %2465  ;;  %v3167_v49 = vsel %vm3153_vm10, %v3131_v5, 0 }
 0x410   : > { %2553 = vst [vmem:[#allocation2 + $0x518] sm:$0xf0] %v2521_v36  ;;  %3872 = vmatprep.subr.msk.bf16.mxu0 %vm3153_vm10, %v3132_v57  ;;  %v1775_v46 = vpop.permute.xlu1 %1774  ;;  %v2494_v61 = vsel %vm734_vm4, %v2464_v3, %v6024_v7 }
 0x411   : > { %3287 = vmatpush1.bf16.msra.mxu0 %v3167_v49  ;;  %v6034_v34 = vsel %vm1778_vm9, %v5744_v52, %v1775_v46  ;;  %v6039_v63 = vsel %vm1778_vm9, %v1775_v46, %v6906_v0  ;;  %v2522_v33 = vrot.slane %v2494_v61, 4  ;;  %2100 = vrot.lane.b32.xlu0 %v5423_v15, %s3932_s22  ;;  %v6907_v61 = vld [vmem:[#allocation23_spill] sm:$0xff] }
 0x412   : > { %2102 = vrot.lane.b32.xlu1 %v5542_v60, %s3932_s22  ;;  %1920 = vst [vmem:[#allocation2 + $0x658] sm:$0xf] %v6034_v34  ;;  %1921 = vst [vmem:[#allocation2 + $0x238] sm:$0xf] %v6039_v63  ;;  %3871 = vmatmul.mubr.msk.bf16.vlgmr.msra.gmra.mxu1 %vm3149_vm11, %v5978_v11 }
 0x413   : > { %2554 = vst [vmem:[#allocation2 + $0x1c0] sm:$0xf0] %v2522_v33  ;;  %v2223_v52 = vpop.permute.xlu0 %2222  ;;  %3357 = vmatprep.mubr.bf16.mxu1 %v6904_v39 }
 0x414   : > { %v6049_v9 = vpop.permute.xlu1 %2224  ;;  %v2254_v15 = vsel %vm734_vm4, %v5770_v30, %v2223_v52 }
 0x415   : > { %v2253_v60 = vsel %vm734_vm4, %v2223_v52, %v6049_v9  ;;  %2264 = vst [vmem:[#allocation2 + $0x280] sm:$0xf] %v2254_v15  ;;  %2234 = vrot.lane.b32.xlu0 %v5681_v17, %s3933_s23 }
 0x416   : > { %2265 = vst [vmem:[#allocation2 + $0x430] sm:$0xf] %v2253_v60  ;;  %2236 = vrot.lane.b32.xlu1 %v5686_v21, %s3933_s23 }
 0x417   : > { %v2627_v3 = vpop.permute.xlu0 %2626  ;;  %v2987_v12 = vld [vmem:[#allocation2 + $0x518] sm:$0xff] }
 0x418   : > { %v6062_v55 = vpop.permute.xlu1 %2628  ;;  %v2655_v35 = vsel %vm605_vm3, %v5961_v32, %v2627_v3 }
 0x419   : > { %v2654_v30 = vsel %vm605_vm3, %v2627_v3, %v6062_v55  ;;  %2668 = vst [vmem:[#allocation2 + $0x2c8] sm:$0xf] %v2655_v35  ;;  %1811 = vrot.lane.b32.xlu0 %v5438_v19, %s3932_s22 }
 0x41a   : > { %2669 = vst [vmem:[#allocation2 + $0x218] sm:$0xf] %v2654_v30  ;;  %1813 = vrot.lane.b32.xlu1 %v5598_v27, %s3932_s22  ;;  %v2988_v14 = vld [vmem:[#allocation2 + $0x1c0] sm:$0xff] }
 0x41b   : > { %v2757_v44 = vpop.permute.xlu0 %2756 }
 0x41c   : > { %v6074_v29 = vpop.permute.xlu1 %2758  ;;  %v2782_v32 = vsel %vm734_vm4, %v5973_v59, %v2757_v44  ;;  %v2971_v25 = vld [vmem:[#allocation2 + $0x280] sm:$0xff] }
 0x41d   : > { %v2781_v8 = vsel %vm734_vm4, %v2757_v44, %v6074_v29  ;;  %v2972_v26 = vld [vmem:[#allocation2 + $0x430] sm:$0xff]  ;;  %2796 = vst [vmem:[#allocation2 + $0x558] sm:$0xf] %v2782_v32  ;;  %1945 = vrot.lane.b32.xlu0 %v5737_v40, %s3933_s23  ;;  %v3115_v27 = vpack.c.bf16 %v2987_v12, %v2971_v25  ;;  %v6908_v44 = vld [vmem:[#allocation20_spill] sm:$0xff] }
 0x41e   : > { %2797 = vst [vmem:[#allocation2 + $0x600] sm:$0xf] %v2781_v8  ;;  %1947 = vrot.lane.b32.xlu1 %v5754_v10, %s3933_s23  ;;  %v3116_v19 = vpack.c.bf16 %v2988_v14, %v2972_v26 }
 0x41f   : > { %v1934_v36 = vpop.permute.xlu0 %1933 }
 0x420   : > { %3288 = vmatprep.subr.bf16.mxu0 %v3116_v19  ;;  %v6086_v59 = vpop.permute.xlu1 %1935  ;;  %v1965_v57 = vsel %vm734_vm4, %v5803_v24, %v1934_v36  ;;  %v3005_v3 = vld [vmem:[#allocation2 + $0x2c8] sm:$0xff] }
 0x421   : > { %v1964_v5 = vsel %vm734_vm4, %v1934_v36, %v6086_v59  ;;  %3289 = vmatpush1.bf16.msra.mxu0 %v3115_v27  ;;  %v1991_v46 = vrot.slane %v1965_v57, 4  ;;  %1602 = vrot.lane.b32.xlu0 %v4084_v42, %s3932_s22  ;;  %v3006_v52 = vld [vmem:[#allocation2 + $0x218] sm:$0xff] }
 0x422   : > { %v1992_v49 = vrot.slane %v1964_v5, 4  ;;  %1604 = vrot.lane.b32.xlu1 %v6907_v61, %s3932_s22 }
 0x423   : > { %2023 = vst [vmem:[#allocation2 + $0x448] sm:$0xf0] %v1991_v46  ;;  %v2338_v0 = vpop.permute.xlu0 %2337 }
 0x424   : > { %2024 = vst [vmem:[#allocation2 + $0x560] sm:$0xf0] %v1992_v49  ;;  %v6098_v33 = vpop.permute.xlu1 %2339  ;;  %v2366_v24 = vsel %vm605_vm3, %v6012_v22, %v2338_v0  ;;  %v3021_v42 = vld [vmem:[#allocation2 + $0x558] sm:$0xf] }
 0x425   : > { %v2365_v15 = vsel %vm605_vm3, %v2338_v0, %v6098_v33  ;;  %v3022_v60 = vld [vmem:[#allocation2 + $0x600] sm:$0xf]  ;;  %v2395_v35 = vrot.slane %v2366_v24, 4  ;;  %1700 = vrot.lane.b32.xlu0 %v6907_v61, %s3933_s23  ;;  %v3133_v32 = vpack.c.bf16 %v3021_v42, %v3005_v3 }
 0x426   : > { %v2396_v30 = vrot.slane %v2365_v15, 4  ;;  %1702 = vrot.lane.b32.xlu1 %v6908_v44, %s3933_s23  ;;  %v3134_v12 = vpack.c.bf16 %v3022_v60, %v3006_v52 }
 0x427   : > { %2427 = vst [vmem:[#allocation2 + $0x398] sm:$0xf0] %v2395_v35  ;;  %v2468_v22 = vpop.permute.xlu0 %2467  ;;  %v3173_v26 = vsel %vm3153_vm10, %v3133_v32, 0 }
 0x428   : > { %2428 = vst [vmem:[#allocation2 + $0x240] sm:$0xf0] %v2396_v30  ;;  %3874 = vmatprep.subr.msk.bf16.mxu1 %vm3153_vm10, %v3134_v12  ;;  %v6111_v8 = vpop.permute.xlu1 %2469  ;;  %v2493_v14 = vsel %vm734_vm4, %v6024_v7, %v2468_v22 }
 0x429   : > { %v2492_v25 = vsel %vm734_vm4, %v2468_v22, %v6111_v8  ;;  %3328 = vmatpush1.bf16.msra.mxu1 %v3173_v26  ;;  %v2523_v19 = vrot.slane %v2493_v14, 4  ;;  %2104 = vrot.lane.b32.xlu0 %v5547_v2, %s3932_s22  ;;  %v6909_v2 = vld [vmem:[#allocation27_spill] sm:$0xff] }
 0x42a   : > { %v2524_v27 = vrot.slane %v2492_v25, 4  ;;  %2106 = vrot.lane.b32.xlu1 %v5681_v17, %s3932_s22  ;;  %v2939_v60 = vld [vmem:[#allocation2 + $0x448] sm:$0xff] }
 0x42b   : > { %2555 = vst [vmem:[#allocation2 + $0x468] sm:$0xf0] %v2523_v19  ;;  %v2093_v36 = vpop.permute.xlu0 %2092  ;;  %v2940_v52 = vld [vmem:[#allocation2 + $0x560] sm:$0xff] }
 0x42c   : > { %2556 = vst [vmem:[#allocation2 + $0x40] sm:$0xf0] %v2524_v27  ;;  %v6124_v57 = vpop.permute.xlu1 %2094  ;;  %v2127_v7 = vsel %vm605_vm3, %v5835_v50, %v2093_v36 }
 0x42d   : > { %v2126_v5 = vsel %vm605_vm3, %v2093_v36, %v6124_v57  ;;  %2136 = vst [vmem:[#allocation2 + $0x2f0] sm:$0xf] %v2127_v7  ;;  %1362 = vrot.lane.b32.xlu0 %v4947_v16, %s3932_s22  ;;  %v6910_v16 = vld [vmem:[#allocation28_spill] sm:$0xff] }
 0x42e   : > { %2137 = vst [vmem:[#allocation2 + $0x5c8] sm:$0xf] %v2126_v5  ;;  %1364 = vrot.lane.b32.xlu1 %v6909_v2, %s3932_s22  ;;  %v6911_v36 = vld [vmem:[#allocation24_spill] sm:$0xff] }
 0x42f   : > { %v2227_v17 = vpop.permute.xlu0 %2226 }
 0x430   : > { %v6136_v46 = vpop.permute.xlu1 %2228  ;;  %v2252_v49 = vsel %vm734_vm4, %v6049_v9, %v2227_v17 }
 0x431   : > { %v2251_v50 = vsel %vm734_vm4, %v2227_v17, %v6136_v46  ;;  %2266 = vst [vmem:[#allocation2 + $0x398] sm:$0xf] %v2252_v49  ;;  %1492 = vrot.lane.b32.xlu0 %v6909_v2, %s3933_s23 }
 0x432   : > { %2267 = vst [vmem:[#allocation2 + $0x240] sm:$0xf] %v2251_v50  ;;  %1494 = vrot.lane.b32.xlu1 %v6910_v16, %s3933_s23  ;;  %v2989_v25 = vld [vmem:[#allocation2 + $0x468] sm:$0xff] }
 0x433   : > { %v1804_v61 = vpop.permute.xlu0 %1803  ;;  %v2990_v22 = vld [vmem:[#allocation2 + $0x40] sm:$0xff] }
 0x434   : > { %v6148_v0 = vpop.permute.xlu1 %1805  ;;  %v1838_v9 = vsel %vm605_vm3, %v5870_v1, %v1804_v61  ;;  %v2955_v3 = vld [vmem:[#allocation2 + $0x2f0] sm:$0xff] }
 0x435   : > { %v1837_v24 = vsel %vm605_vm3, %v1804_v61, %v6148_v0  ;;  %v2956_v15 = vld [vmem:[#allocation2 + $0x5c8] sm:$0xff]  ;;  %v1863_v42 = vrot.slane %v1838_v9, 4  ;;  %1815 = vrot.lane.b32.xlu0 %v5603_v6, %s3932_s22  ;;  %v3099_v12 = vpack.c.bf16 %v2955_v3, %v2939_v60  ;;  %v6913_v9 = vld [vmem:[#allocation29_spill] sm:$0xff] }
 0x436   : > { %v1864_v35 = vrot.slane %v1837_v24, 4  ;;  %1817 = vrot.lane.b32.xlu1 %v5737_v40, %s3932_s22  ;;  %v3100_v30 = vpack.c.bf16 %v2956_v15, %v2940_v52 }
 0x437   : > { %1895 = vst [vmem:[#allocation2 + $0x388] sm:$0xf0] %v1863_v42  ;;  %v1938_v1 = vpop.permute.xlu0 %1937 }
 0x438   : > { %1896 = vst [vmem:[#allocation2 + $0x3f8] sm:$0xf0] %v1864_v35  ;;  %3290 = vmatprep.subr.bf16.mxu0 %v3100_v30  ;;  %v6160_v32 = vpop.permute.xlu1 %1939  ;;  %v1963_v26 = vsel %vm734_vm4, %v6086_v59, %v1938_v1  ;;  %v2973_v40 = vld [vmem:[#allocation2 + $0x398] sm:$0xff] }
 0x439   : > { %v1962_v6 = vsel %vm734_vm4, %v1938_v1, %v6160_v32  ;;  %3291 = vmatpush1.bf16.msra.mxu0 %v3099_v12  ;;  %v2974_v14 = vld [vmem:[#allocation2 + $0x240] sm:$0xff]  ;;  %v1993_v19 = vrot.slane %v1963_v26, 4  ;;  %1606 = vrot.lane.b32.xlu0 %v6908_v44, %s3932_s22  ;;  %v3117_v5 = vpack.c.bf16 %v2989_v25, %v2973_v40  ;;  %v6912_v44 = vld [vmem:[#allocation21_spill] sm:$0xff] }
 0x43a   : > { %v1994_v27 = vrot.slane %v1962_v6, 4  ;;  %1608 = vrot.lane.b32.xlu1 %v6911_v36, %s3932_s22  ;;  %v3118_v7 = vpack.c.bf16 %v2990_v22, %v2974_v14 }
 0x43b   : > { %2025 = vst [vmem:[#allocation2 + $0x6c8] sm:$0xf0] %v1993_v19  ;;  %v1595_v59 = vpop.permute.xlu0 %1594 }
 0x43c   : > { %2026 = vst [vmem:[#allocation2 + $0x50] sm:$0xf0] %v1994_v27  ;;  %3329 = vmatprep.subr.bf16.mxu1 %v3118_v7  ;;  %v1597_v2 = vpop.permute.xlu1 %1596  ;;  %v1629_v17 = vsel %vm605_vm3, %v5897_v20, %v1595_v59 }
 0x43d   : > { %v1628_v49 = vsel %vm605_vm3, %v1595_v59, %v1597_v2  ;;  %3330 = vmatpush1.bf16.msra.mxu1 %v3117_v5  ;;  %1638 = vst [vmem:[#allocation2 + $0x3b8] sm:$0xf] %v1629_v17  ;;  %1704 = vrot.lane.b32.xlu0 %v6911_v36, %s3933_s23 }
 0x43e   : > { %1639 = vst [vmem:[#allocation2 + $0x268] sm:$0xf] %v1628_v49  ;;  %1706 = vrot.lane.b32.xlu1 %v6912_v44, %s3933_s23 }
 0x43f   : > { %v1693_v50 = vpop.permute.xlu0 %1692 }
 0x440   : > { %v6181_v61 = vpop.permute.xlu1 %1694  ;;  %v1724_v52 = vsel %vm734_vm4, %v5909_v38, %v1693_v50 }
 0x441   : > { %v1723_v20 = vsel %vm734_vm4, %v1693_v50, %v6181_v61  ;;  %1734 = vst [vmem:[#allocation2 + $0x388] sm:$0xf] %v1724_v52  ;;  %1366 = vrot.lane.b32.xlu0 %v6910_v16, %s3932_s22  ;;  %v6914_v16 = vld [vmem:[#allocation30_spill] sm:$0xff] }
 0x442   : > { %1735 = vst [vmem:[#allocation2 + $0x3f8] sm:$0xf] %v1723_v20  ;;  %1368 = vrot.lane.b32.xlu1 %v6913_v9, %s3932_s22  ;;  %v2941_v7 = vld [vmem:[#allocation2 + $0x6c8] sm:$0xff] }
 0x443   : > { %v2097_v24 = vpop.permute.xlu0 %2096  ;;  %v2942_v19 = vld [vmem:[#allocation2 + $0x50] sm:$0xff] }
 0x444   : > { %v6193_v15 = vpop.permute.xlu1 %2098  ;;  %v2125_v60 = vsel %vm605_vm3, %v6124_v57, %v2097_v24  ;;  %v2907_v1 = vld [vmem:[#allocation2 + $0x3b8] sm:$0xff] }
 0x445   : > { %v2124_v38 = vsel %vm605_vm3, %v2097_v24, %v6193_v15  ;;  %2138 = vst [vmem:[#allocation2 + $0x498] sm:$0xf] %v2125_v60  ;;  %1496 = vrot.lane.b32.xlu0 %v6913_v9, %s3933_s23  ;;  %v2908_v35 = vld [vmem:[#allocation2 + $0x268] sm:$0xff]  ;;  %v2875_v60 = vld [vmem:[#allocation2 + $0x550] sm:$0xff] }
 0x446   : > { %2139 = vst [vmem:[#allocation2 + $0x48] sm:$0xf] %v2124_v38  ;;  %1498 = vrot.lane.b32.xlu1 %v6914_v16, %s3933_s23 }
 0x447   : > { %v1485_v3 = vpop.permute.xlu0 %1484 }
 0x448   : > { %v6205_v42 = vpop.permute.xlu1 %1486  ;;  %v1516_v57 = vsel %vm734_vm4, %v5921_v56, %v1485_v3  ;;  %v2923_v22 = vld [vmem:[#allocation2 + $0x388] sm:$0xff] }
 0x449   : > { %v1515_v30 = vsel %vm734_vm4, %v1485_v3, %v6205_v42  ;;  %v2924_v12 = vld [vmem:[#allocation2 + $0x3f8] sm:$0xff]  ;;  %v1542_v26 = vrot.slane %v1516_v57, 4  ;;  %2638 = vrot.lane.b32.xlu0 %v5565_v48, %s3932_s22  ;;  %v3083_v40 = vpack.c.bf16 %v2923_v22, %v2907_v1  ;;  %v2844_v1 = vld [vmem:[#allocation2 + $0x3d0] sm:$0xff] }
 0x44a   : > { %v1543_v6 = vrot.slane %v1515_v30, 4  ;;  %2640 = vrot.lane.b32.xlu1 %v5936_v45, %s3932_s22  ;;  %v3084_v14 = vpack.c.bf16 %v2924_v12, %v2908_v35  ;;  %v2860_v30 = vld [vmem:[#allocation2 + $0x410] sm:$0xff] }
 0x44b   : > { %1574 = vst [vmem:[#allocation2 + $0x350] sm:$0xf0] %v1542_v26  ;;  %v1808_v56 = vpop.permute.xlu0 %1807  ;;  %v3052_v22 = vpack.c.bf16 %v2860_v30, %v2844_v1  ;;  %v2859_v26 = vld [vmem:[#allocation2 + $0x2d8] sm:$0xff] }
 0x44c   : > { %1575 = vst [vmem:[#allocation2 + $0xf8] sm:$0xf0] %v1543_v6  ;;  %3292 = vmatprep.subr.bf16.mxu0 %v3084_v14  ;;  %v6217_v25 = vpop.permute.xlu1 %1809  ;;  %v1836_v27 = vsel %vm605_vm3, %v6148_v0, %v1808_v56  ;;  %v2957_v5 = vld [vmem:[#allocation2 + $0x498] sm:$0xff] }
 0x44d   : > { %v1835_v48 = vsel %vm605_vm3, %v1808_v56, %v6217_v25  ;;  %3293 = vmatpush1.bf16.msra.mxu0 %v3083_v40  ;;  %v2958_v36 = vld [vmem:[#allocation2 + $0x48] sm:$0xff]  ;;  %v1865_v59 = vrot.slane %v1836_v27, 4  ;;  %2768 = vrot.lane.b32.xlu0 %v5936_v45, %s3933_s23  ;;  %v3101_v50 = vpack.c.bf16 %v2957_v5, %v2941_v7  ;;  %v2843_v56 = vld [vmem:[#allocation2 + $0x680] sm:$0xff] }
 0x44e   : > { %v1866_v17 = vrot.slane %v1835_v48, 4  ;;  %2770 = vrot.lane.b32.xlu1 %v5941_v23, %s3933_s23  ;;  %v3102_v49 = vpack.c.bf16 %v2958_v36, %v2942_v19  ;;  %v2876_v45 = vld [vmem:[#allocation2 + $0x688] sm:$0xff]  ;;  %v3051_v48 = vpack.c.bf16 %v2859_v26, %v2843_v56 }
 0x44f   : > { %1897 = vst [vmem:[#allocation2 + $0x370] sm:$0xf0] %v1865_v59  ;;  %v1599_v0 = vpop.permute.xlu0 %1598  ;;  %v2812_v36 = vld [vmem:[#allocation2 + $0x328] sm:$0xff] }
 0x450   : > { %1898 = vst [vmem:[#allocation2 + $0x308] sm:$0xf0] %v1866_v17  ;;  %3331 = vmatprep.subr.bf16.mxu1 %v3102_v49  ;;  %v6229_v52 = vpop.permute.xlu1 %1600  ;;  %v1627_v20 = vsel %vm605_vm3, %v1597_v2, %v1599_v0  ;;  %v2827_v5 = vld [vmem:[#allocation2 + $0x3c8] sm:$0xff]  ;;  %v2811_v17 = vld [vmem:[#allocation2 + $0x450] sm:$0xff] }
 0x451   : > { %v1626_v9 = vsel %vm605_vm3, %v1599_v0, %v6229_v52  ;;  %3332 = vmatpush1.bf16.msra.mxu1 %v3101_v50  ;;  %1640 = vst [vmem:[#allocation2 + $0x660] sm:$0xf] %v1627_v20  ;;  %2349 = vrot.lane.b32.xlu0 %v5621_v51, %s3932_s22 }
 0x452   : > { %1641 = vst [vmem:[#allocation2 + $0x28] sm:$0xf] %v1626_v9  ;;  %2351 = vrot.lane.b32.xlu1 %v5946_v37, %s3932_s22  ;;  %v2891_v38 = vld [vmem:[#allocation2 + $0x350] sm:$0xff] }
 0x453   : > { %v2892_v24 = vld [vmem:[#allocation2 + $0xf8] sm:$0xff]  ;;  %v1697_v3 = vpop.permute.xlu0 %1696  ;;  %v3067_v57 = vpack.c.bf16 %v2891_v38, %v2875_v60  ;;  %v3035_v60 = vpack.c.bf16 %v2827_v5, %v2811_v17  ;;  %v2830_v17 = vld [vmem:[#allocation2 + $0x348] sm:$0xff] }
 0x454   : > { %v6240_v35 = vpop.permute.xlu1 %1698  ;;  %v3068_v2 = vpack.c.bf16 %v2892_v24, %v2876_v45  ;;  %v1722_v12 = vsel %vm734_vm4, %v6181_v61, %v1697_v3  ;;  %v2828_v61 = vld [vmem:[#allocation2 + $0x6d8] sm:$0xff]  ;;  %v6915_v24 = vld [vmem:[#allocation37_spill] sm:$0xff] }
 0x455   : > { %v1721_v51 = vsel %vm734_vm4, %v1697_v3, %v6240_v35  ;;  %1736 = vst [vmem:[#allocation2 + $0x370] sm:$0xf] %v1722_v12  ;;  %2479 = vrot.lane.b32.xlu0 %v5946_v37, %s3933_s23  ;;  %v3036_v7 = vpack.c.bf16 %v2828_v61, %v2812_v36  ;;  %v2862_v61 = vld [vmem:[#allocation2 + $0x4e0] sm:$0xff]  ;;  %v2861_v36 = vld [vmem:[#allocation2 + $0x408] sm:$0xff] }
 0x456   : > { %1737 = vst [vmem:[#allocation2 + $0x308] sm:$0xf] %v1721_v51  ;;  %2481 = vrot.lane.b32.xlu1 %v5951_v18, %s3933_s23  ;;  %3294 = vmatprep.subr.bf16.mxu0 %v3068_v2  ;;  %v2877_v51 = vld [vmem:[#allocation2 + $0xb8] sm:$0xff] }
 0x457   : > { %3295 = vmatpush1.bf16.msra.mxu0 %v3067_v57  ;;  %v1489_v6 = vpop.permute.xlu0 %1488 }
 0x458   : > { %v6252_v14 = vpop.permute.xlu1 %1490  ;;  %v1514_v40 = vsel %vm734_vm4, %v6205_v42, %v1489_v6  ;;  %3296 = vmatprep.subr.bf16.mxu0 %v3052_v22  ;;  %v2909_v9 = vld [vmem:[#allocation2 + $0x660] sm:$0xff] }
 0x459   : > { %v1513_v37 = vsel %vm734_vm4, %v1489_v6, %v6252_v14  ;;  %v1544_v19 = vrot.slane %v1514_v40, 4  ;;  %2238 = vrot.lane.b32.xlu0 %v5999_v53, %s3933_s23  ;;  %v2910_v49 = vld [vmem:[#allocation2 + $0x28] sm:$0xff] }
 0x45a   : > { %v1545_v27 = vrot.slane %v1513_v37, 4  ;;  %2240 = vrot.lane.b32.xlu1 %v6004_v47, %s3933_s23 }
 0x45b   : > { %1576 = vst [vmem:[#allocation2 + $0x20] sm:$0xf0] %v1544_v19  ;;  %3297 = vmatpush1.bf16.msra.mxu0 %v3051_v48  ;;  %v2631_v42 = vpop.permute.xlu0 %2630  ;;  %v2846_v48 = vld [vmem:[#allocation2 + $0x6a0] sm:$0xff] }
 0x45c   : > { %1577 = vst [vmem:[#allocation2 + $0x208] sm:$0xf0] %v1545_v27  ;;  %v6264_v59 = vpop.permute.xlu1 %2632  ;;  %v2653_v50 = vsel %vm605_vm3, %v6062_v55, %v2631_v42  ;;  %3298 = vmatprep.subr.bf16.mxu0 %v3036_v7  ;;  %v2925_v45 = vld [vmem:[#allocation2 + $0x370] sm:$0xff]  ;;  %v6916_v27 = vld [vmem:[#allocation36_spill] sm:$0xff]  ;;  %v3054_v7 = vpack.c.bf16 %v2862_v61, %v2846_v48 }
 0x45d   : > { %v2652_v0 = vsel %vm605_vm3, %v2631_v42, %v6264_v59  ;;  %v2926_v20 = vld [vmem:[#allocation2 + $0x308] sm:$0xff]  ;;  %2670 = vst [vmem:[#allocation2 + $0xc0] sm:$0xf] %v2653_v50  ;;  %2642 = vrot.lane.b32.xlu0 %v5941_v23, %s3932_s22  ;;  %v3085_v3 = vpack.c.bf16 %v2925_v45, %v2909_v9  ;;  %v2845_v42 = vld [vmem:[#allocation2 + $0x80] sm:$0xff] }
 0x45e   : > { %2671 = vst [vmem:[#allocation2 + $0x138] sm:$0xf] %v2652_v0  ;;  %2772 = vrot.lane.b32.xlu1 %v6915_v24, %s3933_s23  ;;  %v3086_v38 = vpack.c.bf16 %v2926_v20, %v2910_v49  ;;  %v2878_v23 = vld [vmem:[#allocation2 + $0x128] sm:$0xff]  ;;  %v3053_v0 = vpack.c.bf16 %v2861_v36, %v2845_v42 }
 0x45f   : > { %3299 = vmatpush1.bf16.msra.mxu0 %v3035_v60  ;;  %v2761_v55 = vpop.permute.xlu0 %2760 }
 0x460   : > { %3333 = vmatprep.subr.bf16.mxu1 %v3086_v38  ;;  %v6276_v2 = vpop.permute.xlu1 %2762  ;;  %v2780_v57 = vsel %vm734_vm4, %v6074_v29, %v2761_v55  ;;  %v2814_v38 = vld [vmem:[#allocation2 + $0x378] sm:$0xff] }
 0x461   : > { %v2779_v30 = vsel %vm734_vm4, %v2761_v55, %v6276_v2  ;;  %3334 = vmatpush1.bf16.msra.mxu1 %v3085_v3  ;;  %2798 = vst [vmem:[#allocation2 + $0x618] sm:$0xf] %v2780_v57  ;;  %1949 = vrot.lane.b32.xlu0 %v6034_v34, %s3933_s23  ;;  %v3038_v55 = vpack.c.bf16 %v2830_v17, %v2814_v38  ;;  %v2829_v57 = vld [vmem:[#allocation2 + $0x670] sm:$0xff]  ;;  %v6919_v17 = vld [vmem:[#allocation22_spill] sm:$0xff] }
 0x462   : > { %2799 = vst [vmem:[#allocation2 + $0x628] sm:$0xf] %v2779_v30  ;;  %1951 = vrot.lane.b32.xlu1 %v6039_v63, %s3933_s23  ;;  %3873 = vmatmul.mubr.msk.bf16.vlgmr.msra.gmra.mxu0 %vm3149_vm11, %v5978_v11  ;;  %v2893_v29 = vld [vmem:[#allocation2 + $0x20] sm:$0xff] }
 0x463   : > { %v2894_v12 = vld [vmem:[#allocation2 + $0x208] sm:$0xff]  ;;  %v2342_v1 = vpop.permute.xlu0 %2341  ;;  %v3069_v6 = vpack.c.bf16 %v2893_v29, %v2877_v51  ;;  %3398 = vmatprep.mubr.bf16.mxu0 %v6904_v39  ;;  %v2813_v51 = vld [vmem:[#allocation2 + $0x440] sm:$0xff] }
 0x464   : > { %v6290_v22 = vpop.permute.xlu1 %2343  ;;  %v3070_v26 = vpack.c.bf16 %v2894_v12, %v2878_v23  ;;  %v2364_v40 = vsel %vm605_vm3, %v6098_v33, %v2342_v1  ;;  %v3007_v9 = vld [vmem:[#allocation2 + $0xc0] sm:$0xff]  ;;  %v3037_v29 = vpack.c.bf16 %v2829_v57, %v2813_v51 }
 0x465   : > { %v2363_v37 = vsel %vm605_vm3, %v2342_v1, %v6290_v22  ;;  %v2397_v56 = vrot.slane %v2364_v40, 4  ;;  %2353 = vrot.lane.b32.xlu0 %v5951_v18, %s3932_s22  ;;  %v3008_v49 = vld [vmem:[#allocation2 + $0x138] sm:$0xff] }
 0x466   : > { %v2398_v19 = vrot.slane %v2363_v37, 4  ;;  %2483 = vrot.lane.b32.xlu1 %v6916_v27, %s3933_s23  ;;  %3335 = vmatprep.subr.bf16.mxu1 %v3070_v26 }
 0x467   : > { %2429 = vst [vmem:[#allocation2 + $0x540] sm:$0xf0] %v2397_v56  ;;  %3336 = vmatpush1.bf16.msra.mxu1 %v3069_v6  ;;  %v2472_v33 = vpop.permute.xlu0 %2471 }
 0x468   : > { %2430 = vst [vmem:[#allocation2 + $0x698] sm:$0xf0] %v2398_v19  ;;  %v6303_v5 = vpop.permute.xlu1 %2473  ;;  %v2491_v18 = vsel %vm734_vm4, %v6111_v8, %v2472_v33  ;;  %3337 = vmatprep.subr.bf16.mxu1 %v3054_v7  ;;  %v3023_v45 = vld [vmem:[#allocation2 + $0x618] sm:$0xf] }
 0x469   : > { %v2490_v50 = vsel %vm734_vm4, %v2472_v33, %v6303_v5  ;;  %v3024_v20 = vld [vmem:[#allocation2 + $0x628] sm:$0xf]  ;;  %v2525_v24 = vrot.slane %v2491_v18, 4  ;;  %2108 = vrot.lane.b32.xlu0 %v5686_v21, %s3932_s22  ;;  %v3135_v8 = vpack.c.bf16 %v3023_v45, %v3007_v9 }
 0x46a   : > { %v2526_v60 = vrot.slane %v2490_v50, 4  ;;  %2110 = vrot.lane.b32.xlu1 %v5999_v53, %s3932_s22  ;;  %v3136_v3 = vpack.c.bf16 %v3024_v20, %v3008_v49 }
 0x46b   : > { %2557 = vst [vmem:[#allocation2 + $0x248] sm:$0xf0] %v2525_v24  ;;  %3338 = vmatpush1.bf16.msra.mxu1 %v3053_v0  ;;  %v2231_v30 = vpop.permute.xlu0 %2230  ;;  %v3179_v12 = vsel %vm3153_vm10, %v3135_v8, 0 }
 0x46c   : > { %2558 = vst [vmem:[#allocation2 + $0x400] sm:$0xf0] %v2526_v60  ;;  %3876 = vmatprep.subr.msk.bf16.mxu0 %vm3153_vm10, %v3136_v3  ;;  %v6316_v23 = vpop.permute.xlu1 %2232  ;;  %v2250_v21 = vsel %vm734_vm4, %v6136_v46, %v2231_v30  ;;  %3339 = vmatprep.subr.bf16.mxu1 %v3038_v55 }
 0x46d   : > { %v2249_v53 = vsel %vm734_vm4, %v2231_v30, %v6316_v23  ;;  %3369 = vmatpush1.bf16.msra.mxu0 %v3179_v12  ;;  %2268 = vst [vmem:[#allocation2 + $0x540] sm:$0xf] %v2250_v21  ;;  %2242 = vrot.lane.b32.xlu0 %v5301_v28, %s3933_s23  ;;  %v6917_v28 = vld [vmem:[#allocation39_spill] sm:$0xff] }
 0x46e   : > { %2269 = vst [vmem:[#allocation2 + $0x698] sm:$0xf] %v2249_v53  ;;  %1819 = vrot.lane.b32.xlu1 %v5754_v10, %s3932_s22  ;;  %v6920_v12 = vld [vmem:[#allocation31_spill] sm:$0xff] }
 0x46f   : > { %3340 = vmatpush1.bf16.msra.mxu1 %v3037_v29  ;;  %v2635_v1 = vpop.permute.xlu0 %2634  ;;  %v6921_v29 = vld [vmem:[#allocation32_spill] sm:$0xff] }
 0x470   : > { %v6329_v26 = vpop.permute.xlu1 %2636  ;;  %v2651_v46 = vsel %vm605_vm3, %v6264_v59, %v2635_v1 }
 0x471   : > { %v2650_v6 = vsel %vm605_vm3, %v2635_v1, %v6329_v26  ;;  %2672 = vst [vmem:[#allocation2 + $0x70] sm:$0xf] %v2651_v46  ;;  %1821 = vrot.lane.b32.xlu0 %v6034_v34, %s3932_s22 }
 0x472   : > { %2673 = vst [vmem:[#allocation2 + $0x6c0] sm:$0xf] %v2650_v6  ;;  %1953 = vrot.lane.b32.xlu1 %v6917_v28, %s3933_s23  ;;  %3875 = vmatmul.mubr.msk.bf16.vlgmr.msra.gmra.mxu1 %vm3149_vm11, %v5978_v11  ;;  %v2991_v19 = vld [vmem:[#allocation2 + $0x248] sm:$0xff]  ;;  %v6918_v11 = vld [vmem:[#allocation25_spill] sm:$0xff]  ;;  %v6922_v28 = vld [vmem:[#allocation26_spill] sm:$0xff] }
 0x473   : > { %v2765_v10 = vpop.permute.xlu0 %2764  ;;  %v2992_v40 = vld [vmem:[#allocation2 + $0x400] sm:$0xff]  ;;  %3439 = vmatprep.mubr.bf16.mxu1 %v6904_v39 }
 0x474   : > { %v6343_v61 = vpop.permute.xlu1 %2766  ;;  %v2778_v59 = vsel %vm734_vm4, %v6276_v2, %v2765_v10  ;;  %v2975_v56 = vld [vmem:[#allocation2 + $0x540] sm:$0xff] }
 0x475   : > { %v2777_v34 = vsel %vm734_vm4, %v2765_v10, %v6343_v61  ;;  %v2976_v37 = vld [vmem:[#allocation2 + $0x698] sm:$0xff]  ;;  %2800 = vst [vmem:[#allocation2 + $0x2e0] sm:$0xf] %v2778_v59  ;;  %1610 = vrot.lane.b32.xlu0 %v6912_v44, %s3932_s22  ;;  %v3119_v48 = vpack.c.bf16 %v2991_v19, %v2975_v56 }
 0x476   : > { %2801 = vst [vmem:[#allocation2 + $0x210] sm:$0xf] %v2777_v34  ;;  %1612 = vrot.lane.b32.xlu1 %v6918_v11, %s3932_s22  ;;  %v3120_v27 = vpack.c.bf16 %v2992_v40, %v2976_v37 }
 0x477   : > { %v1942_v36 = vpop.permute.xlu0 %1941 }
 0x478   : > { %3370 = vmatprep.subr.bf16.mxu0 %v3120_v27  ;;  %v6356_v2 = vpop.permute.xlu1 %1943  ;;  %v1961_v7 = vsel %vm734_vm4, %v6160_v32, %v1942_v36  ;;  %v3009_v9 = vld [vmem:[#allocation2 + $0x70] sm:$0xff] }
 0x479   : > { %v1960_v33 = vsel %vm734_vm4, %v1942_v36, %v6356_v2  ;;  %3371 = vmatpush1.bf16.msra.mxu0 %v3119_v48  ;;  %v1995_v42 = vrot.slane %v1961_v7, 4  ;;  %1708 = vrot.lane.b32.xlu0 %v6918_v11, %s3933_s23  ;;  %v3010_v50 = vld [vmem:[#allocation2 + $0x6c0] sm:$0xff]  ;;  %v6923_v27 = vld [vmem:[#allocation33_spill] sm:$0xff] }
 0x47a   : > { %v1996_v44 = vrot.slane %v1960_v33, 4  ;;  %1710 = vrot.lane.b32.xlu1 %v6919_v17, %s3933_s23 }
 0x47b   : > { %2027 = vst [vmem:[#allocation2 + $0x6a8] sm:$0xf0] %v1995_v42  ;;  %v2346_v49 = vpop.permute.xlu0 %2345 }
 0x47c   : > { %2028 = vst [vmem:[#allocation2 + $0x4c8] sm:$0xf0] %v1996_v44  ;;  %v6368_v18 = vpop.permute.xlu1 %2347  ;;  %v2362_v32 = vsel %vm605_vm3, %v6290_v22, %v2346_v49  ;;  %v3025_v45 = vld [vmem:[#allocation2 + $0x2e0] sm:$0xf] }
 0x47d   : > { %v2361_v0 = vsel %vm605_vm3, %v2346_v49, %v6368_v18  ;;  %v3026_v20 = vld [vmem:[#allocation2 + $0x210] sm:$0xf]  ;;  %v2399_v24 = vrot.slane %v2362_v32, 4  ;;  %2112 = vrot.lane.b32.xlu0 %v6004_v47, %s3932_s22  ;;  %v3137_v3 = vpack.c.bf16 %v3025_v45, %v3009_v9 }
 0x47e   : > { %v2400_v60 = vrot.slane %v2361_v0, 4  ;;  %1370 = vrot.lane.b32.xlu1 %v6914_v16, %s3932_s22  ;;  %v3138_v38 = vpack.c.bf16 %v3026_v20, %v3010_v50 }
 0x47f   : > { %2431 = vst [vmem:[#allocation2 + $0x458] sm:$0xf0] %v2399_v24  ;;  %v2476_v22 = vpop.permute.xlu0 %2475  ;;  %v3185_v55 = vsel %vm3153_vm10, %v3137_v3, 0 }
 0x480   : > { %2432 = vst [vmem:[#allocation2 + $0x590] sm:$0xf0] %v2400_v60  ;;  %3878 = vmatprep.subr.msk.bf16.mxu1 %vm3153_vm10, %v3138_v38  ;;  %v6381_v8 = vpop.permute.xlu1 %2477  ;;  %v2489_v57 = vsel %vm734_vm4, %v6303_v5, %v2476_v22 }
 0x481   : > { %v2488_v47 = vsel %vm734_vm4, %v2476_v22, %v6381_v8  ;;  %3410 = vmatpush1.bf16.msra.mxu1 %v3185_v55  ;;  %v2527_v16 = vrot.slane %v2489_v57, 4  ;;  %1372 = vrot.lane.b32.xlu0 %v6920_v12, %s3932_s22 }
 0x482   : > { %v2528_v30 = vrot.slane %v2488_v47, 4  ;;  %1500 = vrot.lane.b32.xlu1 %v6920_v12, %s3933_s23  ;;  %v2943_v37 = vld [vmem:[#allocation2 + $0x6a8] sm:$0xff] }
 0x483   : > { %2559 = vst [vmem:[#allocation2 + $0x2f8] sm:$0xf0] %v2527_v16  ;;  %v2101_v21 = vpop.permute.xlu0 %2100  ;;  %v2944_v40 = vld [vmem:[#allocation2 + $0x4c8] sm:$0xff] }
 0x484   : > { %2560 = vst [vmem:[#allocation2 + $0x3e8] sm:$0xf0] %v2528_v30  ;;  %v6394_v53 = vpop.permute.xlu1 %2102  ;;  %v2123_v5 = vsel %vm605_vm3, %v6193_v15, %v2101_v21 }
 0x485   : > { %v2122_v51 = vsel %vm605_vm3, %v2101_v21, %v6394_v53  ;;  %2140 = vst [vmem:[#allocation2 + $0x570] sm:$0xf] %v2123_v5  ;;  %1502 = vrot.lane.b32.xlu0 %v6921_v29, %s3933_s23  ;;  %v6924_v5 = vld [vmem:[#allocation34_spill] sm:$0xff] }
 0x486   : > { %2141 = vst [vmem:[#allocation2 + $0x1d8] sm:$0xf] %v2122_v51  ;;  %1823 = vrot.lane.b32.xlu1 %v6039_v63, %s3932_s22 }
 0x487   : > { %v2235_v1 = vpop.permute.xlu0 %2234 }
 0x488   : > { %v6406_v46 = vpop.permute.xlu1 %2236  ;;  %v2248_v6 = vsel %vm734_vm4, %v6316_v23, %v2235_v1 }
 0x489   : > { %v2247_v15 = vsel %vm734_vm4, %v2235_v1, %v6406_v46  ;;  %2270 = vst [vmem:[#allocation2 + $0x458] sm:$0xf] %v2248_v6  ;;  %1614 = vrot.lane.b32.xlu0 %v6919_v17, %s3932_s22 }
 0x48a   : > { %2271 = vst [vmem:[#allocation2 + $0x590] sm:$0xf] %v2247_v15  ;;  %1712 = vrot.lane.b32.xlu1 %v6922_v28, %s3933_s23  ;;  %v2993_v32 = vld [vmem:[#allocation2 + $0x2f8] sm:$0xff] }
 0x48b   : > { %v1812_v63 = vpop.permute.xlu0 %1811  ;;  %v2994_v42 = vld [vmem:[#allocation2 + $0x3e8] sm:$0xff] }
 0x48c   : > { %v6418_v10 = vpop.permute.xlu1 %1813  ;;  %v1834_v23 = vsel %vm605_vm3, %v6217_v25, %v1812_v63  ;;  %v2959_v56 = vld [vmem:[#allocation2 + $0x570] sm:$0xff]  ;;  %v3143_v25 = vld [vmem:[%s6796_s2] sm:$0xf] }
 0x48d   : > { %v1833_v59 = vsel %vm605_vm3, %v1812_v63, %v6418_v10  ;;  %v2960_v34 = vld [vmem:[#allocation2 + $0x1d8] sm:$0xff]  ;;  %v1867_v19 = vrot.slane %v1834_v23, 4  ;;  %1374 = vrot.lane.b32.xlu0 %v6921_v29, %s3932_s22  ;;  %v3103_v36 = vpack.c.bf16 %v2959_v56, %v2943_v37 }
 0x48e   : > { %v1868_v11 = vrot.slane %v1833_v59, 4  ;;  %1504 = vrot.lane.b32.xlu1 %v6923_v27, %s3933_s23  ;;  %v3104_v48 = vpack.c.bf16 %v2960_v34, %v2944_v40 }
 0x48f   : > { %1899 = vst [vmem:[#allocation2 + $0x310] sm:$0xf0] %v1867_v19  ;;  %v1946_v7 = vpop.permute.xlu0 %1945 }
 0x490   : > { %1900 = vst [vmem:[#allocation2 + $0x4c0] sm:$0xf0] %v1868_v11  ;;  %3372 = vmatprep.subr.bf16.mxu0 %v3104_v48  ;;  %v6433_v33 = vpop.permute.xlu1 %1947  ;;  %v1959_v44 = vsel %vm734_vm4, %v6356_v2, %v1946_v7  ;;  %v2977_v50 = vld [vmem:[#allocation2 + $0x458] sm:$0xff] }
 0x491   : > { %v1958_v17 = vsel %vm734_vm4, %v1946_v7, %v6433_v33  ;;  %3373 = vmatpush1.bf16.msra.mxu0 %v3103_v36  ;;  %v2978_v49 = vld [vmem:[#allocation2 + $0x590] sm:$0xff]  ;;  %v1997_v0 = vrot.slane %v1959_v44, 4  ;;  %3146 = vperm.xlu0 %3917, %v3143_v25   ;;  %v3121_v45 = vpack.c.bf16 %v2993_v32, %v2977_v50 }
 0x492   : > { %v1998_v20 = vrot.slane %v1958_v17, 4  ;;  %v3122_v9 = vpack.c.bf16 %v2994_v42, %v2978_v49 }
 0x493   : > { %2029 = vst [vmem:[#allocation2 + $0x360] sm:$0xf0] %v1997_v0  ;;  %v1603_v24 = vpop.permute.xlu0 %1602 }
 0x494   : > { %2030 = vst [vmem:[#allocation2 + $0xa8] sm:$0xf0] %v1998_v20  ;;  %3411 = vmatprep.subr.bf16.mxu1 %v3122_v9  ;;  %v1605_v60 = vpop.permute.xlu1 %1604  ;;  %v1625_v2 = vsel %vm605_vm3, %v6229_v52, %v1603_v24 }
 0x495   : > { %v1624_v38 = vsel %vm605_vm3, %v1603_v24, %v1605_v60  ;;  %3412 = vmatpush1.bf16.msra.mxu1 %v3121_v45  ;;  %1642 = vst [vmem:[#allocation2 + $0x5f0] sm:$0xf] %v1625_v2  ;;  %v2864_v45 = vld [vmem:[#allocation2 + $0x68] sm:$0xff] }
 0x496   : > { %1643 = vst [vmem:[#allocation2 + $0x4f8] sm:$0xf] %v1624_v38 }
 0x497   : > { %v1701_v3 = vpop.permute.xlu0 %1700 }
 0x498   : > { %v6446_v22 = vpop.permute.xlu1 %1702  ;;  %v1720_v55 = vsel %vm734_vm4, %v6240_v35, %v1701_v3 }
 0x499   : > { %v1719_v57 = vsel %vm734_vm4, %v1701_v3, %v6446_v22  ;;  %1738 = vst [vmem:[#allocation2 + $0x310] sm:$0xf] %v1720_v55 }
 0x49a   : > { %1739 = vst [vmem:[#allocation2 + $0x4c0] sm:$0xf] %v1719_v57  ;;  %v2945_v11 = vld [vmem:[#allocation2 + $0x360] sm:$0xff] }
 0x49b   : > { %v2105_v52 = vpop.permute.xlu0 %2104  ;;  %v2946_v34 = vld [vmem:[#allocation2 + $0xa8] sm:$0xff] }
 0x49c   : > { %v6454_v47 = vpop.permute.xlu1 %2106  ;;  %v2121_v16 = vsel %vm605_vm3, %v6394_v53, %v2105_v52  ;;  %v2911_v53 = vld [vmem:[#allocation2 + $0x5f0] sm:$0xff] }
 0x49d   : > { %v2120_v30 = vsel %vm605_vm3, %v2105_v52, %v6454_v47  ;;  %2142 = vst [vmem:[#allocation2 + $0x5e0] sm:$0xf] %v2121_v16  ;;  %v2912_v21 = vld [vmem:[#allocation2 + $0x4f8] sm:$0xff] }
 0x49e   : > { %2143 = vst [vmem:[#allocation2 + $0x6e0] sm:$0xf] %v2120_v30  ;;  %v2848_v30 = vld [vmem:[#allocation2 + $0x5c0] sm:$0xff] }
 0x49f   : > { %v1363_v35 = vpop.permute.xlu0 %1362 }
 0x4a0   : > { %v6462_v12 = vpop.permute.xlu1 %1364  ;;  %v1385_v51 = vsel %vm605_vm3, %v6924_v5, %v1363_v35  ;;  %v2927_v6 = vld [vmem:[#allocation2 + $0x310] sm:$0xff]  ;;  %v2832_v5 = vld [vmem:[#allocation2 + $0xa0] sm:$0xff] }
 0x4a1   : > { %v1384_v29 = vsel %vm605_vm3, %v1363_v35, %v6462_v12  ;;  %v2928_v1 = vld [vmem:[#allocation2 + $0x4c0] sm:$0xff]  ;;  %v1418_v15 = vrot.slane %v1385_v51, 4  ;;  %v3087_v40 = vpack.c.bf16 %v2927_v6, %v2911_v53  ;;  %v3056_v35 = vpack.c.bf16 %v2864_v45, %v2848_v30 }
 0x4a2   : > { %v1419_v28 = vrot.slane %v1384_v29, 4  ;;  %v3088_v63 = vpack.c.bf16 %v2928_v1, %v2912_v21  ;;  %v2863_v21 = vld [vmem:[#allocation2 + $0x358] sm:$0xff]  ;;  %v2847_v1 = vld [vmem:[#allocation2 + $0x90] sm:$0xff] }
 0x4a3   : > { %1450 = vst [vmem:[#allocation2 + $0x648] sm:$0xf0] %v1418_v15  ;;  %v1493_v23 = vpop.permute.xlu0 %1492  ;;  %v3055_v6 = vpack.c.bf16 %v2863_v21, %v2847_v1  ;;  %v2816_v15 = vld [vmem:[#allocation2 + $0x510] sm:$0xff] }
 0x4a4   : > { %1451 = vst [vmem:[#allocation2 + $0x190] sm:$0xf0] %v1419_v28  ;;  %3374 = vmatprep.subr.bf16.mxu0 %v3088_v63  ;;  %v6470_v59 = vpop.permute.xlu1 %1494  ;;  %v1512_v37 = vsel %vm734_vm4, %v6252_v14, %v1493_v23  ;;  %v2961_v27 = vld [vmem:[#allocation2 + $0x5e0] sm:$0xff]  ;;  %v2850_v21 = vld [vmem:[#allocation2 + $0x4f0] sm:$0xff] }
 0x4a5   : > { %v1511_v56 = vsel %vm734_vm4, %v1493_v23, %v6470_v59  ;;  %3375 = vmatpush1.bf16.msra.mxu0 %v3087_v40  ;;  %v2962_v19 = vld [vmem:[#allocation2 + $0x6e0] sm:$0xff]  ;;  %v1546_v48 = vrot.slane %v1512_v37, 4  ;;  %v3105_v7 = vpack.c.bf16 %v2961_v27, %v2945_v11  ;;  %v3040_v40 = vpack.c.bf16 %v2832_v5, %v2816_v15  ;;  %v2831_v23 = vld [vmem:[#allocation2 + $0x118] sm:$0xff] }
 0x4a6   : > { %v1547_v36 = vrot.slane %v1511_v56, 4  ;;  %v3106_v25 = vpack.c.bf16 %v2962_v19, %v2946_v34  ;;  %v2815_v56 = vld [vmem:[#allocation2 + $0x108] sm:$0xff] }
 0x4a7   : > { %1578 = vst [vmem:[#allocation2 + $0xd0] sm:$0xf0] %v1546_v48  ;;  %v1816_v42 = vpop.permute.xlu0 %1815  ;;  %v3039_v27 = vpack.c.bf16 %v2831_v23, %v2815_v56 }
 0x4a8   : > { %1579 = vst [vmem:[#allocation2 + $0x1b8] sm:$0xf0] %v1547_v36  ;;  %3413 = vmatprep.subr.bf16.mxu1 %v3106_v25  ;;  %v6478_v44 = vpop.permute.xlu1 %1817  ;;  %v1832_v14 = vsel %vm605_vm3, %v6418_v10, %v1816_v42 }
 0x4a9   : > { %v1831_v17 = vsel %vm605_vm3, %v1816_v42, %v6478_v44  ;;  %3414 = vmatpush1.bf16.msra.mxu1 %v3105_v7  ;;  %v1869_v49 = vrot.slane %v1832_v14, 4 }
 0x4aa   : > { %v1870_v50 = vrot.slane %v1831_v17, 4  ;;  %v2879_v2 = vld [vmem:[#allocation2 + $0x648] sm:$0xff] }
 0x4ab   : > { %1901 = vst [vmem:[#allocation2 + $0x2a0] sm:$0xf0] %v1869_v49  ;;  %v1607_v32 = vpop.permute.xlu0 %1606  ;;  %v2880_v10 = vld [vmem:[#allocation2 + $0x190] sm:$0xff] }
 0x4ac   : > { %1902 = vst [vmem:[#allocation2 + $0xe8] sm:$0xf0] %v1870_v50  ;;  %v6486_v0 = vpop.permute.xlu1 %1608  ;;  %v1623_v20 = vsel %vm605_vm3, %v1605_v60, %v1607_v32 }
 0x4ad   : > { %v1622_v9 = vsel %vm605_vm3, %v1607_v32, %v6486_v0  ;;  %1644 = vst [vmem:[#allocation2 + $0x288] sm:$0xf] %v1623_v20  ;;  %v6528_v20 = vld [vmem:[%s6795_s1] sm:$0x3] }
 0x4ae   : > { %1645 = vst [vmem:[#allocation2 + $0x1b0] sm:$0xf] %v1622_v9  ;;  %v2895_v38 = vld [vmem:[#allocation2 + $0xd0] sm:$0xff] }
 0x4af   : > { %v2896_v24 = vld [vmem:[#allocation2 + $0x1b8] sm:$0xff]  ;;  %v1705_v3 = vpop.permute.xlu0 %1704  ;;  %v3071_v52 = vpack.c.bf16 %v2895_v38, %v2879_v2  ;;  %v2866_v2 = vld [vmem:[#allocation2 + $0x640] sm:$0xff] }
 0x4b0   : > { %v6493_v55 = vpop.permute.xlu1 %1706  ;;  %v3072_v57 = vpack.c.bf16 %v2896_v24, %v2880_v10  ;;  %v1718_v60 = vsel %vm734_vm4, %v6446_v22, %v1705_v3  ;;  %v3058_v1 = vpack.c.bf16 %v2866_v2, %v2850_v21 }
 0x4b1   : > { %v1717_v16 = vsel %vm734_vm4, %v1705_v3, %v6493_v55  ;;  %1740 = vst [vmem:[#allocation2 + $0x2a0] sm:$0xf] %v1718_v60 }
 0x4b2   : > { %1741 = vst [vmem:[#allocation2 + $0xe8] sm:$0xf] %v1717_v16  ;;  %3376 = vmatprep.subr.bf16.mxu0 %v3072_v57 }
 0x4b3   : > { %3377 = vmatpush1.bf16.msra.mxu0 %v3071_v52  ;;  %v1367_v51 = vpop.permute.xlu0 %1366 }
 0x4b4   : > { %3378 = vmatprep.subr.bf16.mxu0 %v3056_v35  ;;  %v6501_v29 = vpop.permute.xlu1 %1368  ;;  %v1383_v22 = vsel %vm605_vm3, %v6462_v12, %v1367_v51  ;;  %v2913_v36 = vld [vmem:[#allocation2 + $0x288] sm:$0xff] }
 0x4b5   : > { %v1382_v53 = vsel %vm605_vm3, %v1367_v51, %v6501_v29  ;;  %v1420_v28 = vrot.slane %v1383_v22, 4  ;;  %v2914_v19 = vld [vmem:[#allocation2 + $0x1b0] sm:$0xff]  ;;  %v2865_v22 = vld [vmem:[#allocation2 + $0x188] sm:$0xff] }
 0x4b6   : > { %v1421_v63 = vrot.slane %v1382_v53, 4  ;;  %v2834_v53 = vld [vmem:[#allocation2 + $0x260] sm:$0xff] }
 0x4b7   : > { %3379 = vmatpush1.bf16.msra.mxu0 %v3055_v6  ;;  %1452 = vst [vmem:[#allocation2 + $0x88] sm:$0xf0] %v1420_v28  ;;  %v1497_v34 = vpop.permute.xlu0 %1496 }
 0x4b8   : > { %1453 = vst [vmem:[#allocation2 + $0x148] sm:$0xf0] %v1421_v63  ;;  %3380 = vmatprep.subr.bf16.mxu0 %v3040_v40  ;;  %v6509_v37 = vpop.permute.xlu1 %1498  ;;  %v1510_v12 = vsel %vm734_vm4, %v6470_v59, %v1497_v34  ;;  %v2929_v25 = vld [vmem:[#allocation2 + $0x2a0] sm:$0xff]  ;;  %v2818_v63 = vld [vmem:[#allocation2 + $0x318] sm:$0xff] }
 0x4b9   : > { %v1509_v11 = vsel %vm734_vm4, %v1497_v34, %v6509_v37  ;;  %v2930_v48 = vld [vmem:[#allocation2 + $0xe8] sm:$0xff]  ;;  %v1548_v7 = vrot.slane %v1510_v12, 4  ;;  %v3089_v17 = vpack.c.bf16 %v2929_v25, %v2913_v36 }
 0x4ba   : > { %v1549_v42 = vrot.slane %v1509_v11, 4  ;;  %v3090_v14 = vpack.c.bf16 %v2930_v48, %v2914_v19  ;;  %v3042_v19 = vpack.c.bf16 %v2834_v53, %v2818_v63 }
 0x4bb   : > { %3381 = vmatpush1.bf16.msra.mxu0 %v3039_v27  ;;  %1580 = vst [vmem:[#allocation2 + $0x1e0] sm:$0xf0] %v1548_v7  ;;  %v2639_v49 = vpop.permute.xlu0 %2638 }
 0x4bc   : > { %1581 = vst [vmem:[#allocation2 + $0x180] sm:$0xf0] %v1549_v42  ;;  %3415 = vmatprep.subr.bf16.mxu1 %v3090_v14  ;;  %v6517_v50 = vpop.permute.xlu1 %2640  ;;  %v2649_v59 = vsel %vm605_vm3, %v6329_v26, %v2639_v49  ;;  %v2833_v14 = vld [vmem:[#allocation2 + $0x1a0] sm:$0xff] }
 0x4bd   : > { %v2648_v32 = vsel %vm605_vm3, %v2639_v49, %v6517_v50  ;;  %3416 = vmatpush1.bf16.msra.mxu1 %v3089_v17  ;;  %2674 = vst [vmem:[#allocation2 + $0xc8] sm:$0xf] %v2649_v59 }
 0x4be   : > { %2675 = vst [vmem:[#allocation2 + $0x1c8] sm:$0xf] %v2648_v32  ;;  %3877 = vmatmul.mubr.msk.bf16.vlgmr.msra.gmra.mxu0 %vm3149_vm11, %v6528_v20  ;;  %v2881_v3 = vld [vmem:[#allocation2 + $0x88] sm:$0xff]  ;;  %v2817_v32 = vld [vmem:[#allocation2 + $0x490] sm:$0xff] }
 0x4bf   : > { %3480 = vmatprep.mubr.bf16.mxu0 %v6904_v39  ;;  %v2769_v9 = vpop.permute.xlu0 %2768  ;;  %v2882_v24 = vld [vmem:[#allocation2 + $0x148] sm:$0xff] }
 0x4c0   : > { %v6533_v10 = vpop.permute.xlu1 %2770  ;;  %v2776_v26 = vsel %vm734_vm4, %v6343_v61, %v2769_v9 }
 0x4c1   : > { %v2775_v45 = vsel %vm734_vm4, %v2769_v9, %v6533_v10  ;;  %2802 = vst [vmem:[#allocation2 + $0x3e0] sm:$0xf] %v2776_v26 }
 0x4c2   : > { %2803 = vst [vmem:[#allocation2 + $0x6e8] sm:$0xf] %v2775_v45  ;;  %v2897_v57 = vld [vmem:[#allocation2 + $0x1e0] sm:$0xff]  ;;  %v3041_v45 = vpack.c.bf16 %v2833_v14, %v2817_v32 }
 0x4c3   : > { %v2898_v38 = vld [vmem:[#allocation2 + $0x180] sm:$0xff]  ;;  %v2350_v52 = vpop.permute.xlu0 %2349  ;;  %v3073_v30 = vpack.c.bf16 %v2897_v57, %v2881_v3  ;;  %v6925_v3 = vld [vmem:[#allocation41_spill] sm:$0xff] }
 0x4c4   : > { %v6541_v60 = vpop.permute.xlu1 %2351  ;;  %v3074_v16 = vpack.c.bf16 %v2898_v38, %v2882_v24  ;;  %v2360_v61 = vsel %vm605_vm3, %v6368_v18, %v2350_v52  ;;  %v2849_v18 = vld [vmem:[#allocation2 + $0x5d0] sm:$0xff]  ;;  %v3011_v11 = vld [vmem:[#allocation2 + $0xc8] sm:$0xff] }
 0x4c5   : > { %v2359_v35 = vsel %vm605_vm3, %v2350_v52, %v6541_v60  ;;  %v2401_v5 = vrot.slane %v2360_v61, 4  ;;  %v3012_v40 = vld [vmem:[#allocation2 + $0x1c8] sm:$0xff]  ;;  %v3057_v56 = vpack.c.bf16 %v2865_v22, %v2849_v18 }
 0x4c6   : > { %v2402_v51 = vrot.slane %v2359_v35, 4  ;;  %3417 = vmatprep.subr.bf16.mxu1 %v3074_v16  ;;  %v6549_v6 = vpop.f32.mrf.mxu0  ;;  %v6926_v16 = vld [vmem:[#allocation42_spill] sm:$0xff] }
 0x4c7   : > { %3418 = vmatpush1.bf16.msra.mxu1 %v3073_v30  ;;  %2433 = vst [vmem:[#allocation2 + $0x30] sm:$0xf0] %v2401_v5  ;;  %v2480_v15 = vpop.permute.xlu0 %2479 }
 0x4c8   : > { %2434 = vst [vmem:[#allocation2 + $0x608] sm:$0xf0] %v2402_v51  ;;  %3419 = vmatprep.subr.bf16.mxu1 %v3058_v1  ;;  %v6551_v28 = vpop.permute.xlu1 %2481  ;;  %v2487_v23 = vsel %vm734_vm4, %v6381_v8, %v2480_v15  ;;  %v3027_v27 = vld [vmem:[#allocation2 + $0x3e0] sm:$0xf]  ;;  %v6559_v48 = vpop.f32.mrf.mxu0 }
 0x4c9   : > { %v2486_v34 = vsel %vm734_vm4, %v2480_v15, %v6551_v28  ;;  %v3028_v12 = vld [vmem:[#allocation2 + $0x6e8] sm:$0xf]  ;;  %v2529_v36 = vrot.slane %v2487_v23, 4  ;;  %v3139_v42 = vpack.c.bf16 %v3027_v27, %v3011_v11 }
 0x4ca   : > { %v2530_v25 = vrot.slane %v2486_v34, 4  ;;  %v3140_v7 = vpack.c.bf16 %v3028_v12, %v3012_v40  ;;  %v3240_v17 = vpop.f32.mrf.mxu0  ;;  %v6928_v11 = vld [vmem:[#allocation44_spill] sm:$0xff] }
 0x4cb   : > { %3420 = vmatpush1.bf16.msra.mxu1 %v3057_v56  ;;  %2561 = vst [vmem:[#allocation2 + $0x168] sm:$0xf0] %v2529_v36  ;;  %v2239_v8 = vpop.permute.xlu0 %2238  ;;  %v3191_v59 = vsel %vm3153_vm10, %v3139_v42, 0  ;;  %v6927_v56 = vld [vmem:[#allocation43_spill] sm:$0xff] }
 0x4cc   : > { %2562 = vst [vmem:[#allocation2 + $0x530] sm:$0xf0] %v2530_v25  ;;  %3421 = vmatprep.subr.bf16.mxu1 %v3042_v19  ;;  %3880 = vmatprep.subr.msk.bf16.mxu0 %vm3153_vm10, %v3140_v7  ;;  %v6562_v49 = vpop.permute.xlu1 %2240  ;;  %v2246_v9 = vsel %vm734_vm4, %v6406_v46, %v2239_v8  ;;  %v3241_v24 = vpop.f32.mrf.mxu0 }
 0x4cd   : > { %v2245_v26 = vsel %vm734_vm4, %v2239_v8, %v6562_v49  ;;  %3451 = vmatpush1.bf16.msra.mxu0 %v3191_v59  ;;  %2272 = vst [vmem:[#allocation2 + $0x30] sm:$0xf] %v2246_v9 }
 0x4ce   : > { %2273 = vst [vmem:[#allocation2 + $0x608] sm:$0xf] %v2245_v26 }
 0x4cf   : > { %3422 = vmatpush1.bf16.msra.mxu1 %v3041_v45  ;;  %v2643_v2 = vpop.permute.xlu0 %2642 }
 0x4d0   : > { %v2773_v38 = vpop.permute.xlu1 %2772  ;;  %v2646_v57 = vsel %vm605_vm3, %v2643_v2, %v6925_v3  ;;  %v2647_v46 = vsel %vm605_vm3, %v6517_v50, %v2643_v2 }
 0x4d1   : > { %v2774_v52 = vsel %vm734_vm4, %v6533_v10, %v2773_v38  ;;  %v2789_v30 = vsel %vm734_vm4, %v2773_v38, %v6926_v16  ;;  %2676 = vst [vmem:[#allocation2 + $0x4d0] sm:$0xf] %v2647_v46  ;;  %2677 = vst [vmem:[#allocation2 + $0x2a8] sm:$0xf] %v2646_v57  ;;  %v6929_v46 = vld [vmem:[#allocation45_spill] sm:$0xff] }
 0x4d2   : > { %2804 = vst [vmem:[#allocation2 + $0x1f0] sm:$0xf] %v2774_v52  ;;  %2805 = vst [vmem:[#allocation2 + $0x460] sm:$0xf] %v2789_v30  ;;  %3879 = vmatmul.mubr.msk.bf16.vlgmr.msra.gmra.mxu1 %vm3149_vm11, %v6528_v20  ;;  %v6585_v61 = vpop.f32.mrf.mxu1  ;;  %v2995_v22 = vld [vmem:[#allocation2 + $0x168] sm:$0xff] }
 0x4d3   : > { %3521 = vmatprep.mubr.bf16.mxu1 %v6904_v39  ;;  %v1950_v50 = vpop.permute.xlu0 %1949  ;;  %v2996_v21 = vld [vmem:[#allocation2 + $0x530] sm:$0xff] }
 0x4d4   : > { %v1952_v35 = vpop.permute.xlu1 %1951  ;;  %v1957_v10 = vsel %vm734_vm4, %v6433_v33, %v1950_v50  ;;  %v2979_v1 = vld [vmem:[#allocation2 + $0x30] sm:$0xff]  ;;  %v6593_v53 = vpop.f32.mrf.mxu1 }
 0x4d5   : > { %v1956_v5 = vsel %vm734_vm4, %v1950_v50, %v1952_v35  ;;  %v2980_v51 = vld [vmem:[#allocation2 + $0x608] sm:$0xff]  ;;  %v1999_v15 = vrot.slane %v1957_v10, 4  ;;  %v3123_v40 = vpack.c.bf16 %v2995_v22, %v2979_v1 }
 0x4d6   : > { %v2000_v18 = vrot.slane %v1956_v5, 4  ;;  %v3124_v63 = vpack.c.bf16 %v2996_v21, %v2980_v51  ;;  %v3281_v39 = vpop.f32.mrf.mxu1 }
 0x4d7   : > { %2031 = vst [vmem:[#allocation2 + $0x690] sm:$0xf0] %v1999_v15  ;;  %v2354_v23 = vpop.permute.xlu0 %2353 }
 0x4d8   : > { %2032 = vst [vmem:[#allocation2 + $0x658] sm:$0xf0] %v2000_v18  ;;  %3452 = vmatprep.subr.bf16.mxu0 %v3124_v63  ;;  %v2484_v34 = vpop.permute.xlu1 %2483  ;;  %v2357_v33 = vsel %vm605_vm3, %v2354_v23, %v6927_v56  ;;  %v2358_v19 = vsel %vm605_vm3, %v6541_v60, %v2354_v23  ;;  %v3014_v36 = vld [vmem:[#allocation2 + $0x2a8] sm:$0xff]  ;;  %v3013_v7 = vld [vmem:[#allocation2 + $0x4d0] sm:$0xff]  ;;  %v3282_v42 = vpop.f32.mrf.mxu1 }
 0x4d9   : > { %v2485_v12 = vsel %vm734_vm4, %v6551_v28, %v2484_v34  ;;  %v2500_v27 = vsel %vm734_vm4, %v2484_v34, %v6928_v11  ;;  %3453 = vmatpush1.bf16.msra.mxu0 %v3123_v40  ;;  %v3030_v25 = vld [vmem:[#allocation2 + $0x460] sm:$0xf]  ;;  %v2403_v14 = vrot.slane %v2358_v19, 4  ;;  %v2404_v17 = vrot.slane %v2357_v33, 4  ;;  %v3029_v32 = vld [vmem:[#allocation2 + $0x1f0] sm:$0xf] }
 0x4da   : > { %v2531_v8 = vrot.slane %v2485_v12, 4  ;;  %v2532_v59 = vrot.slane %v2500_v27, 4  ;;  %v3142_v9 = vpack.c.bf16 %v3030_v25, %v3014_v36  ;;  %v3141_v60 = vpack.c.bf16 %v3029_v32, %v3013_v7 }
 0x4db   : > { %2435 = vst [vmem:[#allocation2 + $0x10] sm:$0xf0] %v2403_v14  ;;  %2436 = vst [vmem:[#allocation2 + $0x4a8] sm:$0xf0] %v2404_v17  ;;  %v2109_v28 = vpop.permute.xlu0 %2108 }
 0x4dc   : > { %2563 = vst [vmem:[#allocation2 + $0x38] sm:$0xf0] %v2531_v8  ;;  %2564 = vst [vmem:[#allocation2 + $0x1d0] sm:$0xf0] %v2532_v59  ;;  %v2111_v26 = vpop.permute.xlu1 %2110  ;;  %v2119_v45 = vsel %vm605_vm3, %v6454_v47, %v2109_v28  ;;  %3882 = vmatprep.subr.msk.bf16.mxu1 %vm3153_vm10, %v3142_v9  ;;  %v3197_v2 = vsel %vm3153_vm10, %v3141_v60, 0 }
 0x4dd   : > { %v2118_v24 = vsel %vm605_vm3, %v2109_v28, %v2111_v26  ;;  %2144 = vst [vmem:[#allocation2 + $0x78] sm:$0xf] %v2119_v45  ;;  %3492 = vmatpush1.bf16.msra.mxu1 %v3197_v2 }
 0x4de   : > { %2145 = vst [vmem:[#allocation2 + $0x580] sm:$0xf] %v2118_v24  ;;  %v2947_v63 = vld [vmem:[#allocation2 + $0x690] sm:$0xff] }
 0x4df   : > { %v2243_v38 = vpop.permute.xlu0 %2242  ;;  %v2948_v5 = vld [vmem:[#allocation2 + $0x658] sm:$0xff] }
 0x4e0   : > { %v1820_v3 = vpop.permute.xlu1 %1819  ;;  %v2244_v57 = vsel %vm734_vm4, %v6562_v49, %v2243_v38  ;;  %v2259_v47 = vsel %vm734_vm4, %v2243_v38, %v6929_v46 }
 0x4e1   : > { %v1830_v52 = vsel %vm605_vm3, %v6478_v44, %v1820_v3  ;;  %2274 = vst [vmem:[#allocation2 + $0x10] sm:$0xf] %v2244_v57  ;;  %2275 = vst [vmem:[#allocation2 + $0x4a8] sm:$0xf] %v2259_v47 }
 0x4e2   : > { %v1871_v16 = vrot.slane %v1830_v52, 4 }
 0x4e3   : > { %v6623_v30 = vpop.permute.xlu0 %1821  ;;  %v2997_v19 = vld [vmem:[#allocation2 + $0x38] sm:$0xff] }
 0x4e4   : > { %1903 = vst [vmem:[#allocation2 + $0x100] sm:$0xf0] %v1871_v16  ;;  %v1954_v50 = vpop.permute.xlu1 %1953  ;;  %v1829_v21 = vsel %vm605_vm3, %v1820_v3, %v6623_v30  ;;  %v2963_v51 = vld [vmem:[#allocation2 + $0x78] sm:$0xff] }
 0x4e5   : > { %v1955_v49 = vsel %vm734_vm4, %v1952_v35, %v1954_v50  ;;  %v1970_v10 = vsel %vm734_vm4, %v1954_v50, %v5746_v58  ;;  %v2964_v44 = vld [vmem:[#allocation2 + $0x580] sm:$0xff]  ;;  %v1872_v1 = vrot.slane %v1829_v21, 4  ;;  %v3107_v40 = vpack.c.bf16 %v2963_v51, %v2947_v63  ;;  %v2998_v35 = vld [vmem:[#allocation2 + $0x1d0] sm:$0xff] }
 0x4e6   : > { %v2001_v22 = vrot.slane %v1955_v49, 4  ;;  %v2002_v15 = vrot.slane %v1970_v10, 4  ;;  %v3108_v18 = vpack.c.bf16 %v2964_v44, %v2948_v5 }
 0x4e7   : > { %1904 = vst [vmem:[#allocation2 + $0x380] sm:$0xf0] %v1872_v1  ;;  %v1611_v39 = vpop.permute.xlu0 %1610 }
 0x4e8   : > { %2033 = vst [vmem:[#allocation2 + $0x238] sm:$0xf0] %v2001_v22  ;;  %2034 = vst [vmem:[#allocation2 + $0x620] sm:$0xf0] %v2002_v15  ;;  %3454 = vmatprep.subr.bf16.mxu0 %v3108_v18  ;;  %v6633_v23 = vpop.permute.xlu1 %1612  ;;  %v1621_v58 = vsel %vm605_vm3, %v6486_v0, %v1611_v39  ;;  %v2982_v56 = vld [vmem:[#allocation2 + $0x4a8] sm:$0xff]  ;;  %v2981_v33 = vld [vmem:[#allocation2 + $0x10] sm:$0xff] }
 0x4e9   : > { %v1620_v34 = vsel %vm605_vm3, %v1611_v39, %v6633_v23  ;;  %3455 = vmatpush1.bf16.msra.mxu0 %v3107_v40  ;;  %1646 = vst [vmem:[#allocation2 + $0x420] sm:$0xf] %v1621_v58  ;;  %v3126_v12 = vpack.c.bf16 %v2998_v35, %v2982_v56  ;;  %v3125_v11 = vpack.c.bf16 %v2997_v19, %v2981_v33 }
 0x4ea   : > { %1647 = vst [vmem:[#allocation2 + $0x178] sm:$0xf] %v1620_v34 }
 0x4eb   : > { %v1709_v27 = vpop.permute.xlu0 %1708  ;;  %3493 = vmatprep.subr.bf16.mxu1 %v3126_v12 }
 0x4ec   : > { %v1711_v36 = vpop.permute.xlu1 %1710  ;;  %v1716_v25 = vsel %vm734_vm4, %v6493_v55, %v1709_v27  ;;  %3494 = vmatpush1.bf16.msra.mxu1 %v3125_v11  ;;  %v2868_v11 = vld [vmem:[#allocation2 + $0x5d8] sm:$0xff] }
 0x4ed   : > { %v1715_v0 = vsel %vm734_vm4, %v1709_v27, %v1711_v36  ;;  %1742 = vst [vmem:[#allocation2 + $0x100] sm:$0xf] %v1716_v25 }
 0x4ee   : > { %1743 = vst [vmem:[#allocation2 + $0x380] sm:$0xf] %v1715_v0 }
 0x4ef   : > { %v2113_v7 = vpop.permute.xlu0 %2112  ;;  %v2950_v52 = vld [vmem:[#allocation2 + $0x620] sm:$0xff]  ;;  %v2949_v44 = vld [vmem:[#allocation2 + $0x238] sm:$0xff] }
 0x4f0   : > { %v1371_v42 = vpop.permute.xlu1 %1370  ;;  %v2116_v14 = vsel %vm605_vm3, %v2113_v7, %v5782_v4  ;;  %v2117_v17 = vsel %vm605_vm3, %v2111_v26, %v2113_v7  ;;  %v2915_v26 = vld [vmem:[#allocation2 + $0x420] sm:$0xff] }
 0x4f1   : > { %v1381_v8 = vsel %vm605_vm3, %v6501_v29, %v1371_v42  ;;  %2146 = vst [vmem:[#allocation2 + $0x668] sm:$0xf] %v2117_v17  ;;  %2147 = vst [vmem:[#allocation2 + $0xf0] sm:$0xf] %v2116_v14  ;;  %v2916_v9 = vld [vmem:[#allocation2 + $0x178] sm:$0xff]  ;;  %v2867_v17 = vld [vmem:[#allocation2 + $0x528] sm:$0xff] }
 0x4f2   : > { %v1422_v55 = vrot.slane %v1381_v8, 4 }
 0x4f3   : > { %v1373_v59 = vpop.permute.xlu0 %1372 }
 0x4f4   : > { %1454 = vst [vmem:[#allocation2 + $0x630] sm:$0xf0] %v1422_v55  ;;  %v1501_v32 = vpop.permute.xlu1 %1500  ;;  %v1380_v60 = vsel %vm605_vm3, %v1371_v42, %v1373_v59  ;;  %v2931_v45 = vld [vmem:[#allocation2 + $0x100] sm:$0xff] }
 0x4f5   : > { %v1508_v4 = vsel %vm734_vm4, %v6509_v37, %v1501_v32  ;;  %v2932_v28 = vld [vmem:[#allocation2 + $0x380] sm:$0xff]  ;;  %v1423_v24 = vrot.slane %v1380_v60, 4  ;;  %v3091_v38 = vpack.c.bf16 %v2931_v45, %v2915_v26 }
 0x4f6   : > { %v1550_v2 = vrot.slane %v1508_v4, 4  ;;  %v3092_v29 = vpack.c.bf16 %v2932_v28, %v2916_v9  ;;  %v2836_v55 = vld [vmem:[#allocation2 + $0x3a0] sm:$0xff]  ;;  %v2851_v9 = vld [vmem:[#allocation2 + $0x610] sm:$0xff] }
 0x4f7   : > { %1455 = vst [vmem:[#allocation2 + $0x130] sm:$0xf0] %v1423_v24  ;;  %v1503_v3 = vpop.permute.xlu0 %1502  ;;  %v3059_v60 = vpack.c.bf16 %v2867_v17, %v2851_v9  ;;  %v2820_v4 = vld [vmem:[#allocation2 + $0x500] sm:$0xff] }
 0x4f8   : > { %1582 = vst [vmem:[#allocation2 + $0x438] sm:$0xf0] %v1550_v2  ;;  %3456 = vmatprep.subr.bf16.mxu0 %v3092_v29  ;;  %v1824_v57 = vpop.permute.xlu1 %1823  ;;  %v1507_v46 = vsel %vm734_vm4, %v1501_v32, %v1503_v3  ;;  %v2966_v16 = vld [vmem:[#allocation2 + $0xf0] sm:$0xff]  ;;  %v2965_v50 = vld [vmem:[#allocation2 + $0x668] sm:$0xff]  ;;  %v3044_v28 = vpack.c.bf16 %v2836_v55, %v2820_v4  ;;  %v2835_v26 = vld [vmem:[#allocation2 + $0xe0] sm:$0xff] }
 0x4f9   : > { %v1827_v47 = vsel %vm605_vm3, %v1824_v57, %v5805_v41  ;;  %v1828_v37 = vsel %vm605_vm3, %v6623_v30, %v1824_v57  ;;  %3457 = vmatpush1.bf16.msra.mxu0 %v3091_v38  ;;  %v1551_v21 = vrot.slane %v1507_v46, 4  ;;  %v3110_v5 = vpack.c.bf16 %v2966_v16, %v2950_v52  ;;  %v2870_v45 = vld [vmem:[#allocation2 + $0x340] sm:$0xff]  ;;  %v2819_v57 = vld [vmem:[#allocation2 + $0x548] sm:$0xff] }
 0x4fa   : > { %v1873_v49 = vrot.slane %v1828_v37, 4  ;;  %v1874_v10 = vrot.slane %v1827_v47, 4  ;;  %v3109_v51 = vpack.c.bf16 %v2965_v50, %v2949_v44  ;;  %v2854_v47 = vld [vmem:[#allocation2 + $0x3f0] sm:$0xff]  ;;  %v3043_v52 = vpack.c.bf16 %v2835_v26, %v2819_v57  ;;  %v6935_v26 = vld [vmem:[#allocation8_spill] sm:$0xff] }
 0x4fb   : > { %1583 = vst [vmem:[#allocation2 + $0x6f8] sm:$0xf0] %v1551_v21  ;;  %v1615_v1 = vpop.permute.xlu0 %1614  ;;  %3495 = vmatprep.subr.bf16.mxu1 %v3110_v5  ;;  %v2883_v27 = vld [vmem:[#allocation2 + $0x630] sm:$0xff]  ;;  %v3062_v50 = vpack.c.bf16 %v2870_v45, %v2854_v47 }
 0x4fc   : > { %1905 = vst [vmem:[#allocation2 + $0x2e8] sm:$0xf0] %v1873_v49  ;;  %1906 = vst [vmem:[#allocation2 + $0x6b8] sm:$0xf0] %v1874_v10  ;;  %v1713_v41 = vpop.permute.xlu1 %1712  ;;  %v1618_v30 = vsel %vm605_vm3, %v1615_v1, %v5847_v43  ;;  %v1619_v22 = vsel %vm605_vm3, %v6633_v23, %v1615_v1  ;;  %3496 = vmatpush1.bf16.msra.mxu1 %v3109_v51  ;;  %v2869_v21 = vld [vmem:[#allocation2 + $0x650] sm:$0xff]  ;;  %v2838_v49 = vld [vmem:[#allocation2 + $0x3c0] sm:$0xff] }
 0x4fd   : > { %v1714_v15 = vsel %vm734_vm4, %v1711_v36, %v1713_v41  ;;  %v1729_v18 = vsel %vm734_vm4, %v1713_v41, %v5849_v13  ;;  %1648 = vst [vmem:[#allocation2 + $0x390] sm:$0xf] %v1619_v22  ;;  %1649 = vst [vmem:[#allocation2 + $0x488] sm:$0xf] %v1618_v30  ;;  %v2852_v36 = vld [vmem:[#allocation2 + $0x220] sm:$0xff]  ;;  %v2853_v30 = vld [vmem:[#allocation2 + $0x58] sm:$0xff] }
 0x4fe   : > { %1744 = vst [vmem:[#allocation2 + $0x2e8] sm:$0xf] %v1714_v15  ;;  %1745 = vst [vmem:[#allocation2 + $0x6b8] sm:$0xf] %v1729_v18  ;;  %v2884_v19 = vld [vmem:[#allocation2 + $0x130] sm:$0xff]  ;;  %v6930_v1 = vld [vmem:[#allocation3_spill] sm:$0xff] }
 0x4ff   : > { %v1375_v63 = vpop.permute.xlu0 %1374  ;;  %v2899_v33 = vld [vmem:[#allocation2 + $0x438] sm:$0xff]  ;;  %v2822_v22 = vld [vmem:[#allocation2 + $0x320] sm:$0xff]  ;;  %v6931_v15 = vld [vmem:[#allocation4_spill] sm:$0xff] }
 0x500   : > { %v1505_v40 = vpop.permute.xlu1 %1504  ;;  %v1378_v43 = vsel %vm605_vm3, %v1375_v63, %v5882_v54  ;;  %v1379_v39 = vsel %vm605_vm3, %v1373_v59, %v1375_v63  ;;  %v3075_v25 = vpack.c.bf16 %v2899_v33, %v2883_v27  ;;  %v3939_v59 = vmov 1983009808   ;;  %v6932_v18 = vld [vmem:[#allocation5_spill] sm:$0xff] }
 0x501   : > { %v1506_v23 = vsel %vm734_vm4, %v1503_v3, %v1505_v40  ;;  %v1521_v13 = vsel %vm734_vm4, %v1505_v40, %v5884_v31  ;;  %v1424_v35 = vrot.slane %v1379_v39, 4  ;;  %v1425_v58 = vrot.slane %v1378_v43, 4  ;;  %v6934_v43 = vld [vmem:[#allocation7_spill] sm:$0xff] }
 0x502   : > { %v1552_v34 = vrot.slane %v1506_v23, 4  ;;  %v1553_v56 = vrot.slane %v1521_v13, 4  ;;  %v2900_v12 = vld [vmem:[#allocation2 + $0x6f8] sm:$0xff]  ;;  %v3060_v31 = vpack.c.bf16 %v2868_v11, %v2852_v36  ;;  %v3581_v32 = vunpack.c.l.s4 %v3939_v59 }
 0x503   : > { %1456 = vst [vmem:[#allocation2 + $0x1e8] sm:$0xf0] %v1424_v35  ;;  %1457 = vst [vmem:[#allocation2 + $0x1f8] sm:$0xf0] %v1425_v58  ;;  %v3076_v54 = vpack.c.bf16 %v2900_v12, %v2884_v19  ;;  %v3061_v39 = vpack.c.bf16 %v2869_v21, %v2853_v30  ;;  %v3046_v23 = vpack.c.bf16 %v2838_v49, %v2822_v22  ;;  %v2821_v19 = vld [vmem:[#allocation2 + $0x6d0] sm:$0xff] }
 0x504   : > { %1584 = vst [vmem:[#allocation2 + $0x158] sm:$0xf0] %v1552_v34  ;;  %1585 = vst [vmem:[#allocation2 + $0x5a0] sm:$0xf0] %v1553_v56  ;;  %v2918_v0 = vld [vmem:[#allocation2 + $0x488] sm:$0xff]  ;;  %v2917_v62 = vld [vmem:[#allocation2 + $0x390] sm:$0xff]  ;;  %v3582_v38 = vunpack.c.0.s8 %v3581_v32 }
 0x505   : > { %v2934_v7 = vld [vmem:[#allocation2 + $0x6b8] sm:$0xff]  ;;  %3458 = vmatprep.subr.bf16.mxu0 %v3076_v54  ;;  %v2933_v14 = vld [vmem:[#allocation2 + $0x2e8] sm:$0xff] }
 0x506   : > { %v3094_v42 = vpack.c.bf16 %v2934_v7, %v2918_v0  ;;  %3459 = vmatpush1.bf16.msra.mxu0 %v3075_v25  ;;  %v3093_v8 = vpack.c.bf16 %v2933_v14, %v2917_v62  ;;  %v6699_v41 = vsub.s32 %v3582_v38, %v6930_v1  ;;  %v6937_v1 = vld [vmem:[#allocation10_spill] sm:$0xff] }
 0x507   : > { %3460 = vmatprep.subr.bf16.mxu0 %v3060_v31 }
 0x508   : > { %3497 = vmatprep.subr.bf16.mxu1 %v3094_v42 }
 0x509   : > { %3498 = vmatpush1.bf16.msra.mxu1 %v3093_v8 }
 0x50a   : > { %3461 = vmatpush1.bf16.msra.mxu0 %v3059_v60  ;;  %v2886_v24 = vld [vmem:[#allocation2 + $0x1f8] sm:$0xff]  ;;  %v2885_v29 = vld [vmem:[#allocation2 + $0x1e8] sm:$0xff] }
 0x50b   : > { %v2902_v2 = vld [vmem:[#allocation2 + $0x5a0] sm:$0xff]  ;;  %3462 = vmatprep.subr.bf16.mxu0 %v3044_v28  ;;  %v2901_v46 = vld [vmem:[#allocation2 + $0x158] sm:$0xff] }
 0x50c   : > { %v3078_v3 = vpack.c.bf16 %v2902_v2, %v2886_v24  ;;  %v6688_v37 = vpop.permute.xlu0 %3146  ;;  %v3077_v16 = vpack.c.bf16 %v2901_v46, %v2885_v29 }
 0x50d   : > { %v3237_v10 = vadd.f32 %v6549_v6, %v6688_v37  ;;  %v3239_v5 = vadd.f32 %v6559_v48, %v6688_v37  ;;  %v3278_v44 = vadd.f32 %v6585_v61, %v6688_v37  ;;  %v3280_v51 = vadd.f32 %v6593_v53, %v6688_v37  ;;  %v6933_v48 = vld [vmem:[#allocation6_spill] sm:$0xff] }
 0x50e   : > { %3499 = vmatprep.subr.bf16.mxu1 %v3078_v3  ;;  %3463 = vmatpush1.bf16.msra.mxu0 %v3043_v52  ;;  %v2837_v53 = vld [vmem:[#allocation2 + $0x538] sm:$0xff]  ;;  %v6936_v3 = vld [vmem:[#allocation9_spill] sm:$0xff] }
 0x50f   : > { %3500 = vmatpush1.bf16.msra.mxu1 %v3077_v16  ;;  %v3530_v6 = vmul.f32 %v3237_v10, %v6931_v15  ;;  %v3531_v63 = vmul.f32 %v3239_v5, %v6932_v18  ;;  %v3532_v40 = vmul.f32 %v3278_v44, %v6933_v48  ;;  %v3533_v61 = vmul.f32 %v3280_v51, %v6934_v43  ;;  %v6938_v48 = vld [vmem:[#allocation11_spill] sm:$0xff] }
 0x510   : > { %3501 = vmatprep.subr.bf16.mxu1 %v3062_v50  ;;  %v3045_v36 = vpack.c.bf16 %v2837_v53, %v2821_v19 }
 0x511   : > { %3881 = vmatmul.mubr.msk.bf16.vlgmr.msra.gmra.mxu0 %vm3149_vm11, %v6528_v20  ;;  %v3884_v13 = vpack.c.bf16 %v3531_v63, %v3530_v6  ;;  %v3885_v35 = vpack.c.bf16 %v3533_v61, %v3532_v40  ;;  %v3655_v58 = vsel %vm3654_vm12, %v3530_v6, 0.0  ;;  %v3656_v34 = vsel %vm3654_vm12, %v3531_v63, 0.0 }
 0x512   : > { %v3657_v56 = vadd.f32 %v3656_v34, %v3655_v58  ;;  %v3690_v33 = vmul.f32 %v3530_v6, %v3530_v6  ;;  %v3658_v11 = vsel %vm3654_vm12, %v3532_v40, 0.0  ;;  %v3691_v54 = vmul.f32 %v3531_v63, %v3531_v63 }
 0x513   : > { %3502 = vmatpush1.bf16.msra.mxu1 %v3061_v39  ;;  %v3593_v12 = vrot.slane %v3885_v35, %v6699_v41  ;;  %v3692_v27 = vmul.f32 %v3532_v40, %v3532_v40  ;;  %v3586_v7 = vrot.slane %v3884_v13, %v6699_v41  ;;  %v3660_v62 = vsel %vm3654_vm12, %v3533_v61, 0.0 }
 0x514   : > { %3503 = vmatprep.subr.bf16.mxu1 %v3046_v23  ;;  %v3659_v25 = vadd.f32 %v3658_v11, %v3657_v56  ;;  %v3706_v0 = vsel %vm3654_vm12, %v3690_v33, 0.0  ;;  %v3693_v31 = vmul.f32 %v3533_v61, %v3533_v61  ;;  %v3707_v42 = vsel %vm3654_vm12, %v3691_v54, 0.0 }
 0x515   : > { %v3708_v17 = vadd.f32 %v3707_v42, %v3706_v0  ;;  %v3594_v8 = vcombine.low %v3586_v7, %v3593_v12  ;;  %v3709_v55 = vsel %vm3654_vm12, %v3692_v27, 0.0  ;;  %v6939_v0 = vld [vmem:[#allocation12_spill] sm:$0xff]  ;;  %v6940_v42 = vld [vmem:[#allocation13_spill] sm:$0xff] }
 0x516   : > { %v3661_v14 = vadd.f32 %v3660_v62, %v3659_v25  ;;  %v3711_v32 = vsel %vm3654_vm12, %v3693_v31, 0.0 }
 0x517   : > { %3504 = vmatpush1.bf16.msra.mxu1 %v3045_v36  ;;  %v3710_v59 = vadd.f32 %v3709_v55, %v3708_v17  ;;  %3650 = vst [vmem:[%s6720_s18] sm:$0xff] %v3594_v8 }
 0x519   : > { %v3712_v9 = vadd.f32 %v3711_v32, %v3710_v59 }
 0x51a   : > { %3883 = vmatmul.mubr.msk.bf16.vlgmr.msra.gmra.mxu1 %vm3149_vm11, %v6528_v20 }
 0x522   : > { %v3318_v60 = vpop.f32.mrf.mxu0 }
 0x523   : > { %v3319_v4 = vadd.f32 %v3318_v60, %v6688_v37 }
 0x524   : > { %v3320_v28 = vpop.f32.mrf.mxu0 }
 0x525   : > { %v3534_v45 = vmul.f32 %v3319_v4, %v6935_v26  ;;  %v3321_v24 = vadd.f32 %v3320_v28, %v6688_v37 }
 0x526   : > { %v3322_v2 = vpop.f32.mrf.mxu0 }
 0x527   : > { %v3662_v29 = vsel %vm3654_vm12, %v3534_v45, 0.0  ;;  %v3694_v38 = vmul.f32 %v3534_v45, %v3534_v45  ;;  %v3535_v57 = vmul.f32 %v3321_v24, %v6936_v3 }
 0x528   : > { %v3663_v46 = vadd.f32 %v3662_v29, %v3661_v14  ;;  %v3323_v47 = vpop.f32.mrf.mxu0 }
 0x529   : > { %v3713_v20 = vsel %vm3654_vm12, %v3694_v38, 0.0  ;;  %v3664_v52 = vsel %vm3654_vm12, %v3535_v57, 0.0  ;;  %v3695_v16 = vmul.f32 %v3535_v57, %v3535_v57  ;;  %v3886_v6 = vpack.c.bf16 %v3535_v57, %v3534_v45  ;;  %v6941_v45 = vld [vmem:[#allocation14_spill] sm:$0xff]  ;;  %v6942_v47 = vld [vmem:[#allocation15_spill] sm:$0xff] }
 0x52a   : > { %v3714_v50 = vadd.f32 %v3713_v20, %v3712_v9  ;;  %v3665_v21 = vadd.f32 %v3664_v52, %v3663_v46 }
 0x52b   : > { %v3715_v49 = vsel %vm3654_vm12, %v3695_v16, 0.0  ;;  %v3603_v34 = vrot.slane %v3886_v6, %v6699_v41 }
 0x52c   : > { %v3716_v10 = vadd.f32 %v3715_v49, %v3714_v50 }
 0x532   : > { %v3359_v5 = vpop.f32.mrf.mxu1 }
 0x533   : > { %v3360_v44 = vadd.f32 %v3359_v5, %v6688_v37 }
 0x534   : > { %v3361_v51 = vpop.f32.mrf.mxu1 }
 0x535   : > { %v3536_v30 = vmul.f32 %v3360_v44, %v6937_v1  ;;  %v3362_v22 = vadd.f32 %v3361_v51, %v6688_v37 }
 0x536   : > { %v3363_v15 = vpop.f32.mrf.mxu1 }
 0x537   : > { %v3666_v18 = vsel %vm3654_vm12, %v3536_v30, 0.0  ;;  %v3696_v63 = vmul.f32 %v3536_v30, %v3536_v30  ;;  %v3537_v40 = vmul.f32 %v3362_v22, %v6938_v48 }
 0x538   : > { %v3667_v43 = vadd.f32 %v3666_v18, %v3665_v21  ;;  %v3364_v61 = vpop.f32.mrf.mxu1 }
 0x539   : > { %v3717_v39 = vsel %vm3654_vm12, %v3696_v63, 0.0  ;;  %v3887_v23 = vpack.c.bf16 %v3537_v40, %v3536_v30  ;;  %v3668_v53 = vsel %vm3654_vm12, %v3537_v40, 0.0  ;;  %v3697_v13 = vmul.f32 %v3537_v40, %v3537_v40  ;;  %v6943_v40 = vld [vmem:[#allocation16_spill] sm:$0xff] }
 0x53a   : > { %v3718_v35 = vadd.f32 %v3717_v39, %v3716_v10  ;;  %v3669_v58 = vadd.f32 %v3668_v53, %v3667_v43 }
 0x53b   : > { %v3610_v56 = vrot.slane %v3887_v23, %v6699_v41  ;;  %v3719_v33 = vsel %vm3654_vm12, %v3697_v13, 0.0  ;;  %v6944_v13 = vld [vmem:[#allocation17_spill] sm:$0xff] }
 0x53c   : > { %v3720_v19 = vadd.f32 %v3719_v33, %v3718_v35 }
 0x53d   : > { %v3611_v12 = vcombine.low %v3603_v34, %v3610_v56 }
 0x53f   : > { %3651 = vst [vmem:[%s6720_s18 + $0x8] sm:$0xff] %v3611_v12 }
 0x57e   : > { %v3400_v11 = vpop.f32.mrf.mxu0 }
 0x57f   : > { %v3401_v25 = vadd.f32 %v3400_v11, %v6688_v37 }
 0x580   : > { %v3402_v54 = vpop.f32.mrf.mxu0 }
 0x581   : > { %v3538_v7 = vmul.f32 %v3401_v25, %v6939_v0  ;;  %v3403_v62 = vadd.f32 %v3402_v54, %v6688_v37 }
 0x582   : > { %v3404_v27 = vpop.f32.mrf.mxu0 }
 0x583   : > { %v3698_v31 = vmul.f32 %v3538_v7, %v3538_v7  ;;  %v3539_v14 = vmul.f32 %v3403_v62, %v6940_v42  ;;  %v3670_v17 = vsel %vm3654_vm12, %v3538_v7, 0.0 }
 0x584   : > { %v3405_v36 = vpop.f32.mrf.mxu0  ;;  %v3671_v59 = vadd.f32 %v3670_v17, %v3669_v58  ;;  %v6946_v17 = vld [vmem:[#allocation19_spill] sm:$0xff] }
 0x585   : > { %v3721_v8 = vsel %vm3654_vm12, %v3698_v31, 0.0  ;;  %v3699_v55 = vmul.f32 %v3539_v14, %v3539_v14  ;;  %v3672_v9 = vsel %vm3654_vm12, %v3539_v14, 0.0  ;;  %v3888_v3 = vpack.c.bf16 %v3539_v14, %v3538_v7  ;;  %v6945_v36 = vld [vmem:[#allocation18_spill] sm:$0xff] }
 0x586   : > { %v3722_v4 = vadd.f32 %v3721_v8, %v3720_v19  ;;  %v3673_v29 = vadd.f32 %v3672_v9, %v3671_v59 }
 0x587   : > { %v3723_v26 = vsel %vm3654_vm12, %v3699_v55, 0.0  ;;  %v3620_v1 = vrot.slane %v3888_v3, %v6699_v41 }
 0x588   : > { %v3724_v52 = vadd.f32 %v3723_v26, %v3722_v4 }
 0x592   : > { %v3441_v32 = vpop.f32.mrf.mxu1 }
 0x593   : > { %v3442_v60 = vadd.f32 %v3441_v32, %v6688_v37 }
 0x594   : > { %v3443_v28 = vpop.f32.mrf.mxu1 }
 0x595   : > { %v3540_v24 = vmul.f32 %v3442_v60, %v6941_v45  ;;  %v3444_v2 = vadd.f32 %v3443_v28, %v6688_v37 }
 0x596   : > { %v3445_v38 = vpop.f32.mrf.mxu1 }
 0x597   : > { %v3674_v57 = vsel %vm3654_vm12, %v3540_v24, 0.0  ;;  %v3700_v46 = vmul.f32 %v3540_v24, %v3540_v24  ;;  %v3541_v20 = vmul.f32 %v3444_v2, %v6942_v47 }
 0x598   : > { %v3675_v16 = vadd.f32 %v3674_v57, %v3673_v29  ;;  %v3446_v50 = vpop.f32.mrf.mxu1 }
 0x599   : > { %v3725_v21 = vsel %vm3654_vm12, %v3700_v46, 0.0  ;;  %v3889_v49 = vpack.c.bf16 %v3541_v20, %v3540_v24  ;;  %v3676_v10 = vsel %vm3654_vm12, %v3541_v20, 0.0  ;;  %v3701_v5 = vmul.f32 %v3541_v20, %v3541_v20 }
 0x59a   : > { %v3726_v44 = vadd.f32 %v3725_v21, %v3724_v52  ;;  %v3677_v51 = vadd.f32 %v3676_v10, %v3675_v16 }
 0x59b   : > { %v3627_v30 = vrot.slane %v3889_v49, %v6699_v41  ;;  %v3727_v22 = vsel %vm3654_vm12, %v3701_v5, 0.0 }
 0x59c   : > { %v3728_v15 = vadd.f32 %v3727_v22, %v3726_v44 }
 0x59d   : > { %v3628_v6 = vcombine.low %v3620_v1, %v3627_v30 }
 0x59f   : > { %3652 = vst [vmem:[%s6720_s18 + $0x10] sm:$0xff] %v3628_v6 }
 0x5d1   : > { %v3482_v18 = vpop.f32.mrf.mxu0 }
 0x5d2   : > { %v3483_v63 = vadd.f32 %v3482_v18, %v6688_v37 }
 0x5d3   : > { %v3484_v48 = vpop.f32.mrf.mxu0 }
 0x5d4   : > { %v3542_v43 = vmul.f32 %v3483_v63, %v6943_v40  ;;  %v3485_v61 = vadd.f32 %v3484_v48, %v6688_v37 }
 0x5d5   : > { %v3486_v39 = vpop.f32.mrf.mxu0 }
 0x5d6   : > { %v3678_v23 = vsel %vm3654_vm12, %v3542_v43, 0.0  ;;  %v3702_v53 = vmul.f32 %v3542_v43, %v3542_v43  ;;  %v3543_v35 = vmul.f32 %v3485_v61, %v6944_v13 }
 0x5d7   : > { %v3487_v58 = vpop.f32.mrf.mxu0  ;;  %v3679_v33 = vadd.f32 %v3678_v23, %v3677_v51 }
 0x5d8   : > { %v3729_v34 = vsel %vm3654_vm12, %v3702_v53, 0.0  ;;  %v3703_v56 = vmul.f32 %v3543_v35, %v3543_v35  ;;  %v3680_v12 = vsel %vm3654_vm12, %v3543_v35, 0.0  ;;  %v3890_v42 = vpack.c.bf16 %v3543_v35, %v3542_v43 }
 0x5d9   : > { %v3730_v27 = vadd.f32 %v3729_v34, %v3728_v15  ;;  %v3681_v31 = vadd.f32 %v3680_v12, %v3679_v33 }
 0x5da   : > { %v3523_v19 = vpop.f32.mrf.mxu1  ;;  %v3731_v7 = vsel %vm3654_vm12, %v3703_v56, 0.0  ;;  %v3637_v24 = vrot.slane %v3890_v42, %v6699_v41 }
 0x5db   : > { %v3524_v11 = vadd.f32 %v3523_v19, %v6688_v37  ;;  %v3732_v9 = vadd.f32 %v3731_v7, %v3730_v27 }
 0x5dc   : > { %v3525_v54 = vpop.f32.mrf.mxu1 }
 0x5dd   : > { %v3544_v25 = vmul.f32 %v3524_v11, %v6945_v36  ;;  %v3526_v0 = vadd.f32 %v3525_v54, %v6688_v37 }
 0x5de   : > { %v3527_v62 = vpop.f32.mrf.mxu1 }
 0x5df   : > { %v3704_v14 = vmul.f32 %v3544_v25, %v3544_v25  ;;  %v3545_v8 = vmul.f32 %v3526_v0, %v6946_v17  ;;  %v3682_v55 = vsel %vm3654_vm12, %v3544_v25, 0.0 }
 0x5e0   : > { %v3528_v59 = vpop.f32.mrf.mxu1  ;;  %v3683_v32 = vadd.f32 %v3682_v55, %v3681_v31 }
 0x5e1   : > { %v3891_v60 = vpack.c.bf16 %v3545_v8, %v3544_v25  ;;  %v3684_v4 = vsel %vm3654_vm12, %v3545_v8, 0.0  ;;  %v3705_v28 = vmul.f32 %v3545_v8, %v3545_v8  ;;  %v3733_v37 = vsel %vm3654_vm12, %v3704_v14, 0.0 }
 0x5e2   : > { %v3685_v26 = vadd.f32 %v3684_v4, %v3683_v32  ;;  %v3734_v45 = vadd.f32 %v3733_v37, %v3732_v9 }
 0x5e3   : > { %v3644_v2 = vrot.slane %v3891_v60, %v6699_v41  ;;  %v3735_v29 = vsel %vm3654_vm12, %v3705_v28, 0.0 }
 0x5e4   : > { %3686 = vadd.xlane.f32.xlu1 %v3685_v26  ;;  %v3736_v38 = vadd.f32 %v3735_v29, %v3734_v45 }
 0x5e5   : > { %v3645_v3 = vcombine.low %v3637_v24, %v3644_v2 }
 0x5e6   : > { %3737 = vadd.xlane.f32.xlu0 %v3736_v38 }
 0x5e7   : > { %3653 = vst [vmem:[%s6720_s18 + $0x18] sm:$0xff] %v3645_v3 }
 0x66d   : > { %v3687_v57 = vpop.xlane.xlu1 %3686 }
 0x66e   : > { %3689 = vst.msk [vmem:[%s322_s21] sm:$0xf] %vm3688_vm13, %v3687_v57 }
 0x66f   : > { %v3738_v41 = vpop.xlane.xlu0 %3737 }
 0x670   : > { %3739 = vst.msk [vmem:[%s326_s24] sm:$0xf] %vm3688_vm13, %v3738_v41 }
 0x671 PF: > { %s19_s27 = sadd.s32 1, %s3925_s27  }
 0x672   : > { %p16_p4 = scmp.ge.s32.totalorder %s19_s27, 4  }
 0x674   :  { %18 = sbr.rel (!%p16_p4) target bundleno = 1 (0x1), region = 98 }

</bundles_post_ra>
